<compile_context>
chip_gen: v7x
topology: tpu7x:2x2x1
jax: 0.10.0
libtpu: 0.0.40
codegen_flags: <defaults>
</compile_context>

<pallas_src>
import numpy as np
import jax
import jax.numpy as jnp
from jax.experimental import pallas as pl
from jax.experimental.pallas import tpu as pltpu

# Static layer configuration (kh, kw, stride, cin, cout) -- never traced.
CONV_CFG = ((5, 5, 2, 1, 32), (3, 3, 2, 32, 64), (3, 3, 2, 64, 64))
N_LANE = 128                       # lane-dense channel padding
FC1_IN, FC1_OUT, N_CLASSES = 256, 128, 10
CONV1_TILES = 2                    # even tile count -> balanced on v7x's 2 TCs


def _round_up(x, m):
    return ((x + m - 1) // m) * m


# ---------------------------------------------------------------------------
# Pallas kernels
# ---------------------------------------------------------------------------
def _conv_pool_kernel(t_ref, w_ref, b_ref, o_ref):
    """Fused conv (im2col matmul, BN scale pre-folded) + 2x2 maxpool + bias+ReLU.

    t_ref: (4, tile_m, K) bf16 stacked pool-tap patches
    w_ref: (K, 128) bf16   b_ref: (1, 128) f32   o_ref: (tile_m, 128) bf16
    The 2x2 max-pool is the max over the four tap matmuls; bias/ReLU commute
    with the max, so the epilogue is a single add + relu after three maxima.
    """
    w = w_ref[...]
    y = jnp.dot(t_ref[0], w, preferred_element_type=jnp.float32)
    y = jnp.maximum(y, jnp.dot(t_ref[1], w, preferred_element_type=jnp.float32))
    y = jnp.maximum(y, jnp.dot(t_ref[2], w, preferred_element_type=jnp.float32))
    y = jnp.maximum(y, jnp.dot(t_ref[3], w, preferred_element_type=jnp.float32))
    o_ref[...] = jnp.maximum(y + b_ref[...], 0.0).astype(o_ref.dtype)


# ---------------------------------------------------------------------------
# conv1 / conv2 wrapper (im2col in XLA, fused matmul+BN+ReLU+pool in Pallas)
# ---------------------------------------------------------------------------
def _pool_tap_patches(x, kh, kw, stride, di, dj, ho, wo):
    """im2col patches for pooled conv outputs at pool tap (di, dj).

    x: (N, H, W, C) NHWC.  Returns (N*ho*wo, kh*kw*C), feature order (i, j, c).
    """
    n, h, w, c = x.shape
    s2 = 2 * stride
    oi, oj = stride * di, stride * dj
    cols = []
    for i in range(kh):
        for j in range(kw):
            cols.append(x[:, oi + i: oi + i + s2 * ho: s2,
                            oj + j: oj + j + s2 * wo: s2, :])
    return jnp.concatenate(cols, axis=-1).reshape(n * ho * wo, kh * kw * c)


def conv_bn_relu_pool(x, w_pad, b_pad, kh, kw, stride, cout, num_tiles,
                      use_pallas=True):
    """One fused conv+BN+ReLU+2x2 maxpool layer.  x: (N, H, W, C) bf16 NHWC."""
    n, h, w, c = x.shape
    oh = (h - kh) // stride + 1
    ow = (w - kw) // stride + 1
    ho, wo = oh // 2, ow // 2                     # floor-mode 2x2 pool
    taps = jnp.stack([_pool_tap_patches(x, kh, kw, stride, di, dj, ho, wo)
                      for di in (0, 1) for dj in (0, 1)], axis=0)   # (4, M, K)
    M, K = n * ho * wo, kh * kw * c

    if not use_pallas:                            # pure-JAX reference path
        acc = jnp.einsum("tmk,kn->tmn", taps, w_pad,
                         preferred_element_type=jnp.float32)
        y = jnp.maximum(acc.max(axis=0) + b_pad, 0.0)
        return y[:, :cout].astype(jnp.bfloat16).reshape(n, ho, wo, cout)

    tile_m = _round_up(pl.cdiv(M, num_tiles), 16)   # 16: bf16 sublane packing
    m_pad = tile_m * num_tiles
    if m_pad != M:
        taps = jnp.pad(taps, ((0, 0), (0, m_pad - M), (0, 0)))
    Np = w_pad.shape[1]
    ce = pl.CostEstimate(
        flops=2 * 4 * m_pad * K * Np, transcendentals=0,
        bytes_accessed=(4 * m_pad * K + K * Np + m_pad * Np) * 2 + 2 * Np * 4)
    out = pl.pallas_call(
        _conv_pool_kernel,
        out_shape=jax.ShapeDtypeStruct((m_pad, Np), jnp.bfloat16),
        grid=(num_tiles,),
        in_specs=[
            pl.BlockSpec((4, tile_m, K), lambda i: (0, i, 0)),  # stacked taps
            pl.BlockSpec((K, Np), lambda i: (0, 0)),            # folded weight
            pl.BlockSpec((1, Np), lambda i: (0, 0)),            # folded bias
        ],
        out_specs=pl.BlockSpec((tile_m, Np), lambda i: (i, 0)),
        compiler_params=pltpu.CompilerParams(dimension_semantics=("parallel",)),
        cost_estimate=ce,
    )(taps, w_pad, b_pad)
    # M and cout are static Python ints (module constants), never traced.
    return out[:M, :cout].reshape(n, ho, wo, cout)


# ---------------------------------------------------------------------------
# Fused tail: conv3 + BN + ReLU + 2x2 maxpool + flatten + fc1 + ReLU + fc2
# ---------------------------------------------------------------------------
def _conv3_blockdiag_patches(a2, kh, kw, stride, ph, pw):
    """conv3 pool-tap patches laid out for one block-diagonal matmul.

    a2: (N, H, W, C) conv2 output.  Returns (4*N, ph*pw*kh*kw*C) bf16 where
    rows are (pool_tap, batch) and lanes are (pool_pos, kh*kw*C).
    """
    n, h, w, c = a2.shape
    s2 = 2 * stride
    rows = []
    for di in (0, 1):
        for dj in (0, 1):
            oi, oj = stride * di, stride * dj
            subs = []
            for i in range(kh):
                for j in range(kw):
                    subs.append(a2[:, oi + i: oi + i + s2 * ph: s2,
                                     oj + j: oj + j + s2 * pw: s2, :])
            t = jnp.stack(subs, axis=3)           # (N, ph, pw, kh*kw, C)
            rows.append(t.reshape(n, ph * pw * kh * kw * c))
    return jnp.concatenate(rows, axis=0)          # (4*N, ph*pw*kh*kw*C)


def tail_forward(a2, w3blk, b3blk, w1p, b1, w2p, b2, use_pallas=True):
    """conv3(+BN+ReLU+pool) + flatten + fc1 + ReLU + fc2 in one pallas_call."""
    kh, kw, stride, cin, cout = CONV_CFG[2]
    n = a2.shape[0]
    patches = _conv3_blockdiag_patches(a2, kh, kw, stride, 2, 2)
    k_blk = patches.shape[1]                      # 4 * kh*kw*cin = 2304

    if not use_pallas:                            # pure-JAX reference path
        z = jnp.dot(patches, w3blk, preferred_element_type=jnp.float32)
        feat = jnp.maximum(z.reshape(4, n, -1).max(axis=0) + b3blk, 0.0)
        h = jnp.maximum(jnp.dot(feat.astype(jnp.bfloat16), w1p,
                                preferred_element_type=jnp.float32) + b1, 0.0)
        y = jnp.dot(h.astype(jnp.bfloat16), w2p,
                    preferred_element_type=jnp.float32) + b2
        return y[:, :N_CLASSES]

    def kernel(p_ref, w3_ref, b3_ref, w1_ref, b1_ref, w2_ref, b2_ref, o_ref):
        # conv3: one block-diagonal matmul emits all 4 pool positions in lanes.
        z = jnp.dot(p_ref[...], w3_ref[...], preferred_element_type=jnp.float32)
        # 2x2 max-pool == max over the 4 tap row groups (n rows each, static).
        zm = jnp.maximum(jnp.maximum(z[0:n], z[n:2 * n]),
                         jnp.maximum(z[2 * n:3 * n], z[3 * n:4 * n]))
        # Lanes already in (pool_pos, channel) order; the NCHW flatten is
        # absorbed into the row permutation of w1 done at init.
        feat = jnp.maximum(zm + b3_ref[...], 0.0)
        h = jnp.dot(feat.astype(w1_ref.dtype), w1_ref[...],
                    preferred_element_type=jnp.float32)
        h = jnp.maximum(h + b1_ref[...], 0.0)
        y = jnp.dot(h.astype(w2_ref.dtype), w2_ref[...],
                    preferred_element_type=jnp.float32)
        o_ref[...] = y + b2_ref[...]

    out = pl.pallas_call(
        kernel,
        out_shape=jax.ShapeDtypeStruct((n, w2p.shape[1]), jnp.float32),
        grid=(1,),
        in_specs=[
            pl.BlockSpec((4 * n, k_blk), lambda i: (0, 0)),
            pl.BlockSpec(w3blk.shape, lambda i: (0, 0)),
            pl.BlockSpec(b3blk.shape, lambda i: (0, 0)),
            pl.BlockSpec(w1p.shape, lambda i: (0, 0)),
            pl.BlockSpec(b1.shape, lambda i: (0, 0)),
            pl.BlockSpec(w2p.shape, lambda i: (0, 0)),
            pl.BlockSpec(b2.shape, lambda i: (0, 0)),
        ],
        out_specs=pl.BlockSpec((n, w2p.shape[1]), lambda i: (0, 0)),
        compiler_params=pltpu.CompilerParams(dimension_semantics=("arbitrary",)),
    )(patches, w3blk, b3blk, w1p, b1, w2p, b2)
    return out[:, :N_CLASSES]


# ---------------------------------------------------------------------------
# Parameters (PyTorch-style init; BN folded; layouts pre-baked for the kernels)
# ---------------------------------------------------------------------------
def init_params(key):
    ks = jax.random.split(key, 8)

    def conv_fold(wk, bnk, kh, kw, cin, cout):
        """Conv weight/bias + inference-mode BN folded into (w2d*scale, bias)."""
        fan_in = cin * kh * kw
        bound = 1.0 / np.sqrt(fan_in)
        k1, k2 = jax.random.split(wk)
        w = jax.random.uniform(k1, (cout, cin, kh, kw), jnp.float32, -bound, bound)
        cb = jax.random.uniform(k2, (cout,), jnp.float32, -bound, bound)
        k3, k4, k5, k6 = jax.random.split(bnk, 4)
        gamma = 1.0 + 0.1 * jax.random.uniform(k3, (cout,), jnp.float32, -1.0, 1.0)
        beta = 0.1 * jax.random.normal(k4, (cout,))
        mean = 0.1 * jax.random.normal(k5, (cout,))
        var = 1.0 + 0.1 * jax.random.uniform(k6, (cout,), jnp.float32, 0.0, 1.0)
        scale = gamma / jnp.sqrt(var + 1e-5)
        bias = beta + (cb - mean) * scale
        # (Cout,Cin,KH,KW) -> im2col layout (KH*KW*Cin, Cout); fold BN scale.
        w2d = jnp.transpose(w, (2, 3, 1, 0)).reshape(kh * kw * cin, cout)
        return w2d * scale[None, :], bias

    params = {}
    # conv1 / conv2: output channels lane-padded to 128, bf16 weights.
    for li in (0, 1):
        kh, kw, _, cin, cout = CONV_CFG[li]
        w2d, bias = conv_fold(ks[li], ks[3 + li], kh, kw, cin, cout)
        params[f"conv{li + 1}_w"] = jnp.pad(
            w2d, ((0, 0), (0, N_LANE - cout))).astype(jnp.bfloat16)
        params[f"conv{li + 1}_b"] = jnp.pad(
            bias, (0, N_LANE - cout)).reshape(1, N_LANE).astype(jnp.float32)

    # conv3: block-diagonal weight so ONE matmul emits all 4 pool positions.
    kh, kw, _, cin, c3 = CONV_CFG[2]
    w3, b3 = conv_fold(ks[2], ks[5], kh, kw, cin, c3)        # (576, 64), (64,)
    k3 = kh * kw * cin
    w3blk = jnp.zeros((4 * k3, 4 * c3), jnp.float32)
    for p in range(4):
        w3blk = w3blk.at[p * k3:(p + 1) * k3, p * c3:(p + 1) * c3].set(w3)
    params["w3blk"] = w3blk.astype(jnp.bfloat16)             # (2304, 256)
    params["b3blk"] = jnp.tile(b3, 4).reshape(1, 4 * c3).astype(jnp.float32)

    def fc_init(k, cout_, cin_):
        bound = 1.0 / np.sqrt(cin_)
        k1, k2 = jax.random.split(k)
        w = jax.random.uniform(k1, (cout_, cin_), jnp.float32, -bound, bound)
        b = jax.random.uniform(k2, (cout_,), jnp.float32, -bound, bound)
        return w.T, b                                        # (in, out), (out,)

    # fc1: rows permuted from PyTorch (c, h, w) flatten order to the kernel's
    # (pool_pos, channel) lane order -> absorbs the flatten/transpose.
    w1, b1 = fc_init(ks[6], FC1_OUT, FC1_IN)
    perm = np.array([c * 4 + pos for pos in range(4) for c in range(c3)])
    params["w1"] = w1[perm, :].astype(jnp.bfloat16)          # (256, 128)
    params["b1"] = b1.reshape(1, FC1_OUT).astype(jnp.float32)

    # fc2: output lane-padded 10 -> 128 for a dense final store.
    w2, b2 = fc_init(ks[7], N_CLASSES, FC1_OUT)
    params["w2"] = jnp.pad(
        w2, ((0, 0), (0, N_LANE - N_CLASSES))).astype(jnp.bfloat16)
    params["b2"] = jnp.pad(
        b2, (0, N_LANE - N_CLASSES)).reshape(1, N_LANE).astype(jnp.float32)
    return params


# ---------------------------------------------------------------------------
# Forward pass (use_pallas=False is the pure-JAX reference with the same math)
# ---------------------------------------------------------------------------
def cnn_forward(params, x_nchw, use_pallas=True):
    x = jnp.transpose(x_nchw, (0, 2, 3, 1)).astype(jnp.bfloat16)  # NCHW -> NHWC
    tiles = (CONV1_TILES, 1)
    for li in (0, 1):
        kh, kw, stride, _, cout = CONV_CFG[li]
        x = conv_bn_relu_pool(x, params[f"conv{li + 1}_w"],
                              params[f"conv{li + 1}_b"],
                              kh, kw, stride, cout, tiles[li], use_pallas)
    return tail_forward(x, params["w3blk"], params["b3blk"], params["w1"],
                        params["b1"], params["w2"], params["b2"], use_pallas)


if __name__ == "__main__":
    key = jax.random.PRNGKey(0)
    pkey, xkey = jax.random.split(key)
    params = init_params(pkey)
    # Smallest input for which the flatten is 256 (required by nn.Linear(256,128)):
    # 152 -> conv1 74 -> pool 37 -> conv2 18 -> 9 -> conv3 4 -> 2; 64*2*2 = 256.
    x = jax.random.normal(xkey, (2, 1, 152, 152), jnp.float32)

    fwd = jax.jit(cnn_forward)
    out = jax.block_until_ready(fwd(params, x))
    assert out.shape == (2, 10) and out.dtype == jnp.float32

    ref_fwd = jax.jit(lambda p, xx: cnn_forward(p, xx, use_pallas=False))
    ref = np.asarray(jax.block_until_ready(ref_fwd(params, x)))
    got = np.asarray(out)
    if not np.allclose(got, ref, rtol=2e-2, atol=2e-2):
        raise SystemExit("mismatch vs reference: max abs diff %.3e"
                         % float(np.max(np.abs(got - ref))))
    print("KERNEL_OK")
</pallas_src>

<mosaic_0001>
module attributes {stable_mosaic.version = 11 : i64} {
  func.func @_conv_pool_kernel(%arg0: i32, %arg1: memref<4x1376x25xbf16, #tpu.memory_space<vmem>>, %arg2: memref<25x128xbf16, #tpu.memory_space<vmem>>, %arg3: memref<1x128xf32, #tpu.memory_space<vmem>>, %arg4: memref<1376x128xbf16, #tpu.memory_space<vmem>>) attributes {dimension_semantics = [#tpu.dimension_semantics<parallel>], iteration_bounds = array<i64: 2>, scalar_prefetch = 0 : i64, scratch_operands = 0 : i64, tpu.core_type = #tpu.core_type<tc>, window_params = [{transform_indices = @transform_0, window_bounds = array<i64: 4, 1376, 25>}, {pipeline_mode = #tpu.pipeline_mode<synchronous>, transform_indices = @transform_1, window_bounds = array<i64: 25, 128>}, {pipeline_mode = #tpu.pipeline_mode<synchronous>, transform_indices = @transform_2, window_bounds = array<i64: 1, 128>}, {transform_indices = @transform_3, window_bounds = array<i64: 1376, 128>}]} {
    %c0 = arith.constant 0 : index
    %c0_0 = arith.constant 0 : index
    %0 = vector.load %arg2[%c0, %c0_0] : memref<25x128xbf16, #tpu.memory_space<vmem>>, vector<25x128xbf16>
    %c0_1 = arith.constant 0 : index
    %c0_2 = arith.constant 0 : index
    %c0_3 = arith.constant 0 : index
    %1 = vector.load %arg1[%c0_1, %c0_2, %c0_3] : memref<4x1376x25xbf16, #tpu.memory_space<vmem>>, vector<1x1376x25xbf16>
    %2 = vector.shape_cast %1 : vector<1x1376x25xbf16> to vector<1376x25xbf16>
    %cst = arith.constant dense<0.000000e+00> : vector<1376x128xf32>
    %3 = tpu.matmul %2, %0, %cst {dimension_numbers = #tpu.dot_dimension_numbers<[1], [0], [0], [1], [0, 0, 1, 1], [], []>} : vector<1376x25xbf16>, vector<25x128xbf16>, vector<1376x128xf32> -> vector<1376x128xf32>
    %c1 = arith.constant 1 : index
    %c0_4 = arith.constant 0 : index
    %c0_5 = arith.constant 0 : index
    %4 = vector.load %arg1[%c1, %c0_4, %c0_5] : memref<4x1376x25xbf16, #tpu.memory_space<vmem>>, vector<1x1376x25xbf16>
    %5 = vector.shape_cast %4 : vector<1x1376x25xbf16> to vector<1376x25xbf16>
    %cst_6 = arith.constant dense<0.000000e+00> : vector<1376x128xf32>
    %6 = tpu.matmul %5, %0, %cst_6 {dimension_numbers = #tpu.dot_dimension_numbers<[1], [0], [0], [1], [0, 0, 1, 1], [], []>} : vector<1376x25xbf16>, vector<25x128xbf16>, vector<1376x128xf32> -> vector<1376x128xf32>
    %7 = arith.maximumf %3, %6 : vector<1376x128xf32>
    %c2 = arith.constant 2 : index
    %c0_7 = arith.constant 0 : index
    %c0_8 = arith.constant 0 : index
    %8 = vector.load %arg1[%c2, %c0_7, %c0_8] : memref<4x1376x25xbf16, #tpu.memory_space<vmem>>, vector<1x1376x25xbf16>
    %9 = vector.shape_cast %8 : vector<1x1376x25xbf16> to vector<1376x25xbf16>
    %cst_9 = arith.constant dense<0.000000e+00> : vector<1376x128xf32>
    %10 = tpu.matmul %9, %0, %cst_9 {dimension_numbers = #tpu.dot_dimension_numbers<[1], [0], [0], [1], [0, 0, 1, 1], [], []>} : vector<1376x25xbf16>, vector<25x128xbf16>, vector<1376x128xf32> -> vector<1376x128xf32>
    %11 = arith.maximumf %7, %10 : vector<1376x128xf32>
    %c3 = arith.constant 3 : index
    %c0_10 = arith.constant 0 : index
    %c0_11 = arith.constant 0 : index
    %12 = vector.load %arg1[%c3, %c0_10, %c0_11] : memref<4x1376x25xbf16, #tpu.memory_space<vmem>>, vector<1x1376x25xbf16>
    %13 = vector.shape_cast %12 : vector<1x1376x25xbf16> to vector<1376x25xbf16>
    %cst_12 = arith.constant dense<0.000000e+00> : vector<1376x128xf32>
    %14 = tpu.matmul %13, %0, %cst_12 {dimension_numbers = #tpu.dot_dimension_numbers<[1], [0], [0], [1], [0, 0, 1, 1], [], []>} : vector<1376x25xbf16>, vector<25x128xbf16>, vector<1376x128xf32> -> vector<1376x128xf32>
    %15 = arith.maximumf %11, %14 : vector<1376x128xf32>
    %c0_13 = arith.constant 0 : index
    %c0_14 = arith.constant 0 : index
    %16 = vector.load %arg3[%c0_13, %c0_14] : memref<1x128xf32, #tpu.memory_space<vmem>>, vector<1x128xf32>
    %17 = vector.broadcast %16 : vector<1x128xf32> to vector<1376x128xf32>
    %18 = arith.addf %15, %17 : vector<1376x128xf32>
    %cst_15 = arith.constant 0.000000e+00 : f32
    %19 = vector.broadcast %cst_15 : f32 to vector<1376x128xf32>
    %20 = arith.maximumf %18, %19 : vector<1376x128xf32>
    %21 = arith.truncf %20 : vector<1376x128xf32> to vector<1376x128xbf16>
    %c0_16 = arith.constant 0 : index
    %c0_17 = arith.constant 0 : index
    %22 = vector.load %arg4[%c0_16, %c0_17] : memref<1376x128xbf16, #tpu.memory_space<vmem>>, vector<1376x128xbf16>
    tpu.vector_store %arg4[%c0_16, %c0_17], %21 {strides = array<i32>} : memref<1376x128xbf16, #tpu.memory_space<vmem>>, vector<1376x128xbf16>,
    return
  }
  func.func @transform_0(%arg0: i32) -> (i32, i32, i32) {
    %c0_i32 = arith.constant 0 : i32
    %c0_i32_0 = arith.constant 0 : i32
    %c0_i32_1 = arith.constant 0 : i32
    return %c0_i32, %arg0, %c0_i32_0 : i32, i32, i32
  }
  func.func @transform_1(%arg0: i32) -> (i32, i32) {
    %c0_i32 = arith.constant 0 : i32
    %c0_i32_0 = arith.constant 0 : i32
    %c0_i32_1 = arith.constant 0 : i32
    return %c0_i32, %c0_i32_0 : i32, i32
  }
  func.func @transform_2(%arg0: i32) -> (i32, i32) {
    %c0_i32 = arith.constant 0 : i32
    %c0_i32_0 = arith.constant 0 : i32
    %c0_i32_1 = arith.constant 0 : i32
    return %c0_i32, %c0_i32_0 : i32, i32
  }
  func.func @transform_3(%arg0: i32) -> (i32, i32) {
    %c0_i32 = arith.constant 0 : i32
    %c0_i32_0 = arith.constant 0 : i32
    return %arg0, %c0_i32 : i32, i32
  }
}

module attributes {stable_mosaic.version = 11 : i64} {
  func.func @_conv_pool_kernel(%arg0: i32, %arg1: memref<4x176x288xbf16, #tpu.memory_space<vmem>>, %arg2: memref<288x128xbf16, #tpu.memory_space<vmem>>, %arg3: memref<1x128xf32, #tpu.memory_space<vmem>>, %arg4: memref<176x128xbf16, #tpu.memory_space<vmem>>) attributes {dimension_semantics = [#tpu.dimension_semantics<parallel>], iteration_bounds = array<i64: 1>, scalar_prefetch = 0 : i64, scratch_operands = 0 : i64, tpu.core_type = #tpu.core_type<tc>, window_params = [{transform_indices = @transform_0, window_bounds = array<i64: 4, 176, 288>}, {pipeline_mode = #tpu.pipeline_mode<synchronous>, transform_indices = @transform_1, window_bounds = array<i64: 288, 128>}, {pipeline_mode = #tpu.pipeline_mode<synchronous>, transform_indices = @transform_2, window_bounds = array<i64: 1, 128>}, {transform_indices = @transform_3, window_bounds = array<i64: 176, 128>}]} {
    %c0 = arith.constant 0 : index
    %c0_0 = arith.constant 0 : index
    %0 = vector.load %arg2[%c0, %c0_0] : memref<288x128xbf16, #tpu.memory_space<vmem>>, vector<288x128xbf16>
    %c0_1 = arith.constant 0 : index
    %c0_2 = arith.constant 0 : index
    %c0_3 = arith.constant 0 : index
    %1 = vector.load %arg1[%c0_1, %c0_2, %c0_3] : memref<4x176x288xbf16, #tpu.memory_space<vmem>>, vector<1x176x288xbf16>
    %2 = vector.shape_cast %1 : vector<1x176x288xbf16> to vector<176x288xbf16>
    %cst = arith.constant dense<0.000000e+00> : vector<176x128xf32>
    %3 = tpu.matmul %2, %0, %cst {dimension_numbers = #tpu.dot_dimension_numbers<[1], [0], [0], [1], [0, 0, 1, 1], [], []>} : vector<176x288xbf16>, vector<288x128xbf16>, vector<176x128xf32> -> vector<176x128xf32>
    %c1 = arith.constant 1 : index
    %c0_4 = arith.constant 0 : index
    %c0_5 = arith.constant 0 : index
    %4 = vector.load %arg1[%c1, %c0_4, %c0_5] : memref<4x176x288xbf16, #tpu.memory_space<vmem>>, vector<1x176x288xbf16>
    %5 = vector.shape_cast %4 : vector<1x176x288xbf16> to vector<176x288xbf16>
    %cst_6 = arith.constant dense<0.000000e+00> : vector<176x128xf32>
    %6 = tpu.matmul %5, %0, %cst_6 {dimension_numbers = #tpu.dot_dimension_numbers<[1], [0], [0], [1], [0, 0, 1, 1], [], []>} : vector<176x288xbf16>, vector<288x128xbf16>, vector<176x128xf32> -> vector<176x128xf32>
    %7 = arith.maximumf %3, %6 : vector<176x128xf32>
    %c2 = arith.constant 2 : index
    %c0_7 = arith.constant 0 : index
    %c0_8 = arith.constant 0 : index
    %8 = vector.load %arg1[%c2, %c0_7, %c0_8] : memref<4x176x288xbf16, #tpu.memory_space<vmem>>, vector<1x176x288xbf16>
    %9 = vector.shape_cast %8 : vector<1x176x288xbf16> to vector<176x288xbf16>
    %cst_9 = arith.constant dense<0.000000e+00> : vector<176x128xf32>
    %10 = tpu.matmul %9, %0, %cst_9 {dimension_numbers = #tpu.dot_dimension_numbers<[1], [0], [0], [1], [0, 0, 1, 1], [], []>} : vector<176x288xbf16>, vector<288x128xbf16>, vector<176x128xf32> -> vector<176x128xf32>
    %11 = arith.maximumf %7, %10 : vector<176x128xf32>
    %c3 = arith.constant 3 : index
    %c0_10 = arith.constant 0 : index
    %c0_11 = arith.constant 0 : index
    %12 = vector.load %arg1[%c3, %c0_10, %c0_11] : memref<4x176x288xbf16, #tpu.memory_space<vmem>>, vector<1x176x288xbf16>
    %13 = vector.shape_cast %12 : vector<1x176x288xbf16> to vector<176x288xbf16>
    %cst_12 = arith.constant dense<0.000000e+00> : vector<176x128xf32>
    %14 = tpu.matmul %13, %0, %cst_12 {dimension_numbers = #tpu.dot_dimension_numbers<[1], [0], [0], [1], [0, 0, 1, 1], [], []>} : vector<176x288xbf16>, vector<288x128xbf16>, vector<176x128xf32> -> vector<176x128xf32>
    %15 = arith.maximumf %11, %14 : vector<176x128xf32>
    %c0_13 = arith.constant 0 : index
    %c0_14 = arith.constant 0 : index
    %16 = vector.load %arg3[%c0_13, %c0_14] : memref<1x128xf32, #tpu.memory_space<vmem>>, vector<1x128xf32>
    %17 = vector.broadcast %16 : vector<1x128xf32> to vector<176x128xf32>
    %18 = arith.addf %15, %17 : vector<176x128xf32>
    %cst_15 = arith.constant 0.000000e+00 : f32
    %19 = vector.broadcast %cst_15 : f32 to vector<176x128xf32>
    %20 = arith.maximumf %18, %19 : vector<176x128xf32>
    %21 = arith.truncf %20 : vector<176x128xf32> to vector<176x128xbf16>
    %c0_16 = arith.constant 0 : index
    %c0_17 = arith.constant 0 : index
    %22 = vector.load %arg4[%c0_16, %c0_17] : memref<176x128xbf16, #tpu.memory_space<vmem>>, vector<176x128xbf16>
    tpu.vector_store %arg4[%c0_16, %c0_17], %21 {strides = array<i32>} : memref<176x128xbf16, #tpu.memory_space<vmem>>, vector<176x128xbf16>,
    return
  }
  func.func @transform_0(%arg0: i32) -> (i32, i32, i32) {
    %c0_i32 = arith.constant 0 : i32
    %c0_i32_0 = arith.constant 0 : i32
    %c0_i32_1 = arith.constant 0 : i32
    return %c0_i32, %arg0, %c0_i32_0 : i32, i32, i32
  }
  func.func @transform_1(%arg0: i32) -> (i32, i32) {
    %c0_i32 = arith.constant 0 : i32
    %c0_i32_0 = arith.constant 0 : i32
    %c0_i32_1 = arith.constant 0 : i32
    return %c0_i32, %c0_i32_0 : i32, i32
  }
  func.func @transform_2(%arg0: i32) -> (i32, i32) {
    %c0_i32 = arith.constant 0 : i32
    %c0_i32_0 = arith.constant 0 : i32
    %c0_i32_1 = arith.constant 0 : i32
    return %c0_i32, %c0_i32_0 : i32, i32
  }
  func.func @transform_3(%arg0: i32) -> (i32, i32) {
    %c0_i32 = arith.constant 0 : i32
    %c0_i32_0 = arith.constant 0 : i32
    return %arg0, %c0_i32 : i32, i32
  }
}

module attributes {stable_mosaic.version = 11 : i64} {
  func.func @kernel(%arg0: i32, %arg1: memref<8x2304xbf16, #tpu.memory_space<vmem>>, %arg2: memref<2304x256xbf16, #tpu.memory_space<vmem>>, %arg3: memref<1x256xf32, #tpu.memory_space<vmem>>, %arg4: memref<256x128xbf16, #tpu.memory_space<vmem>>, %arg5: memref<1x128xf32, #tpu.memory_space<vmem>>, %arg6: memref<128x128xbf16, #tpu.memory_space<vmem>>, %arg7: memref<1x128xf32, #tpu.memory_space<vmem>>, %arg8: memref<2x128xf32, #tpu.memory_space<vmem>>) attributes {dimension_semantics = [#tpu.dimension_semantics<arbitrary>], iteration_bounds = array<i64: 1>, scalar_prefetch = 0 : i64, scratch_operands = 0 : i64, tpu.core_type = #tpu.core_type<tc>, window_params = [{pipeline_mode = #tpu.pipeline_mode<synchronous>, transform_indices = @transform_0, window_bounds = array<i64: 8, 2304>}, {pipeline_mode = #tpu.pipeline_mode<synchronous>, transform_indices = @transform_1, window_bounds = array<i64: 2304, 256>}, {pipeline_mode = #tpu.pipeline_mode<synchronous>, transform_indices = @transform_2, window_bounds = array<i64: 1, 256>}, {pipeline_mode = #tpu.pipeline_mode<synchronous>, transform_indices = @transform_3, window_bounds = array<i64: 256, 128>}, {pipeline_mode = #tpu.pipeline_mode<synchronous>, transform_indices = @transform_4, window_bounds = array<i64: 1, 128>}, {pipeline_mode = #tpu.pipeline_mode<synchronous>, transform_indices = @transform_5, window_bounds = array<i64: 128, 128>}, {pipeline_mode = #tpu.pipeline_mode<synchronous>, transform_indices = @transform_6, window_bounds = array<i64: 1, 128>}, {pipeline_mode = #tpu.pipeline_mode<synchronous>, transform_indices = @transform_7, window_bounds = array<i64: 2, 128>}]} {
    %c0 = arith.constant 0 : index
    %c0_0 = arith.constant 0 : index
    %0 = vector.load %arg1[%c0, %c0_0] : memref<8x2304xbf16, #tpu.memory_space<vmem>>, vector<8x2304xbf16>
    %c0_1 = arith.constant 0 : index
    %c0_2 = arith.constant 0 : index
    %1 = vector.load %arg2[%c0_1, %c0_2] : memref<2304x256xbf16, #tpu.memory_space<vmem>>, vector<2304x256xbf16>
    %cst = arith.constant dense<0.000000e+00> : vector<8x256xf32>
    %2 = tpu.matmul %0, %1, %cst {dimension_numbers = #tpu.dot_dimension_numbers<[1], [0], [0], [1], [0, 0, 1, 1], [], []>} : vector<8x2304xbf16>, vector<2304x256xbf16>, vector<8x256xf32> -> vector<8x256xf32>
    %3 = vector.extract_strided_slice %2 {offsets = [0, 0], sizes = [2, 256], strides = [1, 1]} : vector<8x256xf32> to vector<2x256xf32>
    %4 = vector.extract_strided_slice %2 {offsets = [2, 0], sizes = [2, 256], strides = [1, 1]} : vector<8x256xf32> to vector<2x256xf32>
    %5 = arith.maximumf %3, %4 : vector<2x256xf32>
    %6 = vector.extract_strided_slice %2 {offsets = [4, 0], sizes = [2, 256], strides = [1, 1]} : vector<8x256xf32> to vector<2x256xf32>
    %7 = vector.extract_strided_slice %2 {offsets = [6, 0], sizes = [2, 256], strides = [1, 1]} : vector<8x256xf32> to vector<2x256xf32>
    %8 = arith.maximumf %6, %7 : vector<2x256xf32>
    %9 = arith.maximumf %5, %8 : vector<2x256xf32>
    %c0_3 = arith.constant 0 : index
    %c0_4 = arith.constant 0 : index
    %10 = vector.load %arg3[%c0_3, %c0_4] : memref<1x256xf32, #tpu.memory_space<vmem>>, vector<1x256xf32>
    %11 = vector.broadcast %10 : vector<1x256xf32> to vector<2x256xf32>
    %12 = arith.addf %9, %11 : vector<2x256xf32>
    %cst_5 = arith.constant 0.000000e+00 : f32
    %13 = vector.broadcast %cst_5 : f32 to vector<2x256xf32>
    %14 = arith.maximumf %12, %13 : vector<2x256xf32>
    %15 = arith.truncf %14 : vector<2x256xf32> to vector<2x256xbf16>
    %c0_6 = arith.constant 0 : index
    %c0_7 = arith.constant 0 : index
    %16 = vector.load %arg4[%c0_6, %c0_7] : memref<256x128xbf16, #tpu.memory_space<vmem>>, vector<256x128xbf16>
    %cst_8 = arith.constant dense<0.000000e+00> : vector<2x128xf32>
    %17 = tpu.matmul %15, %16, %cst_8 {dimension_numbers = #tpu.dot_dimension_numbers<[1], [0], [0], [1], [0, 0, 1, 1], [], []>} : vector<2x256xbf16>, vector<256x128xbf16>, vector<2x128xf32> -> vector<2x128xf32>
    %c0_9 = arith.constant 0 : index
    %c0_10 = arith.constant 0 : index
    %18 = vector.load %arg5[%c0_9, %c0_10] : memref<1x128xf32, #tpu.memory_space<vmem>>, vector<1x128xf32>
    %19 = vector.broadcast %18 : vector<1x128xf32> to vector<2x128xf32>
    %20 = arith.addf %17, %19 : vector<2x128xf32>
    %cst_11 = arith.constant 0.000000e+00 : f32
    %21 = vector.broadcast %cst_11 : f32 to vector<2x128xf32>
    %22 = arith.maximumf %20, %21 : vector<2x128xf32>
    %23 = arith.truncf %22 : vector<2x128xf32> to vector<2x128xbf16>
    %c0_12 = arith.constant 0 : index
    %c0_13 = arith.constant 0 : index
    %24 = vector.load %arg6[%c0_12, %c0_13] : memref<128x128xbf16, #tpu.memory_space<vmem>>, vector<128x128xbf16>
    %cst_14 = arith.constant dense<0.000000e+00> : vector<2x128xf32>
    %25 = tpu.matmul %23, %24, %cst_14 {dimension_numbers = #tpu.dot_dimension_numbers<[1], [0], [0], [1], [0, 0, 1, 1], [], []>} : vector<2x128xbf16>, vector<128x128xbf16>, vector<2x128xf32> -> vector<2x128xf32>
    %c0_15 = arith.constant 0 : index
    %c0_16 = arith.constant 0 : index
    %26 = vector.load %arg7[%c0_15, %c0_16] : memref<1x128xf32, #tpu.memory_space<vmem>>, vector<1x128xf32>
    %27 = vector.broadcast %26 : vector<1x128xf32> to vector<2x128xf32>
    %28 = arith.addf %25, %27 : vector<2x128xf32>
    %c0_17 = arith.constant 0 : index
    %c0_18 = arith.constant 0 : index
    %29 = vector.load %arg8[%c0_17, %c0_18] : memref<2x128xf32, #tpu.memory_space<vmem>>, vector<2x128xf32>
    tpu.vector_store %arg8[%c0_17, %c0_18], %28 {strides = array<i32>} : memref<2x128xf32, #tpu.memory_space<vmem>>, vector<2x128xf32>,
    return
  }
  func.func @transform_0(%arg0: i32) -> (i32, i32) {
    %c0_i32 = arith.constant 0 : i32
    %c0_i32_0 = arith.constant 0 : i32
    %c0_i32_1 = arith.constant 0 : i32
    return %c0_i32, %c0_i32_0 : i32, i32
  }
  func.func @transform_1(%arg0: i32) -> (i32, i32) {
    %c0_i32 = arith.constant 0 : i32
    %c0_i32_0 = arith.constant 0 : i32
    %c0_i32_1 = arith.constant 0 : i32
    return %c0_i32, %c0_i32_0 : i32, i32
  }
  func.func @transform_2(%arg0: i32) -> (i32, i32) {
    %c0_i32 = arith.constant 0 : i32
    %c0_i32_0 = arith.constant 0 : i32
    %c0_i32_1 = arith.constant 0 : i32
    return %c0_i32, %c0_i32_0 : i32, i32
  }
  func.func @transform_3(%arg0: i32) -> (i32, i32) {
    %c0_i32 = arith.constant 0 : i32
    %c0_i32_0 = arith.constant 0 : i32
    %c0_i32_1 = arith.constant 0 : i32
    return %c0_i32, %c0_i32_0 : i32, i32
  }
  func.func @transform_4(%arg0: i32) -> (i32, i32) {
    %c0_i32 = arith.constant 0 : i32
    %c0_i32_0 = arith.constant 0 : i32
    %c0_i32_1 = arith.constant 0 : i32
    return %c0_i32, %c0_i32_0 : i32, i32
  }
  func.func @transform_5(%arg0: i32) -> (i32, i32) {
    %c0_i32 = arith.constant 0 : i32
    %c0_i32_0 = arith.constant 0 : i32
    %c0_i32_1 = arith.constant 0 : i32
    return %c0_i32, %c0_i32_0 : i32, i32
  }
  func.func @transform_6(%arg0: i32) -> (i32, i32) {
    %c0_i32 = arith.constant 0 : i32
    %c0_i32_0 = arith.constant 0 : i32
    %c0_i32_1 = arith.constant 0 : i32
    return %c0_i32, %c0_i32_0 : i32, i32
  }
  func.func @transform_7(%arg0: i32) -> (i32, i32) {
    %c0_i32 = arith.constant 0 : i32
    %c0_i32_0 = arith.constant 0 : i32
    %c0_i32_1 = arith.constant 0 : i32
    return %c0_i32, %c0_i32_0 : i32, i32
  }
}

</mosaic_0001>

<bundles_post_ra>
// kernel: cnn_forward.3
= control target key start
LH: loop header
LB: loop body
LE: loop exit
PB: predicated region body
PF: predicated region fallthrough
CT: control target
= control target key end

     0   :  { %s17445_s12 = smov 0   ;;  %s17447_s13 = smov 0   ;;  %s20709_s0 = inlined_call_operand.vmem [shape: bf16[4,2752,25], index: 0, kind: input, shape index: {}]   ;;  %s20710_s1 = inlined_call_operand.vmem [shape: bf16[25,128], index: 1, kind: input, shape index: {}]   ;;  %s20711_s2 = inlined_call_operand.vmem [shape: f32[1,128], index: 2, kind: input, shape index: {}]   ;;  %s20712_s3 = inlined_call_operand.vmem [shape: bf16[2752,128], index: 3, kind: output, shape index: {}]  }
   0x1   :  { %s17449_s14 = smov 0  }
   0x2 LB: > { %s13893_s15 = sadd.s32 4294967295, %s17422_s14   ;;  %s17462_s16 = sadd.s32 1, %s17422_s14   ;;  %s17422_s14 = sphi %s17449_s14, %s21784_s14   ;;  %s17418_s13 = sphi %s17447_s13, %s21783_s13   ;;  %s17414_s12 = sphi %s17445_s12, %s21782_s12  }
   0x3   : > { %s17_s17 = ssub.s32 %s17422_s14, %s17462_s16  ;;  %s20_s18 = sadd.s32 1, %s17418_s13 }
   0x4   : > { %p18_p0 = scmp.eq.s32.totalorder %s17_s17, 0  ;;  %p27_p1 = scmp.ne.s32.totalorder %s17418_s13, %s17414_s12 }
   0x5   : > { %p28_p2 = scmp.eq.s32.totalorder %s17422_s14, 0  ;;  %p13896_p4 = scmp.ge.s32.totalorder %s17422_s14, 2 }
   0x6   : > { %s17471_s19 = scalar_select %p18_p0, %s17418_s13, %s20_s18  }
   0x7   : > { %p29_p3 = por %p28_p2, %p27_p1  ;;  %127 = sbr.rel (%p13896_p4) target bundleno = 191 (0xbf), region = 24 }
   0xe   : > { %130 = sbr.rel (!%p29_p3) target bundleno = 191 (0xbf), region = 28  ;;  %s132_s20 = sand.u32 (%p29_p3), 1, %s17418_s13  }
   0xf   : > { %s15281_s21 = smul.u32 (%p29_p3), 688, %s17422_s14 }
  0x10   : > { %s17025_s22 = smul.u32 (%p29_p3), 2752, %s132_s20 }
  0x11   : > { %s17479_s25 = scalar_lea.vmem (%p29_p3), %s20709_s0, %s15281_s21 }
  0x12   : > { %v153_v0 = vld [vmem:[%s17479_s25] sm:$0xff] (%p29_p3)   ;;  %v157_v1 = vld [vmem:[%s17479_s25 + $0x8] sm:$0xff] (%p29_p3)   ;;  %v161_v2 = vld [vmem:[%s17479_s25 + $0x10] sm:$0xff] (%p29_p3)   ;;  %s17484_s26 = scalar_lea.vmem (%p29_p3), [#allocation2], %s17025_s22 }
  0x13   : > { %154 = vst [vmem:[%s17484_s26] sm:$0xff] (%p29_p3), %v153_v0   ;;  %158 = vst [vmem:[%s17484_s26 + $0x8] sm:$0xff] (%p29_p3), %v157_v1   ;;  %v165_v3 = vld [vmem:[%s17479_s25 + $0x18] sm:$0xff] (%p29_p3)   ;;  %v169_v4 = vld [vmem:[%s17479_s25 + $0x20] sm:$0xff] (%p29_p3)  }
  0x14   : > { %162 = vst [vmem:[%s17484_s26 + $0x10] sm:$0xff] (%p29_p3), %v161_v2   ;;  %v173_v5 = vld [vmem:[%s17479_s25 + $0x28] sm:$0xff] (%p29_p3)   ;;  %166 = vst [vmem:[%s17484_s26 + $0x18] sm:$0xff] (%p29_p3), %v165_v3   ;;  %v177_v6 = vld [vmem:[%s17479_s25 + $0x30] sm:$0xff] (%p29_p3)  }
  0x15   : > { %170 = vst [vmem:[%s17484_s26 + $0x20] sm:$0xff] %v169_v4   ;;  %174 = vst [vmem:[%s17484_s26 + $0x28] sm:$0xff] %v173_v5   ;;  %v181_v7 = vld [vmem:[%s17479_s25 + $0x38] sm:$0xff]   ;;  %v185_v8 = vld [vmem:[%s17479_s25 + $0x40] sm:$0xff]  }
  0x16   : > { %178 = vst [vmem:[%s17484_s26 + $0x30] sm:$0xff] %v177_v6   ;;  %182 = vst [vmem:[%s17484_s26 + $0x38] sm:$0xff] %v181_v7   ;;  %v189_v9 = vld [vmem:[%s17479_s25 + $0x48] sm:$0xff]   ;;  %v193_v10 = vld [vmem:[%s17479_s25 + $0x50] sm:$0xff]  }
  0x17   : > { %186 = vst [vmem:[%s17484_s26 + $0x40] sm:$0xff] %v185_v8   ;;  %v197_v11 = vld [vmem:[%s17479_s25 + $0x58] sm:$0xff]   ;;  %190 = vst [vmem:[%s17484_s26 + $0x48] sm:$0xff] %v189_v9   ;;  %v201_v12 = vld [vmem:[%s17479_s25 + $0x60] sm:$0xff]  }
  0x18   : > { %194 = vst [vmem:[%s17484_s26 + $0x50] sm:$0xff] %v193_v10   ;;  %198 = vst [vmem:[%s17484_s26 + $0x58] sm:$0xff] %v197_v11   ;;  %v205_v13 = vld [vmem:[%s17479_s25 + $0x68] sm:$0xff]   ;;  %v209_v14 = vld [vmem:[%s17479_s25 + $0x70] sm:$0xff]  }
  0x19   : > { %202 = vst [vmem:[%s17484_s26 + $0x60] sm:$0xff] %v201_v12   ;;  %206 = vst [vmem:[%s17484_s26 + $0x68] sm:$0xff] %v205_v13   ;;  %v213_v15 = vld [vmem:[%s17479_s25 + $0x78] sm:$0xff]   ;;  %v217_v16 = vld [vmem:[%s17479_s25 + $0x80] sm:$0xff]  }
  0x1a   : > { %210 = vst [vmem:[%s17484_s26 + $0x70] sm:$0xff] %v209_v14   ;;  %v221_v17 = vld [vmem:[%s17479_s25 + $0x88] sm:$0xff]   ;;  %214 = vst [vmem:[%s17484_s26 + $0x78] sm:$0xff] %v213_v15   ;;  %v225_v18 = vld [vmem:[%s17479_s25 + $0x90] sm:$0xff]  }
  0x1b   : > { %218 = vst [vmem:[%s17484_s26 + $0x80] sm:$0xff] %v217_v16   ;;  %222 = vst [vmem:[%s17484_s26 + $0x88] sm:$0xff] %v221_v17   ;;  %v229_v19 = vld [vmem:[%s17479_s25 + $0x98] sm:$0xff]   ;;  %v233_v20 = vld [vmem:[%s17479_s25 + $0xa0] sm:$0xff]  }
  0x1c   : > { %226 = vst [vmem:[%s17484_s26 + $0x90] sm:$0xff] %v225_v18   ;;  %230 = vst [vmem:[%s17484_s26 + $0x98] sm:$0xff] %v229_v19   ;;  %v237_v21 = vld [vmem:[%s17479_s25 + $0xa8] sm:$0xff]   ;;  %v241_v22 = vld [vmem:[%s17479_s25 + $0xb0] sm:$0xff]  }
  0x1d   : > { %234 = vst [vmem:[%s17484_s26 + $0xa0] sm:$0xff] %v233_v20   ;;  %v245_v23 = vld [vmem:[%s17479_s25 + $0xb8] sm:$0xff]   ;;  %238 = vst [vmem:[%s17484_s26 + $0xa8] sm:$0xff] %v237_v21   ;;  %v249_v24 = vld [vmem:[%s17479_s25 + $0xc0] sm:$0xff]  }
  0x1e   : > { %242 = vst [vmem:[%s17484_s26 + $0xb0] sm:$0xff] %v241_v22   ;;  %246 = vst [vmem:[%s17484_s26 + $0xb8] sm:$0xff] %v245_v23   ;;  %v253_v25 = vld [vmem:[%s17479_s25 + $0xc8] sm:$0xff]   ;;  %v257_v26 = vld [vmem:[%s17479_s25 + $0xd0] sm:$0xff]  }
  0x1f   : > { %250 = vst [vmem:[%s17484_s26 + $0xc0] sm:$0xff] %v249_v24   ;;  %254 = vst [vmem:[%s17484_s26 + $0xc8] sm:$0xff] %v253_v25   ;;  %v261_v27 = vld [vmem:[%s17479_s25 + $0xd8] sm:$0xff]   ;;  %v265_v28 = vld [vmem:[%s17479_s25 + $0xe0] sm:$0xff]  }
  0x20   : > { %258 = vst [vmem:[%s17484_s26 + $0xd0] sm:$0xff] %v257_v26   ;;  %v269_v29 = vld [vmem:[%s17479_s25 + $0xe8] sm:$0xff]   ;;  %262 = vst [vmem:[%s17484_s26 + $0xd8] sm:$0xff] %v261_v27   ;;  %v273_v30 = vld [vmem:[%s17479_s25 + $0xf0] sm:$0xff]  }
  0x21   : > { %266 = vst [vmem:[%s17484_s26 + $0xe0] sm:$0xff] %v265_v28   ;;  %270 = vst [vmem:[%s17484_s26 + $0xe8] sm:$0xff] %v269_v29   ;;  %v277_v31 = vld [vmem:[%s17479_s25 + $0xf8] sm:$0xff]   ;;  %v281_v32 = vld [vmem:[%s17479_s25 + $0x100] sm:$0xff]  }
  0x22   : > { %274 = vst [vmem:[%s17484_s26 + $0xf0] sm:$0xff] %v273_v30   ;;  %278 = vst [vmem:[%s17484_s26 + $0xf8] sm:$0xff] %v277_v31   ;;  %v285_v33 = vld [vmem:[%s17479_s25 + $0x108] sm:$0xff]   ;;  %v289_v34 = vld [vmem:[%s17479_s25 + $0x110] sm:$0xff]  }
  0x23   : > { %282 = vst [vmem:[%s17484_s26 + $0x100] sm:$0xff] %v281_v32   ;;  %v293_v35 = vld [vmem:[%s17479_s25 + $0x118] sm:$0xff]   ;;  %286 = vst [vmem:[%s17484_s26 + $0x108] sm:$0xff] %v285_v33   ;;  %v297_v36 = vld [vmem:[%s17479_s25 + $0x120] sm:$0xff]  }
  0x24   : > { %290 = vst [vmem:[%s17484_s26 + $0x110] sm:$0xff] %v289_v34   ;;  %294 = vst [vmem:[%s17484_s26 + $0x118] sm:$0xff] %v293_v35   ;;  %v301_v37 = vld [vmem:[%s17479_s25 + $0x128] sm:$0xff]   ;;  %v305_v38 = vld [vmem:[%s17479_s25 + $0x130] sm:$0xff]  }
  0x25   : > { %298 = vst [vmem:[%s17484_s26 + $0x120] sm:$0xff] %v297_v36   ;;  %302 = vst [vmem:[%s17484_s26 + $0x128] sm:$0xff] %v301_v37   ;;  %v309_v39 = vld [vmem:[%s17479_s25 + $0x138] sm:$0xff]   ;;  %v313_v40 = vld [vmem:[%s17479_s25 + $0x140] sm:$0xff]  }
  0x26   : > { %306 = vst [vmem:[%s17484_s26 + $0x130] sm:$0xff] %v305_v38   ;;  %v317_v41 = vld [vmem:[%s17479_s25 + $0x148] sm:$0xff]   ;;  %310 = vst [vmem:[%s17484_s26 + $0x138] sm:$0xff] %v309_v39   ;;  %v321_v42 = vld [vmem:[%s17479_s25 + $0x150] sm:$0xff]  }
  0x27   : > { %314 = vst [vmem:[%s17484_s26 + $0x140] sm:$0xff] %v313_v40   ;;  %318 = vst [vmem:[%s17484_s26 + $0x148] sm:$0xff] %v317_v41   ;;  %v325_v43 = vld [vmem:[%s17479_s25 + $0x158] sm:$0xff]   ;;  %v329_v44 = vld [vmem:[%s17479_s25 + $0x160] sm:$0xff]  }
  0x28   : > { %322 = vst [vmem:[%s17484_s26 + $0x150] sm:$0xff] %v321_v42   ;;  %326 = vst [vmem:[%s17484_s26 + $0x158] sm:$0xff] %v325_v43   ;;  %v333_v45 = vld [vmem:[%s17479_s25 + $0x168] sm:$0xff]   ;;  %v337_v46 = vld [vmem:[%s17479_s25 + $0x170] sm:$0xff]  }
  0x29   : > { %330 = vst [vmem:[%s17484_s26 + $0x160] sm:$0xff] %v329_v44   ;;  %v341_v47 = vld [vmem:[%s17479_s25 + $0x178] sm:$0xff]   ;;  %334 = vst [vmem:[%s17484_s26 + $0x168] sm:$0xff] %v333_v45   ;;  %v345_v48 = vld [vmem:[%s17479_s25 + $0x180] sm:$0xff]  }
  0x2a   : > { %338 = vst [vmem:[%s17484_s26 + $0x170] sm:$0xff] %v337_v46   ;;  %342 = vst [vmem:[%s17484_s26 + $0x178] sm:$0xff] %v341_v47   ;;  %v349_v49 = vld [vmem:[%s17479_s25 + $0x188] sm:$0xff]   ;;  %v353_v50 = vld [vmem:[%s17479_s25 + $0x190] sm:$0xff]  }
  0x2b   : > { %346 = vst [vmem:[%s17484_s26 + $0x180] sm:$0xff] %v345_v48   ;;  %350 = vst [vmem:[%s17484_s26 + $0x188] sm:$0xff] %v349_v49   ;;  %v357_v51 = vld [vmem:[%s17479_s25 + $0x198] sm:$0xff]   ;;  %v361_v52 = vld [vmem:[%s17479_s25 + $0x1a0] sm:$0xff]  }
  0x2c   : > { %354 = vst [vmem:[%s17484_s26 + $0x190] sm:$0xff] %v353_v50   ;;  %v365_v53 = vld [vmem:[%s17479_s25 + $0x1a8] sm:$0xff]   ;;  %358 = vst [vmem:[%s17484_s26 + $0x198] sm:$0xff] %v357_v51   ;;  %v369_v54 = vld [vmem:[%s17479_s25 + $0x1b0] sm:$0xff]  }
  0x2d   : > { %362 = vst [vmem:[%s17484_s26 + $0x1a0] sm:$0xff] %v361_v52   ;;  %366 = vst [vmem:[%s17484_s26 + $0x1a8] sm:$0xff] %v365_v53   ;;  %v373_v55 = vld [vmem:[%s17479_s25 + $0x1b8] sm:$0xff]   ;;  %v377_v56 = vld [vmem:[%s17479_s25 + $0x1c0] sm:$0xff]  }
  0x2e   : > { %370 = vst [vmem:[%s17484_s26 + $0x1b0] sm:$0xff] %v369_v54   ;;  %374 = vst [vmem:[%s17484_s26 + $0x1b8] sm:$0xff] %v373_v55   ;;  %v381_v57 = vld [vmem:[%s17479_s25 + $0x1c8] sm:$0xff]   ;;  %v385_v58 = vld [vmem:[%s17479_s25 + $0x1d0] sm:$0xff]  }
  0x2f   : > { %378 = vst [vmem:[%s17484_s26 + $0x1c0] sm:$0xff] %v377_v56   ;;  %v389_v59 = vld [vmem:[%s17479_s25 + $0x1d8] sm:$0xff]   ;;  %382 = vst [vmem:[%s17484_s26 + $0x1c8] sm:$0xff] %v381_v57   ;;  %v393_v60 = vld [vmem:[%s17479_s25 + $0x1e0] sm:$0xff]  }
  0x30   : > { %386 = vst [vmem:[%s17484_s26 + $0x1d0] sm:$0xff] %v385_v58   ;;  %390 = vst [vmem:[%s17484_s26 + $0x1d8] sm:$0xff] %v389_v59   ;;  %v397_v61 = vld [vmem:[%s17479_s25 + $0x1e8] sm:$0xff]   ;;  %v401_v62 = vld [vmem:[%s17479_s25 + $0x1f0] sm:$0xff]  }
  0x31   : > { %394 = vst [vmem:[%s17484_s26 + $0x1e0] sm:$0xff] %v393_v60   ;;  %398 = vst [vmem:[%s17484_s26 + $0x1e8] sm:$0xff] %v397_v61   ;;  %v405_v63 = vld [vmem:[%s17479_s25 + $0x1f8] sm:$0xff]   ;;  %v409_v0 = vld [vmem:[%s17479_s25 + $0x200] sm:$0xff]  }
  0x32   : > { %402 = vst [vmem:[%s17484_s26 + $0x1f0] sm:$0xff] %v401_v62   ;;  %v413_v1 = vld [vmem:[%s17479_s25 + $0x208] sm:$0xff]   ;;  %406 = vst [vmem:[%s17484_s26 + $0x1f8] sm:$0xff] %v405_v63   ;;  %v417_v2 = vld [vmem:[%s17479_s25 + $0x210] sm:$0xff]  }
  0x33   : > { %410 = vst [vmem:[%s17484_s26 + $0x200] sm:$0xff] %v409_v0   ;;  %414 = vst [vmem:[%s17484_s26 + $0x208] sm:$0xff] %v413_v1   ;;  %v421_v3 = vld [vmem:[%s17479_s25 + $0x218] sm:$0xff]   ;;  %v425_v4 = vld [vmem:[%s17479_s25 + $0x220] sm:$0xff]  }
  0x34   : > { %418 = vst [vmem:[%s17484_s26 + $0x210] sm:$0xff] %v417_v2   ;;  %422 = vst [vmem:[%s17484_s26 + $0x218] sm:$0xff] %v421_v3   ;;  %v429_v5 = vld [vmem:[%s17479_s25 + $0x228] sm:$0xff]   ;;  %v433_v6 = vld [vmem:[%s17479_s25 + $0x230] sm:$0xff]  }
  0x35   : > { %426 = vst [vmem:[%s17484_s26 + $0x220] sm:$0xff] %v425_v4   ;;  %v437_v7 = vld [vmem:[%s17479_s25 + $0x238] sm:$0xff]   ;;  %430 = vst [vmem:[%s17484_s26 + $0x228] sm:$0xff] %v429_v5   ;;  %v441_v8 = vld [vmem:[%s17479_s25 + $0x240] sm:$0xff]  }
  0x36   : > { %434 = vst [vmem:[%s17484_s26 + $0x230] sm:$0xff] %v433_v6   ;;  %438 = vst [vmem:[%s17484_s26 + $0x238] sm:$0xff] %v437_v7   ;;  %v445_v9 = vld [vmem:[%s17479_s25 + $0x248] sm:$0xff]   ;;  %v449_v10 = vld [vmem:[%s17479_s25 + $0x250] sm:$0xff]  }
  0x37   : > { %442 = vst [vmem:[%s17484_s26 + $0x240] sm:$0xff] %v441_v8   ;;  %446 = vst [vmem:[%s17484_s26 + $0x248] sm:$0xff] %v445_v9   ;;  %v453_v11 = vld [vmem:[%s17479_s25 + $0x258] sm:$0xff]   ;;  %v457_v12 = vld [vmem:[%s17479_s25 + $0x260] sm:$0xff]  }
  0x38   : > { %450 = vst [vmem:[%s17484_s26 + $0x250] sm:$0xff] %v449_v10   ;;  %v461_v13 = vld [vmem:[%s17479_s25 + $0x268] sm:$0xff]   ;;  %454 = vst [vmem:[%s17484_s26 + $0x258] sm:$0xff] %v453_v11   ;;  %v465_v14 = vld [vmem:[%s17479_s25 + $0x270] sm:$0xff]  }
  0x39   : > { %458 = vst [vmem:[%s17484_s26 + $0x260] sm:$0xff] %v457_v12   ;;  %462 = vst [vmem:[%s17484_s26 + $0x268] sm:$0xff] %v461_v13   ;;  %v469_v15 = vld [vmem:[%s17479_s25 + $0x278] sm:$0xff]   ;;  %v473_v16 = vld [vmem:[%s17479_s25 + $0x280] sm:$0xff]  }
  0x3a   : > { %466 = vst [vmem:[%s17484_s26 + $0x270] sm:$0xff] %v465_v14   ;;  %470 = vst [vmem:[%s17484_s26 + $0x278] sm:$0xff] %v469_v15   ;;  %v477_v17 = vld [vmem:[%s17479_s25 + $0x288] sm:$0xff]   ;;  %v481_v18 = vld [vmem:[%s17479_s25 + $0x290] sm:$0xff]  }
  0x3b   : > { %474 = vst [vmem:[%s17484_s26 + $0x280] sm:$0xff] %v473_v16   ;;  %v485_v19 = vld [vmem:[%s17479_s25 + $0x298] sm:$0xff]   ;;  %478 = vst [vmem:[%s17484_s26 + $0x288] sm:$0xff] %v477_v17   ;;  %v489_v20 = vld [vmem:[%s17479_s25 + $0x2a0] sm:$0xff]  }
  0x3c   : > { %482 = vst [vmem:[%s17484_s26 + $0x290] sm:$0xff] %v481_v18   ;;  %486 = vst [vmem:[%s17484_s26 + $0x298] sm:$0xff] %v485_v19   ;;  %v493_v21 = vld [vmem:[%s17479_s25 + $0x2a8] sm:$0xff]   ;;  %v497_v22 = vld [vmem:[%s17479_s25 + $0x560] sm:$0xff]  }
  0x3d   : > { %490 = vst [vmem:[%s17484_s26 + $0x2a0] sm:$0xff] %v489_v20   ;;  %494 = vst [vmem:[%s17484_s26 + $0x2a8] sm:$0xff] %v493_v21   ;;  %v501_v23 = vld [vmem:[%s17479_s25 + $0x568] sm:$0xff]   ;;  %v505_v24 = vld [vmem:[%s17479_s25 + $0x570] sm:$0xff]  }
  0x3e   : > { %498 = vst [vmem:[%s17484_s26 + $0x2b0] sm:$0xff] %v497_v22   ;;  %v509_v25 = vld [vmem:[%s17479_s25 + $0x578] sm:$0xff]   ;;  %502 = vst [vmem:[%s17484_s26 + $0x2b8] sm:$0xff] %v501_v23   ;;  %v513_v26 = vld [vmem:[%s17479_s25 + $0x580] sm:$0xff]  }
  0x3f   : > { %506 = vst [vmem:[%s17484_s26 + $0x2c0] sm:$0xff] %v505_v24   ;;  %510 = vst [vmem:[%s17484_s26 + $0x2c8] sm:$0xff] %v509_v25   ;;  %v517_v27 = vld [vmem:[%s17479_s25 + $0x588] sm:$0xff]   ;;  %v521_v28 = vld [vmem:[%s17479_s25 + $0x590] sm:$0xff]  }
  0x40   : > { %514 = vst [vmem:[%s17484_s26 + $0x2d0] sm:$0xff] %v513_v26   ;;  %518 = vst [vmem:[%s17484_s26 + $0x2d8] sm:$0xff] %v517_v27   ;;  %v525_v29 = vld [vmem:[%s17479_s25 + $0x598] sm:$0xff]   ;;  %v529_v30 = vld [vmem:[%s17479_s25 + $0x5a0] sm:$0xff]  }
  0x41   : > { %522 = vst [vmem:[%s17484_s26 + $0x2e0] sm:$0xff] %v521_v28   ;;  %v533_v31 = vld [vmem:[%s17479_s25 + $0x5a8] sm:$0xff]   ;;  %526 = vst [vmem:[%s17484_s26 + $0x2e8] sm:$0xff] %v525_v29   ;;  %v537_v32 = vld [vmem:[%s17479_s25 + $0x5b0] sm:$0xff]  }
  0x42   : > { %530 = vst [vmem:[%s17484_s26 + $0x2f0] sm:$0xff] %v529_v30   ;;  %534 = vst [vmem:[%s17484_s26 + $0x2f8] sm:$0xff] %v533_v31   ;;  %v541_v33 = vld [vmem:[%s17479_s25 + $0x5b8] sm:$0xff]   ;;  %v545_v34 = vld [vmem:[%s17479_s25 + $0x5c0] sm:$0xff]  }
  0x43   : > { %538 = vst [vmem:[%s17484_s26 + $0x300] sm:$0xff] %v537_v32   ;;  %542 = vst [vmem:[%s17484_s26 + $0x308] sm:$0xff] %v541_v33   ;;  %v549_v35 = vld [vmem:[%s17479_s25 + $0x5c8] sm:$0xff]   ;;  %v553_v36 = vld [vmem:[%s17479_s25 + $0x5d0] sm:$0xff]  }
  0x44   : > { %546 = vst [vmem:[%s17484_s26 + $0x310] sm:$0xff] %v545_v34   ;;  %v557_v37 = vld [vmem:[%s17479_s25 + $0x5d8] sm:$0xff]   ;;  %550 = vst [vmem:[%s17484_s26 + $0x318] sm:$0xff] %v549_v35   ;;  %v561_v38 = vld [vmem:[%s17479_s25 + $0x5e0] sm:$0xff]  }
  0x45   : > { %554 = vst [vmem:[%s17484_s26 + $0x320] sm:$0xff] %v553_v36   ;;  %558 = vst [vmem:[%s17484_s26 + $0x328] sm:$0xff] %v557_v37   ;;  %v565_v39 = vld [vmem:[%s17479_s25 + $0x5e8] sm:$0xff]   ;;  %v569_v40 = vld [vmem:[%s17479_s25 + $0x5f0] sm:$0xff]  }
  0x46   : > { %562 = vst [vmem:[%s17484_s26 + $0x330] sm:$0xff] %v561_v38   ;;  %566 = vst [vmem:[%s17484_s26 + $0x338] sm:$0xff] %v565_v39   ;;  %v573_v41 = vld [vmem:[%s17479_s25 + $0x5f8] sm:$0xff]   ;;  %v577_v42 = vld [vmem:[%s17479_s25 + $0x600] sm:$0xff]  }
  0x47   : > { %570 = vst [vmem:[%s17484_s26 + $0x340] sm:$0xff] %v569_v40   ;;  %v581_v43 = vld [vmem:[%s17479_s25 + $0x608] sm:$0xff]   ;;  %574 = vst [vmem:[%s17484_s26 + $0x348] sm:$0xff] %v573_v41   ;;  %v585_v44 = vld [vmem:[%s17479_s25 + $0x610] sm:$0xff]  }
  0x48   : > { %578 = vst [vmem:[%s17484_s26 + $0x350] sm:$0xff] %v577_v42   ;;  %582 = vst [vmem:[%s17484_s26 + $0x358] sm:$0xff] %v581_v43   ;;  %v589_v45 = vld [vmem:[%s17479_s25 + $0x618] sm:$0xff]   ;;  %v593_v46 = vld [vmem:[%s17479_s25 + $0x620] sm:$0xff]  }
  0x49   : > { %586 = vst [vmem:[%s17484_s26 + $0x360] sm:$0xff] %v585_v44   ;;  %590 = vst [vmem:[%s17484_s26 + $0x368] sm:$0xff] %v589_v45   ;;  %v597_v47 = vld [vmem:[%s17479_s25 + $0x628] sm:$0xff]   ;;  %v601_v48 = vld [vmem:[%s17479_s25 + $0x630] sm:$0xff]  }
  0x4a   : > { %594 = vst [vmem:[%s17484_s26 + $0x370] sm:$0xff] %v593_v46   ;;  %v605_v49 = vld [vmem:[%s17479_s25 + $0x638] sm:$0xff]   ;;  %598 = vst [vmem:[%s17484_s26 + $0x378] sm:$0xff] %v597_v47   ;;  %v609_v50 = vld [vmem:[%s17479_s25 + $0x640] sm:$0xff]  }
  0x4b   : > { %602 = vst [vmem:[%s17484_s26 + $0x380] sm:$0xff] %v601_v48   ;;  %606 = vst [vmem:[%s17484_s26 + $0x388] sm:$0xff] %v605_v49   ;;  %v613_v51 = vld [vmem:[%s17479_s25 + $0x648] sm:$0xff]   ;;  %v617_v52 = vld [vmem:[%s17479_s25 + $0x650] sm:$0xff]  }
  0x4c   : > { %610 = vst [vmem:[%s17484_s26 + $0x390] sm:$0xff] %v609_v50   ;;  %614 = vst [vmem:[%s17484_s26 + $0x398] sm:$0xff] %v613_v51   ;;  %v621_v53 = vld [vmem:[%s17479_s25 + $0x658] sm:$0xff]   ;;  %v625_v54 = vld [vmem:[%s17479_s25 + $0x660] sm:$0xff]  }
  0x4d   : > { %618 = vst [vmem:[%s17484_s26 + $0x3a0] sm:$0xff] %v617_v52   ;;  %v629_v55 = vld [vmem:[%s17479_s25 + $0x668] sm:$0xff]   ;;  %622 = vst [vmem:[%s17484_s26 + $0x3a8] sm:$0xff] %v621_v53   ;;  %v633_v56 = vld [vmem:[%s17479_s25 + $0x670] sm:$0xff]  }
  0x4e   : > { %626 = vst [vmem:[%s17484_s26 + $0x3b0] sm:$0xff] %v625_v54   ;;  %630 = vst [vmem:[%s17484_s26 + $0x3b8] sm:$0xff] %v629_v55   ;;  %v637_v57 = vld [vmem:[%s17479_s25 + $0x678] sm:$0xff]   ;;  %v641_v58 = vld [vmem:[%s17479_s25 + $0x680] sm:$0xff]  }
  0x4f   : > { %634 = vst [vmem:[%s17484_s26 + $0x3c0] sm:$0xff] %v633_v56   ;;  %638 = vst [vmem:[%s17484_s26 + $0x3c8] sm:$0xff] %v637_v57   ;;  %v645_v59 = vld [vmem:[%s17479_s25 + $0x688] sm:$0xff]   ;;  %v649_v60 = vld [vmem:[%s17479_s25 + $0x690] sm:$0xff]  }
  0x50   : > { %642 = vst [vmem:[%s17484_s26 + $0x3d0] sm:$0xff] %v641_v58   ;;  %v653_v61 = vld [vmem:[%s17479_s25 + $0x698] sm:$0xff]   ;;  %646 = vst [vmem:[%s17484_s26 + $0x3d8] sm:$0xff] %v645_v59   ;;  %v657_v62 = vld [vmem:[%s17479_s25 + $0x6a0] sm:$0xff]  }
  0x51   : > { %650 = vst [vmem:[%s17484_s26 + $0x3e0] sm:$0xff] %v649_v60   ;;  %654 = vst [vmem:[%s17484_s26 + $0x3e8] sm:$0xff] %v653_v61   ;;  %v661_v63 = vld [vmem:[%s17479_s25 + $0x6a8] sm:$0xff]   ;;  %v665_v0 = vld [vmem:[%s17479_s25 + $0x6b0] sm:$0xff]  }
  0x52   : > { %658 = vst [vmem:[%s17484_s26 + $0x3f0] sm:$0xff] %v657_v62   ;;  %662 = vst [vmem:[%s17484_s26 + $0x3f8] sm:$0xff] %v661_v63   ;;  %v669_v1 = vld [vmem:[%s17479_s25 + $0x6b8] sm:$0xff]   ;;  %v673_v2 = vld [vmem:[%s17479_s25 + $0x6c0] sm:$0xff]  }
  0x53   : > { %666 = vst [vmem:[%s17484_s26 + $0x400] sm:$0xff] %v665_v0   ;;  %v677_v3 = vld [vmem:[%s17479_s25 + $0x6c8] sm:$0xff]   ;;  %670 = vst [vmem:[%s17484_s26 + $0x408] sm:$0xff] %v669_v1   ;;  %v681_v4 = vld [vmem:[%s17479_s25 + $0x6d0] sm:$0xff]  }
  0x54   : > { %674 = vst [vmem:[%s17484_s26 + $0x410] sm:$0xff] %v673_v2   ;;  %678 = vst [vmem:[%s17484_s26 + $0x418] sm:$0xff] %v677_v3   ;;  %v685_v5 = vld [vmem:[%s17479_s25 + $0x6d8] sm:$0xff]   ;;  %v689_v6 = vld [vmem:[%s17479_s25 + $0x6e0] sm:$0xff]  }
  0x55   : > { %682 = vst [vmem:[%s17484_s26 + $0x420] sm:$0xff] %v681_v4   ;;  %686 = vst [vmem:[%s17484_s26 + $0x428] sm:$0xff] %v685_v5   ;;  %v693_v7 = vld [vmem:[%s17479_s25 + $0x6e8] sm:$0xff]   ;;  %v697_v8 = vld [vmem:[%s17479_s25 + $0x6f0] sm:$0xff]  }
  0x56   : > { %690 = vst [vmem:[%s17484_s26 + $0x430] sm:$0xff] %v689_v6   ;;  %v701_v9 = vld [vmem:[%s17479_s25 + $0x6f8] sm:$0xff]   ;;  %694 = vst [vmem:[%s17484_s26 + $0x438] sm:$0xff] %v693_v7   ;;  %v705_v10 = vld [vmem:[%s17479_s25 + $0x700] sm:$0xff]  }
  0x57   : > { %698 = vst [vmem:[%s17484_s26 + $0x440] sm:$0xff] %v697_v8   ;;  %702 = vst [vmem:[%s17484_s26 + $0x448] sm:$0xff] %v701_v9   ;;  %v709_v11 = vld [vmem:[%s17479_s25 + $0x708] sm:$0xff]   ;;  %v713_v12 = vld [vmem:[%s17479_s25 + $0x710] sm:$0xff]  }
  0x58   : > { %706 = vst [vmem:[%s17484_s26 + $0x450] sm:$0xff] %v705_v10   ;;  %710 = vst [vmem:[%s17484_s26 + $0x458] sm:$0xff] %v709_v11   ;;  %v717_v13 = vld [vmem:[%s17479_s25 + $0x718] sm:$0xff]   ;;  %v721_v14 = vld [vmem:[%s17479_s25 + $0x720] sm:$0xff]  }
  0x59   : > { %714 = vst [vmem:[%s17484_s26 + $0x460] sm:$0xff] %v713_v12   ;;  %v725_v15 = vld [vmem:[%s17479_s25 + $0x728] sm:$0xff]   ;;  %718 = vst [vmem:[%s17484_s26 + $0x468] sm:$0xff] %v717_v13   ;;  %v729_v16 = vld [vmem:[%s17479_s25 + $0x730] sm:$0xff]  }
  0x5a   : > { %722 = vst [vmem:[%s17484_s26 + $0x470] sm:$0xff] %v721_v14   ;;  %726 = vst [vmem:[%s17484_s26 + $0x478] sm:$0xff] %v725_v15   ;;  %v733_v17 = vld [vmem:[%s17479_s25 + $0x738] sm:$0xff]   ;;  %v737_v18 = vld [vmem:[%s17479_s25 + $0x740] sm:$0xff]  }
  0x5b   : > { %730 = vst [vmem:[%s17484_s26 + $0x480] sm:$0xff] %v729_v16   ;;  %734 = vst [vmem:[%s17484_s26 + $0x488] sm:$0xff] %v733_v17   ;;  %v741_v19 = vld [vmem:[%s17479_s25 + $0x748] sm:$0xff]   ;;  %v745_v20 = vld [vmem:[%s17479_s25 + $0x750] sm:$0xff]  }
  0x5c   : > { %738 = vst [vmem:[%s17484_s26 + $0x490] sm:$0xff] %v737_v18   ;;  %v749_v21 = vld [vmem:[%s17479_s25 + $0x758] sm:$0xff]   ;;  %742 = vst [vmem:[%s17484_s26 + $0x498] sm:$0xff] %v741_v19   ;;  %v753_v22 = vld [vmem:[%s17479_s25 + $0x760] sm:$0xff]  }
  0x5d   : > { %746 = vst [vmem:[%s17484_s26 + $0x4a0] sm:$0xff] %v745_v20   ;;  %750 = vst [vmem:[%s17484_s26 + $0x4a8] sm:$0xff] %v749_v21   ;;  %v757_v23 = vld [vmem:[%s17479_s25 + $0x768] sm:$0xff]   ;;  %v761_v24 = vld [vmem:[%s17479_s25 + $0x770] sm:$0xff]  }
  0x5e   : > { %754 = vst [vmem:[%s17484_s26 + $0x4b0] sm:$0xff] %v753_v22   ;;  %758 = vst [vmem:[%s17484_s26 + $0x4b8] sm:$0xff] %v757_v23   ;;  %v765_v25 = vld [vmem:[%s17479_s25 + $0x778] sm:$0xff]   ;;  %v769_v26 = vld [vmem:[%s17479_s25 + $0x780] sm:$0xff]  }
  0x5f   : > { %762 = vst [vmem:[%s17484_s26 + $0x4c0] sm:$0xff] %v761_v24   ;;  %v773_v27 = vld [vmem:[%s17479_s25 + $0x788] sm:$0xff]   ;;  %766 = vst [vmem:[%s17484_s26 + $0x4c8] sm:$0xff] %v765_v25   ;;  %v777_v28 = vld [vmem:[%s17479_s25 + $0x790] sm:$0xff]  }
  0x60   : > { %770 = vst [vmem:[%s17484_s26 + $0x4d0] sm:$0xff] %v769_v26   ;;  %774 = vst [vmem:[%s17484_s26 + $0x4d8] sm:$0xff] %v773_v27   ;;  %v781_v29 = vld [vmem:[%s17479_s25 + $0x798] sm:$0xff]   ;;  %v785_v30 = vld [vmem:[%s17479_s25 + $0x7a0] sm:$0xff]  }
  0x61   : > { %778 = vst [vmem:[%s17484_s26 + $0x4e0] sm:$0xff] %v777_v28   ;;  %782 = vst [vmem:[%s17484_s26 + $0x4e8] sm:$0xff] %v781_v29   ;;  %v789_v31 = vld [vmem:[%s17479_s25 + $0x7a8] sm:$0xff]   ;;  %v793_v32 = vld [vmem:[%s17479_s25 + $0x7b0] sm:$0xff]  }
  0x62   : > { %786 = vst [vmem:[%s17484_s26 + $0x4f0] sm:$0xff] %v785_v30   ;;  %v797_v33 = vld [vmem:[%s17479_s25 + $0x7b8] sm:$0xff]   ;;  %790 = vst [vmem:[%s17484_s26 + $0x4f8] sm:$0xff] %v789_v31   ;;  %v801_v34 = vld [vmem:[%s17479_s25 + $0x7c0] sm:$0xff]  }
  0x63   : > { %794 = vst [vmem:[%s17484_s26 + $0x500] sm:$0xff] %v793_v32   ;;  %798 = vst [vmem:[%s17484_s26 + $0x508] sm:$0xff] %v797_v33   ;;  %v805_v35 = vld [vmem:[%s17479_s25 + $0x7c8] sm:$0xff]   ;;  %v809_v36 = vld [vmem:[%s17479_s25 + $0x7d0] sm:$0xff]  }
  0x64   : > { %802 = vst [vmem:[%s17484_s26 + $0x510] sm:$0xff] %v801_v34   ;;  %806 = vst [vmem:[%s17484_s26 + $0x518] sm:$0xff] %v805_v35   ;;  %v813_v37 = vld [vmem:[%s17479_s25 + $0x7d8] sm:$0xff]   ;;  %v817_v38 = vld [vmem:[%s17479_s25 + $0x7e0] sm:$0xff]  }
  0x65   : > { %810 = vst [vmem:[%s17484_s26 + $0x520] sm:$0xff] %v809_v36   ;;  %v821_v39 = vld [vmem:[%s17479_s25 + $0x7e8] sm:$0xff]   ;;  %814 = vst [vmem:[%s17484_s26 + $0x528] sm:$0xff] %v813_v37   ;;  %v825_v40 = vld [vmem:[%s17479_s25 + $0x7f0] sm:$0xff]  }
  0x66   : > { %818 = vst [vmem:[%s17484_s26 + $0x530] sm:$0xff] %v817_v38   ;;  %822 = vst [vmem:[%s17484_s26 + $0x538] sm:$0xff] %v821_v39   ;;  %v829_v41 = vld [vmem:[%s17479_s25 + $0x7f8] sm:$0xff]   ;;  %v833_v42 = vld [vmem:[%s17479_s25 + $0x800] sm:$0xff]  }
  0x67   : > { %826 = vst [vmem:[%s17484_s26 + $0x540] sm:$0xff] %v825_v40   ;;  %830 = vst [vmem:[%s17484_s26 + $0x548] sm:$0xff] %v829_v41   ;;  %v837_v43 = vld [vmem:[%s17479_s25 + $0x808] sm:$0xff]   ;;  %v841_v44 = vld [vmem:[%s17479_s25 + $0xac0] sm:$0xff]  }
  0x68   : > { %834 = vst [vmem:[%s17484_s26 + $0x550] sm:$0xff] %v833_v42   ;;  %v845_v45 = vld [vmem:[%s17479_s25 + $0xac8] sm:$0xff]   ;;  %838 = vst [vmem:[%s17484_s26 + $0x558] sm:$0xff] %v837_v43   ;;  %v849_v46 = vld [vmem:[%s17479_s25 + $0xad0] sm:$0xff]  }
  0x69   : > { %842 = vst [vmem:[%s17484_s26 + $0x560] sm:$0xff] %v841_v44   ;;  %846 = vst [vmem:[%s17484_s26 + $0x568] sm:$0xff] %v845_v45   ;;  %v853_v47 = vld [vmem:[%s17479_s25 + $0xad8] sm:$0xff]   ;;  %v857_v48 = vld [vmem:[%s17479_s25 + $0xae0] sm:$0xff]  }
  0x6a   : > { %850 = vst [vmem:[%s17484_s26 + $0x570] sm:$0xff] %v849_v46   ;;  %854 = vst [vmem:[%s17484_s26 + $0x578] sm:$0xff] %v853_v47   ;;  %v861_v49 = vld [vmem:[%s17479_s25 + $0xae8] sm:$0xff]   ;;  %v865_v50 = vld [vmem:[%s17479_s25 + $0xaf0] sm:$0xff]  }
  0x6b   : > { %858 = vst [vmem:[%s17484_s26 + $0x580] sm:$0xff] %v857_v48   ;;  %v869_v51 = vld [vmem:[%s17479_s25 + $0xaf8] sm:$0xff]   ;;  %862 = vst [vmem:[%s17484_s26 + $0x588] sm:$0xff] %v861_v49   ;;  %v873_v52 = vld [vmem:[%s17479_s25 + $0xb00] sm:$0xff]  }
  0x6c   : > { %866 = vst [vmem:[%s17484_s26 + $0x590] sm:$0xff] %v865_v50   ;;  %870 = vst [vmem:[%s17484_s26 + $0x598] sm:$0xff] %v869_v51   ;;  %v877_v53 = vld [vmem:[%s17479_s25 + $0xb08] sm:$0xff]   ;;  %v881_v54 = vld [vmem:[%s17479_s25 + $0xb10] sm:$0xff]  }
  0x6d   : > { %874 = vst [vmem:[%s17484_s26 + $0x5a0] sm:$0xff] %v873_v52   ;;  %878 = vst [vmem:[%s17484_s26 + $0x5a8] sm:$0xff] %v877_v53   ;;  %v885_v55 = vld [vmem:[%s17479_s25 + $0xb18] sm:$0xff]   ;;  %v889_v56 = vld [vmem:[%s17479_s25 + $0xb20] sm:$0xff]  }
  0x6e   : > { %882 = vst [vmem:[%s17484_s26 + $0x5b0] sm:$0xff] %v881_v54   ;;  %v893_v57 = vld [vmem:[%s17479_s25 + $0xb28] sm:$0xff]   ;;  %886 = vst [vmem:[%s17484_s26 + $0x5b8] sm:$0xff] %v885_v55   ;;  %v897_v58 = vld [vmem:[%s17479_s25 + $0xb30] sm:$0xff]  }
  0x6f   : > { %890 = vst [vmem:[%s17484_s26 + $0x5c0] sm:$0xff] %v889_v56   ;;  %894 = vst [vmem:[%s17484_s26 + $0x5c8] sm:$0xff] %v893_v57   ;;  %v901_v59 = vld [vmem:[%s17479_s25 + $0xb38] sm:$0xff]   ;;  %v905_v60 = vld [vmem:[%s17479_s25 + $0xb40] sm:$0xff]  }
  0x70   : > { %898 = vst [vmem:[%s17484_s26 + $0x5d0] sm:$0xff] %v897_v58   ;;  %902 = vst [vmem:[%s17484_s26 + $0x5d8] sm:$0xff] %v901_v59   ;;  %v909_v61 = vld [vmem:[%s17479_s25 + $0xb48] sm:$0xff]   ;;  %v913_v62 = vld [vmem:[%s17479_s25 + $0xb50] sm:$0xff]  }
  0x71   : > { %906 = vst [vmem:[%s17484_s26 + $0x5e0] sm:$0xff] %v905_v60   ;;  %v917_v63 = vld [vmem:[%s17479_s25 + $0xb58] sm:$0xff]   ;;  %910 = vst [vmem:[%s17484_s26 + $0x5e8] sm:$0xff] %v909_v61   ;;  %v921_v0 = vld [vmem:[%s17479_s25 + $0xb60] sm:$0xff]  }
  0x72   : > { %914 = vst [vmem:[%s17484_s26 + $0x5f0] sm:$0xff] %v913_v62   ;;  %918 = vst [vmem:[%s17484_s26 + $0x5f8] sm:$0xff] %v917_v63   ;;  %v925_v1 = vld [vmem:[%s17479_s25 + $0xb68] sm:$0xff]   ;;  %v929_v2 = vld [vmem:[%s17479_s25 + $0xb70] sm:$0xff]  }
  0x73   : > { %922 = vst [vmem:[%s17484_s26 + $0x600] sm:$0xff] %v921_v0   ;;  %926 = vst [vmem:[%s17484_s26 + $0x608] sm:$0xff] %v925_v1   ;;  %v933_v3 = vld [vmem:[%s17479_s25 + $0xb78] sm:$0xff]   ;;  %v937_v4 = vld [vmem:[%s17479_s25 + $0xb80] sm:$0xff]  }
  0x74   : > { %930 = vst [vmem:[%s17484_s26 + $0x610] sm:$0xff] %v929_v2   ;;  %v941_v5 = vld [vmem:[%s17479_s25 + $0xb88] sm:$0xff]   ;;  %934 = vst [vmem:[%s17484_s26 + $0x618] sm:$0xff] %v933_v3   ;;  %v945_v6 = vld [vmem:[%s17479_s25 + $0xb90] sm:$0xff]  }
  0x75   : > { %938 = vst [vmem:[%s17484_s26 + $0x620] sm:$0xff] %v937_v4   ;;  %942 = vst [vmem:[%s17484_s26 + $0x628] sm:$0xff] %v941_v5   ;;  %v949_v7 = vld [vmem:[%s17479_s25 + $0xb98] sm:$0xff]   ;;  %v953_v8 = vld [vmem:[%s17479_s25 + $0xba0] sm:$0xff]  }
  0x76   : > { %946 = vst [vmem:[%s17484_s26 + $0x630] sm:$0xff] %v945_v6   ;;  %950 = vst [vmem:[%s17484_s26 + $0x638] sm:$0xff] %v949_v7   ;;  %v957_v9 = vld [vmem:[%s17479_s25 + $0xba8] sm:$0xff]   ;;  %v961_v10 = vld [vmem:[%s17479_s25 + $0xbb0] sm:$0xff]  }
  0x77   : > { %954 = vst [vmem:[%s17484_s26 + $0x640] sm:$0xff] %v953_v8   ;;  %v965_v11 = vld [vmem:[%s17479_s25 + $0xbb8] sm:$0xff]   ;;  %958 = vst [vmem:[%s17484_s26 + $0x648] sm:$0xff] %v957_v9   ;;  %v969_v12 = vld [vmem:[%s17479_s25 + $0xbc0] sm:$0xff]  }
  0x78   : > { %962 = vst [vmem:[%s17484_s26 + $0x650] sm:$0xff] %v961_v10   ;;  %966 = vst [vmem:[%s17484_s26 + $0x658] sm:$0xff] %v965_v11   ;;  %v973_v13 = vld [vmem:[%s17479_s25 + $0xbc8] sm:$0xff]   ;;  %v977_v14 = vld [vmem:[%s17479_s25 + $0xbd0] sm:$0xff]  }
  0x79   : > { %970 = vst [vmem:[%s17484_s26 + $0x660] sm:$0xff] %v969_v12   ;;  %974 = vst [vmem:[%s17484_s26 + $0x668] sm:$0xff] %v973_v13   ;;  %v981_v15 = vld [vmem:[%s17479_s25 + $0xbd8] sm:$0xff]   ;;  %v985_v16 = vld [vmem:[%s17479_s25 + $0xbe0] sm:$0xff]  }
  0x7a   : > { %978 = vst [vmem:[%s17484_s26 + $0x670] sm:$0xff] %v977_v14   ;;  %v989_v17 = vld [vmem:[%s17479_s25 + $0xbe8] sm:$0xff]   ;;  %982 = vst [vmem:[%s17484_s26 + $0x678] sm:$0xff] %v981_v15   ;;  %v993_v18 = vld [vmem:[%s17479_s25 + $0xbf0] sm:$0xff]  }
  0x7b   : > { %986 = vst [vmem:[%s17484_s26 + $0x680] sm:$0xff] %v985_v16   ;;  %990 = vst [vmem:[%s17484_s26 + $0x688] sm:$0xff] %v989_v17   ;;  %v997_v19 = vld [vmem:[%s17479_s25 + $0xbf8] sm:$0xff]   ;;  %v1001_v20 = vld [vmem:[%s17479_s25 + $0xc00] sm:$0xff]  }
  0x7c   : > { %994 = vst [vmem:[%s17484_s26 + $0x690] sm:$0xff] %v993_v18   ;;  %998 = vst [vmem:[%s17484_s26 + $0x698] sm:$0xff] %v997_v19   ;;  %v1005_v21 = vld [vmem:[%s17479_s25 + $0xc08] sm:$0xff]   ;;  %v1009_v22 = vld [vmem:[%s17479_s25 + $0xc10] sm:$0xff]  }
  0x7d   : > { %1002 = vst [vmem:[%s17484_s26 + $0x6a0] sm:$0xff] %v1001_v20   ;;  %v1013_v23 = vld [vmem:[%s17479_s25 + $0xc18] sm:$0xff]   ;;  %1006 = vst [vmem:[%s17484_s26 + $0x6a8] sm:$0xff] %v1005_v21   ;;  %v1017_v24 = vld [vmem:[%s17479_s25 + $0xc20] sm:$0xff]  }
  0x7e   : > { %1010 = vst [vmem:[%s17484_s26 + $0x6b0] sm:$0xff] %v1009_v22   ;;  %1014 = vst [vmem:[%s17484_s26 + $0x6b8] sm:$0xff] %v1013_v23   ;;  %v1021_v25 = vld [vmem:[%s17479_s25 + $0xc28] sm:$0xff]   ;;  %v1025_v26 = vld [vmem:[%s17479_s25 + $0xc30] sm:$0xff]  }
  0x7f   : > { %1018 = vst [vmem:[%s17484_s26 + $0x6c0] sm:$0xff] %v1017_v24   ;;  %1022 = vst [vmem:[%s17484_s26 + $0x6c8] sm:$0xff] %v1021_v25   ;;  %v1029_v27 = vld [vmem:[%s17479_s25 + $0xc38] sm:$0xff]   ;;  %v1033_v28 = vld [vmem:[%s17479_s25 + $0xc40] sm:$0xff]  }
  0x80   : > { %1026 = vst [vmem:[%s17484_s26 + $0x6d0] sm:$0xff] %v1025_v26   ;;  %v1037_v29 = vld [vmem:[%s17479_s25 + $0xc48] sm:$0xff]   ;;  %1030 = vst [vmem:[%s17484_s26 + $0x6d8] sm:$0xff] %v1029_v27   ;;  %v1041_v30 = vld [vmem:[%s17479_s25 + $0xc50] sm:$0xff]  }
  0x81   : > { %1034 = vst [vmem:[%s17484_s26 + $0x6e0] sm:$0xff] %v1033_v28   ;;  %1038 = vst [vmem:[%s17484_s26 + $0x6e8] sm:$0xff] %v1037_v29   ;;  %v1045_v31 = vld [vmem:[%s17479_s25 + $0xc58] sm:$0xff]   ;;  %v1049_v32 = vld [vmem:[%s17479_s25 + $0xc60] sm:$0xff]  }
  0x82   : > { %1042 = vst [vmem:[%s17484_s26 + $0x6f0] sm:$0xff] %v1041_v30   ;;  %1046 = vst [vmem:[%s17484_s26 + $0x6f8] sm:$0xff] %v1045_v31   ;;  %v1053_v33 = vld [vmem:[%s17479_s25 + $0xc68] sm:$0xff]   ;;  %v1057_v34 = vld [vmem:[%s17479_s25 + $0xc70] sm:$0xff]  }
  0x83   : > { %1050 = vst [vmem:[%s17484_s26 + $0x700] sm:$0xff] %v1049_v32   ;;  %v1061_v35 = vld [vmem:[%s17479_s25 + $0xc78] sm:$0xff]   ;;  %1054 = vst [vmem:[%s17484_s26 + $0x708] sm:$0xff] %v1053_v33   ;;  %v1065_v36 = vld [vmem:[%s17479_s25 + $0xc80] sm:$0xff]  }
  0x84   : > { %1058 = vst [vmem:[%s17484_s26 + $0x710] sm:$0xff] %v1057_v34   ;;  %1062 = vst [vmem:[%s17484_s26 + $0x718] sm:$0xff] %v1061_v35   ;;  %v1069_v37 = vld [vmem:[%s17479_s25 + $0xc88] sm:$0xff]   ;;  %v1073_v38 = vld [vmem:[%s17479_s25 + $0xc90] sm:$0xff]  }
  0x85   : > { %1066 = vst [vmem:[%s17484_s26 + $0x720] sm:$0xff] %v1065_v36   ;;  %1070 = vst [vmem:[%s17484_s26 + $0x728] sm:$0xff] %v1069_v37   ;;  %v1077_v39 = vld [vmem:[%s17479_s25 + $0xc98] sm:$0xff]   ;;  %v1081_v40 = vld [vmem:[%s17479_s25 + $0xca0] sm:$0xff]  }
  0x86   : > { %1074 = vst [vmem:[%s17484_s26 + $0x730] sm:$0xff] %v1073_v38   ;;  %v1085_v41 = vld [vmem:[%s17479_s25 + $0xca8] sm:$0xff]   ;;  %1078 = vst [vmem:[%s17484_s26 + $0x738] sm:$0xff] %v1077_v39   ;;  %v1089_v42 = vld [vmem:[%s17479_s25 + $0xcb0] sm:$0xff]  }
  0x87   : > { %1082 = vst [vmem:[%s17484_s26 + $0x740] sm:$0xff] %v1081_v40   ;;  %1086 = vst [vmem:[%s17484_s26 + $0x748] sm:$0xff] %v1085_v41   ;;  %v1093_v43 = vld [vmem:[%s17479_s25 + $0xcb8] sm:$0xff]   ;;  %v1097_v44 = vld [vmem:[%s17479_s25 + $0xcc0] sm:$0xff]  }
  0x88   : > { %1090 = vst [vmem:[%s17484_s26 + $0x750] sm:$0xff] %v1089_v42   ;;  %1094 = vst [vmem:[%s17484_s26 + $0x758] sm:$0xff] %v1093_v43   ;;  %v1101_v45 = vld [vmem:[%s17479_s25 + $0xcc8] sm:$0xff]   ;;  %v1105_v46 = vld [vmem:[%s17479_s25 + $0xcd0] sm:$0xff]  }
  0x89   : > { %1098 = vst [vmem:[%s17484_s26 + $0x760] sm:$0xff] %v1097_v44   ;;  %v1109_v47 = vld [vmem:[%s17479_s25 + $0xcd8] sm:$0xff]   ;;  %1102 = vst [vmem:[%s17484_s26 + $0x768] sm:$0xff] %v1101_v45   ;;  %v1113_v48 = vld [vmem:[%s17479_s25 + $0xce0] sm:$0xff]  }
  0x8a   : > { %1106 = vst [vmem:[%s17484_s26 + $0x770] sm:$0xff] %v1105_v46   ;;  %1110 = vst [vmem:[%s17484_s26 + $0x778] sm:$0xff] %v1109_v47   ;;  %v1117_v49 = vld [vmem:[%s17479_s25 + $0xce8] sm:$0xff]   ;;  %v1121_v50 = vld [vmem:[%s17479_s25 + $0xcf0] sm:$0xff]  }
  0x8b   : > { %1114 = vst [vmem:[%s17484_s26 + $0x780] sm:$0xff] %v1113_v48   ;;  %1118 = vst [vmem:[%s17484_s26 + $0x788] sm:$0xff] %v1117_v49   ;;  %v1125_v51 = vld [vmem:[%s17479_s25 + $0xcf8] sm:$0xff]   ;;  %v1129_v52 = vld [vmem:[%s17479_s25 + $0xd00] sm:$0xff]  }
  0x8c   : > { %1122 = vst [vmem:[%s17484_s26 + $0x790] sm:$0xff] %v1121_v50   ;;  %v1133_v53 = vld [vmem:[%s17479_s25 + $0xd08] sm:$0xff]   ;;  %1126 = vst [vmem:[%s17484_s26 + $0x798] sm:$0xff] %v1125_v51   ;;  %v1137_v54 = vld [vmem:[%s17479_s25 + $0xd10] sm:$0xff]  }
  0x8d   : > { %1130 = vst [vmem:[%s17484_s26 + $0x7a0] sm:$0xff] %v1129_v52   ;;  %1134 = vst [vmem:[%s17484_s26 + $0x7a8] sm:$0xff] %v1133_v53   ;;  %v1141_v55 = vld [vmem:[%s17479_s25 + $0xd18] sm:$0xff]   ;;  %v1145_v56 = vld [vmem:[%s17479_s25 + $0xd20] sm:$0xff]  }
  0x8e   : > { %1138 = vst [vmem:[%s17484_s26 + $0x7b0] sm:$0xff] %v1137_v54   ;;  %1142 = vst [vmem:[%s17484_s26 + $0x7b8] sm:$0xff] %v1141_v55   ;;  %v1149_v57 = vld [vmem:[%s17479_s25 + $0xd28] sm:$0xff]   ;;  %v1153_v58 = vld [vmem:[%s17479_s25 + $0xd30] sm:$0xff]  }
  0x8f   : > { %1146 = vst [vmem:[%s17484_s26 + $0x7c0] sm:$0xff] %v1145_v56   ;;  %v1157_v59 = vld [vmem:[%s17479_s25 + $0xd38] sm:$0xff]   ;;  %1150 = vst [vmem:[%s17484_s26 + $0x7c8] sm:$0xff] %v1149_v57   ;;  %v1161_v60 = vld [vmem:[%s17479_s25 + $0xd40] sm:$0xff]  }
  0x90   : > { %1154 = vst [vmem:[%s17484_s26 + $0x7d0] sm:$0xff] %v1153_v58   ;;  %1158 = vst [vmem:[%s17484_s26 + $0x7d8] sm:$0xff] %v1157_v59   ;;  %v1165_v61 = vld [vmem:[%s17479_s25 + $0xd48] sm:$0xff]   ;;  %v1169_v62 = vld [vmem:[%s17479_s25 + $0xd50] sm:$0xff]  }
  0x91   : > { %1162 = vst [vmem:[%s17484_s26 + $0x7e0] sm:$0xff] %v1161_v60   ;;  %1166 = vst [vmem:[%s17484_s26 + $0x7e8] sm:$0xff] %v1165_v61   ;;  %v1173_v63 = vld [vmem:[%s17479_s25 + $0xd58] sm:$0xff]   ;;  %v1177_v0 = vld [vmem:[%s17479_s25 + $0xd60] sm:$0xff]  }
  0x92   : > { %1170 = vst [vmem:[%s17484_s26 + $0x7f0] sm:$0xff] %v1169_v62   ;;  %v1181_v1 = vld [vmem:[%s17479_s25 + $0xd68] sm:$0xff]   ;;  %1174 = vst [vmem:[%s17484_s26 + $0x7f8] sm:$0xff] %v1173_v63   ;;  %v1185_v2 = vld [vmem:[%s17479_s25 + $0x1020] sm:$0xff]  }
  0x93   : > { %1178 = vst [vmem:[%s17484_s26 + $0x800] sm:$0xff] %v1177_v0   ;;  %1182 = vst [vmem:[%s17484_s26 + $0x808] sm:$0xff] %v1181_v1   ;;  %v1189_v3 = vld [vmem:[%s17479_s25 + $0x1028] sm:$0xff]   ;;  %v1193_v4 = vld [vmem:[%s17479_s25 + $0x1030] sm:$0xff]  }
  0x94   : > { %1186 = vst [vmem:[%s17484_s26 + $0x810] sm:$0xff] %v1185_v2   ;;  %1190 = vst [vmem:[%s17484_s26 + $0x818] sm:$0xff] %v1189_v3   ;;  %v1197_v5 = vld [vmem:[%s17479_s25 + $0x1038] sm:$0xff]   ;;  %v1201_v6 = vld [vmem:[%s17479_s25 + $0x1040] sm:$0xff]  }
  0x95   : > { %1194 = vst [vmem:[%s17484_s26 + $0x820] sm:$0xff] %v1193_v4   ;;  %v1205_v7 = vld [vmem:[%s17479_s25 + $0x1048] sm:$0xff]   ;;  %1198 = vst [vmem:[%s17484_s26 + $0x828] sm:$0xff] %v1197_v5   ;;  %v1209_v8 = vld [vmem:[%s17479_s25 + $0x1050] sm:$0xff]  }
  0x96   : > { %1202 = vst [vmem:[%s17484_s26 + $0x830] sm:$0xff] %v1201_v6   ;;  %1206 = vst [vmem:[%s17484_s26 + $0x838] sm:$0xff] %v1205_v7   ;;  %v1213_v9 = vld [vmem:[%s17479_s25 + $0x1058] sm:$0xff]   ;;  %v1217_v10 = vld [vmem:[%s17479_s25 + $0x1060] sm:$0xff]  }
  0x97   : > { %1210 = vst [vmem:[%s17484_s26 + $0x840] sm:$0xff] %v1209_v8   ;;  %1214 = vst [vmem:[%s17484_s26 + $0x848] sm:$0xff] %v1213_v9   ;;  %v1221_v11 = vld [vmem:[%s17479_s25 + $0x1068] sm:$0xff]   ;;  %v1225_v12 = vld [vmem:[%s17479_s25 + $0x1070] sm:$0xff]  }
  0x98   : > { %1218 = vst [vmem:[%s17484_s26 + $0x850] sm:$0xff] %v1217_v10   ;;  %v1229_v13 = vld [vmem:[%s17479_s25 + $0x1078] sm:$0xff]   ;;  %1222 = vst [vmem:[%s17484_s26 + $0x858] sm:$0xff] %v1221_v11   ;;  %v1233_v14 = vld [vmem:[%s17479_s25 + $0x1080] sm:$0xff]  }
  0x99   : > { %1226 = vst [vmem:[%s17484_s26 + $0x860] sm:$0xff] %v1225_v12   ;;  %1230 = vst [vmem:[%s17484_s26 + $0x868] sm:$0xff] %v1229_v13   ;;  %v1237_v15 = vld [vmem:[%s17479_s25 + $0x1088] sm:$0xff]   ;;  %v1241_v16 = vld [vmem:[%s17479_s25 + $0x1090] sm:$0xff]  }
  0x9a   : > { %1234 = vst [vmem:[%s17484_s26 + $0x870] sm:$0xff] %v1233_v14   ;;  %1238 = vst [vmem:[%s17484_s26 + $0x878] sm:$0xff] %v1237_v15   ;;  %v1245_v17 = vld [vmem:[%s17479_s25 + $0x1098] sm:$0xff]   ;;  %v1249_v18 = vld [vmem:[%s17479_s25 + $0x10a0] sm:$0xff]  }
  0x9b   : > { %1242 = vst [vmem:[%s17484_s26 + $0x880] sm:$0xff] %v1241_v16   ;;  %v1253_v19 = vld [vmem:[%s17479_s25 + $0x10a8] sm:$0xff]   ;;  %1246 = vst [vmem:[%s17484_s26 + $0x888] sm:$0xff] %v1245_v17   ;;  %v1257_v20 = vld [vmem:[%s17479_s25 + $0x10b0] sm:$0xff]  }
  0x9c   : > { %1250 = vst [vmem:[%s17484_s26 + $0x890] sm:$0xff] %v1249_v18   ;;  %1254 = vst [vmem:[%s17484_s26 + $0x898] sm:$0xff] %v1253_v19   ;;  %v1261_v21 = vld [vmem:[%s17479_s25 + $0x10b8] sm:$0xff]   ;;  %v1265_v22 = vld [vmem:[%s17479_s25 + $0x10c0] sm:$0xff]  }
  0x9d   : > { %1258 = vst [vmem:[%s17484_s26 + $0x8a0] sm:$0xff] %v1257_v20   ;;  %1262 = vst [vmem:[%s17484_s26 + $0x8a8] sm:$0xff] %v1261_v21   ;;  %v1269_v23 = vld [vmem:[%s17479_s25 + $0x10c8] sm:$0xff]   ;;  %v1273_v24 = vld [vmem:[%s17479_s25 + $0x10d0] sm:$0xff]  }
  0x9e   : > { %1266 = vst [vmem:[%s17484_s26 + $0x8b0] sm:$0xff] %v1265_v22   ;;  %v1277_v25 = vld [vmem:[%s17479_s25 + $0x10d8] sm:$0xff]   ;;  %1270 = vst [vmem:[%s17484_s26 + $0x8b8] sm:$0xff] %v1269_v23   ;;  %v1281_v26 = vld [vmem:[%s17479_s25 + $0x10e0] sm:$0xff]  }
  0x9f   : > { %1274 = vst [vmem:[%s17484_s26 + $0x8c0] sm:$0xff] %v1273_v24   ;;  %1278 = vst [vmem:[%s17484_s26 + $0x8c8] sm:$0xff] %v1277_v25   ;;  %v1285_v27 = vld [vmem:[%s17479_s25 + $0x10e8] sm:$0xff]   ;;  %v1289_v28 = vld [vmem:[%s17479_s25 + $0x10f0] sm:$0xff]  }
  0xa0   : > { %1282 = vst [vmem:[%s17484_s26 + $0x8d0] sm:$0xff] %v1281_v26   ;;  %1286 = vst [vmem:[%s17484_s26 + $0x8d8] sm:$0xff] %v1285_v27   ;;  %v1293_v29 = vld [vmem:[%s17479_s25 + $0x10f8] sm:$0xff]   ;;  %v1297_v30 = vld [vmem:[%s17479_s25 + $0x1100] sm:$0xff]  }
  0xa1   : > { %1290 = vst [vmem:[%s17484_s26 + $0x8e0] sm:$0xff] %v1289_v28   ;;  %v1301_v31 = vld [vmem:[%s17479_s25 + $0x1108] sm:$0xff]   ;;  %1294 = vst [vmem:[%s17484_s26 + $0x8e8] sm:$0xff] %v1293_v29   ;;  %v1305_v32 = vld [vmem:[%s17479_s25 + $0x1110] sm:$0xff]  }
  0xa2   : > { %1298 = vst [vmem:[%s17484_s26 + $0x8f0] sm:$0xff] %v1297_v30   ;;  %1302 = vst [vmem:[%s17484_s26 + $0x8f8] sm:$0xff] %v1301_v31   ;;  %v1309_v33 = vld [vmem:[%s17479_s25 + $0x1118] sm:$0xff]   ;;  %v1313_v34 = vld [vmem:[%s17479_s25 + $0x1120] sm:$0xff]  }
  0xa3   : > { %1306 = vst [vmem:[%s17484_s26 + $0x900] sm:$0xff] %v1305_v32   ;;  %1310 = vst [vmem:[%s17484_s26 + $0x908] sm:$0xff] %v1309_v33   ;;  %v1317_v35 = vld [vmem:[%s17479_s25 + $0x1128] sm:$0xff]   ;;  %v1321_v36 = vld [vmem:[%s17479_s25 + $0x1130] sm:$0xff]  }
  0xa4   : > { %1314 = vst [vmem:[%s17484_s26 + $0x910] sm:$0xff] %v1313_v34   ;;  %v1325_v37 = vld [vmem:[%s17479_s25 + $0x1138] sm:$0xff]   ;;  %1318 = vst [vmem:[%s17484_s26 + $0x918] sm:$0xff] %v1317_v35   ;;  %v1329_v38 = vld [vmem:[%s17479_s25 + $0x1140] sm:$0xff]  }
  0xa5   : > { %1322 = vst [vmem:[%s17484_s26 + $0x920] sm:$0xff] %v1321_v36   ;;  %1326 = vst [vmem:[%s17484_s26 + $0x928] sm:$0xff] %v1325_v37   ;;  %v1333_v39 = vld [vmem:[%s17479_s25 + $0x1148] sm:$0xff]   ;;  %v1337_v40 = vld [vmem:[%s17479_s25 + $0x1150] sm:$0xff]  }
  0xa6   : > { %1330 = vst [vmem:[%s17484_s26 + $0x930] sm:$0xff] %v1329_v38   ;;  %1334 = vst [vmem:[%s17484_s26 + $0x938] sm:$0xff] %v1333_v39   ;;  %v1341_v41 = vld [vmem:[%s17479_s25 + $0x1158] sm:$0xff]   ;;  %v1345_v42 = vld [vmem:[%s17479_s25 + $0x1160] sm:$0xff]  }
  0xa7   : > { %1338 = vst [vmem:[%s17484_s26 + $0x940] sm:$0xff] %v1337_v40   ;;  %v1349_v43 = vld [vmem:[%s17479_s25 + $0x1168] sm:$0xff]   ;;  %1342 = vst [vmem:[%s17484_s26 + $0x948] sm:$0xff] %v1341_v41   ;;  %v1353_v44 = vld [vmem:[%s17479_s25 + $0x1170] sm:$0xff]  }
  0xa8   : > { %1346 = vst [vmem:[%s17484_s26 + $0x950] sm:$0xff] %v1345_v42   ;;  %1350 = vst [vmem:[%s17484_s26 + $0x958] sm:$0xff] %v1349_v43   ;;  %v1357_v45 = vld [vmem:[%s17479_s25 + $0x1178] sm:$0xff]   ;;  %v1361_v46 = vld [vmem:[%s17479_s25 + $0x1180] sm:$0xff]  }
  0xa9   : > { %1354 = vst [vmem:[%s17484_s26 + $0x960] sm:$0xff] %v1353_v44   ;;  %1358 = vst [vmem:[%s17484_s26 + $0x968] sm:$0xff] %v1357_v45   ;;  %v1365_v47 = vld [vmem:[%s17479_s25 + $0x1188] sm:$0xff]   ;;  %v1369_v48 = vld [vmem:[%s17479_s25 + $0x1190] sm:$0xff]  }
  0xaa   : > { %1362 = vst [vmem:[%s17484_s26 + $0x970] sm:$0xff] %v1361_v46   ;;  %v1373_v49 = vld [vmem:[%s17479_s25 + $0x1198] sm:$0xff]   ;;  %1366 = vst [vmem:[%s17484_s26 + $0x978] sm:$0xff] %v1365_v47   ;;  %v1377_v50 = vld [vmem:[%s17479_s25 + $0x11a0] sm:$0xff]  }
  0xab   : > { %1370 = vst [vmem:[%s17484_s26 + $0x980] sm:$0xff] %v1369_v48   ;;  %1374 = vst [vmem:[%s17484_s26 + $0x988] sm:$0xff] %v1373_v49   ;;  %v1381_v51 = vld [vmem:[%s17479_s25 + $0x11a8] sm:$0xff]   ;;  %v1385_v52 = vld [vmem:[%s17479_s25 + $0x11b0] sm:$0xff]  }
  0xac   : > { %1378 = vst [vmem:[%s17484_s26 + $0x990] sm:$0xff] %v1377_v50   ;;  %1382 = vst [vmem:[%s17484_s26 + $0x998] sm:$0xff] %v1381_v51   ;;  %v1389_v53 = vld [vmem:[%s17479_s25 + $0x11b8] sm:$0xff]   ;;  %v1393_v54 = vld [vmem:[%s17479_s25 + $0x11c0] sm:$0xff]  }
  0xad   : > { %1386 = vst [vmem:[%s17484_s26 + $0x9a0] sm:$0xff] %v1385_v52   ;;  %v1397_v55 = vld [vmem:[%s17479_s25 + $0x11c8] sm:$0xff]   ;;  %1390 = vst [vmem:[%s17484_s26 + $0x9a8] sm:$0xff] %v1389_v53   ;;  %v1401_v56 = vld [vmem:[%s17479_s25 + $0x11d0] sm:$0xff]  }
  0xae   : > { %1394 = vst [vmem:[%s17484_s26 + $0x9b0] sm:$0xff] %v1393_v54   ;;  %1398 = vst [vmem:[%s17484_s26 + $0x9b8] sm:$0xff] %v1397_v55   ;;  %v1405_v57 = vld [vmem:[%s17479_s25 + $0x11d8] sm:$0xff]   ;;  %v1409_v58 = vld [vmem:[%s17479_s25 + $0x11e0] sm:$0xff]  }
  0xaf   : > { %1402 = vst [vmem:[%s17484_s26 + $0x9c0] sm:$0xff] %v1401_v56   ;;  %1406 = vst [vmem:[%s17484_s26 + $0x9c8] sm:$0xff] %v1405_v57   ;;  %v1413_v59 = vld [vmem:[%s17479_s25 + $0x11e8] sm:$0xff]   ;;  %v1417_v60 = vld [vmem:[%s17479_s25 + $0x11f0] sm:$0xff]  }
  0xb0   : > { %1410 = vst [vmem:[%s17484_s26 + $0x9d0] sm:$0xff] %v1409_v58   ;;  %v1421_v61 = vld [vmem:[%s17479_s25 + $0x11f8] sm:$0xff]   ;;  %1414 = vst [vmem:[%s17484_s26 + $0x9d8] sm:$0xff] %v1413_v59   ;;  %v1425_v62 = vld [vmem:[%s17479_s25 + $0x1200] sm:$0xff]  }
  0xb1   : > { %1418 = vst [vmem:[%s17484_s26 + $0x9e0] sm:$0xff] %v1417_v60   ;;  %1422 = vst [vmem:[%s17484_s26 + $0x9e8] sm:$0xff] %v1421_v61   ;;  %v1429_v63 = vld [vmem:[%s17479_s25 + $0x1208] sm:$0xff]   ;;  %v1433_v0 = vld [vmem:[%s17479_s25 + $0x1210] sm:$0xff]  }
  0xb2   : > { %1426 = vst [vmem:[%s17484_s26 + $0x9f0] sm:$0xff] %v1425_v62   ;;  %1430 = vst [vmem:[%s17484_s26 + $0x9f8] sm:$0xff] %v1429_v63   ;;  %v1437_v1 = vld [vmem:[%s17479_s25 + $0x1218] sm:$0xff]   ;;  %v1441_v2 = vld [vmem:[%s17479_s25 + $0x1220] sm:$0xff]  }
  0xb3   : > { %1434 = vst [vmem:[%s17484_s26 + $0xa00] sm:$0xff] %v1433_v0   ;;  %v1445_v3 = vld [vmem:[%s17479_s25 + $0x1228] sm:$0xff]   ;;  %1438 = vst [vmem:[%s17484_s26 + $0xa08] sm:$0xff] %v1437_v1   ;;  %v1449_v4 = vld [vmem:[%s17479_s25 + $0x1230] sm:$0xff]  }
  0xb4   : > { %1442 = vst [vmem:[%s17484_s26 + $0xa10] sm:$0xff] %v1441_v2   ;;  %1446 = vst [vmem:[%s17484_s26 + $0xa18] sm:$0xff] %v1445_v3   ;;  %v1453_v5 = vld [vmem:[%s17479_s25 + $0x1238] sm:$0xff]   ;;  %v1457_v6 = vld [vmem:[%s17479_s25 + $0x1240] sm:$0xff]  }
  0xb5   : > { %1450 = vst [vmem:[%s17484_s26 + $0xa20] sm:$0xff] %v1449_v4   ;;  %1454 = vst [vmem:[%s17484_s26 + $0xa28] sm:$0xff] %v1453_v5   ;;  %v1461_v7 = vld [vmem:[%s17479_s25 + $0x1248] sm:$0xff]   ;;  %v1465_v8 = vld [vmem:[%s17479_s25 + $0x1250] sm:$0xff]  }
  0xb6   : > { %1458 = vst [vmem:[%s17484_s26 + $0xa30] sm:$0xff] %v1457_v6   ;;  %v1469_v9 = vld [vmem:[%s17479_s25 + $0x1258] sm:$0xff]   ;;  %1462 = vst [vmem:[%s17484_s26 + $0xa38] sm:$0xff] %v1461_v7   ;;  %v1473_v10 = vld [vmem:[%s17479_s25 + $0x1260] sm:$0xff]  }
  0xb7   : > { %1466 = vst [vmem:[%s17484_s26 + $0xa40] sm:$0xff] %v1465_v8   ;;  %1470 = vst [vmem:[%s17484_s26 + $0xa48] sm:$0xff] %v1469_v9   ;;  %v1477_v11 = vld [vmem:[%s17479_s25 + $0x1268] sm:$0xff]   ;;  %v1481_v12 = vld [vmem:[%s17479_s25 + $0x1270] sm:$0xff]  }
  0xb8   : > { %1474 = vst [vmem:[%s17484_s26 + $0xa50] sm:$0xff] %v1473_v10   ;;  %1478 = vst [vmem:[%s17484_s26 + $0xa58] sm:$0xff] %v1477_v11   ;;  %v1485_v13 = vld [vmem:[%s17479_s25 + $0x1278] sm:$0xff]   ;;  %v1489_v14 = vld [vmem:[%s17479_s25 + $0x1280] sm:$0xff]  }
  0xb9   : > { %1482 = vst [vmem:[%s17484_s26 + $0xa60] sm:$0xff] %v1481_v12   ;;  %v1493_v15 = vld [vmem:[%s17479_s25 + $0x1288] sm:$0xff]   ;;  %1486 = vst [vmem:[%s17484_s26 + $0xa68] sm:$0xff] %v1485_v13   ;;  %v1497_v16 = vld [vmem:[%s17479_s25 + $0x1290] sm:$0xff]  }
  0xba   : > { %1490 = vst [vmem:[%s17484_s26 + $0xa70] sm:$0xff] %v1489_v14   ;;  %1494 = vst [vmem:[%s17484_s26 + $0xa78] sm:$0xff] %v1493_v15   ;;  %v1501_v17 = vld [vmem:[%s17479_s25 + $0x1298] sm:$0xff]   ;;  %v1505_v18 = vld [vmem:[%s17479_s25 + $0x12a0] sm:$0xff]  }
  0xbb   : > { %1498 = vst [vmem:[%s17484_s26 + $0xa80] sm:$0xff] %v1497_v16   ;;  %1502 = vst [vmem:[%s17484_s26 + $0xa88] sm:$0xff] %v1501_v17   ;;  %v1509_v19 = vld [vmem:[%s17479_s25 + $0x12a8] sm:$0xff]   ;;  %v1513_v20 = vld [vmem:[%s17479_s25 + $0x12b0] sm:$0xff]  }
  0xbc   : > { %1506 = vst [vmem:[%s17484_s26 + $0xa90] sm:$0xff] %v1505_v18   ;;  %v1517_v21 = vld [vmem:[%s17479_s25 + $0x12b8] sm:$0xff]   ;;  %1510 = vst [vmem:[%s17484_s26 + $0xa98] sm:$0xff] %v1509_v19   ;;  %v1521_v22 = vld [vmem:[%s17479_s25 + $0x12c0] sm:$0xff]  }
  0xbd   : > { %1514 = vst [vmem:[%s17484_s26 + $0xaa0] sm:$0xff] %v1513_v20   ;;  %1518 = vst [vmem:[%s17484_s26 + $0xaa8] sm:$0xff] %v1517_v21   ;;  %v1525_v23 = vld [vmem:[%s17479_s25 + $0x12c8] sm:$0xff]  }
  0xbe   : > { %1522 = vst [vmem:[%s17484_s26 + $0xab0] sm:$0xff] %v1521_v22   ;;  %1526 = vst [vmem:[%s17484_s26 + $0xab8] sm:$0xff] %v1525_v23  }
  0xbf PF: > { %p13898_p5 = scmp.ge.s32.totalorder %s17422_s14, 1  ;;  %p5708_p6 = scmp.lt.s32.totalorder %s17422_s14, 3 }
  0xc1   : > { %p5709_p7 = pnand %p13898_p5, %p5708_p6 }
  0xc3   : > { %5712 = sbr.rel (%p5709_p7) target bundleno = 1118 (0x45e), region = 80 }
  0xca   : > { %v17052_v24 = vld [vmem:[%s20710_s1] sm:$0xff]   ;;  %vm6622_vm0 = vcmask 1043456   ;;  %v17053_v25 = vld [vmem:[%s20710_s1 + $0x8] sm:$0x1f]   ;;  %vm6623_vm1 = vcmask 1044480   ;;  %s5715_s4 = sand.u32 1, %s17414_s12  }
  0xcb   : > { %16321 = vmatprep.subr.bf16.mxu0 %v17052_v24  ;;  %16497 = vmatprep.subr.bf16.mxu1 %v17052_v24  ;;  %v17424_v26 = vmov 65535   ;;  %s17026_s5 = smul.u32 2752, %s5715_s4  ;;  %vm6363_vm2 = vcmask 203776  }
  0xcc   : > { %16322 = vmatpush3.bf16.msra.mxu0 %v17052_v24  ;;  %16498 = vmatpush3.bf16.msra.mxu1 %v17052_v24  ;;  %v6624_v27 = vsel %vm6622_vm0, 4294967295, %v17424_v26  ;;  %s5739_s7 = smul.u32 172, %s13893_s15 }
  0xcd   : > { %v6625_v28 = vsel %vm6623_vm1, %v6624_v27, 0  ;;  %s18180_s6 = scalar_lea.vmem [#allocation2], %s17026_s5 }
  0xce   : > { %v6627_v29 = vand.u32 %v17053_v25, %v6625_v28  ;;  %v17054_v30 = vld [vmem:[%s18180_s6] sm:$0xff]   ;;  %v17055_v31 = vld [vmem:[%s18180_s6 + $0x2b0] sm:$0xff]   ;;  %v17056_v32 = vld [vmem:[%s18180_s6 + $0x8] sm:$0xff]   ;;  %p5740_p8 = scmp.lt.s32.totalorder %s5739_s7, 343 }
  0xcf   : > { %16325 = vmatprep.mubr.msk.bf16.mxu0 %vm6363_vm2, %v17054_v30  ;;  %16501 = vmatprep.mubr.msk.bf16.mxu1 %vm6363_vm2, %v17055_v31  ;;  %v17057_v33 = vld [vmem:[%s18180_s6 + $0x2b8] sm:$0xff]   ;;  %v17058_v34 = vld [vmem:[%s18180_s6 + $0x10] sm:$0xff]   ;;  %v17059_v35 = vld [vmem:[%s18180_s6 + $0x2c0] sm:$0xff]  }
  0xd0   : > { %16323 = vmatprep.subr.bf16.mxu0 %v6627_v29  ;;  %16499 = vmatprep.subr.bf16.mxu1 %v6627_v29  ;;  %v17060_v36 = vld [vmem:[%s18180_s6 + $0x18] sm:$0xff]   ;;  %v17061_v37 = vld [vmem:[%s18180_s6 + $0x2c8] sm:$0xff]   ;;  %v17062_v38 = vld [vmem:[%s18180_s6 + $0x20] sm:$0xff]   ;;  %s21786_s7 = smov (!%p5740_p8, %s5739_s7), 343 }
  0xd1   : > { %16324 = vmatpush3.bf16.msra.mxu0 %v6627_v29  ;;  %16500 = vmatpush3.bf16.msra.mxu1 %v6627_v29  ;;  %v17063_v39 = vld [vmem:[%s18180_s6 + $0x2d0] sm:$0xff]   ;;  %v17064_v40 = vld [vmem:[%s18180_s6 + $0x28] sm:$0xff]   ;;  %v17065_v41 = vld [vmem:[%s18180_s6 + $0x2d8] sm:$0xff]   ;;  %s13899_s10 = sshll.u32 %s21786_s7, 2 }
  0xd2   : > { %16673 = vmatprep.subr.bf16.mxu0 %v17052_v24  ;;  %16849 = vmatprep.subr.bf16.mxu1 %v17052_v24  ;;  %v17066_v42 = vld [vmem:[%s18180_s6 + $0x30] sm:$0xff]   ;;  %v17067_v43 = vld [vmem:[%s18180_s6 + $0x2e0] sm:$0xff]   ;;  %v17068_v44 = vld [vmem:[%s18180_s6 + $0x38] sm:$0xff]   ;;  %s19818_s14 = scalar_lea.vmem %s20712_s3, %s13899_s10 }
  0xd3   : > { %v17069_v45 = vld [vmem:[%s18180_s6 + $0x2e8] sm:$0xff]   ;;  %v17070_v46 = vld [vmem:[%s18180_s6 + $0x40] sm:$0xff]   ;;  %v17071_v47 = vld [vmem:[%s18180_s6 + $0x2f0] sm:$0xff]  }
  0xd4   : > { %16326 = vmatmul.mubr.msk.bf16.vlgmr.msra.gmra.mrb[0].mxu0 %vm6363_vm2, %v17056_v32  ;;  %16502 = vmatmul.mubr.msk.bf16.vlgmr.msra.gmra.mrb[0].mxu1 %vm6363_vm2, %v17057_v33  ;;  %v17072_v48 = vld [vmem:[%s18180_s6 + $0x48] sm:$0xff]   ;;  %v17073_v49 = vld [vmem:[%s18180_s6 + $0x2f8] sm:$0xff]   ;;  %v17074_v50 = vld [vmem:[%s18180_s6 + $0x50] sm:$0xff]  }
  0xd5   : > { %16674 = vmatpush3.bf16.msra.mxu0 %v17052_v24  ;;  %16850 = vmatpush3.bf16.msra.mxu1 %v17052_v24  ;;  %v17075_v51 = vld [vmem:[%s18180_s6 + $0x300] sm:$0xff]   ;;  %v17076_v52 = vld [vmem:[%s18180_s6 + $0x58] sm:$0xff]   ;;  %v17077_v53 = vld [vmem:[%s18180_s6 + $0x308] sm:$0xff]  }
  0xd6   : > { %16329 = vmatprep.mubr.msk.bf16.mxu0 %vm6363_vm2, %v17058_v34  ;;  %16505 = vmatprep.mubr.msk.bf16.mxu1 %vm6363_vm2, %v17059_v35  ;;  %v17078_v54 = vld [vmem:[%s18180_s6 + $0x60] sm:$0xff]   ;;  %v17079_v55 = vld [vmem:[%s18180_s6 + $0x310] sm:$0xff]   ;;  %v17080_v56 = vld [vmem:[%s18180_s6 + $0x68] sm:$0xff]  }
  0xd7   : > { %16675 = vmatprep.subr.bf16.mxu0 %v6627_v29  ;;  %16851 = vmatprep.subr.bf16.mxu1 %v6627_v29  ;;  %v17081_v57 = vld [vmem:[%s18180_s6 + $0x318] sm:$0xff]   ;;  %v17082_v58 = vld [vmem:[%s18180_s6 + $0x70] sm:$0xff]   ;;  %v17083_v59 = vld [vmem:[%s18180_s6 + $0x320] sm:$0xff]  }
  0xd8   : > { %v17084_v60 = vld [vmem:[%s18180_s6 + $0x78] sm:$0xff]   ;;  %v17085_v61 = vld [vmem:[%s18180_s6 + $0x328] sm:$0xff]   ;;  %v17086_v62 = vld [vmem:[%s18180_s6 + $0x80] sm:$0xff]  }
  0xd9   : > { %16676 = vmatpush3.bf16.msra.mxu0 %v6627_v29  ;;  %16852 = vmatpush3.bf16.msra.mxu1 %v6627_v29  ;;  %v17087_v63 = vld [vmem:[%s18180_s6 + $0x330] sm:$0xff]   ;;  %v17088_v0 = vld [vmem:[%s18180_s6 + $0x88] sm:$0xff]   ;;  %v17089_v1 = vld [vmem:[%s18180_s6 + $0x338] sm:$0xff]  }
  0xda   : > { %v17090_v2 = vld [vmem:[%s18180_s6 + $0x90] sm:$0xff]   ;;  %v17091_v3 = vld [vmem:[%s18180_s6 + $0x340] sm:$0xff]   ;;  %v17092_v4 = vld [vmem:[%s18180_s6 + $0x98] sm:$0xff]  }
  0xdb   : > { %v17093_v5 = vld [vmem:[%s18180_s6 + $0x348] sm:$0xff]   ;;  %v17094_v6 = vld [vmem:[%s18180_s6 + $0xa0] sm:$0xff]   ;;  %v17095_v7 = vld [vmem:[%s18180_s6 + $0x350] sm:$0xff]  }
  0xdc   : > { %16330 = vmatmul.mubr.msk.bf16.gmra.mrb[4].mxu0 %vm6363_vm2, %v17060_v36  ;;  %16506 = vmatmul.mubr.msk.bf16.gmra.mrb[4].mxu1 %vm6363_vm2, %v17061_v37  ;;  %v17096_v8 = vld [vmem:[%s18180_s6 + $0xa8] sm:$0xff]   ;;  %v17097_v9 = vld [vmem:[%s18180_s6 + $0x358] sm:$0xff]   ;;  %v17098_v10 = vld [vmem:[%s18180_s6 + $0xb0] sm:$0xff]  }
  0xdd   : > { %16333 = vmatprep.mubr.msk.bf16.mxu0 %vm6363_vm2, %v17062_v38  ;;  %16509 = vmatprep.mubr.msk.bf16.mxu1 %vm6363_vm2, %v17063_v39  ;;  %v17099_v11 = vld [vmem:[%s18180_s6 + $0x360] sm:$0xff]   ;;  %v17100_v12 = vld [vmem:[%s18180_s6 + $0xb8] sm:$0xff]   ;;  %v17101_v13 = vld [vmem:[%s18180_s6 + $0x368] sm:$0xff]  }
  0xde   : > { %v17102_v14 = vld [vmem:[%s18180_s6 + $0xc0] sm:$0xff]   ;;  %v17103_v15 = vld [vmem:[%s18180_s6 + $0x370] sm:$0xff]   ;;  %v17104_v16 = vld [vmem:[%s18180_s6 + $0xc8] sm:$0xff]  }
  0xdf   : > { %v17105_v17 = vld [vmem:[%s18180_s6 + $0x378] sm:$0xff]   ;;  %v17106_v18 = vld [vmem:[%s18180_s6 + $0xd0] sm:$0xff]   ;;  %v17107_v19 = vld [vmem:[%s18180_s6 + $0x380] sm:$0xff]  }
  0xe0   : > { %v17108_v20 = vld [vmem:[%s18180_s6 + $0xd8] sm:$0xff]   ;;  %v17109_v21 = vld [vmem:[%s18180_s6 + $0x388] sm:$0xff]   ;;  %v17110_v22 = vld [vmem:[%s18180_s6 + $0xe0] sm:$0xff]  }
  0xe1   : > { %v17111_v23 = vld [vmem:[%s18180_s6 + $0x390] sm:$0xff]   ;;  %v17112_v24 = vld [vmem:[%s18180_s6 + $0xe8] sm:$0xff]   ;;  %v17113_v25 = vld [vmem:[%s18180_s6 + $0x398] sm:$0xff]  }
  0xe2   : > { %v17114_v26 = vld [vmem:[%s18180_s6 + $0xf0] sm:$0xff]   ;;  %v17115_v27 = vld [vmem:[%s18180_s6 + $0x3a0] sm:$0xff]   ;;  %v17116_v28 = vld [vmem:[%s18180_s6 + $0xf8] sm:$0xff]  }
  0xe3   : > { %v17117_v29 = vld [vmem:[%s18180_s6 + $0x3a8] sm:$0xff]   ;;  %v17118_v30 = vld [vmem:[%s18180_s6 + $0x100] sm:$0xff]   ;;  %v17119_v31 = vld [vmem:[%s18180_s6 + $0x3b0] sm:$0xff]  }
  0xe4   : > { %16334 = vmatmul.mubr.msk.bf16.gmra.mrb[8].mxu0 %vm6363_vm2, %v17064_v40  ;;  %16510 = vmatmul.mubr.msk.bf16.gmra.mrb[8].mxu1 %vm6363_vm2, %v17065_v41  ;;  %v17120_v32 = vld [vmem:[%s18180_s6 + $0x108] sm:$0xff]   ;;  %v17121_v33 = vld [vmem:[%s18180_s6 + $0x3b8] sm:$0xff]   ;;  %v17122_v34 = vld [vmem:[%s18180_s6 + $0x110] sm:$0xff]  }
  0xe5   : > { %16337 = vmatprep.mubr.msk.bf16.mxu0 %vm6363_vm2, %v17066_v42  ;;  %16513 = vmatprep.mubr.msk.bf16.mxu1 %vm6363_vm2, %v17067_v43  ;;  %v17123_v35 = vld [vmem:[%s18180_s6 + $0x3c0] sm:$0xff]   ;;  %v17124_v36 = vld [vmem:[%s18180_s6 + $0x118] sm:$0xff]   ;;  %v17125_v37 = vld [vmem:[%s18180_s6 + $0x3c8] sm:$0xff]  }
  0xe6   : > { %v17126_v38 = vld [vmem:[%s18180_s6 + $0x120] sm:$0xff]   ;;  %v17127_v39 = vld [vmem:[%s18180_s6 + $0x3d0] sm:$0xff]   ;;  %v17128_v40 = vld [vmem:[%s18180_s6 + $0x128] sm:$0xff]  }
  0xe7   : > { %v17129_v41 = vld [vmem:[%s18180_s6 + $0x3d8] sm:$0xff]   ;;  %v17130_v42 = vld [vmem:[%s18180_s6 + $0x130] sm:$0xff]   ;;  %v17131_v43 = vld [vmem:[%s18180_s6 + $0x3e0] sm:$0xff]  }
  0xec   : > { %16338 = vmatmul.mubr.msk.bf16.gmra.mrb[12].mxu0 %vm6363_vm2, %v17068_v44  ;;  %16514 = vmatmul.mubr.msk.bf16.gmra.mrb[12].mxu1 %vm6363_vm2, %v17069_v45  ;;  %v17132_v44 = vld [vmem:[%s18180_s6 + $0x138] sm:$0xff]   ;;  %v17133_v45 = vld [vmem:[%s18180_s6 + $0x3e8] sm:$0xff]  }
  0xed   : > { %16341 = vmatprep.mubr.msk.bf16.mxu0 %vm6363_vm2, %v17070_v46  ;;  %16517 = vmatprep.mubr.msk.bf16.mxu1 %vm6363_vm2, %v17071_v47  ;;  %v17134_v46 = vld [vmem:[%s18180_s6 + $0x140] sm:$0xff]   ;;  %v17135_v47 = vld [vmem:[%s18180_s6 + $0x3f0] sm:$0xff]  }
  0xf4   : > { %16342 = vmatmul.mubr.msk.bf16.gmra.mrb[16].mxu0 %vm6363_vm2, %v17072_v48  ;;  %16518 = vmatmul.mubr.msk.bf16.gmra.mrb[16].mxu1 %vm6363_vm2, %v17073_v49  ;;  %v17136_v48 = vld [vmem:[%s18180_s6 + $0x148] sm:$0xff]   ;;  %v17137_v49 = vld [vmem:[%s18180_s6 + $0x3f8] sm:$0xff]  }
  0xf5   : > { %16345 = vmatprep.mubr.msk.bf16.mxu0 %vm6363_vm2, %v17074_v50  ;;  %16521 = vmatprep.mubr.msk.bf16.mxu1 %vm6363_vm2, %v17075_v51  ;;  %v17138_v50 = vld [vmem:[%s18180_s6 + $0x150] sm:$0xff]   ;;  %v17139_v51 = vld [vmem:[%s18180_s6 + $0x400] sm:$0xff]  }
  0xfc   : > { %16346 = vmatmul.mubr.msk.bf16.gmra.mrb[20].mxu0 %vm6363_vm2, %v17076_v52  ;;  %16522 = vmatmul.mubr.msk.bf16.gmra.mrb[20].mxu1 %vm6363_vm2, %v17077_v53  ;;  %v17140_v52 = vld [vmem:[%s18180_s6 + $0x158] sm:$0xff]   ;;  %v17141_v53 = vld [vmem:[%s18180_s6 + $0x408] sm:$0xff]  }
  0xfd   : > { %16349 = vmatprep.mubr.msk.bf16.mxu0 %vm6363_vm2, %v17078_v54  ;;  %16525 = vmatprep.mubr.msk.bf16.mxu1 %vm6363_vm2, %v17079_v55  ;;  %v17142_v54 = vld [vmem:[%s18180_s6 + $0x160] sm:$0xff]   ;;  %v17143_v55 = vld [vmem:[%s18180_s6 + $0x410] sm:$0xff]  }
 0x104   : > { %16350 = vmatmul.mubr.msk.bf16.gmra.mrb[24].mxu0 %vm6363_vm2, %v17080_v56  ;;  %16526 = vmatmul.mubr.msk.bf16.gmra.mrb[24].mxu1 %vm6363_vm2, %v17081_v57  ;;  %v17144_v56 = vld [vmem:[%s18180_s6 + $0x168] sm:$0xff]   ;;  %v17145_v57 = vld [vmem:[%s18180_s6 + $0x418] sm:$0xff]  }
 0x105   : > { %16353 = vmatprep.mubr.msk.bf16.mxu0 %vm6363_vm2, %v17082_v58  ;;  %16529 = vmatprep.mubr.msk.bf16.mxu1 %vm6363_vm2, %v17083_v59  ;;  %v17146_v58 = vld [vmem:[%s18180_s6 + $0x170] sm:$0xff]   ;;  %v17147_v59 = vld [vmem:[%s18180_s6 + $0x420] sm:$0xff]  }
 0x10c   : > { %16354 = vmatmul.mubr.msk.bf16.gmra.mrb[28].mxu0 %vm6363_vm2, %v17084_v60  ;;  %16530 = vmatmul.mubr.msk.bf16.gmra.mrb[28].mxu1 %vm6363_vm2, %v17085_v61  ;;  %v17148_v60 = vld [vmem:[%s18180_s6 + $0x178] sm:$0xff]   ;;  %v17149_v61 = vld [vmem:[%s18180_s6 + $0x428] sm:$0xff]  }
 0x10d   : > { %16357 = vmatprep.mubr.msk.bf16.mxu0 %vm6363_vm2, %v17086_v62  ;;  %16533 = vmatprep.mubr.msk.bf16.mxu1 %vm6363_vm2, %v17087_v63  ;;  %v17150_v62 = vld [vmem:[%s18180_s6 + $0x180] sm:$0xff]   ;;  %v17151_v63 = vld [vmem:[%s18180_s6 + $0x430] sm:$0xff]  }
 0x114   : > { %16358 = vmatmul.mubr.msk.bf16.gmra.mrb[32].mxu0 %vm6363_vm2, %v17088_v0  ;;  %16534 = vmatmul.mubr.msk.bf16.gmra.mrb[32].mxu1 %vm6363_vm2, %v17089_v1  ;;  %v17152_v0 = vld [vmem:[%s18180_s6 + $0x188] sm:$0xff]   ;;  %v17153_v1 = vld [vmem:[%s18180_s6 + $0x438] sm:$0xff]  }
 0x115   : > { %16361 = vmatprep.mubr.msk.bf16.mxu0 %vm6363_vm2, %v17090_v2  ;;  %16537 = vmatprep.mubr.msk.bf16.mxu1 %vm6363_vm2, %v17091_v3  ;;  %v17154_v2 = vld [vmem:[%s18180_s6 + $0x190] sm:$0xff]   ;;  %v17155_v3 = vld [vmem:[%s18180_s6 + $0x440] sm:$0xff]  }
 0x11c   : > { %16362 = vmatmul.mubr.msk.bf16.gmra.mrb[36].mxu0 %vm6363_vm2, %v17092_v4  ;;  %16538 = vmatmul.mubr.msk.bf16.gmra.mrb[36].mxu1 %vm6363_vm2, %v17093_v5  ;;  %v17156_v4 = vld [vmem:[%s18180_s6 + $0x198] sm:$0xff]   ;;  %v17157_v5 = vld [vmem:[%s18180_s6 + $0x448] sm:$0xff]  }
 0x11d   : > { %16365 = vmatprep.mubr.msk.bf16.mxu0 %vm6363_vm2, %v17094_v6  ;;  %16541 = vmatprep.mubr.msk.bf16.mxu1 %vm6363_vm2, %v17095_v7  ;;  %v17158_v6 = vld [vmem:[%s18180_s6 + $0x1a0] sm:$0xff]   ;;  %v17159_v7 = vld [vmem:[%s18180_s6 + $0x450] sm:$0xff]  }
 0x124   : > { %16366 = vmatmul.mubr.msk.bf16.gmra.mrb[40].mxu0 %vm6363_vm2, %v17096_v8  ;;  %16542 = vmatmul.mubr.msk.bf16.gmra.mrb[40].mxu1 %vm6363_vm2, %v17097_v9  ;;  %v17160_v8 = vld [vmem:[%s18180_s6 + $0x1a8] sm:$0xff]   ;;  %v17161_v9 = vld [vmem:[%s18180_s6 + $0x458] sm:$0xff]  }
 0x125   : > { %16369 = vmatprep.mubr.msk.bf16.mxu0 %vm6363_vm2, %v17098_v10  ;;  %16545 = vmatprep.mubr.msk.bf16.mxu1 %vm6363_vm2, %v17099_v11  ;;  %v17162_v10 = vld [vmem:[%s18180_s6 + $0x1b0] sm:$0xff]   ;;  %v17163_v11 = vld [vmem:[%s18180_s6 + $0x460] sm:$0xff]  }
 0x12c   : > { %16370 = vmatmul.mubr.msk.bf16.gmra.mrb[44].mxu0 %vm6363_vm2, %v17100_v12  ;;  %16546 = vmatmul.mubr.msk.bf16.gmra.mrb[44].mxu1 %vm6363_vm2, %v17101_v13  ;;  %v17164_v12 = vld [vmem:[%s18180_s6 + $0x1b8] sm:$0xff]   ;;  %v17165_v13 = vld [vmem:[%s18180_s6 + $0x468] sm:$0xff]  }
 0x12d   : > { %16373 = vmatprep.mubr.msk.bf16.mxu0 %vm6363_vm2, %v17102_v14  ;;  %16549 = vmatprep.mubr.msk.bf16.mxu1 %vm6363_vm2, %v17103_v15 }
 0x134   : > { %16374 = vmatmul.mubr.msk.bf16.gmra.mrb[48].mxu0 %vm6363_vm2, %v17104_v16  ;;  %16550 = vmatmul.mubr.msk.bf16.gmra.mrb[48].mxu1 %vm6363_vm2, %v17105_v17 }
 0x135   : > { %16377 = vmatprep.mubr.msk.bf16.mxu0 %vm6363_vm2, %v17106_v18  ;;  %16553 = vmatprep.mubr.msk.bf16.mxu1 %vm6363_vm2, %v17107_v19  ;;  %v17193_v18 = vld [vmem:[%s18180_s6 + $0x4d8] sm:$0xff]  }
 0x13c   : > { %16378 = vmatmul.mubr.msk.bf16.gmra.mrb[52].mxu0 %vm6363_vm2, %v17108_v20  ;;  %16554 = vmatmul.mubr.msk.bf16.gmra.mrb[52].mxu1 %vm6363_vm2, %v17109_v21  ;;  %v17166_v21 = vld [vmem:[%s18180_s6 + $0x1c0] sm:$0xff]  }
 0x13d   : > { %16381 = vmatprep.mubr.msk.bf16.mxu0 %vm6363_vm2, %v17110_v22  ;;  %16557 = vmatprep.mubr.msk.bf16.mxu1 %vm6363_vm2, %v17111_v23  ;;  %v17167_v22 = vld [vmem:[%s18180_s6 + $0x470] sm:$0xff]  }
 0x144   : > { %16382 = vmatmul.mubr.msk.bf16.gmra.mrb[56].mxu0 %vm6363_vm2, %v17112_v24  ;;  %16558 = vmatmul.mubr.msk.bf16.gmra.mrb[56].mxu1 %vm6363_vm2, %v17113_v25 }
 0x145   : > { %16385 = vmatprep.mubr.msk.bf16.mxu0 %vm6363_vm2, %v17114_v26  ;;  %16561 = vmatprep.mubr.msk.bf16.mxu1 %vm6363_vm2, %v17115_v27 }
 0x14c   : > { %16386 = vmatmul.mubr.msk.bf16.gmra.mrb[60].mxu0 %vm6363_vm2, %v17116_v28  ;;  %16562 = vmatmul.mubr.msk.bf16.gmra.mrb[60].mxu1 %vm6363_vm2, %v17117_v29  ;;  %v17168_v28 = vld [vmem:[%s18180_s6 + $0x1c8] sm:$0xff]   ;;  %v17169_v29 = vld [vmem:[%s18180_s6 + $0x478] sm:$0xff]  }
 0x14d   : > { %16389 = vmatprep.mubr.msk.bf16.mxu0 %vm6363_vm2, %v17118_v30  ;;  %16565 = vmatprep.mubr.msk.bf16.mxu1 %vm6363_vm2, %v17119_v31 }
 0x154   : > { %16390 = vmatmul.mubr.msk.bf16.gmra.mrb[64].mxu0 %vm6363_vm2, %v17120_v32  ;;  %16566 = vmatmul.mubr.msk.bf16.gmra.mrb[64].mxu1 %vm6363_vm2, %v17121_v33 }
 0x155   : > { %16393 = vmatprep.mubr.msk.bf16.mxu0 %vm6363_vm2, %v17122_v34  ;;  %16569 = vmatprep.mubr.msk.bf16.mxu1 %vm6363_vm2, %v17123_v35  ;;  %v17192_v34 = vld [vmem:[%s18180_s6 + $0x228] sm:$0xff]  }
 0x15c   : > { %16394 = vmatmul.mubr.msk.bf16.gmra.mrb[68].mxu0 %vm6363_vm2, %v17124_v36  ;;  %16570 = vmatmul.mubr.msk.bf16.gmra.mrb[68].mxu1 %vm6363_vm2, %v17125_v37  ;;  %v17170_v37 = vld [vmem:[%s18180_s6 + $0x1d0] sm:$0xff]  }
 0x15d   : > { %16397 = vmatprep.mubr.msk.bf16.mxu0 %vm6363_vm2, %v17126_v38  ;;  %16573 = vmatprep.mubr.msk.bf16.mxu1 %vm6363_vm2, %v17127_v39  ;;  %v17171_v38 = vld [vmem:[%s18180_s6 + $0x480] sm:$0xff]  }
 0x164   : > { %16398 = vmatmul.mubr.msk.bf16.gmra.mrb[72].mxu0 %vm6363_vm2, %v17128_v40  ;;  %16574 = vmatmul.mubr.msk.bf16.gmra.mrb[72].mxu1 %vm6363_vm2, %v17129_v41 }
 0x165   : > { %16401 = vmatprep.mubr.msk.bf16.mxu0 %vm6363_vm2, %v17130_v42  ;;  %16577 = vmatprep.mubr.msk.bf16.mxu1 %vm6363_vm2, %v17131_v43 }
 0x16c   : > { %16402 = vmatmul.mubr.msk.bf16.gmra.mrb[76].mxu0 %vm6363_vm2, %v17132_v44  ;;  %16578 = vmatmul.mubr.msk.bf16.gmra.mrb[76].mxu1 %vm6363_vm2, %v17133_v45  ;;  %v17172_v44 = vld [vmem:[%s18180_s6 + $0x1d8] sm:$0xff]   ;;  %v17173_v45 = vld [vmem:[%s18180_s6 + $0x488] sm:$0xff]  }
 0x16d   : > { %16405 = vmatprep.mubr.msk.bf16.mxu0 %vm6363_vm2, %v17134_v46  ;;  %16581 = vmatprep.mubr.msk.bf16.mxu1 %vm6363_vm2, %v17135_v47 }
 0x174   : > { %16406 = vmatmul.mubr.msk.bf16.gmra.mrb[80].mxu0 %vm6363_vm2, %v17136_v48  ;;  %16582 = vmatmul.mubr.msk.bf16.gmra.mrb[80].mxu1 %vm6363_vm2, %v17137_v49 }
 0x175   : > { %16409 = vmatprep.mubr.msk.bf16.mxu0 %vm6363_vm2, %v17138_v50  ;;  %16585 = vmatprep.mubr.msk.bf16.mxu1 %vm6363_vm2, %v17139_v51  ;;  %v17189_v50 = vld [vmem:[%s18180_s6 + $0x4c8] sm:$0xff]  }
 0x17c   : > { %16410 = vmatmul.mubr.msk.bf16.gmra.mrb[84].mxu0 %vm6363_vm2, %v17140_v52  ;;  %16586 = vmatmul.mubr.msk.bf16.gmra.mrb[84].mxu1 %vm6363_vm2, %v17141_v53  ;;  %v17174_v53 = vld [vmem:[%s18180_s6 + $0x1e0] sm:$0xff]  }
 0x17d   : > { %16413 = vmatprep.mubr.msk.bf16.mxu0 %vm6363_vm2, %v17142_v54  ;;  %16589 = vmatprep.mubr.msk.bf16.mxu1 %vm6363_vm2, %v17143_v55  ;;  %v17175_v54 = vld [vmem:[%s18180_s6 + $0x490] sm:$0xff]  }
 0x184   : > { %16414 = vmatmul.mubr.msk.bf16.gmra.mrb[88].mxu0 %vm6363_vm2, %v17144_v56  ;;  %16590 = vmatmul.mubr.msk.bf16.gmra.mrb[88].mxu1 %vm6363_vm2, %v17145_v57 }
 0x185   : > { %16417 = vmatprep.mubr.msk.bf16.mxu0 %vm6363_vm2, %v17146_v58  ;;  %16593 = vmatprep.mubr.msk.bf16.mxu1 %vm6363_vm2, %v17147_v59 }
 0x18c   : > { %16418 = vmatmul.mubr.msk.bf16.gmra.mrb[92].mxu0 %vm6363_vm2, %v17148_v60  ;;  %16594 = vmatmul.mubr.msk.bf16.gmra.mrb[92].mxu1 %vm6363_vm2, %v17149_v61  ;;  %v17176_v60 = vld [vmem:[%s18180_s6 + $0x1e8] sm:$0xff]   ;;  %v17177_v61 = vld [vmem:[%s18180_s6 + $0x498] sm:$0xff]  }
 0x18d   : > { %16421 = vmatprep.mubr.msk.bf16.mxu0 %vm6363_vm2, %v17150_v62  ;;  %16597 = vmatprep.mubr.msk.bf16.mxu1 %vm6363_vm2, %v17151_v63 }
 0x194   : > { %16422 = vmatmul.mubr.msk.bf16.gmra.mrb[96].mxu0 %vm6363_vm2, %v17152_v0  ;;  %16598 = vmatmul.mubr.msk.bf16.gmra.mrb[96].mxu1 %vm6363_vm2, %v17153_v1 }
 0x195   : > { %16425 = vmatprep.mubr.msk.bf16.mxu0 %vm6363_vm2, %v17154_v2  ;;  %16601 = vmatprep.mubr.msk.bf16.mxu1 %vm6363_vm2, %v17155_v3  ;;  %v17188_v2 = vld [vmem:[%s18180_s6 + $0x218] sm:$0xff]  }
 0x19c   : > { %16426 = vmatmul.mubr.msk.bf16.gmra.mrb[100].mxu0 %vm6363_vm2, %v17156_v4  ;;  %16602 = vmatmul.mubr.msk.bf16.gmra.mrb[100].mxu1 %vm6363_vm2, %v17157_v5  ;;  %v17178_v5 = vld [vmem:[%s18180_s6 + $0x1f0] sm:$0xff]  }
 0x19d   : > { %16429 = vmatprep.mubr.msk.bf16.mxu0 %vm6363_vm2, %v17158_v6  ;;  %16605 = vmatprep.mubr.msk.bf16.mxu1 %vm6363_vm2, %v17159_v7  ;;  %v17179_v6 = vld [vmem:[%s18180_s6 + $0x4a0] sm:$0xff]  }
 0x1a4   : > { %16430 = vmatmul.mubr.msk.bf16.gmra.mrb[104].mxu0 %vm6363_vm2, %v17160_v8  ;;  %16606 = vmatmul.mubr.msk.bf16.gmra.mrb[104].mxu1 %vm6363_vm2, %v17161_v9 }
 0x1a5   : > { %16433 = vmatprep.mubr.msk.bf16.mxu0 %vm6363_vm2, %v17162_v10  ;;  %16609 = vmatprep.mubr.msk.bf16.mxu1 %vm6363_vm2, %v17163_v11 }
 0x1a7   : > { %v18404_v14 = vpop.f32.mrb[0].mxu0  ;;  %v18406_v15 = vpop.f32.mrb[0].mxu1 }
 0x1a8   : > { %v18408_v16 = vpop.f32.mrb[1].mxu0  ;;  %v18410_v17 = vpop.f32.mrb[1].mxu1 }
 0x1a9   : > { %v18414_v19 = vpop.f32.mrb[2].mxu0  ;;  %v18416_v20 = vpop.f32.mrb[2].mxu1 }
 0x1aa   : > { %v18422_v24 = vpop.f32.mrb[3].mxu0  ;;  %v18424_v25 = vpop.f32.mrb[3].mxu1 }
 0x1ac   : > { %16434 = vmatmul.mubr.msk.bf16.gmra.mrb[108].mxu0 %vm6363_vm2, %v17164_v12  ;;  %16610 = vmatmul.mubr.msk.bf16.gmra.mrb[108].mxu1 %vm6363_vm2, %v17165_v13  ;;  %v17180_v12 = vld [vmem:[%s18180_s6 + $0x1f8] sm:$0xff]   ;;  %v17181_v13 = vld [vmem:[%s18180_s6 + $0x4a8] sm:$0xff]  }
 0x1ad   : > { %16437 = vmatprep.mubr.msk.bf16.mxu0 %vm6363_vm2, %v17166_v21  ;;  %16613 = vmatprep.mubr.msk.bf16.mxu1 %vm6363_vm2, %v17167_v22 }
 0x1af   : > { %v18436_v30 = vpop.f32.mrb[4].mxu0  ;;  %v18438_v31 = vpop.f32.mrb[4].mxu1 }
 0x1b0   : > { %v18440_v32 = vpop.f32.mrb[5].mxu0  ;;  %v18442_v33 = vpop.f32.mrb[5].mxu1 }
 0x1b1   : > { %v18446_v35 = vpop.f32.mrb[6].mxu0  ;;  %v18448_v36 = vpop.f32.mrb[6].mxu1 }
 0x1b2   : > { %v18454_v40 = vpop.f32.mrb[7].mxu0  ;;  %v18456_v41 = vpop.f32.mrb[7].mxu1 }
 0x1b4   : > { %16438 = vmatmul.mubr.msk.bf16.gmra.mrb[112].mxu0 %vm6363_vm2, %v17168_v28  ;;  %16614 = vmatmul.mubr.msk.bf16.gmra.mrb[112].mxu1 %vm6363_vm2, %v17169_v29 }
 0x1b5   : > { %16441 = vmatprep.mubr.msk.bf16.mxu0 %vm6363_vm2, %v17170_v37  ;;  %16617 = vmatprep.mubr.msk.bf16.mxu1 %vm6363_vm2, %v17171_v38  ;;  %v17185_v37 = vld [vmem:[%s18180_s6 + $0x4b8] sm:$0xff]  }
 0x1b7   : > { %v18468_v46 = vpop.f32.mrb[8].mxu0  ;;  %v18470_v47 = vpop.f32.mrb[8].mxu1 }
 0x1b8   : > { %v18472_v48 = vpop.f32.mrb[9].mxu0  ;;  %v18474_v49 = vpop.f32.mrb[9].mxu1 }
 0x1b9   : > { %v18478_v51 = vpop.f32.mrb[10].mxu0  ;;  %v18480_v52 = vpop.f32.mrb[10].mxu1 }
 0x1ba   : > { %v18486_v56 = vpop.f32.mrb[11].mxu0  ;;  %v18488_v57 = vpop.f32.mrb[11].mxu1 }
 0x1bc   : > { %16442 = vmatmul.mubr.msk.bf16.gmra.mrb[116].mxu0 %vm6363_vm2, %v17172_v44  ;;  %16618 = vmatmul.mubr.msk.bf16.gmra.mrb[116].mxu1 %vm6363_vm2, %v17173_v45  ;;  %v17182_v45 = vld [vmem:[%s18180_s6 + $0x200] sm:$0xff]  }
 0x1bd   : > { %16445 = vmatprep.mubr.msk.bf16.mxu0 %vm6363_vm2, %v17174_v53  ;;  %16621 = vmatprep.mubr.msk.bf16.mxu1 %vm6363_vm2, %v17175_v54  ;;  %v17183_v53 = vld [vmem:[%s18180_s6 + $0x4b0] sm:$0xff]   ;;  %v17184_v54 = vld [vmem:[%s18180_s6 + $0x208] sm:$0xff]  }
 0x1bf   : > { %v18500_v62 = vpop.f32.mrb[12].mxu0  ;;  %v18502_v63 = vpop.f32.mrb[12].mxu1 }
 0x1c0   : > { %v18504_v0 = vpop.f32.mrb[13].mxu0  ;;  %v18506_v1 = vpop.f32.mrb[13].mxu1 }
 0x1c1   : > { %v18510_v3 = vpop.f32.mrb[14].mxu0  ;;  %v18512_v4 = vpop.f32.mrb[14].mxu1 }
 0x1c2   : > { %v18518_v8 = vpop.f32.mrb[15].mxu0  ;;  %v18520_v9 = vpop.f32.mrb[15].mxu1 }
 0x1c4   : > { %16446 = vmatmul.mubr.msk.bf16.gmra.mrb[120].mxu0 %vm6363_vm2, %v17176_v60  ;;  %16622 = vmatmul.mubr.msk.bf16.gmra.mrb[120].mxu1 %vm6363_vm2, %v17177_v61 }
 0x1c5   : > { %16449 = vmatprep.mubr.msk.bf16.mxu0 %vm6363_vm2, %v17178_v5  ;;  %16625 = vmatprep.mubr.msk.bf16.mxu1 %vm6363_vm2, %v17179_v6  ;;  %v17187_v6 = vld [vmem:[%s18180_s6 + $0x4c0] sm:$0xff]  }
 0x1c7   : > { %v18532_v21 = vpop.f32.mrb[16].mxu0  ;;  %v18534_v22 = vpop.f32.mrb[16].mxu1 }
 0x1c8   : > { %v18536_v28 = vpop.f32.mrb[17].mxu0  ;;  %v18538_v29 = vpop.f32.mrb[17].mxu1 }
 0x1c9   : > { %v18542_v38 = vpop.f32.mrb[18].mxu0  ;;  %v18544_v44 = vpop.f32.mrb[18].mxu1 }
 0x1ca   : > { %v18550_v60 = vpop.f32.mrb[19].mxu0  ;;  %v18552_v61 = vpop.f32.mrb[19].mxu1 }
 0x1cc   : > { %16450 = vmatmul.mubr.msk.bf16.gmra.mrb[124].mxu0 %vm6363_vm2, %v17180_v12  ;;  %16626 = vmatmul.mubr.msk.bf16.gmra.mrb[124].mxu1 %vm6363_vm2, %v17181_v13  ;;  %v17191_v12 = vld [vmem:[%s18180_s6 + $0x4d0] sm:$0xff]  }
 0x1cd   : > { %16453 = vmatprep.mubr.msk.bf16.mxu0 %vm6363_vm2, %v17182_v45  ;;  %16629 = vmatprep.mubr.msk.bf16.mxu1 %vm6363_vm2, %v17183_v53  ;;  %v17186_v53 = vld [vmem:[%s18180_s6 + $0x210] sm:$0xff]  }
 0x1cf   : > { %v18564_v11 = vpop.f32.mrb[20].mxu0  ;;  %v18566_v10 = vpop.f32.mrb[20].mxu1 }
 0x1d0   : > { %v18568_v7 = vpop.f32.mrb[21].mxu0  ;;  %v18570_v5 = vpop.f32.mrb[21].mxu1 }
 0x1d1   : > { %v18574_v13 = vpop.f32.mrb[22].mxu0  ;;  %v18576_v45 = vpop.f32.mrb[22].mxu1 }
 0x1d2   : > { %21012 = vst [vmem:[#allocation3_spill] sm:$0xff] %v18576_v45  ;;  %v18582_v59 = vpop.f32.mrb[23].mxu0  ;;  %v18584_v58 = vpop.f32.mrb[23].mxu1 }
 0x1d3   : > { %21013 = vst [vmem:[#allocation4_spill] sm:$0xff] %v18582_v59  ;;  %21014 = vst [vmem:[#allocation5_spill] sm:$0xff] %v18584_v58  ;;  %v21314_v59 = vmax.f32 %v18422_v24, %v18424_v25 }
 0x1d4   : > { %16454 = vmatmul.mubr.msk.bf16.gmra.mrb[128].mxu0 %vm6363_vm2, %v17184_v54  ;;  %16630 = vmatmul.mubr.msk.bf16.gmra.mrb[128].mxu1 %vm6363_vm2, %v17185_v37  ;;  %v17195_v54 = vld [vmem:[%s18180_s6 + $0x4e0] sm:$0xff]  }
 0x1d5   : > { %16457 = vmatprep.mubr.msk.bf16.mxu0 %vm6363_vm2, %v17186_v53  ;;  %16633 = vmatprep.mubr.msk.bf16.mxu1 %vm6363_vm2, %v17187_v6  ;;  %v17190_v6 = vld [vmem:[%s18180_s6 + $0x220] sm:$0xff]  }
 0x1d7   : > { %v18596_v43 = vpop.f32.mrb[24].mxu0  ;;  %v18598_v42 = vpop.f32.mrb[24].mxu1 }
 0x1d8   : > { %21015 = vst [vmem:[#allocation6_spill] sm:$0xff] %v18596_v43  ;;  %21016 = vst [vmem:[#allocation7_spill] sm:$0xff] %v18598_v42  ;;  %v18600_v39 = vpop.f32.mrb[25].mxu0  ;;  %v18602_v55 = vpop.f32.mrb[25].mxu1 }
 0x1d9   : > { %21017 = vst [vmem:[#allocation8_spill] sm:$0xff] %v18600_v39  ;;  %21018 = vst [vmem:[#allocation9_spill] sm:$0xff] %v18602_v55  ;;  %v18606_v37 = vpop.f32.mrb[26].mxu0  ;;  %v18608_v53 = vpop.f32.mrb[26].mxu1 }
 0x1da   : > { %21019 = vst [vmem:[#allocation10_spill] sm:$0xff] %v18606_v37  ;;  %21020 = vst [vmem:[#allocation11_spill] sm:$0xff] %v18608_v53  ;;  %v18614_v27 = vpop.f32.mrb[27].mxu0  ;;  %v18616_v26 = vpop.f32.mrb[27].mxu1 }
 0x1db   : > { %21021 = vst [vmem:[#allocation12_spill] sm:$0xff] %v18614_v27  ;;  %21022 = vst [vmem:[#allocation13_spill] sm:$0xff] %v18616_v26  ;;  %v17196_v26 = vld [vmem:[%s18180_s6 + $0x238] sm:$0xff]  }
 0x1dc   : > { %16458 = vmatmul.mubr.msk.bf16.gmra.mrb[132].mxu0 %vm6363_vm2, %v17188_v2  ;;  %16634 = vmatmul.mubr.msk.bf16.gmra.mrb[132].mxu1 %vm6363_vm2, %v17189_v50  ;;  %v17199_v2 = vld [vmem:[%s18180_s6 + $0x4f0] sm:$0xff]  }
 0x1dd   : > { %16461 = vmatprep.mubr.msk.bf16.mxu0 %vm6363_vm2, %v17190_v6  ;;  %16637 = vmatprep.mubr.msk.bf16.mxu1 %vm6363_vm2, %v17191_v12  ;;  %v17194_v12 = vld [vmem:[%s18180_s6 + $0x230] sm:$0xff]  }
 0x1df   : > { %v18628_v55 = vpop.f32.mrb[28].mxu0  ;;  %v18630_v39 = vpop.f32.mrb[28].mxu1 }
 0x1e0   : > { %21023 = vst [vmem:[#allocation14_spill] sm:$0xff] %v18628_v55  ;;  %21024 = vst [vmem:[#allocation15_spill] sm:$0xff] %v18630_v39  ;;  %v18632_v42 = vpop.f32.mrb[29].mxu0  ;;  %v18634_v23 = vpop.f32.mrb[29].mxu1 }
 0x1e1   : > { %21025 = vst [vmem:[#allocation16_spill] sm:$0xff] %v18632_v42  ;;  %21026 = vst [vmem:[#allocation17_spill] sm:$0xff] %v18634_v23  ;;  %v18638_v50 = vpop.f32.mrb[30].mxu0  ;;  %v18640_v6 = vpop.f32.mrb[30].mxu1  ;;  %v17197_v23 = vld [vmem:[%s18180_s6 + $0x4e8] sm:$0xff]  }
 0x1e2   : > { %21027 = vst [vmem:[#allocation18_spill] sm:$0xff] %v18638_v50  ;;  %21028 = vst [vmem:[#allocation19_spill] sm:$0xff] %v18640_v6  ;;  %v18646_v27 = vpop.f32.mrb[31].mxu0  ;;  %v18648_v53 = vpop.f32.mrb[31].mxu1 }
 0x1e3   : > { %21029 = vst [vmem:[#allocation20_spill] sm:$0xff] %v18646_v27  ;;  %21030 = vst [vmem:[#allocation21_spill] sm:$0xff] %v18648_v53  ;;  %v17200_v53 = vld [vmem:[%s18180_s6 + $0x248] sm:$0xff]  }
 0x1e4   : > { %16462 = vmatmul.mubr.msk.bf16.gmra.mrb[136].mxu0 %vm6363_vm2, %v17192_v34  ;;  %16638 = vmatmul.mubr.msk.bf16.gmra.mrb[136].mxu1 %vm6363_vm2, %v17193_v18  ;;  %v17203_v34 = vld [vmem:[%s18180_s6 + $0x500] sm:$0xff]  }
 0x1e5   : > { %16465 = vmatprep.mubr.msk.bf16.mxu0 %vm6363_vm2, %v17194_v12  ;;  %16641 = vmatprep.mubr.msk.bf16.mxu1 %vm6363_vm2, %v17195_v54  ;;  %v17198_v54 = vld [vmem:[%s18180_s6 + $0x240] sm:$0xff]  }
 0x1e7   : > { %v18660_v42 = vpop.f32.mrb[32].mxu0  ;;  %v18662_v39 = vpop.f32.mrb[32].mxu1 }
 0x1e8   : > { %21031 = vst [vmem:[#allocation22_spill] sm:$0xff] %v18660_v42  ;;  %21032 = vst [vmem:[#allocation23_spill] sm:$0xff] %v18662_v39  ;;  %v18664_v55 = vpop.f32.mrb[33].mxu0  ;;  %v18666_v37 = vpop.f32.mrb[33].mxu1 }
 0x1e9   : > { %21033 = vst [vmem:[#allocation24_spill] sm:$0xff] %v18664_v55  ;;  %21034 = vst [vmem:[#allocation25_spill] sm:$0xff] %v18666_v37  ;;  %v18670_v18 = vpop.f32.mrb[34].mxu0  ;;  %v18672_v12 = vpop.f32.mrb[34].mxu1  ;;  %v17201_v37 = vld [vmem:[%s18180_s6 + $0x4f8] sm:$0xff]  }
 0x1ea   : > { %21035 = vst [vmem:[#allocation26_spill] sm:$0xff] %v18670_v18  ;;  %21036 = vst [vmem:[#allocation27_spill] sm:$0xff] %v18672_v12  ;;  %v18678_v27 = vpop.f32.mrb[35].mxu0  ;;  %v18680_v6 = vpop.f32.mrb[35].mxu1 }
 0x1eb   : > { %21037 = vst [vmem:[#allocation28_spill] sm:$0xff] %v18678_v27  ;;  %21038 = vst [vmem:[#allocation29_spill] sm:$0xff] %v18680_v6  ;;  %v17204_v6 = vld [vmem:[%s18180_s6 + $0x258] sm:$0xff]  }
 0x1ec   : > { %16466 = vmatmul.mubr.msk.bf16.gmra.mrb[140].mxu0 %vm6363_vm2, %v17196_v26  ;;  %16642 = vmatmul.mubr.msk.bf16.gmra.mrb[140].mxu1 %vm6363_vm2, %v17197_v23  ;;  %v17207_v26 = vld [vmem:[%s18180_s6 + $0x510] sm:$0xff]  }
 0x1ed   : > { %16469 = vmatprep.mubr.msk.bf16.mxu0 %vm6363_vm2, %v17198_v54  ;;  %16645 = vmatprep.mubr.msk.bf16.mxu1 %vm6363_vm2, %v17199_v2  ;;  %v17202_v2 = vld [vmem:[%s18180_s6 + $0x250] sm:$0xff]  }
 0x1ef   : > { %v18692_v55 = vpop.f32.mrb[36].mxu0  ;;  %v18694_v39 = vpop.f32.mrb[36].mxu1 }
 0x1f0   : > { %21039 = vst [vmem:[#allocation30_spill] sm:$0xff] %v18692_v55  ;;  %21040 = vst [vmem:[#allocation31_spill] sm:$0xff] %v18694_v39  ;;  %v18696_v42 = vpop.f32.mrb[37].mxu0  ;;  %v18698_v50 = vpop.f32.mrb[37].mxu1 }
 0x1f1   : > { %21041 = vst [vmem:[#allocation32_spill] sm:$0xff] %v18696_v42  ;;  %21042 = vst [vmem:[#allocation33_spill] sm:$0xff] %v18698_v50  ;;  %v18702_v23 = vpop.f32.mrb[38].mxu0  ;;  %v18704_v54 = vpop.f32.mrb[38].mxu1  ;;  %v17205_v50 = vld [vmem:[%s18180_s6 + $0x508] sm:$0xff]  }
 0x1f2   : > { %21043 = vst [vmem:[#allocation34_spill] sm:$0xff] %v18702_v23  ;;  %21044 = vst [vmem:[#allocation35_spill] sm:$0xff] %v18704_v54  ;;  %v18710_v27 = vpop.f32.mrb[39].mxu0  ;;  %v18712_v12 = vpop.f32.mrb[39].mxu1 }
 0x1f3   : > { %21045 = vst [vmem:[#allocation36_spill] sm:$0xff] %v18710_v27  ;;  %21046 = vst [vmem:[#allocation37_spill] sm:$0xff] %v18712_v12  ;;  %v17208_v12 = vld [vmem:[%s18180_s6 + $0x268] sm:$0xff]  }
 0x1f4   : > { %16470 = vmatmul.mubr.msk.bf16.gmra.mrb[144].mxu0 %vm6363_vm2, %v17200_v53  ;;  %16646 = vmatmul.mubr.msk.bf16.gmra.mrb[144].mxu1 %vm6363_vm2, %v17201_v37  ;;  %v17252_v53 = vld [vmem:[%s18180_s6 + $0x5c8] sm:$0xff]  }
 0x1f5   : > { %16473 = vmatprep.mubr.msk.bf16.mxu0 %vm6363_vm2, %v17202_v2  ;;  %16649 = vmatprep.mubr.msk.bf16.mxu1 %vm6363_vm2, %v17203_v34  ;;  %v17206_v34 = vld [vmem:[%s18180_s6 + $0x260] sm:$0xff]  }
 0x1f7   : > { %v18724_v42 = vpop.f32.mrb[40].mxu0  ;;  %v18726_v39 = vpop.f32.mrb[40].mxu1 }
 0x1f8   : > { %21047 = vst [vmem:[#allocation38_spill] sm:$0xff] %v18724_v42  ;;  %21048 = vst [vmem:[#allocation39_spill] sm:$0xff] %v18726_v39  ;;  %v18728_v55 = vpop.f32.mrb[41].mxu0  ;;  %v18730_v18 = vpop.f32.mrb[41].mxu1 }
 0x1f9   : > { %21049 = vst [vmem:[#allocation40_spill] sm:$0xff] %v18728_v55  ;;  %21050 = vst [vmem:[#allocation41_spill] sm:$0xff] %v18730_v18  ;;  %v18734_v37 = vpop.f32.mrb[42].mxu0  ;;  %v18736_v2 = vpop.f32.mrb[42].mxu1  ;;  %v17209_v18 = vld [vmem:[%s18180_s6 + $0x518] sm:$0xff]  }
 0x1fa   : > { %21051 = vst [vmem:[#allocation42_spill] sm:$0xff] %v18734_v37  ;;  %21052 = vst [vmem:[#allocation43_spill] sm:$0xff] %v18736_v2  ;;  %v18742_v27 = vpop.f32.mrb[43].mxu0  ;;  %v18744_v54 = vpop.f32.mrb[43].mxu1  ;;  %v17212_v37 = vld [vmem:[%s18180_s6 + $0x278] sm:$0xff]  }
 0x1fb   : > { %21053 = vst [vmem:[#allocation44_spill] sm:$0xff] %v18742_v27  ;;  %21054 = vst [vmem:[#allocation45_spill] sm:$0xff] %v18744_v54 }
 0x1fc   : > { %16474 = vmatmul.mubr.msk.bf16.gmra.mrb[148].mxu0 %vm6363_vm2, %v17204_v6  ;;  %16650 = vmatmul.mubr.msk.bf16.gmra.mrb[148].mxu1 %vm6363_vm2, %v17205_v50 }
 0x1fd   : > { %16477 = vmatprep.mubr.msk.bf16.mxu0 %vm6363_vm2, %v17206_v34  ;;  %16653 = vmatprep.mubr.msk.bf16.mxu1 %vm6363_vm2, %v17207_v26  ;;  %v17210_v34 = vld [vmem:[%s18180_s6 + $0x270] sm:$0xff]   ;;  %v17211_v26 = vld [vmem:[%s18180_s6 + $0x520] sm:$0xff]  }
 0x1ff   : > { %v18756_v55 = vpop.f32.mrb[44].mxu0  ;;  %v18758_v39 = vpop.f32.mrb[44].mxu1 }
 0x200   : > { %21055 = vst [vmem:[#allocation46_spill] sm:$0xff] %v18756_v55  ;;  %21056 = vst [vmem:[#allocation47_spill] sm:$0xff] %v18758_v39  ;;  %v18760_v42 = vpop.f32.mrb[45].mxu0  ;;  %v18762_v23 = vpop.f32.mrb[45].mxu1  ;;  %v17216_v55 = vld [vmem:[%s18180_s6 + $0x288] sm:$0xff]  }
 0x201   : > { %21057 = vst [vmem:[#allocation48_spill] sm:$0xff] %v18760_v42  ;;  %21058 = vst [vmem:[#allocation49_spill] sm:$0xff] %v18762_v23  ;;  %v18766_v6 = vpop.f32.mrb[46].mxu0  ;;  %v18768_v50 = vpop.f32.mrb[46].mxu1 }
 0x202   : > { %21059 = vst [vmem:[#allocation50_spill] sm:$0xff] %v18766_v6  ;;  %21060 = vst [vmem:[#allocation51_spill] sm:$0xff] %v18768_v50  ;;  %v18774_v27 = vpop.f32.mrb[47].mxu0  ;;  %v18776_v2 = vpop.f32.mrb[47].mxu1  ;;  %v17213_v50 = vld [vmem:[%s18180_s6 + $0x528] sm:$0xff]  }
 0x203   : > { %21061 = vst [vmem:[#allocation52_spill] sm:$0xff] %v18774_v27  ;;  %21062 = vst [vmem:[#allocation53_spill] sm:$0xff] %v18776_v2 }
 0x204   : > { %16478 = vmatmul.mubr.msk.bf16.gmra.mrb[152].mxu0 %vm6363_vm2, %v17208_v12  ;;  %16654 = vmatmul.mubr.msk.bf16.gmra.mrb[152].mxu1 %vm6363_vm2, %v17209_v18 }
 0x205   : > { %16481 = vmatprep.mubr.msk.bf16.mxu0 %vm6363_vm2, %v17210_v34  ;;  %16657 = vmatprep.mubr.msk.bf16.mxu1 %vm6363_vm2, %v17211_v26  ;;  %v17214_v34 = vld [vmem:[%s18180_s6 + $0x280] sm:$0xff]   ;;  %v17215_v26 = vld [vmem:[%s18180_s6 + $0x530] sm:$0xff]  }
 0x207   : > { %v18786_v54 = vpop.f32.mrb[48].mxu0  ;;  %v18788_v23 = vpop.f32.mrb[48].mxu1 }
 0x208   : > { %21063 = vst [vmem:[#allocation54_spill] sm:$0xff] %v18786_v54  ;;  %21064 = vst [vmem:[#allocation55_spill] sm:$0xff] %v18788_v23  ;;  %v18790_v42 = vpop.f32.mrb[49].mxu0  ;;  %v18792_v39 = vpop.f32.mrb[49].mxu1  ;;  %v17220_v54 = vld [vmem:[%s18180_s6 + $0x298] sm:$0xff]  }
 0x209   : > { %21065 = vst [vmem:[#allocation56_spill] sm:$0xff] %v18790_v42  ;;  %21066 = vst [vmem:[#allocation57_spill] sm:$0xff] %v18792_v39  ;;  %v18798_v12 = vpop.f32.mrb[50].mxu0  ;;  %v18800_v18 = vpop.f32.mrb[50].mxu1 }
 0x20a   : > { %21067 = vst [vmem:[#allocation58_spill] sm:$0xff] %v18798_v12  ;;  %21068 = vst [vmem:[#allocation59_spill] sm:$0xff] %v18800_v18  ;;  %v18806_v27 = vpop.f32.mrb[51].mxu0  ;;  %v18808_v6 = vpop.f32.mrb[51].mxu1  ;;  %v17217_v18 = vld [vmem:[%s18180_s6 + $0x538] sm:$0xff]  }
 0x20b   : > { %21069 = vst [vmem:[#allocation60_spill] sm:$0xff] %v18806_v27  ;;  %21070 = vst [vmem:[#allocation61_spill] sm:$0xff] %v18808_v6 }
 0x20c   : > { %16482 = vmatmul.mubr.msk.bf16.gmra.mrb[156].mxu0 %vm6363_vm2, %v17212_v37  ;;  %16658 = vmatmul.mubr.msk.bf16.gmra.mrb[156].mxu1 %vm6363_vm2, %v17213_v50 }
 0x20d   : > { %16485 = vmatprep.mubr.msk.bf16.mxu0 %vm6363_vm2, %v17214_v34  ;;  %16661 = vmatprep.mubr.msk.bf16.mxu1 %vm6363_vm2, %v17215_v26  ;;  %v17218_v34 = vld [vmem:[%s18180_s6 + $0x290] sm:$0xff]   ;;  %v17219_v26 = vld [vmem:[%s18180_s6 + $0x540] sm:$0xff]  }
 0x20f   : > { %v18818_v2 = vpop.f32.mrb[52].mxu0  ;;  %v18820_v39 = vpop.f32.mrb[52].mxu1 }
 0x210   : > { %21071 = vst [vmem:[#allocation62_spill] sm:$0xff] %v18818_v2  ;;  %21072 = vst [vmem:[#allocation63_spill] sm:$0xff] %v18820_v39  ;;  %v18822_v42 = vpop.f32.mrb[53].mxu0  ;;  %v18824_v23 = vpop.f32.mrb[53].mxu1  ;;  %v17224_v2 = vld [vmem:[%s18180_s6 + $0x2a8] sm:$0xff]  }
 0x211   : > { %21073 = vst [vmem:[#allocation64_spill] sm:$0xff] %v18822_v42  ;;  %21074 = vst [vmem:[#allocation65_spill] sm:$0xff] %v18824_v23  ;;  %v18830_v37 = vpop.f32.mrb[54].mxu0  ;;  %v18832_v50 = vpop.f32.mrb[54].mxu1 }
 0x212   : > { %21075 = vst [vmem:[#allocation66_spill] sm:$0xff] %v18830_v37  ;;  %21076 = vst [vmem:[#allocation67_spill] sm:$0xff] %v18832_v50  ;;  %v18838_v27 = vpop.f32.mrb[55].mxu0  ;;  %v18840_v12 = vpop.f32.mrb[55].mxu1  ;;  %v17221_v50 = vld [vmem:[%s18180_s6 + $0x548] sm:$0xff]  }
 0x213   : > { %21077 = vst [vmem:[#allocation68_spill] sm:$0xff] %v18838_v27  ;;  %21078 = vst [vmem:[#allocation69_spill] sm:$0xff] %v18840_v12 }
 0x214   : > { %16486 = vmatmul.mubr.msk.bf16.gmra.mrb[160].mxu0 %vm6363_vm2, %v17216_v55  ;;  %16662 = vmatmul.mubr.msk.bf16.gmra.mrb[160].mxu1 %vm6363_vm2, %v17217_v18 }
 0x215   : > { %16489 = vmatprep.mubr.msk.bf16.mxu0 %vm6363_vm2, %v17218_v34  ;;  %16665 = vmatprep.mubr.msk.bf16.mxu1 %vm6363_vm2, %v17219_v26  ;;  %v17222_v34 = vld [vmem:[%s18180_s6 + $0x2a0] sm:$0xff]   ;;  %v17223_v26 = vld [vmem:[%s18180_s6 + $0x550] sm:$0xff]  }
 0x217   : > { %v18850_v6 = vpop.f32.mrb[56].mxu0  ;;  %v18852_v23 = vpop.f32.mrb[56].mxu1 }
 0x218   : > { %21079 = vst [vmem:[#allocation70_spill] sm:$0xff] %v18850_v6  ;;  %21080 = vst [vmem:[#allocation71_spill] sm:$0xff] %v18852_v23  ;;  %v18854_v42 = vpop.f32.mrb[57].mxu0  ;;  %v18856_v39 = vpop.f32.mrb[57].mxu1  ;;  %v17228_v6 = vld [vmem:[%s18180_s6 + $0x568] sm:$0xff]  }
 0x219   : > { %21081 = vst [vmem:[#allocation72_spill] sm:$0xff] %v18854_v42  ;;  %21082 = vst [vmem:[#allocation73_spill] sm:$0xff] %v18856_v39  ;;  %v18862_v55 = vpop.f32.mrb[58].mxu0  ;;  %v18864_v18 = vpop.f32.mrb[58].mxu1 }
 0x21a   : > { %21083 = vst [vmem:[#allocation74_spill] sm:$0xff] %v18862_v55  ;;  %21084 = vst [vmem:[#allocation75_spill] sm:$0xff] %v18864_v18  ;;  %v18870_v27 = vpop.f32.mrb[59].mxu0  ;;  %v18872_v37 = vpop.f32.mrb[59].mxu1  ;;  %v17225_v18 = vld [vmem:[%s18180_s6 + $0x558] sm:$0xff]  }
 0x21b   : > { %21085 = vst [vmem:[#allocation76_spill] sm:$0xff] %v18870_v27  ;;  %21086 = vst [vmem:[#allocation77_spill] sm:$0xff] %v18872_v37 }
 0x21c   : > { %16490 = vmatmul.mubr.msk.bf16.gmra.mrb[164].mxu0 %vm6363_vm2, %v17220_v54  ;;  %16666 = vmatmul.mubr.msk.bf16.gmra.mrb[164].mxu1 %vm6363_vm2, %v17221_v50 }
 0x21d   : > { %16493 = vmatprep.mubr.msk.bf16.mxu0 %vm6363_vm2, %v17222_v34  ;;  %16669 = vmatprep.mubr.msk.bf16.mxu1 %vm6363_vm2, %v17223_v26  ;;  %v17226_v34 = vld [vmem:[%s18180_s6 + $0x560] sm:$0xff]   ;;  %v17227_v26 = vld [vmem:[%s18180_s6 + $0x810] sm:$0xff]  }
 0x21f   : > { %v18882_v12 = vpop.f32.mrb[60].mxu0  ;;  %v18884_v39 = vpop.f32.mrb[60].mxu1 }
 0x220   : > { %21087 = vst [vmem:[#allocation78_spill] sm:$0xff] %v18882_v12  ;;  %21088 = vst [vmem:[#allocation79_spill] sm:$0xff] %v18884_v39  ;;  %v18886_v42 = vpop.f32.mrb[61].mxu0  ;;  %v18888_v23 = vpop.f32.mrb[61].mxu1  ;;  %v17232_v12 = vld [vmem:[%s18180_s6 + $0x578] sm:$0xff]  }
 0x221   : > { %21089 = vst [vmem:[#allocation80_spill] sm:$0xff] %v18886_v42  ;;  %21090 = vst [vmem:[#allocation81_spill] sm:$0xff] %v18888_v23  ;;  %v18894_v54 = vpop.f32.mrb[62].mxu0  ;;  %v18896_v50 = vpop.f32.mrb[62].mxu1 }
 0x222   : > { %21091 = vst [vmem:[#allocation82_spill] sm:$0xff] %v18894_v54  ;;  %21092 = vst [vmem:[#allocation83_spill] sm:$0xff] %v18896_v50  ;;  %v18902_v27 = vpop.f32.mrb[63].mxu0  ;;  %v18904_v55 = vpop.f32.mrb[63].mxu1  ;;  %v17229_v50 = vld [vmem:[%s18180_s6 + $0x818] sm:$0xff]  }
 0x223   : > { %21093 = vst [vmem:[#allocation84_spill] sm:$0xff] %v18902_v27  ;;  %21094 = vst [vmem:[#allocation85_spill] sm:$0xff] %v18904_v55 }
 0x224   : > { %16494 = vmatmul.mubr.msk.bf16.gmra.mrb[168].mxu0 %vm6363_vm2, %v17224_v2  ;;  %16670 = vmatmul.mubr.msk.bf16.gmra.mrb[168].mxu1 %vm6363_vm2, %v17225_v18 }
 0x225   : > { %16677 = vmatprep.mubr.msk.bf16.mxu0 %vm6363_vm2, %v17226_v34  ;;  %16853 = vmatprep.mubr.msk.bf16.mxu1 %vm6363_vm2, %v17227_v26  ;;  %v17230_v34 = vld [vmem:[%s18180_s6 + $0x570] sm:$0xff]   ;;  %v17231_v26 = vld [vmem:[%s18180_s6 + $0x820] sm:$0xff]  }
 0x227   : > { %v18914_v37 = vpop.f32.mrb[64].mxu0  ;;  %v18916_v23 = vpop.f32.mrb[64].mxu1 }
 0x228   : > { %21095 = vst [vmem:[#allocation86_spill] sm:$0xff] %v18914_v37  ;;  %21096 = vst [vmem:[#allocation87_spill] sm:$0xff] %v18916_v23  ;;  %v18918_v42 = vpop.f32.mrb[65].mxu0  ;;  %v18920_v39 = vpop.f32.mrb[65].mxu1  ;;  %v17236_v37 = vld [vmem:[%s18180_s6 + $0x588] sm:$0xff]  }
 0x229   : > { %21097 = vst [vmem:[#allocation88_spill] sm:$0xff] %v18918_v42  ;;  %21098 = vst [vmem:[#allocation89_spill] sm:$0xff] %v18920_v39  ;;  %v18926_v2 = vpop.f32.mrb[66].mxu0  ;;  %v18928_v18 = vpop.f32.mrb[66].mxu1 }
 0x22a   : > { %21099 = vst [vmem:[#allocation90_spill] sm:$0xff] %v18926_v2  ;;  %21100 = vst [vmem:[#allocation91_spill] sm:$0xff] %v18928_v18  ;;  %v18934_v27 = vpop.f32.mrb[67].mxu0  ;;  %v18936_v54 = vpop.f32.mrb[67].mxu1  ;;  %v17233_v18 = vld [vmem:[%s18180_s6 + $0x828] sm:$0xff]  }
 0x22b   : > { %21101 = vst [vmem:[#allocation92_spill] sm:$0xff] %v18934_v27  ;;  %21102 = vst [vmem:[#allocation93_spill] sm:$0xff] %v18936_v54 }
 0x22c   : > { %16678 = vmatmul.mubr.msk.bf16.vlgmr.msra.gmra.mrb[172].mxu0 %vm6363_vm2, %v17228_v6  ;;  %16854 = vmatmul.mubr.msk.bf16.vlgmr.msra.gmra.mrb[172].mxu1 %vm6363_vm2, %v17229_v50 }
 0x22d   : > { %16681 = vmatprep.mubr.msk.bf16.mxu0 %vm6363_vm2, %v17230_v34  ;;  %16857 = vmatprep.mubr.msk.bf16.mxu1 %vm6363_vm2, %v17231_v26  ;;  %v17234_v34 = vld [vmem:[%s18180_s6 + $0x580] sm:$0xff]   ;;  %v17235_v26 = vld [vmem:[%s18180_s6 + $0x830] sm:$0xff]  }
 0x22f   : > { %v18946_v55 = vpop.f32.mrb[68].mxu0  ;;  %v18948_v39 = vpop.f32.mrb[68].mxu1 }
 0x230   : > { %21103 = vst [vmem:[#allocation94_spill] sm:$0xff] %v18946_v55  ;;  %21104 = vst [vmem:[#allocation95_spill] sm:$0xff] %v18948_v39  ;;  %v18950_v42 = vpop.f32.mrb[69].mxu0  ;;  %v18952_v23 = vpop.f32.mrb[69].mxu1  ;;  %v17240_v55 = vld [vmem:[%s18180_s6 + $0x598] sm:$0xff]  }
 0x231   : > { %21105 = vst [vmem:[#allocation96_spill] sm:$0xff] %v18950_v42  ;;  %21106 = vst [vmem:[#allocation97_spill] sm:$0xff] %v18952_v23  ;;  %v18958_v6 = vpop.f32.mrb[70].mxu0  ;;  %v18960_v50 = vpop.f32.mrb[70].mxu1 }
 0x232   : > { %21107 = vst [vmem:[#allocation98_spill] sm:$0xff] %v18958_v6  ;;  %21108 = vst [vmem:[#allocation99_spill] sm:$0xff] %v18960_v50  ;;  %v18966_v27 = vpop.f32.mrb[71].mxu0  ;;  %v18968_v2 = vpop.f32.mrb[71].mxu1  ;;  %v17237_v50 = vld [vmem:[%s18180_s6 + $0x838] sm:$0xff]  }
 0x233   : > { %21109 = vst [vmem:[#allocation100_spill] sm:$0xff] %v18966_v27  ;;  %21110 = vst [vmem:[#allocation101_spill] sm:$0xff] %v18968_v2 }
 0x234   : > { %16682 = vmatmul.mubr.msk.bf16.gmra.mrb[176].mxu0 %vm6363_vm2, %v17232_v12  ;;  %16858 = vmatmul.mubr.msk.bf16.gmra.mrb[176].mxu1 %vm6363_vm2, %v17233_v18 }
 0x235   : > { %16685 = vmatprep.mubr.msk.bf16.mxu0 %vm6363_vm2, %v17234_v34  ;;  %16861 = vmatprep.mubr.msk.bf16.mxu1 %vm6363_vm2, %v17235_v26  ;;  %v17238_v34 = vld [vmem:[%s18180_s6 + $0x590] sm:$0xff]   ;;  %v17239_v26 = vld [vmem:[%s18180_s6 + $0x840] sm:$0xff]  }
 0x237   : > { %v18978_v54 = vpop.f32.mrb[72].mxu0  ;;  %v18980_v23 = vpop.f32.mrb[72].mxu1 }
 0x238   : > { %21111 = vst [vmem:[#allocation102_spill] sm:$0xff] %v18978_v54  ;;  %21112 = vst [vmem:[#allocation103_spill] sm:$0xff] %v18980_v23  ;;  %v18982_v42 = vpop.f32.mrb[73].mxu0  ;;  %v18984_v39 = vpop.f32.mrb[73].mxu1  ;;  %v17244_v54 = vld [vmem:[%s18180_s6 + $0x5a8] sm:$0xff]  }
 0x239   : > { %21113 = vst [vmem:[#allocation104_spill] sm:$0xff] %v18982_v42  ;;  %21114 = vst [vmem:[#allocation105_spill] sm:$0xff] %v18984_v39  ;;  %v18990_v12 = vpop.f32.mrb[74].mxu0  ;;  %v18992_v18 = vpop.f32.mrb[74].mxu1 }
 0x23a   : > { %21115 = vst [vmem:[#allocation106_spill] sm:$0xff] %v18990_v12  ;;  %21116 = vst [vmem:[#allocation107_spill] sm:$0xff] %v18992_v18  ;;  %v18998_v27 = vpop.f32.mrb[75].mxu0  ;;  %v19000_v6 = vpop.f32.mrb[75].mxu1  ;;  %v17241_v18 = vld [vmem:[%s18180_s6 + $0x848] sm:$0xff]  }
 0x23b   : > { %21117 = vst [vmem:[#allocation108_spill] sm:$0xff] %v18998_v27  ;;  %21118 = vst [vmem:[#allocation109_spill] sm:$0xff] %v19000_v6 }
 0x23c   : > { %16686 = vmatmul.mubr.msk.bf16.gmra.mrb[180].mxu0 %vm6363_vm2, %v17236_v37  ;;  %16862 = vmatmul.mubr.msk.bf16.gmra.mrb[180].mxu1 %vm6363_vm2, %v17237_v50 }
 0x23d   : > { %16689 = vmatprep.mubr.msk.bf16.mxu0 %vm6363_vm2, %v17238_v34  ;;  %16865 = vmatprep.mubr.msk.bf16.mxu1 %vm6363_vm2, %v17239_v26  ;;  %v17242_v34 = vld [vmem:[%s18180_s6 + $0x5a0] sm:$0xff]   ;;  %v17243_v26 = vld [vmem:[%s18180_s6 + $0x850] sm:$0xff]  }
 0x23f   : > { %v19010_v2 = vpop.f32.mrb[76].mxu0  ;;  %v19012_v39 = vpop.f32.mrb[76].mxu1 }
 0x240   : > { %21119 = vst [vmem:[#allocation110_spill] sm:$0xff] %v19010_v2  ;;  %21120 = vst [vmem:[#allocation111_spill] sm:$0xff] %v19012_v39  ;;  %v19014_v42 = vpop.f32.mrb[77].mxu0  ;;  %v19016_v23 = vpop.f32.mrb[77].mxu1  ;;  %v17248_v2 = vld [vmem:[%s18180_s6 + $0x5b8] sm:$0xff]  }
 0x241   : > { %21121 = vst [vmem:[#allocation112_spill] sm:$0xff] %v19014_v42  ;;  %21122 = vst [vmem:[#allocation113_spill] sm:$0xff] %v19016_v23  ;;  %v19022_v37 = vpop.f32.mrb[78].mxu0  ;;  %v19024_v50 = vpop.f32.mrb[78].mxu1 }
 0x242   : > { %21123 = vst [vmem:[#allocation114_spill] sm:$0xff] %v19022_v37  ;;  %21124 = vst [vmem:[#allocation115_spill] sm:$0xff] %v19024_v50  ;;  %v19030_v27 = vpop.f32.mrb[79].mxu0  ;;  %v19032_v12 = vpop.f32.mrb[79].mxu1  ;;  %v17245_v50 = vld [vmem:[%s18180_s6 + $0x858] sm:$0xff]  }
 0x243   : > { %21125 = vst [vmem:[#allocation116_spill] sm:$0xff] %v19030_v27  ;;  %21126 = vst [vmem:[#allocation117_spill] sm:$0xff] %v19032_v12 }
 0x244   : > { %16690 = vmatmul.mubr.msk.bf16.gmra.mrb[184].mxu0 %vm6363_vm2, %v17240_v55  ;;  %16866 = vmatmul.mubr.msk.bf16.gmra.mrb[184].mxu1 %vm6363_vm2, %v17241_v18 }
 0x245   : > { %16693 = vmatprep.mubr.msk.bf16.mxu0 %vm6363_vm2, %v17242_v34  ;;  %16869 = vmatprep.mubr.msk.bf16.mxu1 %vm6363_vm2, %v17243_v26  ;;  %v17246_v34 = vld [vmem:[%s18180_s6 + $0x5b0] sm:$0xff]   ;;  %v17247_v26 = vld [vmem:[%s18180_s6 + $0x860] sm:$0xff]  }
 0x247   : > { %v19042_v6 = vpop.f32.mrb[80].mxu0  ;;  %v19044_v23 = vpop.f32.mrb[80].mxu1 }
 0x248   : > { %21127 = vst [vmem:[#allocation118_spill] sm:$0xff] %v19042_v6  ;;  %21128 = vst [vmem:[#allocation119_spill] sm:$0xff] %v19044_v23  ;;  %v19046_v42 = vpop.f32.mrb[81].mxu0  ;;  %v19048_v39 = vpop.f32.mrb[81].mxu1 }
 0x249   : > { %21129 = vst [vmem:[#allocation120_spill] sm:$0xff] %v19046_v42  ;;  %21130 = vst [vmem:[#allocation121_spill] sm:$0xff] %v19048_v39  ;;  %v19054_v55 = vpop.f32.mrb[82].mxu0  ;;  %v19056_v18 = vpop.f32.mrb[82].mxu1 }
 0x24a   : > { %21131 = vst [vmem:[#allocation122_spill] sm:$0xff] %v19054_v55  ;;  %21132 = vst [vmem:[#allocation123_spill] sm:$0xff] %v19056_v18  ;;  %v19062_v27 = vpop.f32.mrb[83].mxu0  ;;  %v19064_v37 = vpop.f32.mrb[83].mxu1  ;;  %v17249_v18 = vld [vmem:[%s18180_s6 + $0x868] sm:$0xff]  }
 0x24b   : > { %21133 = vst [vmem:[#allocation124_spill] sm:$0xff] %v19062_v27  ;;  %21134 = vst [vmem:[#allocation125_spill] sm:$0xff] %v19064_v37 }
 0x24c   : > { %16694 = vmatmul.mubr.msk.bf16.gmra.mrb[188].mxu0 %vm6363_vm2, %v17244_v54  ;;  %16870 = vmatmul.mubr.msk.bf16.gmra.mrb[188].mxu1 %vm6363_vm2, %v17245_v50 }
 0x24d   : > { %16697 = vmatprep.mubr.msk.bf16.mxu0 %vm6363_vm2, %v17246_v34  ;;  %16873 = vmatprep.mubr.msk.bf16.mxu1 %vm6363_vm2, %v17247_v26  ;;  %v17250_v34 = vld [vmem:[%s18180_s6 + $0x5c0] sm:$0xff]   ;;  %v17251_v26 = vld [vmem:[%s18180_s6 + $0x870] sm:$0xff]  }
 0x24f   : > { %v19074_v12 = vpop.f32.mrb[84].mxu0  ;;  %v19076_v39 = vpop.f32.mrb[84].mxu1 }
 0x250   : > { %21135 = vst [vmem:[#allocation126_spill] sm:$0xff] %v19074_v12  ;;  %21136 = vst [vmem:[#allocation127_spill] sm:$0xff] %v19076_v39  ;;  %v19078_v42 = vpop.f32.mrb[85].mxu0  ;;  %v19080_v23 = vpop.f32.mrb[85].mxu1  ;;  %v17338_v39 = vld [vmem:[%s18180_s6 + $0x720] sm:$0xff]   ;;  %v17339_v12 = vld [vmem:[%s18180_s6 + $0x9d0] sm:$0xff]  }
 0x251   : > { %21137 = vst [vmem:[#allocation128_spill] sm:$0xff] %v19078_v42  ;;  %21138 = vst [vmem:[#allocation129_spill] sm:$0xff] %v19080_v23  ;;  %v19086_v54 = vpop.f32.mrb[86].mxu0  ;;  %v19088_v50 = vpop.f32.mrb[86].mxu1  ;;  %v17256_v42 = vld [vmem:[%s18180_s6 + $0x5d8] sm:$0xff]  }
 0x252   : > { %21139 = vst [vmem:[#allocation130_spill] sm:$0xff] %v19086_v54  ;;  %21140 = vst [vmem:[#allocation131_spill] sm:$0xff] %v19088_v50  ;;  %v19094_v27 = vpop.f32.mrb[87].mxu0  ;;  %v19096_v55 = vpop.f32.mrb[87].mxu1 }
 0x253   : > { %21141 = vst [vmem:[#allocation132_spill] sm:$0xff] %v19094_v27  ;;  %21142 = vst [vmem:[#allocation133_spill] sm:$0xff] %v19096_v55  ;;  %v17253_v55 = vld [vmem:[%s18180_s6 + $0x878] sm:$0xff]   ;;  %v17255_v27 = vld [vmem:[%s18180_s6 + $0x880] sm:$0xff]  }
 0x254   : > { %16698 = vmatmul.mubr.msk.bf16.gmra.mrb[192].mxu0 %vm6363_vm2, %v17248_v2  ;;  %16874 = vmatmul.mubr.msk.bf16.gmra.mrb[192].mxu1 %vm6363_vm2, %v17249_v18 }
 0x255   : > { %16701 = vmatprep.mubr.msk.bf16.mxu0 %vm6363_vm2, %v17250_v34  ;;  %16877 = vmatprep.mubr.msk.bf16.mxu1 %vm6363_vm2, %v17251_v26  ;;  %v17254_v26 = vld [vmem:[%s18180_s6 + $0x5d0] sm:$0xff]  }
 0x257   : > { %v19106_v37 = vpop.f32.mrb[88].mxu0  ;;  %v19108_v23 = vpop.f32.mrb[88].mxu1 }
 0x258   : > { %21143 = vst [vmem:[#allocation134_spill] sm:$0xff] %v19106_v37  ;;  %21144 = vst [vmem:[#allocation135_spill] sm:$0xff] %v19108_v23  ;;  %v19112_v50 = vpop.f32.mrb[89].mxu0  ;;  %v19114_v54 = vpop.f32.mrb[89].mxu1 }
 0x259   : > { %21145 = vst [vmem:[#allocation136_spill] sm:$0xff] %v19112_v50  ;;  %21146 = vst [vmem:[#allocation137_spill] sm:$0xff] %v19114_v54  ;;  %v19120_v18 = vpop.f32.mrb[90].mxu0  ;;  %v19122_v34 = vpop.f32.mrb[90].mxu1  ;;  %v17260_v50 = vld [vmem:[%s18180_s6 + $0x5e8] sm:$0xff]  }
 0x25a   : > { %21147 = vst [vmem:[#allocation138_spill] sm:$0xff] %v19120_v18  ;;  %21148 = vst [vmem:[#allocation139_spill] sm:$0xff] %v19122_v34  ;;  %v19128_v23 = vpop.f32.mrb[91].mxu0  ;;  %v19130_v37 = vpop.f32.mrb[91].mxu1 }
 0x25b   : > { %21149 = vst [vmem:[#allocation140_spill] sm:$0xff] %v19128_v23  ;;  %21150 = vst [vmem:[#allocation141_spill] sm:$0xff] %v19130_v37  ;;  %v17257_v37 = vld [vmem:[%s18180_s6 + $0x888] sm:$0xff]   ;;  %v17259_v23 = vld [vmem:[%s18180_s6 + $0x890] sm:$0xff]  }
 0x25c   : > { %16702 = vmatmul.mubr.msk.bf16.gmra.mrb[196].mxu0 %vm6363_vm2, %v17252_v53  ;;  %16878 = vmatmul.mubr.msk.bf16.gmra.mrb[196].mxu1 %vm6363_vm2, %v17253_v55 }
 0x25d   : > { %16705 = vmatprep.mubr.msk.bf16.mxu0 %vm6363_vm2, %v17254_v26  ;;  %16881 = vmatprep.mubr.msk.bf16.mxu1 %vm6363_vm2, %v17255_v27  ;;  %v17258_v27 = vld [vmem:[%s18180_s6 + $0x5e0] sm:$0xff]  }
 0x25f   : > { %v19138_v2 = vpop.f32.mrb[92].mxu0  ;;  %v19140_v6 = vpop.f32.mrb[92].mxu1 }
 0x260   : > { %21151 = vst [vmem:[#allocation142_spill] sm:$0xff] %v19138_v2  ;;  %21152 = vst [vmem:[#allocation143_spill] sm:$0xff] %v19140_v6  ;;  %v19144_v18 = vpop.f32.mrb[93].mxu0  ;;  %v19146_v54 = vpop.f32.mrb[93].mxu1 }
 0x261   : > { %21153 = vst [vmem:[#allocation144_spill] sm:$0xff] %v19144_v18  ;;  %21154 = vst [vmem:[#allocation145_spill] sm:$0xff] %v19146_v54  ;;  %v19152_v55 = vpop.f32.mrb[94].mxu0  ;;  %v19154_v26 = vpop.f32.mrb[94].mxu1  ;;  %v17264_v18 = vld [vmem:[%s18180_s6 + $0x5f8] sm:$0xff]  }
 0x262   : > { %21155 = vst [vmem:[#allocation146_spill] sm:$0xff] %v19152_v55  ;;  %21156 = vst [vmem:[#allocation147_spill] sm:$0xff] %v19154_v26  ;;  %v19160_v6 = vpop.f32.mrb[95].mxu0  ;;  %v19162_v2 = vpop.f32.mrb[95].mxu1 }
 0x263   : > { %21157 = vst [vmem:[#allocation148_spill] sm:$0xff] %v19160_v6  ;;  %21158 = vst [vmem:[#allocation149_spill] sm:$0xff] %v19162_v2  ;;  %v17261_v2 = vld [vmem:[%s18180_s6 + $0x898] sm:$0xff]   ;;  %v17263_v6 = vld [vmem:[%s18180_s6 + $0x8a0] sm:$0xff]  }
 0x264   : > { %16706 = vmatmul.mubr.msk.bf16.gmra.mrb[200].mxu0 %vm6363_vm2, %v17256_v42  ;;  %16882 = vmatmul.mubr.msk.bf16.gmra.mrb[200].mxu1 %vm6363_vm2, %v17257_v37 }
 0x265   : > { %16709 = vmatprep.mubr.msk.bf16.mxu0 %vm6363_vm2, %v17258_v27  ;;  %16885 = vmatprep.mubr.msk.bf16.mxu1 %vm6363_vm2, %v17259_v23  ;;  %v17262_v23 = vld [vmem:[%s18180_s6 + $0x5f0] sm:$0xff]  }
 0x267   : > { %v19170_v53 = vpop.f32.mrb[96].mxu0  ;;  %v19172_v34 = vpop.f32.mrb[96].mxu1 }
 0x268   : > { %21159 = vst [vmem:[#allocation150_spill] sm:$0xff] %v19170_v53  ;;  %21160 = vst [vmem:[#allocation151_spill] sm:$0xff] %v19172_v34  ;;  %v19176_v55 = vpop.f32.mrb[97].mxu0  ;;  %v19178_v54 = vpop.f32.mrb[97].mxu1 }
 0x269   : > { %21161 = vst [vmem:[#allocation152_spill] sm:$0xff] %v19176_v55  ;;  %21162 = vst [vmem:[#allocation153_spill] sm:$0xff] %v19178_v54  ;;  %v19184_v37 = vpop.f32.mrb[98].mxu0  ;;  %v19186_v27 = vpop.f32.mrb[98].mxu1  ;;  %v17268_v55 = vld [vmem:[%s18180_s6 + $0x608] sm:$0xff]  }
 0x26a   : > { %21163 = vst [vmem:[#allocation154_spill] sm:$0xff] %v19184_v37  ;;  %21164 = vst [vmem:[#allocation155_spill] sm:$0xff] %v19186_v27  ;;  %v19192_v34 = vpop.f32.mrb[99].mxu0  ;;  %v19194_v53 = vpop.f32.mrb[99].mxu1 }
 0x26b   : > { %21165 = vst [vmem:[#allocation156_spill] sm:$0xff] %v19192_v34  ;;  %21166 = vst [vmem:[#allocation157_spill] sm:$0xff] %v19194_v53  ;;  %v17265_v53 = vld [vmem:[%s18180_s6 + $0x8a8] sm:$0xff]   ;;  %v17267_v34 = vld [vmem:[%s18180_s6 + $0x8b0] sm:$0xff]  }
 0x26c   : > { %16710 = vmatmul.mubr.msk.bf16.gmra.mrb[204].mxu0 %vm6363_vm2, %v17260_v50  ;;  %16886 = vmatmul.mubr.msk.bf16.gmra.mrb[204].mxu1 %vm6363_vm2, %v17261_v2 }
 0x26d   : > { %16713 = vmatprep.mubr.msk.bf16.mxu0 %vm6363_vm2, %v17262_v23  ;;  %16889 = vmatprep.mubr.msk.bf16.mxu1 %vm6363_vm2, %v17263_v6  ;;  %v17266_v6 = vld [vmem:[%s18180_s6 + $0x600] sm:$0xff]  }
 0x26f   : > { %v19202_v42 = vpop.f32.mrb[100].mxu0  ;;  %v19204_v26 = vpop.f32.mrb[100].mxu1 }
 0x270   : > { %21167 = vst [vmem:[#allocation158_spill] sm:$0xff] %v19202_v42  ;;  %21168 = vst [vmem:[#allocation159_spill] sm:$0xff] %v19204_v26  ;;  %v19208_v37 = vpop.f32.mrb[101].mxu0  ;;  %v19210_v54 = vpop.f32.mrb[101].mxu1 }
 0x271   : > { %21169 = vst [vmem:[#allocation160_spill] sm:$0xff] %v19208_v37  ;;  %21170 = vst [vmem:[#allocation161_spill] sm:$0xff] %v19210_v54  ;;  %v19216_v2 = vpop.f32.mrb[102].mxu0  ;;  %v19218_v23 = vpop.f32.mrb[102].mxu1  ;;  %v17272_v37 = vld [vmem:[%s18180_s6 + $0x618] sm:$0xff]  }
 0x272   : > { %21171 = vst [vmem:[#allocation162_spill] sm:$0xff] %v19216_v2  ;;  %21172 = vst [vmem:[#allocation163_spill] sm:$0xff] %v19218_v23  ;;  %v19224_v26 = vpop.f32.mrb[103].mxu0  ;;  %v19226_v42 = vpop.f32.mrb[103].mxu1 }
 0x273   : > { %21173 = vst [vmem:[#allocation164_spill] sm:$0xff] %v19224_v26  ;;  %21174 = vst [vmem:[#allocation165_spill] sm:$0xff] %v19226_v42  ;;  %v17269_v42 = vld [vmem:[%s18180_s6 + $0x8b8] sm:$0xff]   ;;  %v17271_v26 = vld [vmem:[%s18180_s6 + $0x8c0] sm:$0xff]  }
 0x274   : > { %16714 = vmatmul.mubr.msk.bf16.gmra.mrb[208].mxu0 %vm6363_vm2, %v17264_v18  ;;  %16890 = vmatmul.mubr.msk.bf16.gmra.mrb[208].mxu1 %vm6363_vm2, %v17265_v53 }
 0x275   : > { %16717 = vmatprep.mubr.msk.bf16.mxu0 %vm6363_vm2, %v17266_v6  ;;  %16893 = vmatprep.mubr.msk.bf16.mxu1 %vm6363_vm2, %v17267_v34  ;;  %v17270_v34 = vld [vmem:[%s18180_s6 + $0x610] sm:$0xff]  }
 0x277   : > { %v19234_v50 = vpop.f32.mrb[104].mxu0  ;;  %v19236_v27 = vpop.f32.mrb[104].mxu1 }
 0x278   : > { %21175 = vst [vmem:[#allocation166_spill] sm:$0xff] %v19234_v50  ;;  %21176 = vst [vmem:[#allocation167_spill] sm:$0xff] %v19236_v27  ;;  %v19240_v2 = vpop.f32.mrb[105].mxu0  ;;  %v19242_v54 = vpop.f32.mrb[105].mxu1 }
 0x279   : > { %21177 = vst [vmem:[#allocation168_spill] sm:$0xff] %v19240_v2  ;;  %21178 = vst [vmem:[#allocation169_spill] sm:$0xff] %v19242_v54  ;;  %v19248_v53 = vpop.f32.mrb[106].mxu0  ;;  %v19250_v6 = vpop.f32.mrb[106].mxu1  ;;  %v17276_v2 = vld [vmem:[%s18180_s6 + $0x628] sm:$0xff]  }
 0x27a   : > { %21179 = vst [vmem:[#allocation170_spill] sm:$0xff] %v19248_v53  ;;  %21180 = vst [vmem:[#allocation171_spill] sm:$0xff] %v19250_v6  ;;  %v19256_v27 = vpop.f32.mrb[107].mxu0  ;;  %v19258_v50 = vpop.f32.mrb[107].mxu1 }
 0x27b   : > { %21181 = vst [vmem:[#allocation172_spill] sm:$0xff] %v19256_v27  ;;  %21182 = vst [vmem:[#allocation173_spill] sm:$0xff] %v19258_v50  ;;  %v17273_v50 = vld [vmem:[%s18180_s6 + $0x8c8] sm:$0xff]   ;;  %v17275_v27 = vld [vmem:[%s18180_s6 + $0x8d0] sm:$0xff]  }
 0x27c   : > { %16718 = vmatmul.mubr.msk.bf16.gmra.mrb[212].mxu0 %vm6363_vm2, %v17268_v55  ;;  %16894 = vmatmul.mubr.msk.bf16.gmra.mrb[212].mxu1 %vm6363_vm2, %v17269_v42 }
 0x27d   : > { %16721 = vmatprep.mubr.msk.bf16.mxu0 %vm6363_vm2, %v17270_v34  ;;  %16897 = vmatprep.mubr.msk.bf16.mxu1 %vm6363_vm2, %v17271_v26  ;;  %v17274_v26 = vld [vmem:[%s18180_s6 + $0x620] sm:$0xff]  }
 0x27f   : > { %v19266_v18 = vpop.f32.mrb[108].mxu0  ;;  %v19268_v23 = vpop.f32.mrb[108].mxu1 }
 0x280   : > { %21183 = vst [vmem:[#allocation174_spill] sm:$0xff] %v19266_v18  ;;  %21184 = vst [vmem:[#allocation175_spill] sm:$0xff] %v19268_v23  ;;  %v19272_v53 = vpop.f32.mrb[109].mxu0  ;;  %v19274_v54 = vpop.f32.mrb[109].mxu1 }
 0x281   : > { %21185 = vst [vmem:[#allocation176_spill] sm:$0xff] %v19272_v53  ;;  %21186 = vst [vmem:[#allocation177_spill] sm:$0xff] %v19274_v54  ;;  %v19280_v42 = vpop.f32.mrb[110].mxu0  ;;  %v19282_v34 = vpop.f32.mrb[110].mxu1  ;;  %v17280_v53 = vld [vmem:[%s18180_s6 + $0x638] sm:$0xff]  }
 0x282   : > { %21187 = vst [vmem:[#allocation178_spill] sm:$0xff] %v19280_v42  ;;  %21188 = vst [vmem:[#allocation179_spill] sm:$0xff] %v19282_v34  ;;  %v19288_v23 = vpop.f32.mrb[111].mxu0  ;;  %v19290_v18 = vpop.f32.mrb[111].mxu1 }
 0x283   : > { %21189 = vst [vmem:[#allocation180_spill] sm:$0xff] %v19288_v23  ;;  %21190 = vst [vmem:[#allocation181_spill] sm:$0xff] %v19290_v18  ;;  %v17277_v18 = vld [vmem:[%s18180_s6 + $0x8d8] sm:$0xff]   ;;  %v17279_v23 = vld [vmem:[%s18180_s6 + $0x8e0] sm:$0xff]  }
 0x284   : > { %16722 = vmatmul.mubr.msk.bf16.gmra.mrb[216].mxu0 %vm6363_vm2, %v17272_v37  ;;  %16898 = vmatmul.mubr.msk.bf16.gmra.mrb[216].mxu1 %vm6363_vm2, %v17273_v50 }
 0x285   : > { %16725 = vmatprep.mubr.msk.bf16.mxu0 %vm6363_vm2, %v17274_v26  ;;  %16901 = vmatprep.mubr.msk.bf16.mxu1 %vm6363_vm2, %v17275_v27  ;;  %v17278_v27 = vld [vmem:[%s18180_s6 + $0x630] sm:$0xff]  }
 0x287   : > { %v19298_v55 = vpop.f32.mrb[112].mxu0  ;;  %v19300_v6 = vpop.f32.mrb[112].mxu1 }
 0x288   : > { %21191 = vst [vmem:[#allocation182_spill] sm:$0xff] %v19298_v55  ;;  %21192 = vst [vmem:[#allocation183_spill] sm:$0xff] %v19300_v6  ;;  %v19304_v42 = vpop.f32.mrb[113].mxu0  ;;  %v19306_v54 = vpop.f32.mrb[113].mxu1 }
 0x289   : > { %21193 = vst [vmem:[#allocation184_spill] sm:$0xff] %v19304_v42  ;;  %21194 = vst [vmem:[#allocation185_spill] sm:$0xff] %v19306_v54  ;;  %v19312_v50 = vpop.f32.mrb[114].mxu0  ;;  %v19314_v26 = vpop.f32.mrb[114].mxu1  ;;  %v17284_v42 = vld [vmem:[%s18180_s6 + $0x648] sm:$0xff]  }
 0x28a   : > { %21195 = vst [vmem:[#allocation186_spill] sm:$0xff] %v19312_v50  ;;  %21196 = vst [vmem:[#allocation187_spill] sm:$0xff] %v19314_v26  ;;  %v19320_v6 = vpop.f32.mrb[115].mxu0  ;;  %v19322_v55 = vpop.f32.mrb[115].mxu1 }
 0x28b   : > { %21197 = vst [vmem:[#allocation188_spill] sm:$0xff] %v19320_v6  ;;  %21198 = vst [vmem:[#allocation189_spill] sm:$0xff] %v19322_v55  ;;  %v17281_v55 = vld [vmem:[%s18180_s6 + $0x8e8] sm:$0xff]   ;;  %v17283_v6 = vld [vmem:[%s18180_s6 + $0x8f0] sm:$0xff]  }
 0x28c   : > { %16726 = vmatmul.mubr.msk.bf16.gmra.mrb[220].mxu0 %vm6363_vm2, %v17276_v2  ;;  %16902 = vmatmul.mubr.msk.bf16.gmra.mrb[220].mxu1 %vm6363_vm2, %v17277_v18 }
 0x28d   : > { %16729 = vmatprep.mubr.msk.bf16.mxu0 %vm6363_vm2, %v17278_v27  ;;  %16905 = vmatprep.mubr.msk.bf16.mxu1 %vm6363_vm2, %v17279_v23  ;;  %v17282_v23 = vld [vmem:[%s18180_s6 + $0x640] sm:$0xff]  }
 0x28f   : > { %v19330_v37 = vpop.f32.mrb[116].mxu0  ;;  %v19332_v34 = vpop.f32.mrb[116].mxu1 }
 0x290   : > { %21199 = vst [vmem:[#allocation190_spill] sm:$0xff] %v19330_v37  ;;  %21200 = vst [vmem:[#allocation191_spill] sm:$0xff] %v19332_v34  ;;  %v19336_v50 = vpop.f32.mrb[117].mxu0  ;;  %v19338_v54 = vpop.f32.mrb[117].mxu1 }
 0x291   : > { %21201 = vst [vmem:[#allocation192_spill] sm:$0xff] %v19336_v50  ;;  %21202 = vst [vmem:[#allocation193_spill] sm:$0xff] %v19338_v54  ;;  %v19344_v18 = vpop.f32.mrb[118].mxu0  ;;  %v19346_v27 = vpop.f32.mrb[118].mxu1  ;;  %v17288_v50 = vld [vmem:[%s18180_s6 + $0x658] sm:$0xff]  }
 0x292   : > { %21203 = vst [vmem:[#allocation194_spill] sm:$0xff] %v19344_v18  ;;  %21204 = vst [vmem:[#allocation195_spill] sm:$0xff] %v19346_v27  ;;  %v19352_v34 = vpop.f32.mrb[119].mxu0  ;;  %v19354_v37 = vpop.f32.mrb[119].mxu1 }
 0x293   : > { %21205 = vst [vmem:[#allocation196_spill] sm:$0xff] %v19352_v34  ;;  %21206 = vst [vmem:[#allocation197_spill] sm:$0xff] %v19354_v37  ;;  %v17285_v37 = vld [vmem:[%s18180_s6 + $0x8f8] sm:$0xff]   ;;  %v17287_v34 = vld [vmem:[%s18180_s6 + $0x900] sm:$0xff]  }
 0x294   : > { %16730 = vmatmul.mubr.msk.bf16.gmra.mrb[224].mxu0 %vm6363_vm2, %v17280_v53  ;;  %16906 = vmatmul.mubr.msk.bf16.gmra.mrb[224].mxu1 %vm6363_vm2, %v17281_v55 }
 0x295   : > { %16733 = vmatprep.mubr.msk.bf16.mxu0 %vm6363_vm2, %v17282_v23  ;;  %16909 = vmatprep.mubr.msk.bf16.mxu1 %vm6363_vm2, %v17283_v6  ;;  %v17286_v6 = vld [vmem:[%s18180_s6 + $0x650] sm:$0xff]  }
 0x297   : > { %v19362_v2 = vpop.f32.mrb[120].mxu0  ;;  %v19364_v26 = vpop.f32.mrb[120].mxu1 }
 0x298   : > { %21207 = vst [vmem:[#allocation198_spill] sm:$0xff] %v19362_v2  ;;  %21208 = vst [vmem:[#allocation199_spill] sm:$0xff] %v19364_v26  ;;  %v19368_v18 = vpop.f32.mrb[121].mxu0  ;;  %v19370_v54 = vpop.f32.mrb[121].mxu1 }
 0x299   : > { %21209 = vst [vmem:[#allocation200_spill] sm:$0xff] %v19368_v18  ;;  %21210 = vst [vmem:[#allocation201_spill] sm:$0xff] %v19370_v54  ;;  %v19376_v55 = vpop.f32.mrb[122].mxu0  ;;  %v19378_v23 = vpop.f32.mrb[122].mxu1  ;;  %v17292_v18 = vld [vmem:[%s18180_s6 + $0x668] sm:$0xff]  }
 0x29a   : > { %21211 = vst [vmem:[#allocation202_spill] sm:$0xff] %v19376_v55  ;;  %21212 = vst [vmem:[#allocation203_spill] sm:$0xff] %v19378_v23  ;;  %v19384_v26 = vpop.f32.mrb[123].mxu0  ;;  %v19386_v2 = vpop.f32.mrb[123].mxu1 }
 0x29b   : > { %21213 = vst [vmem:[#allocation204_spill] sm:$0xff] %v19384_v26  ;;  %21214 = vst [vmem:[#allocation205_spill] sm:$0xff] %v19386_v2  ;;  %v17289_v2 = vld [vmem:[%s18180_s6 + $0x908] sm:$0xff]   ;;  %v17291_v26 = vld [vmem:[%s18180_s6 + $0x910] sm:$0xff]  }
 0x29c   : > { %16734 = vmatmul.mubr.msk.bf16.gmra.mrb[228].mxu0 %vm6363_vm2, %v17284_v42  ;;  %16910 = vmatmul.mubr.msk.bf16.gmra.mrb[228].mxu1 %vm6363_vm2, %v17285_v37 }
 0x29d   : > { %16737 = vmatprep.mubr.msk.bf16.mxu0 %vm6363_vm2, %v17286_v6  ;;  %16913 = vmatprep.mubr.msk.bf16.mxu1 %vm6363_vm2, %v17287_v34  ;;  %v17290_v34 = vld [vmem:[%s18180_s6 + $0x660] sm:$0xff]  }
 0x29f   : > { %v19394_v53 = vpop.f32.mrb[124].mxu0  ;;  %v19396_v27 = vpop.f32.mrb[124].mxu1 }
 0x2a0   : > { %21215 = vst [vmem:[#allocation206_spill] sm:$0xff] %v19394_v53  ;;  %21216 = vst [vmem:[#allocation207_spill] sm:$0xff] %v19396_v27  ;;  %v19400_v55 = vpop.f32.mrb[125].mxu0  ;;  %v19402_v54 = vpop.f32.mrb[125].mxu1 }
 0x2a1   : > { %21217 = vst [vmem:[#allocation208_spill] sm:$0xff] %v19400_v55  ;;  %21218 = vst [vmem:[#allocation209_spill] sm:$0xff] %v19402_v54  ;;  %v19408_v37 = vpop.f32.mrb[126].mxu0  ;;  %v19410_v6 = vpop.f32.mrb[126].mxu1  ;;  %v17296_v55 = vld [vmem:[%s18180_s6 + $0x678] sm:$0xff]  }
 0x2a2   : > { %21219 = vst [vmem:[#allocation210_spill] sm:$0xff] %v19408_v37  ;;  %21220 = vst [vmem:[#allocation211_spill] sm:$0xff] %v19410_v6  ;;  %v19416_v27 = vpop.f32.mrb[127].mxu0  ;;  %v19418_v53 = vpop.f32.mrb[127].mxu1 }
 0x2a3   : > { %21221 = vst [vmem:[#allocation212_spill] sm:$0xff] %v19416_v27  ;;  %21222 = vst [vmem:[#allocation213_spill] sm:$0xff] %v19418_v53  ;;  %v17293_v53 = vld [vmem:[%s18180_s6 + $0x918] sm:$0xff]   ;;  %v17295_v27 = vld [vmem:[%s18180_s6 + $0x920] sm:$0xff]  }
 0x2a4   : > { %16738 = vmatmul.mubr.msk.bf16.gmra.mrb[232].mxu0 %vm6363_vm2, %v17288_v50  ;;  %16914 = vmatmul.mubr.msk.bf16.gmra.mrb[232].mxu1 %vm6363_vm2, %v17289_v2 }
 0x2a5   : > { %16741 = vmatprep.mubr.msk.bf16.mxu0 %vm6363_vm2, %v17290_v34  ;;  %16917 = vmatprep.mubr.msk.bf16.mxu1 %vm6363_vm2, %v17291_v26  ;;  %v17294_v26 = vld [vmem:[%s18180_s6 + $0x670] sm:$0xff]  }
 0x2a7   : > { %v19426_v42 = vpop.f32.mrb[128].mxu0  ;;  %v19428_v23 = vpop.f32.mrb[128].mxu1 }
 0x2a8   : > { %21223 = vst [vmem:[#allocation214_spill] sm:$0xff] %v19426_v42  ;;  %21224 = vst [vmem:[#allocation215_spill] sm:$0xff] %v19428_v23  ;;  %v19432_v37 = vpop.f32.mrb[129].mxu0  ;;  %v19434_v54 = vpop.f32.mrb[129].mxu1 }
 0x2a9   : > { %21225 = vst [vmem:[#allocation216_spill] sm:$0xff] %v19432_v37  ;;  %21226 = vst [vmem:[#allocation217_spill] sm:$0xff] %v19434_v54  ;;  %v19440_v2 = vpop.f32.mrb[130].mxu0  ;;  %v19442_v34 = vpop.f32.mrb[130].mxu1  ;;  %v17300_v37 = vld [vmem:[%s18180_s6 + $0x688] sm:$0xff]  }
 0x2aa   : > { %21227 = vst [vmem:[#allocation218_spill] sm:$0xff] %v19440_v2  ;;  %21228 = vst [vmem:[#allocation219_spill] sm:$0xff] %v19442_v34  ;;  %v19448_v23 = vpop.f32.mrb[131].mxu0  ;;  %v19450_v42 = vpop.f32.mrb[131].mxu1 }
 0x2ab   : > { %21229 = vst [vmem:[#allocation220_spill] sm:$0xff] %v19448_v23  ;;  %21230 = vst [vmem:[#allocation221_spill] sm:$0xff] %v19450_v42  ;;  %v17297_v42 = vld [vmem:[%s18180_s6 + $0x928] sm:$0xff]   ;;  %v17299_v23 = vld [vmem:[%s18180_s6 + $0x930] sm:$0xff]  }
 0x2ac   : > { %16742 = vmatmul.mubr.msk.bf16.gmra.mrb[236].mxu0 %vm6363_vm2, %v17292_v18  ;;  %16918 = vmatmul.mubr.msk.bf16.gmra.mrb[236].mxu1 %vm6363_vm2, %v17293_v53 }
 0x2ad   : > { %16745 = vmatprep.mubr.msk.bf16.mxu0 %vm6363_vm2, %v17294_v26  ;;  %16921 = vmatprep.mubr.msk.bf16.mxu1 %vm6363_vm2, %v17295_v27  ;;  %v17298_v27 = vld [vmem:[%s18180_s6 + $0x680] sm:$0xff]  }
 0x2af   : > { %v19458_v50 = vpop.f32.mrb[132].mxu0  ;;  %v19460_v6 = vpop.f32.mrb[132].mxu1 }
 0x2b0   : > { %21231 = vst [vmem:[#allocation222_spill] sm:$0xff] %v19458_v50  ;;  %21232 = vst [vmem:[#allocation223_spill] sm:$0xff] %v19460_v6  ;;  %v19464_v2 = vpop.f32.mrb[133].mxu0  ;;  %v19466_v54 = vpop.f32.mrb[133].mxu1 }
 0x2b1   : > { %21233 = vst [vmem:[#allocation224_spill] sm:$0xff] %v19464_v2  ;;  %21234 = vst [vmem:[#allocation225_spill] sm:$0xff] %v19466_v54  ;;  %v19472_v53 = vpop.f32.mrb[134].mxu0  ;;  %v19474_v26 = vpop.f32.mrb[134].mxu1  ;;  %v17304_v2 = vld [vmem:[%s18180_s6 + $0x698] sm:$0xff]  }
 0x2b2   : > { %21235 = vst [vmem:[#allocation226_spill] sm:$0xff] %v19472_v53  ;;  %21236 = vst [vmem:[#allocation227_spill] sm:$0xff] %v19474_v26  ;;  %v19480_v6 = vpop.f32.mrb[135].mxu0  ;;  %v19482_v50 = vpop.f32.mrb[135].mxu1 }
 0x2b3   : > { %21237 = vst [vmem:[#allocation228_spill] sm:$0xff] %v19480_v6  ;;  %21238 = vst [vmem:[#allocation229_spill] sm:$0xff] %v19482_v50  ;;  %v17301_v50 = vld [vmem:[%s18180_s6 + $0x938] sm:$0xff]   ;;  %v17303_v6 = vld [vmem:[%s18180_s6 + $0x940] sm:$0xff]  }
 0x2b4   : > { %16746 = vmatmul.mubr.msk.bf16.gmra.mrb[240].mxu0 %vm6363_vm2, %v17296_v55  ;;  %16922 = vmatmul.mubr.msk.bf16.gmra.mrb[240].mxu1 %vm6363_vm2, %v17297_v42 }
 0x2b5   : > { %16749 = vmatprep.mubr.msk.bf16.mxu0 %vm6363_vm2, %v17298_v27  ;;  %16925 = vmatprep.mubr.msk.bf16.mxu1 %vm6363_vm2, %v17299_v23  ;;  %v17302_v23 = vld [vmem:[%s18180_s6 + $0x690] sm:$0xff]  }
 0x2b7   : > { %v19490_v18 = vpop.f32.mrb[136].mxu0  ;;  %v19492_v34 = vpop.f32.mrb[136].mxu1 }
 0x2b8   : > { %21239 = vst [vmem:[#allocation230_spill] sm:$0xff] %v19490_v18  ;;  %21240 = vst [vmem:[#allocation231_spill] sm:$0xff] %v19492_v34  ;;  %v19496_v53 = vpop.f32.mrb[137].mxu0  ;;  %v19498_v54 = vpop.f32.mrb[137].mxu1 }
 0x2b9   : > { %21241 = vst [vmem:[#allocation232_spill] sm:$0xff] %v19496_v53  ;;  %21242 = vst [vmem:[#allocation233_spill] sm:$0xff] %v19498_v54  ;;  %v19504_v42 = vpop.f32.mrb[138].mxu0  ;;  %v19506_v27 = vpop.f32.mrb[138].mxu1  ;;  %v17308_v53 = vld [vmem:[%s18180_s6 + $0x6a8] sm:$0xff]  }
 0x2ba   : > { %21243 = vst [vmem:[#allocation234_spill] sm:$0xff] %v19504_v42  ;;  %21244 = vst [vmem:[#allocation235_spill] sm:$0xff] %v19506_v27  ;;  %v19512_v34 = vpop.f32.mrb[139].mxu0  ;;  %v19514_v18 = vpop.f32.mrb[139].mxu1 }
 0x2bb   : > { %21245 = vst [vmem:[#allocation236_spill] sm:$0xff] %v19512_v34  ;;  %21246 = vst [vmem:[#allocation237_spill] sm:$0xff] %v19514_v18  ;;  %v17305_v18 = vld [vmem:[%s18180_s6 + $0x948] sm:$0xff]   ;;  %v17307_v34 = vld [vmem:[%s18180_s6 + $0x950] sm:$0xff]  }
 0x2bc   : > { %16750 = vmatmul.mubr.msk.bf16.gmra.mrb[244].mxu0 %vm6363_vm2, %v17300_v37  ;;  %16926 = vmatmul.mubr.msk.bf16.gmra.mrb[244].mxu1 %vm6363_vm2, %v17301_v50 }
 0x2bd   : > { %16753 = vmatprep.mubr.msk.bf16.mxu0 %vm6363_vm2, %v17302_v23  ;;  %16929 = vmatprep.mubr.msk.bf16.mxu1 %vm6363_vm2, %v17303_v6  ;;  %v17306_v6 = vld [vmem:[%s18180_s6 + $0x6a0] sm:$0xff]  }
 0x2bf   : > { %v19522_v55 = vpop.f32.mrb[140].mxu0  ;;  %v19524_v26 = vpop.f32.mrb[140].mxu1 }
 0x2c0   : > { %21247 = vst [vmem:[#allocation238_spill] sm:$0xff] %v19522_v55  ;;  %21248 = vst [vmem:[#allocation239_spill] sm:$0xff] %v19524_v26  ;;  %v19528_v42 = vpop.f32.mrb[141].mxu0  ;;  %v19530_v54 = vpop.f32.mrb[141].mxu1 }
 0x2c1   : > { %21249 = vst [vmem:[#allocation240_spill] sm:$0xff] %v19528_v42  ;;  %21250 = vst [vmem:[#allocation241_spill] sm:$0xff] %v19530_v54  ;;  %v19536_v50 = vpop.f32.mrb[142].mxu0  ;;  %v19538_v23 = vpop.f32.mrb[142].mxu1  ;;  %v17312_v42 = vld [vmem:[%s18180_s6 + $0x6b8] sm:$0xff]  }
 0x2c2   : > { %21251 = vst [vmem:[#allocation242_spill] sm:$0xff] %v19536_v50  ;;  %21252 = vst [vmem:[#allocation243_spill] sm:$0xff] %v19538_v23  ;;  %v19544_v26 = vpop.f32.mrb[143].mxu0  ;;  %v19546_v55 = vpop.f32.mrb[143].mxu1 }
 0x2c3   : > { %21253 = vst [vmem:[#allocation244_spill] sm:$0xff] %v19544_v26  ;;  %21254 = vst [vmem:[#allocation245_spill] sm:$0xff] %v19546_v55  ;;  %v17309_v55 = vld [vmem:[%s18180_s6 + $0x958] sm:$0xff]   ;;  %v17311_v26 = vld [vmem:[%s18180_s6 + $0x960] sm:$0xff]  }
 0x2c4   : > { %16754 = vmatmul.mubr.msk.bf16.gmra.mrb[248].mxu0 %vm6363_vm2, %v17304_v2  ;;  %16930 = vmatmul.mubr.msk.bf16.gmra.mrb[248].mxu1 %vm6363_vm2, %v17305_v18 }
 0x2c5   : > { %16757 = vmatprep.mubr.msk.bf16.mxu0 %vm6363_vm2, %v17306_v6  ;;  %16933 = vmatprep.mubr.msk.bf16.mxu1 %vm6363_vm2, %v17307_v34  ;;  %v17310_v34 = vld [vmem:[%s18180_s6 + $0x6b0] sm:$0xff]  }
 0x2c7   : > { %v19554_v37 = vpop.f32.mrb[144].mxu0  ;;  %v19556_v27 = vpop.f32.mrb[144].mxu1 }
 0x2c8   : > { %21255 = vst [vmem:[#allocation246_spill] sm:$0xff] %v19554_v37  ;;  %21256 = vst [vmem:[#allocation247_spill] sm:$0xff] %v19556_v27  ;;  %v19560_v50 = vpop.f32.mrb[145].mxu0  ;;  %v19562_v54 = vpop.f32.mrb[145].mxu1 }
 0x2c9   : > { %21257 = vst [vmem:[#allocation248_spill] sm:$0xff] %v19560_v50  ;;  %21258 = vst [vmem:[#allocation249_spill] sm:$0xff] %v19562_v54  ;;  %v19568_v18 = vpop.f32.mrb[146].mxu0  ;;  %v19570_v6 = vpop.f32.mrb[146].mxu1  ;;  %v17316_v50 = vld [vmem:[%s18180_s6 + $0x6c8] sm:$0xff]  }
 0x2ca   : > { %21259 = vst [vmem:[#allocation250_spill] sm:$0xff] %v19568_v18  ;;  %21260 = vst [vmem:[#allocation251_spill] sm:$0xff] %v19570_v6  ;;  %v19576_v27 = vpop.f32.mrb[147].mxu0  ;;  %v19578_v37 = vpop.f32.mrb[147].mxu1 }
 0x2cb   : > { %21261 = vst [vmem:[#allocation252_spill] sm:$0xff] %v19576_v27  ;;  %21262 = vst [vmem:[#allocation253_spill] sm:$0xff] %v19578_v37  ;;  %v17313_v37 = vld [vmem:[%s18180_s6 + $0x968] sm:$0xff]   ;;  %v17315_v27 = vld [vmem:[%s18180_s6 + $0x970] sm:$0xff]  }
 0x2cc   : > { %16758 = vmatmul.mubr.msk.bf16.gmra.mrb[252].mxu0 %vm6363_vm2, %v17308_v53  ;;  %16934 = vmatmul.mubr.msk.bf16.gmra.mrb[252].mxu1 %vm6363_vm2, %v17309_v55 }
 0x2cd   : > { %16761 = vmatprep.mubr.msk.bf16.mxu0 %vm6363_vm2, %v17310_v34  ;;  %16937 = vmatprep.mubr.msk.bf16.mxu1 %vm6363_vm2, %v17311_v26  ;;  %v17314_v26 = vld [vmem:[%s18180_s6 + $0x6c0] sm:$0xff]  }
 0x2cf   : > { %v19586_v2 = vpop.f32.mrb[148].mxu0  ;;  %v19588_v23 = vpop.f32.mrb[148].mxu1 }
 0x2d0   : > { %21263 = vst [vmem:[#allocation254_spill] sm:$0xff] %v19586_v2  ;;  %21264 = vst [vmem:[#allocation255_spill] sm:$0xff] %v19588_v23  ;;  %v19592_v18 = vpop.f32.mrb[149].mxu0  ;;  %v19594_v54 = vpop.f32.mrb[149].mxu1 }
 0x2d1   : > { %21265 = vst [vmem:[#allocation256_spill] sm:$0xff] %v19592_v18  ;;  %21266 = vst [vmem:[#allocation257_spill] sm:$0xff] %v19594_v54  ;;  %v19600_v55 = vpop.f32.mrb[150].mxu0  ;;  %v19602_v34 = vpop.f32.mrb[150].mxu1  ;;  %v17320_v18 = vld [vmem:[%s18180_s6 + $0x6d8] sm:$0xff]  }
 0x2d2   : > { %21267 = vst [vmem:[#allocation258_spill] sm:$0xff] %v19600_v55  ;;  %21268 = vst [vmem:[#allocation259_spill] sm:$0xff] %v19602_v34  ;;  %v19608_v23 = vpop.f32.mrb[151].mxu0  ;;  %v19610_v2 = vpop.f32.mrb[151].mxu1 }
 0x2d3   : > { %21269 = vst [vmem:[#allocation260_spill] sm:$0xff] %v19608_v23  ;;  %21270 = vst [vmem:[#allocation261_spill] sm:$0xff] %v19610_v2  ;;  %v17317_v2 = vld [vmem:[%s18180_s6 + $0x978] sm:$0xff]   ;;  %v17319_v23 = vld [vmem:[%s18180_s6 + $0x980] sm:$0xff]  }
 0x2d4   : > { %16762 = vmatmul.mubr.msk.bf16.gmra.mrb[0].mxu0 %vm6363_vm2, %v17312_v42  ;;  %16938 = vmatmul.mubr.msk.bf16.gmra.mrb[0].mxu1 %vm6363_vm2, %v17313_v37 }
 0x2d5   : > { %16765 = vmatprep.mubr.msk.bf16.mxu0 %vm6363_vm2, %v17314_v26  ;;  %16941 = vmatprep.mubr.msk.bf16.mxu1 %vm6363_vm2, %v17315_v27  ;;  %v17318_v27 = vld [vmem:[%s18180_s6 + $0x6d0] sm:$0xff]  }
 0x2d7   : > { %v19618_v53 = vpop.f32.mrb[152].mxu0  ;;  %v19620_v6 = vpop.f32.mrb[152].mxu1 }
 0x2d8   : > { %21271 = vst [vmem:[#allocation262_spill] sm:$0xff] %v19618_v53  ;;  %21272 = vst [vmem:[#allocation263_spill] sm:$0xff] %v19620_v6  ;;  %v19624_v55 = vpop.f32.mrb[153].mxu0  ;;  %v19626_v54 = vpop.f32.mrb[153].mxu1 }
 0x2d9   : > { %21273 = vst [vmem:[#allocation264_spill] sm:$0xff] %v19624_v55  ;;  %21274 = vst [vmem:[#allocation265_spill] sm:$0xff] %v19626_v54  ;;  %v19632_v37 = vpop.f32.mrb[154].mxu0  ;;  %v19634_v26 = vpop.f32.mrb[154].mxu1  ;;  %v17324_v55 = vld [vmem:[%s18180_s6 + $0x6e8] sm:$0xff]  }
 0x2da   : > { %21275 = vst [vmem:[#allocation266_spill] sm:$0xff] %v19632_v37  ;;  %21276 = vst [vmem:[#allocation267_spill] sm:$0xff] %v19634_v26  ;;  %v19640_v6 = vpop.f32.mrb[155].mxu0  ;;  %v19642_v53 = vpop.f32.mrb[155].mxu1 }
 0x2db   : > { %21277 = vst [vmem:[#allocation268_spill] sm:$0xff] %v19640_v6  ;;  %21278 = vst [vmem:[#allocation269_spill] sm:$0xff] %v19642_v53  ;;  %v17321_v53 = vld [vmem:[%s18180_s6 + $0x988] sm:$0xff]   ;;  %v17323_v6 = vld [vmem:[%s18180_s6 + $0x990] sm:$0xff]  }
 0x2dc   : > { %16766 = vmatmul.mubr.msk.bf16.gmra.mrb[4].mxu0 %vm6363_vm2, %v17316_v50  ;;  %16942 = vmatmul.mubr.msk.bf16.gmra.mrb[4].mxu1 %vm6363_vm2, %v17317_v2 }
 0x2dd   : > { %16769 = vmatprep.mubr.msk.bf16.mxu0 %vm6363_vm2, %v17318_v27  ;;  %16945 = vmatprep.mubr.msk.bf16.mxu1 %vm6363_vm2, %v17319_v23  ;;  %v17322_v23 = vld [vmem:[%s18180_s6 + $0x6e0] sm:$0xff]  }
 0x2df   : > { %v19650_v42 = vpop.f32.mrb[156].mxu0  ;;  %v19652_v34 = vpop.f32.mrb[156].mxu1 }
 0x2e0   : > { %21279 = vst [vmem:[#allocation270_spill] sm:$0xff] %v19650_v42  ;;  %21280 = vst [vmem:[#allocation271_spill] sm:$0xff] %v19652_v34  ;;  %v19656_v37 = vpop.f32.mrb[157].mxu0  ;;  %v19658_v54 = vpop.f32.mrb[157].mxu1 }
 0x2e1   : > { %21281 = vst [vmem:[#allocation272_spill] sm:$0xff] %v19656_v37  ;;  %21282 = vst [vmem:[#allocation273_spill] sm:$0xff] %v19658_v54  ;;  %v19664_v2 = vpop.f32.mrb[158].mxu0  ;;  %v19666_v27 = vpop.f32.mrb[158].mxu1  ;;  %v17328_v37 = vld [vmem:[%s18180_s6 + $0x6f8] sm:$0xff]  }
 0x2e2   : > { %21283 = vst [vmem:[#allocation274_spill] sm:$0xff] %v19664_v2  ;;  %21284 = vst [vmem:[#allocation275_spill] sm:$0xff] %v19666_v27  ;;  %v19672_v34 = vpop.f32.mrb[159].mxu0  ;;  %v19674_v42 = vpop.f32.mrb[159].mxu1 }
 0x2e3   : > { %21285 = vst [vmem:[#allocation276_spill] sm:$0xff] %v19672_v34  ;;  %21286 = vst [vmem:[#allocation277_spill] sm:$0xff] %v19674_v42  ;;  %v17325_v42 = vld [vmem:[%s18180_s6 + $0x998] sm:$0xff]   ;;  %v17327_v34 = vld [vmem:[%s18180_s6 + $0x9a0] sm:$0xff]  }
 0x2e4   : > { %16770 = vmatmul.mubr.msk.bf16.gmra.mrb[8].mxu0 %vm6363_vm2, %v17320_v18  ;;  %16946 = vmatmul.mubr.msk.bf16.gmra.mrb[8].mxu1 %vm6363_vm2, %v17321_v53 }
 0x2e5   : > { %16773 = vmatprep.mubr.msk.bf16.mxu0 %vm6363_vm2, %v17322_v23  ;;  %16949 = vmatprep.mubr.msk.bf16.mxu1 %vm6363_vm2, %v17323_v6  ;;  %v17326_v6 = vld [vmem:[%s18180_s6 + $0x6f0] sm:$0xff]  }
 0x2e7   : > { %v19682_v50 = vpop.f32.mrb[160].mxu0  ;;  %v19684_v26 = vpop.f32.mrb[160].mxu1 }
 0x2e8   : > { %21287 = vst [vmem:[#allocation278_spill] sm:$0xff] %v19682_v50  ;;  %21288 = vst [vmem:[#allocation279_spill] sm:$0xff] %v19684_v26  ;;  %v19688_v2 = vpop.f32.mrb[161].mxu0  ;;  %v19690_v54 = vpop.f32.mrb[161].mxu1 }
 0x2e9   : > { %21289 = vst [vmem:[#allocation280_spill] sm:$0xff] %v19688_v2  ;;  %21290 = vst [vmem:[#allocation281_spill] sm:$0xff] %v19690_v54  ;;  %v19696_v53 = vpop.f32.mrb[162].mxu0  ;;  %v19698_v23 = vpop.f32.mrb[162].mxu1 }
 0x2ea   : > { %21291 = vst [vmem:[#allocation282_spill] sm:$0xff] %v19696_v53  ;;  %21292 = vst [vmem:[#allocation283_spill] sm:$0xff] %v19698_v23  ;;  %v19704_v26 = vpop.f32.mrb[163].mxu0  ;;  %v19706_v50 = vpop.f32.mrb[163].mxu1 }
 0x2eb   : > { %21293 = vst [vmem:[#allocation284_spill] sm:$0xff] %v19704_v26  ;;  %21294 = vst [vmem:[#allocation285_spill] sm:$0xff] %v19706_v50  ;;  %v17329_v50 = vld [vmem:[%s18180_s6 + $0x9a8] sm:$0xff]   ;;  %v17331_v26 = vld [vmem:[%s18180_s6 + $0x9b0] sm:$0xff]  }
 0x2ec   : > { %16774 = vmatmul.mubr.msk.bf16.gmra.mrb[12].mxu0 %vm6363_vm2, %v17324_v55  ;;  %16950 = vmatmul.mubr.msk.bf16.gmra.mrb[12].mxu1 %vm6363_vm2, %v17325_v42 }
 0x2ed   : > { %16777 = vmatprep.mubr.msk.bf16.mxu0 %vm6363_vm2, %v17326_v6  ;;  %16953 = vmatprep.mubr.msk.bf16.mxu1 %vm6363_vm2, %v17327_v34  ;;  %v17330_v34 = vld [vmem:[%s18180_s6 + $0x700] sm:$0xff]  }
 0x2ef   : > { %v19714_v18 = vpop.f32.mrb[164].mxu0  ;;  %v19716_v27 = vpop.f32.mrb[164].mxu1 }
 0x2f0   : > { %21295 = vst [vmem:[#allocation286_spill] sm:$0xff] %v19714_v18  ;;  %21296 = vst [vmem:[#allocation287_spill] sm:$0xff] %v19716_v27  ;;  %v19720_v53 = vpop.f32.mrb[165].mxu0  ;;  %v19722_v54 = vpop.f32.mrb[165].mxu1 }
 0x2f1   : > { %21297 = vst [vmem:[#allocation288_spill] sm:$0xff] %v19720_v53  ;;  %21298 = vst [vmem:[#allocation289_spill] sm:$0xff] %v19722_v54  ;;  %v19728_v42 = vpop.f32.mrb[166].mxu0  ;;  %v19730_v6 = vpop.f32.mrb[166].mxu1  ;;  %v17335_v54 = vld [vmem:[%s18180_s6 + $0x9c0] sm:$0xff]  }
 0x2f2   : > { %21299 = vst [vmem:[#allocation290_spill] sm:$0xff] %v19728_v42  ;;  %21300 = vst [vmem:[#allocation291_spill] sm:$0xff] %v19730_v6  ;;  %v19736_v27 = vpop.f32.mrb[167].mxu0  ;;  %v19738_v18 = vpop.f32.mrb[167].mxu1 }
 0x2f3   : > { %21301 = vst [vmem:[#allocation292_spill] sm:$0xff] %v19736_v27  ;;  %21302 = vst [vmem:[#allocation293_spill] sm:$0xff] %v19738_v18  ;;  %v17332_v18 = vld [vmem:[%s18180_s6 + $0x708] sm:$0xff]   ;;  %v17334_v27 = vld [vmem:[%s18180_s6 + $0x710] sm:$0xff]  }
 0x2f4   : > { %16778 = vmatmul.mubr.msk.bf16.gmra.mrb[16].mxu0 %vm6363_vm2, %v17328_v37  ;;  %16954 = vmatmul.mubr.msk.bf16.gmra.mrb[16].mxu1 %vm6363_vm2, %v17329_v50  ;;  %v17333_v37 = vld [vmem:[%s18180_s6 + $0x9b8] sm:$0xff]  }
 0x2f5   : > { %16781 = vmatprep.mubr.msk.bf16.mxu0 %vm6363_vm2, %v17330_v34  ;;  %16957 = vmatprep.mubr.msk.bf16.mxu1 %vm6363_vm2, %v17331_v26  ;;  %v17336_v50 = vld [vmem:[%s18180_s6 + $0x718] sm:$0xff]  }
 0x2f7   : > { %v19746_v55 = vpop.f32.mrb[168].mxu0  ;;  %v19748_v23 = vpop.f32.mrb[168].mxu1 }
 0x2f8   : > { %21303 = vst [vmem:[#allocation294_spill] sm:$0xff] %v19746_v55  ;;  %21304 = vst [vmem:[#allocation295_spill] sm:$0xff] %v19748_v23  ;;  %v19752_v42 = vpop.f32.mrb[169].mxu0  ;;  %v19754_v2 = vpop.f32.mrb[169].mxu1 }
 0x2f9   : > { %21305 = vst [vmem:[#allocation296_spill] sm:$0xff] %v19752_v42  ;;  %21306 = vst [vmem:[#allocation297_spill] sm:$0xff] %v19754_v2  ;;  %v19760_v34 = vpop.f32.mrb[170].mxu0  ;;  %v19762_v26 = vpop.f32.mrb[170].mxu1 }
 0x2fa   : > { %21307 = vst [vmem:[#allocation298_spill] sm:$0xff] %v19760_v34  ;;  %21308 = vst [vmem:[#allocation299_spill] sm:$0xff] %v19762_v26  ;;  %v19768_v6 = vpop.f32.mrb[171].mxu0  ;;  %v19770_v23 = vpop.f32.mrb[171].mxu1  ;;  %v21311_v34 = vmax.f32 %v18404_v14, %v18406_v15  ;;  %v21313_v14 = vmax.f32 %v18414_v19, %v18416_v20 }
 0x2fb   : > { %21309 = vst [vmem:[#allocation300_spill] sm:$0xff] %v19768_v6  ;;  %21310 = vst [vmem:[#allocation301_spill] sm:$0xff] %v19770_v23  ;;  %v17337_v23 = vld [vmem:[%s18180_s6 + $0x9c8] sm:$0xff]  }
 0x2fc   : > { %16782 = vmatmul.mubr.msk.bf16.gmra.mrb[20].mxu0 %vm6363_vm2, %v17332_v18  ;;  %16958 = vmatmul.mubr.msk.bf16.gmra.mrb[20].mxu1 %vm6363_vm2, %v17333_v37  ;;  %v19788_v18 = vld [vmem:[%s20711_s2] ss:$0 sm:$0xff] }
 0x2fd   : > { %16785 = vmatprep.mubr.msk.bf16.mxu0 %vm6363_vm2, %v17334_v27  ;;  %16961 = vmatprep.mubr.msk.bf16.mxu1 %vm6363_vm2, %v17335_v54  ;;  %v21312_v27 = vmax.f32 %v18408_v16, %v18410_v17 }
 0x2ff   : > { %v16679_v53 = vpop.f32.mrb[172].mxu0  ;;  %v16855_v26 = vpop.f32.mrb[172].mxu1 }
 0x300   : > { %v10688_v2 = vmax.f32 %v21311_v34, %v16679_v53  ;;  %v9999_v42 = vpop.f32.mrb[173].mxu0  ;;  %v11753_v55 = vpop.f32.mrb[173].mxu1 }
 0x301   : > { %v10686_v54 = vmax.f32 %v21312_v27, %v9999_v42  ;;  %v16680_v37 = vpop.f32.mrb[174].mxu0  ;;  %v16856_v6 = vpop.f32.mrb[174].mxu1 }
 0x302   : > { %v12442_v43 = vmax.f32 %v10688_v2, %v16855_v26  ;;  %v10689_v15 = vmax.f32 %v21313_v14, %v16680_v37  ;;  %v10002_v53 = vpop.f32.mrb[175].mxu0  ;;  %v11756_v34 = vpop.f32.mrb[175].mxu1  ;;  %v21316_v26 = vmax.f32 %v18440_v32, %v18442_v33 }
 0x303   : > { %v12440_v58 = vmax.f32 %v10686_v54, %v11753_v55  ;;  %v10687_v45 = vmax.f32 %v21314_v59, %v10002_v53  ;;  %v21317_v53 = vmax.f32 %v18446_v35, %v18448_v36 }
 0x304   : > { %v12621_v16 = vadd.f32 %v19788_v18, %v12442_v43  ;;  %v12443_v17 = vmax.f32 %v10689_v15, %v16856_v6  ;;  %16786 = vmatmul.mubr.msk.bf16.gmra.mrb[24].mxu0 %vm6363_vm2, %v17336_v50  ;;  %16962 = vmatmul.mubr.msk.bf16.gmra.mrb[24].mxu1 %vm6363_vm2, %v17337_v23  ;;  %v21315_v23 = vmax.f32 %v18436_v30, %v18438_v31  ;;  %v17341_v6 = vld [vmem:[%s18180_s6 + $0x9d8] sm:$0xff]   ;;  %v17342_v30 = vld [vmem:[%s18180_s6 + $0x730] sm:$0xff]   ;;  %v17343_v31 = vld [vmem:[%s18180_s6 + $0x9e0] sm:$0xff]  }
 0x305   : > { %v12619_v19 = vadd.f32 %v19788_v18, %v12440_v58  ;;  %v12441_v20 = vmax.f32 %v10687_v45, %v11756_v34  ;;  %16789 = vmatprep.mubr.msk.bf16.mxu0 %vm6363_vm2, %v17338_v39  ;;  %16965 = vmatprep.mubr.msk.bf16.mxu1 %vm6363_vm2, %v17339_v12  ;;  %v17340_v39 = vld [vmem:[%s18180_s6 + $0x728] sm:$0xff]  }
 0x306   : > { %v12622_v24 = vadd.f32 %v19788_v18, %v12443_v17  ;;  %v12793_v2 = vmax.f32 %v12621_v16, 0.0 }
 0x307   : > { %v12620_v25 = vadd.f32 %v19788_v18, %v12441_v20  ;;  %v16683_v43 = vpop.f32.mrb[176].mxu0  ;;  %v16859_v59 = vpop.f32.mrb[176].mxu1  ;;  %v12791_v12 = vmax.f32 %v12619_v19, 0.0 }
 0x308   : > { %v12794_v55 = vmax.f32 %v12622_v24, 0.0  ;;  %v10692_v58 = vmax.f32 %v21315_v23, %v16683_v43  ;;  %v10015_v45 = vpop.f32.mrb[177].mxu0  ;;  %v11769_v42 = vpop.f32.mrb[177].mxu1  ;;  %v21318_v24 = vmax.f32 %v18454_v40, %v18456_v41  ;;  %v21319_v23 = vmax.f32 %v18468_v46, %v18470_v47 }
 0x309   : > { %v12792_v50 = vmax.f32 %v12620_v25, 0.0  ;;  %v10690_v27 = vmax.f32 %v21316_v26, %v10015_v45  ;;  %v16684_v54 = vpop.f32.mrb[178].mxu0  ;;  %v16860_v37 = vpop.f32.mrb[178].mxu1  ;;  %v21320_v26 = vmax.f32 %v18472_v48, %v18474_v49  ;;  %v21321_v46 = vmax.f32 %v18478_v51, %v18480_v52 }
 0x30a   : > { %v15462_v14 = vpack.c.bf16 %v12794_v55, %v12793_v2  ;;  %v12446_v15 = vmax.f32 %v10692_v58, %v16859_v59  ;;  %v10693_v34 = vmax.f32 %v21317_v53, %v16684_v54  ;;  %v10018_v16 = vpop.f32.mrb[179].mxu0  ;;  %v11772_v17 = vpop.f32.mrb[179].mxu1 }
 0x30b   : > { %v15457_v19 = vpack.c.bf16 %v12792_v50, %v12791_v12  ;;  %v12444_v20 = vmax.f32 %v10690_v27, %v11769_v42  ;;  %v10691_v32 = vmax.f32 %v21318_v24, %v10018_v16 }
 0x30c   : > { %15884 = vst [vmem:[%s19818_s14 + $0x8] sm:$0xff] %v15462_v14   ;;  %v12625_v33 = vadd.f32 %v19788_v18, %v12446_v15  ;;  %v12447_v25 = vmax.f32 %v10693_v34, %v16860_v37  ;;  %16790 = vmatmul.mubr.msk.bf16.gmra.mrb[28].mxu0 %vm6363_vm2, %v17340_v39  ;;  %16966 = vmatmul.mubr.msk.bf16.gmra.mrb[28].mxu1 %vm6363_vm2, %v17341_v6  ;;  %v17344_v39 = vld [vmem:[%s18180_s6 + $0x738] sm:$0xff]   ;;  %v17345_v6 = vld [vmem:[%s18180_s6 + $0x9e8] sm:$0xff]  }
 0x30d   : > { %15458 = vst [vmem:[%s19818_s14] sm:$0xff] %v15457_v19   ;;  %v12623_v35 = vadd.f32 %v19788_v18, %v12444_v20  ;;  %v12445_v36 = vmax.f32 %v10691_v32, %v11772_v17  ;;  %16793 = vmatprep.mubr.msk.bf16.mxu0 %vm6363_vm2, %v17342_v30  ;;  %16969 = vmatprep.mubr.msk.bf16.mxu1 %vm6363_vm2, %v17343_v31  ;;  %v17346_v30 = vld [vmem:[%s18180_s6 + $0x740] sm:$0xff]   ;;  %v17347_v31 = vld [vmem:[%s18180_s6 + $0x9f0] sm:$0xff]  }
 0x30e   : > { %v12626_v40 = vadd.f32 %v19788_v18, %v12447_v25  ;;  %v12797_v2 = vmax.f32 %v12625_v33, 0.0  ;;  %v21322_v19 = vmax.f32 %v18486_v56, %v18488_v57 }
 0x30f   : > { %v12624_v41 = vadd.f32 %v19788_v18, %v12445_v36  ;;  %v16687_v43 = vpop.f32.mrb[180].mxu0  ;;  %v16863_v59 = vpop.f32.mrb[180].mxu1  ;;  %v12795_v12 = vmax.f32 %v12623_v35, 0.0  ;;  %v21323_v35 = vmax.f32 %v18500_v62, %v18502_v63  ;;  %v21325_v62 = vmax.f32 %v18510_v3, %v18512_v4 }
 0x310   : > { %v12798_v55 = vmax.f32 %v12626_v40, 0.0  ;;  %v10696_v58 = vmax.f32 %v21319_v23, %v16687_v43  ;;  %v10031_v45 = vpop.f32.mrb[181].mxu0  ;;  %v11785_v42 = vpop.f32.mrb[181].mxu1  ;;  %v17348_v43 = vld [vmem:[%s18180_s6 + $0x748] sm:$0xff]   ;;  %v21324_v23 = vmax.f32 %v18504_v0, %v18506_v1 }
 0x311   : > { %v12796_v50 = vmax.f32 %v12624_v41, 0.0  ;;  %v10694_v27 = vmax.f32 %v21320_v26, %v10031_v45  ;;  %v16688_v54 = vpop.f32.mrb[182].mxu0  ;;  %v16864_v37 = vpop.f32.mrb[182].mxu1 }
 0x312   : > { %v15472_v14 = vpack.c.bf16 %v12798_v55, %v12797_v2  ;;  %v12450_v15 = vmax.f32 %v10696_v58, %v16863_v59  ;;  %v10697_v47 = vmax.f32 %v21321_v46, %v16688_v54  ;;  %v10034_v53 = vpop.f32.mrb[183].mxu0  ;;  %v11788_v34 = vpop.f32.mrb[183].mxu1  ;;  %v17349_v59 = vld [vmem:[%s18180_s6 + $0x9f8] sm:$0xff]  }
 0x313   : > { %v15467_v16 = vpack.c.bf16 %v12796_v50, %v12795_v12  ;;  %v12448_v17 = vmax.f32 %v10694_v27, %v11785_v42  ;;  %v10695_v48 = vmax.f32 %v21322_v19, %v10034_v53  ;;  %v21327_v53 = vmax.f32 %v18532_v21, %v18534_v22  ;;  %v17352_v19 = vld [vmem:[%s18180_s6 + $0x758] sm:$0xff]  }
 0x314   : > { %15886 = vst [vmem:[%s19818_s14 + $0x18] sm:$0xff] %v15472_v14   ;;  %v12629_v49 = vadd.f32 %v19788_v18, %v12450_v15  ;;  %v12451_v20 = vmax.f32 %v10697_v47, %v16864_v37  ;;  %16794 = vmatmul.mubr.msk.bf16.gmra.mrb[32].mxu0 %vm6363_vm2, %v17344_v39  ;;  %16970 = vmatmul.mubr.msk.bf16.gmra.mrb[32].mxu1 %vm6363_vm2, %v17345_v6  ;;  %v17350_v39 = vld [vmem:[%s18180_s6 + $0x750] sm:$0xff]   ;;  %v17351_v6 = vld [vmem:[%s18180_s6 + $0xa00] sm:$0xff]  }
 0x315   : > { %15885 = vst [vmem:[%s19818_s14 + $0x10] sm:$0xff] %v15467_v16   ;;  %v12627_v51 = vadd.f32 %v19788_v18, %v12448_v17  ;;  %v12449_v52 = vmax.f32 %v10695_v48, %v11788_v34  ;;  %16797 = vmatprep.mubr.msk.bf16.mxu0 %vm6363_vm2, %v17346_v30  ;;  %16973 = vmatprep.mubr.msk.bf16.mxu1 %vm6363_vm2, %v17347_v31  ;;  %v17353_v48 = vld [vmem:[%s18180_s6 + $0xa08] sm:$0xff]  }
 0x316   : > { %v12630_v56 = vadd.f32 %v19788_v18, %v12451_v20  ;;  %v12801_v33 = vmax.f32 %v12629_v49, 0.0  ;;  %v21326_v30 = vmax.f32 %v18518_v8, %v18520_v9  ;;  %v21329_v21 = vmax.f32 %v18542_v38, %v18544_v44 }
 0x317   : > { %v12628_v57 = vadd.f32 %v19788_v18, %v12449_v52  ;;  %v16691_v24 = vpop.f32.mrb[184].mxu0  ;;  %v16867_v32 = vpop.f32.mrb[184].mxu1  ;;  %v12799_v2 = vmax.f32 %v12627_v51, 0.0  ;;  %v21328_v51 = vmax.f32 %v18536_v28, %v18538_v29 }
 0x318   : > { %v12802_v25 = vmax.f32 %v12630_v56, 0.0  ;;  %v10700_v36 = vmax.f32 %v21323_v35, %v16691_v24  ;;  %v10047_v40 = vpop.f32.mrb[185].mxu0  ;;  %v11801_v41 = vpop.f32.mrb[185].mxu1  ;;  %v17354_v24 = vld [vmem:[%s18180_s6 + $0x760] sm:$0xff]  }
 0x319   : > { %v12800_v55 = vmax.f32 %v12628_v57, 0.0  ;;  %v10698_v58 = vmax.f32 %v21324_v23, %v10047_v40  ;;  %v16692_v45 = vpop.f32.mrb[186].mxu0  ;;  %v16868_v42 = vpop.f32.mrb[186].mxu1 }
 0x31a   : > { %v15482_v12 = vpack.c.bf16 %v12802_v25, %v12801_v33  ;;  %v12454_v50 = vmax.f32 %v10700_v36, %v16867_v32  ;;  %v10701_v63 = vmax.f32 %v21325_v62, %v16692_v45  ;;  %v10050_v26 = vpop.f32.mrb[187].mxu0  ;;  %v11804_v27 = vpop.f32.mrb[187].mxu1  ;;  %v17355_v32 = vld [vmem:[%s18180_s6 + $0xa10] sm:$0xff]   ;;  %v21331_v45 = vmax.f32 %v18564_v11, %v18566_v10  ;;  %v21333_v10 = vld [vmem:[#allocation3_spill] sm:$0xff] }
 0x31b   : > { %v15477_v54 = vpack.c.bf16 %v12800_v55, %v12799_v2  ;;  %v12452_v37 = vmax.f32 %v10698_v58, %v11801_v41  ;;  %v10699_v0 = vmax.f32 %v21326_v30, %v10050_v26  ;;  %v21332_v26 = vmax.f32 %v18568_v7, %v18570_v5  ;;  %v17358_v30 = vld [vmem:[%s18180_s6 + $0x770] sm:$0xff]  }
 0x31c   : > { %15888 = vst [vmem:[%s19818_s14 + $0x28] sm:$0xff] %v15482_v12   ;;  %v12633_v1 = vadd.f32 %v19788_v18, %v12454_v50  ;;  %v12455_v31 = vmax.f32 %v10701_v63, %v16868_v42  ;;  %16798 = vmatmul.mubr.msk.bf16.gmra.mrb[36].mxu0 %vm6363_vm2, %v17348_v43  ;;  %16974 = vmatmul.mubr.msk.bf16.gmra.mrb[36].mxu1 %vm6363_vm2, %v17349_v59  ;;  %v17356_v12 = vld [vmem:[%s18180_s6 + $0x768] sm:$0xff]   ;;  %v17357_v50 = vld [vmem:[%s18180_s6 + $0xa18] sm:$0xff]  }
 0x31d   : > { %15887 = vst [vmem:[%s19818_s14 + $0x20] sm:$0xff] %v15477_v54   ;;  %v12631_v3 = vadd.f32 %v19788_v18, %v12452_v37  ;;  %v12453_v4 = vmax.f32 %v10699_v0, %v11804_v27  ;;  %16801 = vmatprep.mubr.msk.bf16.mxu0 %vm6363_vm2, %v17350_v39  ;;  %16977 = vmatprep.mubr.msk.bf16.mxu1 %vm6363_vm2, %v17351_v6  ;;  %v17359_v0 = vld [vmem:[%s18180_s6 + $0xa20] sm:$0xff]  }
 0x31e   : > { %v12634_v8 = vadd.f32 %v19788_v18, %v12455_v31  ;;  %v12805_v46 = vmax.f32 %v12633_v1, 0.0  ;;  %v21330_v43 = vmax.f32 %v18550_v60, %v18552_v61  ;;  %v21334_v11 = vmax.f32 %v18574_v13, %v21333_v10  ;;  %v21350_v10 = vld [vmem:[#allocation14_spill] sm:$0xff] }
 0x31f   : > { %v12632_v9 = vadd.f32 %v19788_v18, %v12453_v4  ;;  %v16695_v14 = vpop.f32.mrb[188].mxu0  ;;  %v16871_v15 = vpop.f32.mrb[188].mxu1  ;;  %v12803_v49 = vmax.f32 %v12631_v3, 0.0 }
 0x320   : > { %v12806_v47 = vmax.f32 %v12634_v8, 0.0  ;;  %v10704_v34 = vmax.f32 %v21327_v53, %v16695_v14  ;;  %v10063_v16 = vpop.f32.mrb[189].mxu0  ;;  %v11817_v17 = vpop.f32.mrb[189].mxu1 }
 0x321   : > { %v12804_v20 = vmax.f32 %v12632_v9, 0.0  ;;  %v10702_v52 = vmax.f32 %v21328_v51, %v10063_v16  ;;  %v16696_v56 = vpop.f32.mrb[190].mxu0  ;;  %v16872_v57 = vpop.f32.mrb[190].mxu1  ;;  %v21338_v51 = vld [vmem:[#allocation6_spill] sm:$0xff] }
 0x322   : > { %v15492_v33 = vpack.c.bf16 %v12806_v47, %v12805_v46  ;;  %v12458_v25 = vmax.f32 %v10704_v34, %v16871_v15  ;;  %v10705_v22 = vmax.f32 %v21329_v21, %v16696_v56  ;;  %v10066_v35 = vpop.f32.mrb[191].mxu0  ;;  %v11820_v36 = vpop.f32.mrb[191].mxu1  ;;  %v21335_v15 = vld [vmem:[#allocation4_spill] sm:$0xff]  ;;  %v21336_v46 = vld [vmem:[#allocation5_spill] sm:$0xff] }
 0x323   : > { %v15487_v40 = vpack.c.bf16 %v12804_v20, %v12803_v49  ;;  %v12456_v41 = vmax.f32 %v10702_v52, %v11817_v17  ;;  %v10703_v28 = vmax.f32 %v21330_v43, %v10066_v35  ;;  %v21337_v47 = vmax.f32 %v21335_v15, %v21336_v46  ;;  %v21339_v52 = vld [vmem:[#allocation7_spill] sm:$0xff]  ;;  %v21341_v35 = vld [vmem:[#allocation8_spill] sm:$0xff]  ;;  %v17365_v15 = vld [vmem:[%s18180_s6 + $0xa38] sm:$0xff]  }
 0x324   : > { %15890 = vst [vmem:[%s19818_s14 + $0x38] sm:$0xff] %v15492_v33   ;;  %v12637_v29 = vadd.f32 %v19788_v18, %v12458_v25  ;;  %v12459_v59 = vmax.f32 %v10705_v22, %v16872_v57  ;;  %16802 = vmatmul.mubr.msk.bf16.gmra.mrb[40].mxu0 %vm6363_vm2, %v17352_v19  ;;  %16978 = vmatmul.mubr.msk.bf16.gmra.mrb[40].mxu1 %vm6363_vm2, %v17353_v48  ;;  %v17360_v33 = vld [vmem:[%s18180_s6 + $0x778] sm:$0xff]   ;;  %v17361_v25 = vld [vmem:[%s18180_s6 + $0xa28] sm:$0xff]  }
 0x325   : > { %15889 = vst [vmem:[%s19818_s14 + $0x30] sm:$0xff] %v15487_v40   ;;  %v12635_v38 = vadd.f32 %v19788_v18, %v12456_v41  ;;  %v12457_v44 = vmax.f32 %v10703_v28, %v11820_v36  ;;  %16805 = vmatprep.mubr.msk.bf16.mxu0 %vm6363_vm2, %v17354_v24  ;;  %16981 = vmatprep.mubr.msk.bf16.mxu1 %vm6363_vm2, %v17355_v32  ;;  %v21342_v36 = vld [vmem:[#allocation9_spill] sm:$0xff] }
 0x326   : > { %v12638_v60 = vadd.f32 %v19788_v18, %v12459_v59  ;;  %v12809_v23 = vmax.f32 %v12637_v29, 0.0  ;;  %v21340_v56 = vmax.f32 %v21338_v51, %v21339_v52  ;;  %v21343_v40 = vmax.f32 %v21341_v35, %v21342_v36  ;;  %v17362_v29 = vld [vmem:[%s18180_s6 + $0x780] sm:$0xff]   ;;  %v17363_v59 = vld [vmem:[%s18180_s6 + $0xa30] sm:$0xff]  }
 0x327   : > { %v12636_v61 = vadd.f32 %v19788_v18, %v12457_v44  ;;  %v16699_v2 = vpop.f32.mrb[192].mxu0  ;;  %v16875_v55 = vpop.f32.mrb[192].mxu1  ;;  %v12807_v62 = vmax.f32 %v12635_v38, 0.0  ;;  %v21357_v51 = vld [vmem:[#allocation19_spill] sm:$0xff] }
 0x328   : > { %v12810_v58 = vmax.f32 %v12638_v60, 0.0  ;;  %v10708_v42 = vmax.f32 %v21331_v45, %v16699_v2  ;;  %v10079_v39 = vpop.f32.mrb[193].mxu0  ;;  %v11833_v6 = vpop.f32.mrb[193].mxu1  ;;  %v21344_v60 = vld [vmem:[#allocation10_spill] sm:$0xff] }
 0x329   : > { %v12808_v63 = vmax.f32 %v12636_v61, 0.0  ;;  %v10706_v27 = vmax.f32 %v21332_v26, %v10079_v39  ;;  %v16700_v54 = vpop.f32.mrb[194].mxu0  ;;  %v16876_v37 = vpop.f32.mrb[194].mxu1  ;;  %v21345_v61 = vld [vmem:[#allocation11_spill] sm:$0xff]  ;;  %v21347_v39 = vld [vmem:[#allocation12_spill] sm:$0xff] }
 0x32a   : > { %v15502_v1 = vpack.c.bf16 %v12810_v58, %v12809_v23  ;;  %v12462_v31 = vmax.f32 %v10708_v42, %v16875_v55  ;;  %v10709_v3 = vmax.f32 %v21334_v11, %v16700_v54  ;;  %v10082_v4 = vpop.f32.mrb[195].mxu0  ;;  %v11836_v8 = vpop.f32.mrb[195].mxu1  ;;  %v21346_v2 = vmax.f32 %v21344_v60, %v21345_v61  ;;  %v21351_v11 = vld [vmem:[#allocation15_spill] sm:$0xff]  ;;  %v21362_v61 = vld [vmem:[#allocation22_spill] sm:$0xff] }
 0x32b   : > { %v15497_v9 = vpack.c.bf16 %v12808_v63, %v12807_v62  ;;  %v12460_v14 = vmax.f32 %v10706_v27, %v11833_v6  ;;  %v10707_v7 = vmax.f32 %v21337_v47, %v10082_v4  ;;  %v21348_v6 = vld [vmem:[#allocation13_spill] sm:$0xff] }
 0x32c   : > { %15892 = vst [vmem:[%s19818_s14 + $0x48] sm:$0xff] %v15502_v1   ;;  %v12641_v5 = vadd.f32 %v19788_v18, %v12462_v31  ;;  %v12463_v53 = vmax.f32 %v10709_v3, %v16876_v37  ;;  %16806 = vmatmul.mubr.msk.bf16.gmra.mrb[44].mxu0 %vm6363_vm2, %v17356_v12  ;;  %16982 = vmatmul.mubr.msk.bf16.gmra.mrb[44].mxu1 %vm6363_vm2, %v17357_v50 }
 0x32d   : > { %15891 = vst [vmem:[%s19818_s14 + $0x40] sm:$0xff] %v15497_v9   ;;  %v12639_v13 = vadd.f32 %v19788_v18, %v12460_v14  ;;  %v12461_v34 = vmax.f32 %v10707_v7, %v11836_v8  ;;  %16809 = vmatprep.mubr.msk.bf16.mxu0 %vm6363_vm2, %v17358_v30  ;;  %16985 = vmatprep.mubr.msk.bf16.mxu1 %vm6363_vm2, %v17359_v0  ;;  %v17364_v14 = vld [vmem:[%s18180_s6 + $0x788] sm:$0xff]  }
 0x32e   : > { %v12642_v16 = vadd.f32 %v19788_v18, %v12463_v53  ;;  %v12813_v49 = vmax.f32 %v12641_v5, 0.0  ;;  %v21349_v12 = vmax.f32 %v21347_v39, %v21348_v6  ;;  %v21352_v3 = vmax.f32 %v21350_v10, %v21351_v11  ;;  %v21353_v7 = vld [vmem:[#allocation16_spill] sm:$0xff]  ;;  %v21354_v5 = vld [vmem:[#allocation17_spill] sm:$0xff]  ;;  %v21369_v10 = vld [vmem:[#allocation27_spill] sm:$0xff] }
 0x32f   : > { %v12640_v17 = vadd.f32 %v19788_v18, %v12461_v34  ;;  %v16703_v19 = vpop.f32.mrb[196].mxu0  ;;  %v16879_v48 = vpop.f32.mrb[196].mxu1  ;;  %v12811_v21 = vmax.f32 %v12639_v13, 0.0  ;;  %v21355_v53 = vmax.f32 %v21353_v7, %v21354_v5  ;;  %v17369_v39 = vld [vmem:[%s18180_s6 + $0xa48] sm:$0xff]  }
 0x330   : > { %v12814_v20 = vmax.f32 %v12642_v16, 0.0  ;;  %v10712_v57 = vmax.f32 %v21340_v56, %v16703_v19  ;;  %v10095_v24 = vpop.f32.mrb[197].mxu0  ;;  %v11849_v32 = vpop.f32.mrb[197].mxu1  ;;  %v17367_v19 = vld [vmem:[%s18180_s6 + $0xa40] sm:$0xff]  }
 0x331   : > { %v12812_v22 = vmax.f32 %v12640_v17, 0.0  ;;  %v10710_v41 = vmax.f32 %v21343_v40, %v10095_v24  ;;  %v16704_v43 = vpop.f32.mrb[198].mxu0  ;;  %v16880_v28 = vpop.f32.mrb[198].mxu1  ;;  %v17366_v17 = vld [vmem:[%s18180_s6 + $0x790] sm:$0xff]  }
 0x332   : > { %v15512_v38 = vpack.c.bf16 %v12814_v20, %v12813_v49  ;;  %v12466_v44 = vmax.f32 %v10712_v57, %v16879_v48  ;;  %v10713_v55 = vmax.f32 %v21346_v2, %v16704_v43  ;;  %v10098_v23 = vpop.f32.mrb[199].mxu0  ;;  %v11852_v58 = vpop.f32.mrb[199].mxu1  ;;  %v21356_v20 = vld [vmem:[#allocation18_spill] sm:$0xff]  ;;  %v21363_v2 = vld [vmem:[#allocation23_spill] sm:$0xff] }
 0x333   : > { %v15507_v45 = vpack.c.bf16 %v12812_v22, %v12811_v21  ;;  %v12464_v42 = vmax.f32 %v10710_v41, %v11849_v32  ;;  %v10711_v50 = vmax.f32 %v21349_v12, %v10098_v23  ;;  %v21358_v52 = vmax.f32 %v21356_v20, %v21357_v51  ;;  %v21360_v21 = vld [vmem:[#allocation21_spill] sm:$0xff]  ;;  %v21374_v51 = vld [vmem:[#allocation30_spill] sm:$0xff] }
 0x334   : > { %15894 = vst [vmem:[%s19818_s14 + $0x58] sm:$0xff] %v15512_v38   ;;  %v12645_v62 = vadd.f32 %v19788_v18, %v12466_v44  ;;  %v12467_v63 = vmax.f32 %v10713_v55, %v16880_v28  ;;  %16810 = vmatmul.mubr.msk.bf16.gmra.mrb[48].mxu0 %vm6363_vm2, %v17360_v33  ;;  %16986 = vmatmul.mubr.msk.bf16.gmra.mrb[48].mxu1 %vm6363_vm2, %v17361_v25  ;;  %v21359_v25 = vld [vmem:[#allocation20_spill] sm:$0xff] }
 0x335   : > { %15893 = vst [vmem:[%s19818_s14 + $0x50] sm:$0xff] %v15507_v45   ;;  %v12643_v26 = vadd.f32 %v19788_v18, %v12464_v42  ;;  %v12465_v27 = vmax.f32 %v10711_v50, %v11852_v58  ;;  %16813 = vmatprep.mubr.msk.bf16.mxu0 %vm6363_vm2, %v17362_v29  ;;  %16989 = vmatprep.mubr.msk.bf16.mxu1 %vm6363_vm2, %v17363_v59  ;;  %v17368_v42 = vld [vmem:[%s18180_s6 + $0x798] sm:$0xff]   ;;  %v21365_v50 = vld [vmem:[#allocation24_spill] sm:$0xff] }
 0x336   : > { %v12646_v54 = vadd.f32 %v19788_v18, %v12467_v63  ;;  %v12817_v1 = vmax.f32 %v12645_v62, 0.0  ;;  %v21361_v22 = vmax.f32 %v21359_v25, %v21360_v21  ;;  %v21364_v55 = vmax.f32 %v21362_v61, %v21363_v2  ;;  %v21366_v62 = vld [vmem:[#allocation25_spill] sm:$0xff]  ;;  %v17373_v25 = vld [vmem:[%s18180_s6 + $0xa58] sm:$0xff]   ;;  %v21381_v61 = vld [vmem:[#allocation35_spill] sm:$0xff] }
 0x337   : > { %v12644_v37 = vadd.f32 %v19788_v18, %v12465_v27  ;;  %v16707_v30 = vpop.f32.mrb[200].mxu0  ;;  %v16883_v0 = vpop.f32.mrb[200].mxu1  ;;  %v12815_v46 = vmax.f32 %v12643_v26, 0.0  ;;  %v21367_v63 = vmax.f32 %v21365_v50, %v21366_v62 }
 0x338   : > { %v12818_v31 = vmax.f32 %v12646_v54, 0.0  ;;  %v10716_v4 = vmax.f32 %v21352_v3, %v16707_v30  ;;  %v10111_v8 = vpop.f32.mrb[201].mxu0  ;;  %v11865_v9 = vpop.f32.mrb[201].mxu1  ;;  %v17371_v30 = vld [vmem:[%s18180_s6 + $0xa50] sm:$0xff]  }
 0x339   : > { %v12816_v47 = vmax.f32 %v12644_v37, 0.0  ;;  %v10714_v13 = vmax.f32 %v21355_v53, %v10111_v8  ;;  %v16708_v34 = vpop.f32.mrb[202].mxu0  ;;  %v16884_v16 = vpop.f32.mrb[202].mxu1  ;;  %v17370_v37 = vld [vmem:[%s18180_s6 + $0x7a0] sm:$0xff]  }
 0x33a   : > { %v15522_v48 = vpack.c.bf16 %v12818_v31, %v12817_v1  ;;  %v12470_v49 = vmax.f32 %v10716_v4, %v16883_v0  ;;  %v10717_v56 = vmax.f32 %v21358_v52, %v16708_v34  ;;  %v10114_v57 = vpop.f32.mrb[203].mxu0  ;;  %v11868_v24 = vpop.f32.mrb[203].mxu1  ;;  %v21368_v31 = vld [vmem:[#allocation26_spill] sm:$0xff]  ;;  %v21375_v52 = vld [vmem:[#allocation31_spill] sm:$0xff] }
 0x33b   : > { %v15517_v32 = vpack.c.bf16 %v12816_v47, %v12815_v46  ;;  %v12468_v33 = vmax.f32 %v10714_v13, %v11865_v9  ;;  %v10715_v35 = vmax.f32 %v21361_v22, %v10114_v57  ;;  %v21370_v11 = vmax.f32 %v21368_v31, %v21369_v10  ;;  %v21372_v46 = vld [vmem:[#allocation29_spill] sm:$0xff]  ;;  %v21386_v10 = vld [vmem:[#allocation38_spill] sm:$0xff] }
 0x33c   : > { %15896 = vst [vmem:[%s19818_s14 + $0x68] sm:$0xff] %v15522_v48   ;;  %v12649_v36 = vadd.f32 %v19788_v18, %v12470_v49  ;;  %v12471_v40 = vmax.f32 %v10717_v56, %v16884_v16  ;;  %16814 = vmatmul.mubr.msk.bf16.gmra.mrb[52].mxu0 %vm6363_vm2, %v17364_v14  ;;  %16990 = vmatmul.mubr.msk.bf16.gmra.mrb[52].mxu1 %vm6363_vm2, %v17365_v15  ;;  %v21371_v15 = vld [vmem:[#allocation28_spill] sm:$0xff] }
 0x33d   : > { %15895 = vst [vmem:[%s19818_s14 + $0x60] sm:$0xff] %v15517_v32   ;;  %v12647_v41 = vadd.f32 %v19788_v18, %v12468_v33  ;;  %v12469_v43 = vmax.f32 %v10715_v35, %v11868_v24  ;;  %16817 = vmatprep.mubr.msk.bf16.mxu0 %vm6363_vm2, %v17366_v17  ;;  %16993 = vmatprep.mubr.msk.bf16.mxu1 %vm6363_vm2, %v17367_v19  ;;  %v17372_v33 = vld [vmem:[%s18180_s6 + $0x7a8] sm:$0xff]  }
 0x33e   : > { %v12650_v28 = vadd.f32 %v19788_v18, %v12471_v40  ;;  %v12821_v44 = vmax.f32 %v12649_v36, 0.0  ;;  %v21373_v47 = vmax.f32 %v21371_v15, %v21372_v46  ;;  %v21376_v56 = vmax.f32 %v21374_v51, %v21375_v52  ;;  %v21377_v35 = vld [vmem:[#allocation32_spill] sm:$0xff]  ;;  %v21378_v36 = vld [vmem:[#allocation33_spill] sm:$0xff]  ;;  %v21393_v51 = vld [vmem:[#allocation43_spill] sm:$0xff] }
 0x33f   : > { %v12648_v29 = vadd.f32 %v19788_v18, %v12469_v43  ;;  %v16711_v59 = vpop.f32.mrb[204].mxu0  ;;  %v16887_v38 = vpop.f32.mrb[204].mxu1  ;;  %v12819_v6 = vmax.f32 %v12647_v41, 0.0  ;;  %v21379_v40 = vmax.f32 %v21377_v35, %v21378_v36  ;;  %v17377_v15 = vld [vmem:[%s18180_s6 + $0xa68] sm:$0xff]  }
 0x340   : > { %v12822_v60 = vmax.f32 %v12650_v28, 0.0  ;;  %v10720_v23 = vmax.f32 %v21364_v55, %v16711_v59  ;;  %v10127_v58 = vpop.f32.mrb[205].mxu0  ;;  %v11881_v45 = vpop.f32.mrb[205].mxu1  ;;  %v17375_v59 = vld [vmem:[%s18180_s6 + $0xa60] sm:$0xff]  }
 0x341   : > { %v12820_v12 = vmax.f32 %v12648_v29, 0.0  ;;  %v10718_v26 = vmax.f32 %v21367_v63, %v10127_v58  ;;  %v16712_v27 = vpop.f32.mrb[206].mxu0  ;;  %v16888_v54 = vpop.f32.mrb[206].mxu1  ;;  %v17374_v29 = vld [vmem:[%s18180_s6 + $0x7b0] sm:$0xff]  }
 0x342   : > { %v15532_v0 = vpack.c.bf16 %v12822_v60, %v12821_v44  ;;  %v12474_v1 = vmax.f32 %v10720_v23, %v16887_v38  ;;  %v10721_v3 = vmax.f32 %v21370_v11, %v16712_v27  ;;  %v10130_v4 = vpop.f32.mrb[207].mxu0  ;;  %v11884_v8 = vpop.f32.mrb[207].mxu1  ;;  %v21380_v60 = vld [vmem:[#allocation34_spill] sm:$0xff]  ;;  %v21387_v11 = vld [vmem:[#allocation39_spill] sm:$0xff] }
 0x343   : > { %v15527_v9 = vpack.c.bf16 %v12820_v12, %v12819_v6  ;;  %v12472_v14 = vmax.f32 %v10718_v26, %v11881_v45  ;;  %v10719_v7 = vmax.f32 %v21373_v47, %v10130_v4  ;;  %v21382_v2 = vmax.f32 %v21380_v60, %v21381_v61  ;;  %v21384_v6 = vld [vmem:[#allocation37_spill] sm:$0xff]  ;;  %v21398_v61 = vld [vmem:[#allocation46_spill] sm:$0xff] }
 0x344   : > { %15898 = vst [vmem:[%s19818_s14 + $0x78] sm:$0xff] %v15532_v0   ;;  %v12653_v5 = vadd.f32 %v19788_v18, %v12474_v1  ;;  %v12475_v53 = vmax.f32 %v10721_v3, %v16888_v54  ;;  %16818 = vmatmul.mubr.msk.bf16.gmra.mrb[56].mxu0 %vm6363_vm2, %v17368_v42  ;;  %16994 = vmatmul.mubr.msk.bf16.gmra.mrb[56].mxu1 %vm6363_vm2, %v17369_v39  ;;  %v21383_v39 = vld [vmem:[#allocation36_spill] sm:$0xff] }
 0x345   : > { %15897 = vst [vmem:[%s19818_s14 + $0x70] sm:$0xff] %v15527_v9   ;;  %v12651_v13 = vadd.f32 %v19788_v18, %v12472_v14  ;;  %v12473_v34 = vmax.f32 %v10719_v7, %v11884_v8  ;;  %16821 = vmatprep.mubr.msk.bf16.mxu0 %vm6363_vm2, %v17370_v37  ;;  %16997 = vmatprep.mubr.msk.bf16.mxu1 %vm6363_vm2, %v17371_v30  ;;  %v17376_v14 = vld [vmem:[%s18180_s6 + $0x7b8] sm:$0xff]   ;;  %v21389_v7 = vld [vmem:[#allocation40_spill] sm:$0xff] }
 0x346   : > { %v12654_v16 = vadd.f32 %v19788_v18, %v12475_v53  ;;  %v12825_v49 = vmax.f32 %v12653_v5, 0.0  ;;  %v21385_v12 = vmax.f32 %v21383_v39, %v21384_v6  ;;  %v21388_v3 = vmax.f32 %v21386_v10, %v21387_v11  ;;  %v21390_v5 = vld [vmem:[#allocation41_spill] sm:$0xff]  ;;  %v17381_v39 = vld [vmem:[%s18180_s6 + $0xa78] sm:$0xff]   ;;  %v21405_v10 = vld [vmem:[#allocation51_spill] sm:$0xff] }
 0x347   : > { %v12652_v17 = vadd.f32 %v19788_v18, %v12473_v34  ;;  %v16715_v19 = vpop.f32.mrb[208].mxu0  ;;  %v16891_v48 = vpop.f32.mrb[208].mxu1  ;;  %v12823_v21 = vmax.f32 %v12651_v13, 0.0  ;;  %v21391_v53 = vmax.f32 %v21389_v7, %v21390_v5 }
 0x348   : > { %v12826_v20 = vmax.f32 %v12654_v16, 0.0  ;;  %v10724_v57 = vmax.f32 %v21376_v56, %v16715_v19  ;;  %v10143_v24 = vpop.f32.mrb[209].mxu0  ;;  %v11897_v32 = vpop.f32.mrb[209].mxu1  ;;  %v17379_v19 = vld [vmem:[%s18180_s6 + $0xa70] sm:$0xff]  }
 0x349   : > { %v12824_v22 = vmax.f32 %v12652_v17, 0.0  ;;  %v10722_v41 = vmax.f32 %v21379_v40, %v10143_v24  ;;  %v16716_v43 = vpop.f32.mrb[210].mxu0  ;;  %v16892_v28 = vpop.f32.mrb[210].mxu1  ;;  %v17378_v17 = vld [vmem:[%s18180_s6 + $0x7c0] sm:$0xff]  }
 0x34a   : > { %v15542_v38 = vpack.c.bf16 %v12826_v20, %v12825_v49  ;;  %v12478_v44 = vmax.f32 %v10724_v57, %v16891_v48  ;;  %v10725_v55 = vmax.f32 %v21382_v2, %v16716_v43  ;;  %v10146_v23 = vpop.f32.mrb[211].mxu0  ;;  %v11900_v58 = vpop.f32.mrb[211].mxu1  ;;  %v21392_v20 = vld [vmem:[#allocation42_spill] sm:$0xff]  ;;  %v21399_v2 = vld [vmem:[#allocation47_spill] sm:$0xff] }
 0x34b   : > { %v15537_v45 = vpack.c.bf16 %v12824_v22, %v12823_v21  ;;  %v12476_v42 = vmax.f32 %v10722_v41, %v11897_v32  ;;  %v10723_v50 = vmax.f32 %v21385_v12, %v10146_v23  ;;  %v21394_v52 = vmax.f32 %v21392_v20, %v21393_v51  ;;  %v21396_v21 = vld [vmem:[#allocation45_spill] sm:$0xff]  ;;  %v21410_v51 = vld [vmem:[#allocation54_spill] sm:$0xff] }
 0x34c   : > { %15900 = vst [vmem:[%s19818_s14 + $0x88] sm:$0xff] %v15542_v38   ;;  %v12657_v62 = vadd.f32 %v19788_v18, %v12478_v44  ;;  %v12479_v63 = vmax.f32 %v10725_v55, %v16892_v28  ;;  %16822 = vmatmul.mubr.msk.bf16.gmra.mrb[60].mxu0 %vm6363_vm2, %v17372_v33  ;;  %16998 = vmatmul.mubr.msk.bf16.gmra.mrb[60].mxu1 %vm6363_vm2, %v17373_v25  ;;  %v21395_v25 = vld [vmem:[#allocation44_spill] sm:$0xff] }
 0x34d   : > { %15899 = vst [vmem:[%s19818_s14 + $0x80] sm:$0xff] %v15537_v45   ;;  %v12655_v26 = vadd.f32 %v19788_v18, %v12476_v42  ;;  %v12477_v27 = vmax.f32 %v10723_v50, %v11900_v58  ;;  %16825 = vmatprep.mubr.msk.bf16.mxu0 %vm6363_vm2, %v17374_v29  ;;  %17001 = vmatprep.mubr.msk.bf16.mxu1 %vm6363_vm2, %v17375_v59  ;;  %v17380_v42 = vld [vmem:[%s18180_s6 + $0x7c8] sm:$0xff]  }
 0x34e   : > { %v12658_v54 = vadd.f32 %v19788_v18, %v12479_v63  ;;  %v12829_v1 = vmax.f32 %v12657_v62, 0.0  ;;  %v21397_v22 = vmax.f32 %v21395_v25, %v21396_v21  ;;  %v21400_v55 = vmax.f32 %v21398_v61, %v21399_v2  ;;  %v21401_v50 = vld [vmem:[#allocation48_spill] sm:$0xff]  ;;  %v21402_v62 = vld [vmem:[#allocation49_spill] sm:$0xff]  ;;  %v21417_v61 = vld [vmem:[#allocation59_spill] sm:$0xff] }
 0x34f   : > { %v12656_v37 = vadd.f32 %v19788_v18, %v12477_v27  ;;  %v16719_v30 = vpop.f32.mrb[212].mxu0  ;;  %v16895_v0 = vpop.f32.mrb[212].mxu1  ;;  %v12827_v46 = vmax.f32 %v12655_v26, 0.0  ;;  %v21403_v63 = vmax.f32 %v21401_v50, %v21402_v62  ;;  %v17385_v25 = vld [vmem:[%s18180_s6 + $0xa88] sm:$0xff]  }
 0x350   : > { %v12830_v31 = vmax.f32 %v12658_v54, 0.0  ;;  %v10728_v4 = vmax.f32 %v21388_v3, %v16719_v30  ;;  %v10159_v8 = vpop.f32.mrb[213].mxu0  ;;  %v11913_v9 = vpop.f32.mrb[213].mxu1  ;;  %v17383_v30 = vld [vmem:[%s18180_s6 + $0xa80] sm:$0xff]  }
 0x351   : > { %v12828_v47 = vmax.f32 %v12656_v37, 0.0  ;;  %v10726_v13 = vmax.f32 %v21391_v53, %v10159_v8  ;;  %v16720_v34 = vpop.f32.mrb[214].mxu0  ;;  %v16896_v16 = vpop.f32.mrb[214].mxu1  ;;  %v17382_v37 = vld [vmem:[%s18180_s6 + $0x7d0] sm:$0xff]  }
 0x352   : > { %v15552_v48 = vpack.c.bf16 %v12830_v31, %v12829_v1  ;;  %v12482_v49 = vmax.f32 %v10728_v4, %v16895_v0  ;;  %v10729_v56 = vmax.f32 %v21394_v52, %v16720_v34  ;;  %v10162_v57 = vpop.f32.mrb[215].mxu0  ;;  %v11916_v24 = vpop.f32.mrb[215].mxu1  ;;  %v21404_v31 = vld [vmem:[#allocation50_spill] sm:$0xff]  ;;  %v21411_v52 = vld [vmem:[#allocation55_spill] sm:$0xff] }
 0x353   : > { %v15547_v32 = vpack.c.bf16 %v12828_v47, %v12827_v46  ;;  %v12480_v33 = vmax.f32 %v10726_v13, %v11913_v9  ;;  %v10727_v35 = vmax.f32 %v21397_v22, %v10162_v57  ;;  %v21406_v11 = vmax.f32 %v21404_v31, %v21405_v10  ;;  %v21408_v46 = vld [vmem:[#allocation53_spill] sm:$0xff]  ;;  %v21422_v10 = vld [vmem:[#allocation62_spill] sm:$0xff] }
 0x354   : > { %15902 = vst [vmem:[%s19818_s14 + $0x98] sm:$0xff] %v15552_v48   ;;  %v12661_v36 = vadd.f32 %v19788_v18, %v12482_v49  ;;  %v12483_v40 = vmax.f32 %v10729_v56, %v16896_v16  ;;  %16826 = vmatmul.mubr.msk.bf16.gmra.mrb[64].mxu0 %vm6363_vm2, %v17376_v14  ;;  %17002 = vmatmul.mubr.msk.bf16.gmra.mrb[64].mxu1 %vm6363_vm2, %v17377_v15  ;;  %v21407_v15 = vld [vmem:[#allocation52_spill] sm:$0xff] }
 0x355   : > { %15901 = vst [vmem:[%s19818_s14 + $0x90] sm:$0xff] %v15547_v32   ;;  %v12659_v41 = vadd.f32 %v19788_v18, %v12480_v33  ;;  %v12481_v43 = vmax.f32 %v10727_v35, %v11916_v24  ;;  %16829 = vmatprep.mubr.msk.bf16.mxu0 %vm6363_vm2, %v17378_v17  ;;  %17005 = vmatprep.mubr.msk.bf16.mxu1 %vm6363_vm2, %v17379_v19  ;;  %v17384_v33 = vld [vmem:[%s18180_s6 + $0x7d8] sm:$0xff]   ;;  %v21413_v35 = vld [vmem:[#allocation56_spill] sm:$0xff] }
 0x356   : > { %v12662_v28 = vadd.f32 %v19788_v18, %v12483_v40  ;;  %v12833_v44 = vmax.f32 %v12661_v36, 0.0  ;;  %v21409_v47 = vmax.f32 %v21407_v15, %v21408_v46  ;;  %v21412_v56 = vmax.f32 %v21410_v51, %v21411_v52  ;;  %v21414_v36 = vld [vmem:[#allocation57_spill] sm:$0xff]  ;;  %v17389_v15 = vld [vmem:[%s18180_s6 + $0xa98] sm:$0xff]   ;;  %v21429_v51 = vld [vmem:[#allocation67_spill] sm:$0xff] }
 0x357   : > { %v12660_v29 = vadd.f32 %v19788_v18, %v12481_v43  ;;  %v16723_v59 = vpop.f32.mrb[216].mxu0  ;;  %v16899_v38 = vpop.f32.mrb[216].mxu1  ;;  %v12831_v6 = vmax.f32 %v12659_v41, 0.0  ;;  %v21415_v40 = vmax.f32 %v21413_v35, %v21414_v36 }
 0x358   : > { %v12834_v60 = vmax.f32 %v12662_v28, 0.0  ;;  %v10732_v23 = vmax.f32 %v21400_v55, %v16723_v59  ;;  %v10175_v58 = vpop.f32.mrb[217].mxu0  ;;  %v11929_v45 = vpop.f32.mrb[217].mxu1  ;;  %v17387_v59 = vld [vmem:[%s18180_s6 + $0xa90] sm:$0xff]  }
 0x359   : > { %v12832_v12 = vmax.f32 %v12660_v29, 0.0  ;;  %v10730_v26 = vmax.f32 %v21403_v63, %v10175_v58  ;;  %v16724_v27 = vpop.f32.mrb[218].mxu0  ;;  %v16900_v54 = vpop.f32.mrb[218].mxu1  ;;  %v17386_v29 = vld [vmem:[%s18180_s6 + $0x7e0] sm:$0xff]  }
 0x35a   : > { %v15562_v0 = vpack.c.bf16 %v12834_v60, %v12833_v44  ;;  %v12486_v1 = vmax.f32 %v10732_v23, %v16899_v38  ;;  %v10733_v3 = vmax.f32 %v21406_v11, %v16724_v27  ;;  %v10178_v4 = vpop.f32.mrb[219].mxu0  ;;  %v11932_v8 = vpop.f32.mrb[219].mxu1  ;;  %v21416_v60 = vld [vmem:[#allocation58_spill] sm:$0xff]  ;;  %v21423_v11 = vld [vmem:[#allocation63_spill] sm:$0xff] }
 0x35b   : > { %v15557_v9 = vpack.c.bf16 %v12832_v12, %v12831_v6  ;;  %v12484_v14 = vmax.f32 %v10730_v26, %v11929_v45  ;;  %v10731_v7 = vmax.f32 %v21409_v47, %v10178_v4  ;;  %v21418_v2 = vmax.f32 %v21416_v60, %v21417_v61  ;;  %v21420_v6 = vld [vmem:[#allocation61_spill] sm:$0xff]  ;;  %v21434_v61 = vld [vmem:[#allocation70_spill] sm:$0xff] }
 0x35c   : > { %15904 = vst [vmem:[%s19818_s14 + $0xa8] sm:$0xff] %v15562_v0   ;;  %v12665_v5 = vadd.f32 %v19788_v18, %v12486_v1  ;;  %v12487_v53 = vmax.f32 %v10733_v3, %v16900_v54  ;;  %16830 = vmatmul.mubr.msk.bf16.gmra.mrb[68].mxu0 %vm6363_vm2, %v17380_v42  ;;  %17006 = vmatmul.mubr.msk.bf16.gmra.mrb[68].mxu1 %vm6363_vm2, %v17381_v39  ;;  %v21419_v39 = vld [vmem:[#allocation60_spill] sm:$0xff] }
 0x35d   : > { %15903 = vst [vmem:[%s19818_s14 + $0xa0] sm:$0xff] %v15557_v9   ;;  %v12663_v13 = vadd.f32 %v19788_v18, %v12484_v14  ;;  %v12485_v34 = vmax.f32 %v10731_v7, %v11932_v8  ;;  %16833 = vmatprep.mubr.msk.bf16.mxu0 %vm6363_vm2, %v17382_v37  ;;  %17009 = vmatprep.mubr.msk.bf16.mxu1 %vm6363_vm2, %v17383_v30  ;;  %v17388_v14 = vld [vmem:[%s18180_s6 + $0x7e8] sm:$0xff]  }
 0x35e   : > { %v12666_v16 = vadd.f32 %v19788_v18, %v12487_v53  ;;  %v12837_v49 = vmax.f32 %v12665_v5, 0.0  ;;  %v21421_v12 = vmax.f32 %v21419_v39, %v21420_v6  ;;  %v21424_v3 = vmax.f32 %v21422_v10, %v21423_v11  ;;  %v21425_v7 = vld [vmem:[#allocation64_spill] sm:$0xff]  ;;  %v21426_v5 = vld [vmem:[#allocation65_spill] sm:$0xff] }
 0x35f   : > { %v12664_v17 = vadd.f32 %v19788_v18, %v12485_v34  ;;  %v16727_v19 = vpop.f32.mrb[220].mxu0  ;;  %v16903_v48 = vpop.f32.mrb[220].mxu1  ;;  %v12835_v21 = vmax.f32 %v12663_v13, 0.0  ;;  %v21427_v53 = vmax.f32 %v21425_v7, %v21426_v5  ;;  %v17393_v39 = vld [vmem:[%s18180_s6 + $0xaa8] sm:$0xff]   ;;  %v20173_v7 = vld [vmem:[%s20711_s2] ss:$0 sm:$0xff] }
 0x360   : > { %v12838_v20 = vmax.f32 %v12666_v16, 0.0  ;;  %v10736_v57 = vmax.f32 %v21412_v56, %v16727_v19  ;;  %v10191_v24 = vpop.f32.mrb[221].mxu0  ;;  %v11945_v32 = vpop.f32.mrb[221].mxu1  ;;  %v17391_v19 = vld [vmem:[%s18180_s6 + $0xaa0] sm:$0xff]  }
 0x361   : > { %v12836_v22 = vmax.f32 %v12664_v17, 0.0  ;;  %v10734_v41 = vmax.f32 %v21415_v40, %v10191_v24  ;;  %v16728_v43 = vpop.f32.mrb[222].mxu0  ;;  %v16904_v28 = vpop.f32.mrb[222].mxu1  ;;  %v17390_v17 = vld [vmem:[%s18180_s6 + $0x7f0] sm:$0xff]  }
 0x362   : > { %v15572_v38 = vpack.c.bf16 %v12838_v20, %v12837_v49  ;;  %v12490_v44 = vmax.f32 %v10736_v57, %v16903_v48  ;;  %v10737_v55 = vmax.f32 %v21418_v2, %v16728_v43  ;;  %v10194_v23 = vpop.f32.mrb[223].mxu0  ;;  %v11948_v58 = vpop.f32.mrb[223].mxu1  ;;  %v21428_v20 = vld [vmem:[#allocation66_spill] sm:$0xff]  ;;  %v21435_v2 = vld [vmem:[#allocation71_spill] sm:$0xff] }
 0x363   : > { %v15567_v45 = vpack.c.bf16 %v12836_v22, %v12835_v21  ;;  %v12488_v42 = vmax.f32 %v10734_v41, %v11945_v32  ;;  %v10735_v50 = vmax.f32 %v21421_v12, %v10194_v23  ;;  %v21430_v52 = vmax.f32 %v21428_v20, %v21429_v51  ;;  %v21432_v21 = vld [vmem:[#allocation69_spill] sm:$0xff]  ;;  %v21446_v51 = vld [vmem:[#allocation78_spill] sm:$0xff] }
 0x364   : > { %15906 = vst [vmem:[%s19818_s14 + $0xb8] sm:$0xff] %v15572_v38   ;;  %v12669_v62 = vadd.f32 %v19788_v18, %v12490_v44  ;;  %v12491_v63 = vmax.f32 %v10737_v55, %v16904_v28  ;;  %16834 = vmatmul.mubr.msk.bf16.gmra.mrb[72].mxu0 %vm6363_vm2, %v17384_v33  ;;  %17010 = vmatmul.mubr.msk.bf16.gmra.mrb[72].mxu1 %vm6363_vm2, %v17385_v25  ;;  %v21431_v25 = vld [vmem:[#allocation68_spill] sm:$0xff] }
 0x365   : > { %15905 = vst [vmem:[%s19818_s14 + $0xb0] sm:$0xff] %v15567_v45   ;;  %v12667_v26 = vadd.f32 %v19788_v18, %v12488_v42  ;;  %v12489_v27 = vmax.f32 %v10735_v50, %v11948_v58  ;;  %16837 = vmatprep.mubr.msk.bf16.mxu0 %vm6363_vm2, %v17386_v29  ;;  %17013 = vmatprep.mubr.msk.bf16.mxu1 %vm6363_vm2, %v17387_v59  ;;  %v17392_v42 = vld [vmem:[%s18180_s6 + $0x7f8] sm:$0xff]   ;;  %v21437_v50 = vld [vmem:[#allocation72_spill] sm:$0xff] }
 0x366   : > { %v12670_v54 = vadd.f32 %v19788_v18, %v12491_v63  ;;  %v12841_v1 = vmax.f32 %v12669_v62, 0.0  ;;  %v21433_v22 = vmax.f32 %v21431_v25, %v21432_v21  ;;  %v21436_v55 = vmax.f32 %v21434_v61, %v21435_v2  ;;  %v21438_v62 = vld [vmem:[#allocation73_spill] sm:$0xff]  ;;  %v17397_v25 = vld [vmem:[%s18180_s6 + $0xab8] sm:$0xff]  }
 0x367   : > { %v12668_v37 = vadd.f32 %v19788_v18, %v12489_v27  ;;  %v16731_v30 = vpop.f32.mrb[224].mxu0  ;;  %v16907_v0 = vpop.f32.mrb[224].mxu1  ;;  %v12839_v46 = vmax.f32 %v12667_v26, 0.0  ;;  %v21439_v63 = vmax.f32 %v21437_v50, %v21438_v62 }
 0x368   : > { %v12842_v31 = vmax.f32 %v12670_v54, 0.0  ;;  %v10740_v4 = vmax.f32 %v21424_v3, %v16731_v30  ;;  %v10207_v8 = vpop.f32.mrb[225].mxu0  ;;  %v11961_v9 = vpop.f32.mrb[225].mxu1  ;;  %v17394_v54 = vld [vmem:[%s18180_s6 + $0x800] sm:$0xff]  }
 0x369   : > { %v12840_v47 = vmax.f32 %v12668_v37, 0.0  ;;  %v10738_v13 = vmax.f32 %v21427_v53, %v10207_v8  ;;  %v16732_v34 = vpop.f32.mrb[226].mxu0  ;;  %v16908_v16 = vpop.f32.mrb[226].mxu1  ;;  %v17395_v37 = vld [vmem:[%s18180_s6 + $0xab0] sm:$0xff]  }
 0x36a   : > { %v15582_v48 = vpack.c.bf16 %v12842_v31, %v12841_v1  ;;  %v12494_v49 = vmax.f32 %v10740_v4, %v16907_v0  ;;  %v10741_v56 = vmax.f32 %v21430_v52, %v16732_v34  ;;  %v10210_v57 = vpop.f32.mrb[227].mxu0  ;;  %v11964_v24 = vpop.f32.mrb[227].mxu1  ;;  %v21440_v1 = vld [vmem:[#allocation74_spill] sm:$0xff]  ;;  %v21441_v31 = vld [vmem:[#allocation75_spill] sm:$0xff] }
 0x36b   : > { %v15577_v32 = vpack.c.bf16 %v12840_v47, %v12839_v46  ;;  %v12492_v33 = vmax.f32 %v10738_v13, %v11961_v9  ;;  %v10739_v35 = vmax.f32 %v21433_v22, %v10210_v57  ;;  %v21442_v10 = vmax.f32 %v21440_v1, %v21441_v31  ;;  %v21447_v52 = vld [vmem:[#allocation79_spill] sm:$0xff] }
 0x36c   : > { %15908 = vst [vmem:[%s19818_s14 + $0xc8] sm:$0xff] %v15582_v48   ;;  %v12673_v36 = vadd.f32 %v19788_v18, %v12494_v49  ;;  %v12495_v40 = vmax.f32 %v10741_v56, %v16908_v16  ;;  %16838 = vmatmul.mubr.msk.bf16.gmra.mrb[76].mxu0 %vm6363_vm2, %v17388_v14  ;;  %17014 = vmatmul.mubr.msk.bf16.gmra.mrb[76].mxu1 %vm6363_vm2, %v17389_v15  ;;  %v21443_v14 = vld [vmem:[#allocation76_spill] sm:$0xff]  ;;  %v21444_v15 = vld [vmem:[#allocation77_spill] sm:$0xff]  ;;  %v21459_v1 = vld [vmem:[#allocation87_spill] sm:$0xff] }
 0x36d   : > { %15907 = vst [vmem:[%s19818_s14 + $0xc0] sm:$0xff] %v15577_v32   ;;  %v12671_v41 = vadd.f32 %v19788_v18, %v12492_v33  ;;  %v12493_v43 = vmax.f32 %v10739_v35, %v11964_v24  ;;  %16841 = vmatprep.mubr.msk.bf16.mxu0 %vm6363_vm2, %v17390_v17  ;;  %17017 = vmatprep.mubr.msk.bf16.mxu1 %vm6363_vm2, %v17391_v19  ;;  %v17396_v33 = vld [vmem:[%s18180_s6 + $0x808] sm:$0xff]  }
 0x36e   : > { %v12674_v28 = vadd.f32 %v19788_v18, %v12495_v40  ;;  %v12845_v44 = vmax.f32 %v12673_v36, 0.0  ;;  %v21445_v46 = vmax.f32 %v21443_v14, %v21444_v15  ;;  %v21448_v56 = vmax.f32 %v21446_v51, %v21447_v52  ;;  %v21449_v35 = vld [vmem:[#allocation80_spill] sm:$0xff]  ;;  %v21450_v36 = vld [vmem:[#allocation81_spill] sm:$0xff] }
 0x36f   : > { %v12672_v29 = vadd.f32 %v19788_v18, %v12493_v43  ;;  %v16735_v59 = vpop.f32.mrb[228].mxu0  ;;  %v16911_v38 = vpop.f32.mrb[228].mxu1  ;;  %v12843_v6 = vmax.f32 %v12671_v41, 0.0  ;;  %v21451_v40 = vmax.f32 %v21449_v35, %v21450_v36  ;;  %v21462_v14 = vld [vmem:[#allocation89_spill] sm:$0xff]  ;;  %v21467_v52 = vld [vmem:[#allocation92_spill] sm:$0xff] }
 0x370   : > { %v12846_v60 = vmax.f32 %v12674_v28, 0.0  ;;  %v10744_v23 = vmax.f32 %v21436_v55, %v16735_v59  ;;  %v10223_v58 = vpop.f32.mrb[229].mxu0  ;;  %v11977_v45 = vpop.f32.mrb[229].mxu1 }
 0x371   : > { %v12844_v12 = vmax.f32 %v12672_v29, 0.0  ;;  %v10742_v18 = vmax.f32 %v21439_v63, %v10223_v58  ;;  %v16736_v26 = vpop.f32.mrb[230].mxu0  ;;  %v16912_v27 = vpop.f32.mrb[230].mxu1 }
 0x372   : > { %v15592_v30 = vpack.c.bf16 %v12846_v60, %v12845_v44  ;;  %v12498_v0 = vmax.f32 %v10744_v23, %v16911_v38  ;;  %v10745_v11 = vmax.f32 %v21442_v10, %v16736_v26  ;;  %v10226_v3 = vpop.f32.mrb[231].mxu0  ;;  %v11980_v4 = vpop.f32.mrb[231].mxu1  ;;  %v21452_v38 = vld [vmem:[#allocation82_spill] sm:$0xff]  ;;  %v21453_v44 = vld [vmem:[#allocation83_spill] sm:$0xff] }
 0x373   : > { %v15587_v8 = vpack.c.bf16 %v12844_v12, %v12843_v6  ;;  %v12496_v9 = vmax.f32 %v10742_v18, %v11977_v45  ;;  %v10743_v47 = vmax.f32 %v21445_v46, %v10226_v3  ;;  %v21454_v60 = vmax.f32 %v21452_v38, %v21453_v44  ;;  %v21455_v45 = vld [vmem:[#allocation84_spill] sm:$0xff] }
 0x374   : > { %15910 = vst [vmem:[%s19818_s14 + $0xd8] sm:$0xff] %v15592_v30   ;;  %v12677_v5 = vadd.f32 %v20173_v7, %v12498_v0  ;;  %v12499_v53 = vmax.f32 %v10745_v11, %v16912_v27  ;;  %16842 = vmatmul.mubr.msk.bf16.gmra.mrb[80].mxu0 %vm6363_vm2, %v17392_v42  ;;  %17018 = vmatmul.mubr.msk.bf16.gmra.mrb[80].mxu1 %vm6363_vm2, %v17393_v39  ;;  %v21456_v42 = vld [vmem:[#allocation85_spill] sm:$0xff]  ;;  %v21458_v0 = vld [vmem:[#allocation86_spill] sm:$0xff] }
 0x375   : > { %15909 = vst [vmem:[%s19818_s14 + $0xd0] sm:$0xff] %v15587_v8   ;;  %v12675_v13 = vadd.f32 %v20173_v7, %v12496_v9  ;;  %v12497_v34 = vmax.f32 %v10743_v47, %v11980_v4  ;;  %16845 = vmatprep.mubr.msk.bf16.mxu0 %vm6363_vm2, %v17394_v54  ;;  %17021 = vmatprep.mubr.msk.bf16.mxu1 %vm6363_vm2, %v17395_v37  ;;  %v21461_v9 = vld [vmem:[#allocation88_spill] sm:$0xff] }
 0x376   : > { %v12678_v16 = vadd.f32 %v20173_v7, %v12499_v53  ;;  %v12849_v49 = vmax.f32 %v12677_v5, 0.0  ;;  %v21457_v39 = vmax.f32 %v21455_v45, %v21456_v42  ;;  %v21460_v31 = vmax.f32 %v21458_v0, %v21459_v1  ;;  %v21480_v0 = vld [vmem:[#allocation101_spill] sm:$0xff] }
 0x377   : > { %v12676_v17 = vadd.f32 %v20173_v7, %v12497_v34  ;;  %v16739_v19 = vpop.f32.mrb[232].mxu0  ;;  %v16915_v48 = vpop.f32.mrb[232].mxu1  ;;  %v12847_v21 = vmax.f32 %v12675_v13, 0.0  ;;  %v21463_v15 = vmax.f32 %v21461_v9, %v21462_v14  ;;  %v21464_v34 = vld [vmem:[#allocation90_spill] sm:$0xff] }
 0x378   : > { %v12850_v20 = vmax.f32 %v12678_v16, 0.0  ;;  %v10748_v57 = vmax.f32 %v21448_v56, %v16739_v19  ;;  %v10239_v24 = vpop.f32.mrb[233].mxu0  ;;  %v11993_v32 = vpop.f32.mrb[233].mxu1  ;;  %v21465_v16 = vld [vmem:[#allocation91_spill] sm:$0xff]  ;;  %v21468_v56 = vld [vmem:[#allocation93_spill] sm:$0xff] }
 0x379   : > { %v12848_v22 = vmax.f32 %v12676_v17, 0.0  ;;  %v10746_v41 = vmax.f32 %v21451_v40, %v10239_v24  ;;  %v16740_v43 = vpop.f32.mrb[234].mxu0  ;;  %v16916_v28 = vpop.f32.mrb[234].mxu1  ;;  %v21466_v17 = vmax.f32 %v21464_v34, %v21465_v16 }
 0x37a   : > { %v15602_v29 = vpack.c.bf16 %v12850_v20, %v12849_v49  ;;  %v12502_v59 = vmax.f32 %v10748_v57, %v16915_v48  ;;  %v10749_v61 = vmax.f32 %v21454_v60, %v16740_v43  ;;  %v10242_v2 = vpop.f32.mrb[235].mxu0  ;;  %v11996_v55 = vpop.f32.mrb[235].mxu1  ;;  %v21469_v57 = vmax.f32 %v21467_v52, %v21468_v56 }
 0x37b   : > { %v15597_v23 = vpack.c.bf16 %v12848_v22, %v12847_v21  ;;  %v12500_v58 = vmax.f32 %v10746_v41, %v11993_v32  ;;  %v10747_v6 = vmax.f32 %v21457_v39, %v10242_v2 }
 0x37c   : > { %15912 = vst [vmem:[%s19818_s14 + $0xe8] sm:$0xff] %v15602_v29   ;;  %v12681_v12 = vadd.f32 %v20173_v7, %v12502_v59  ;;  %v12503_v50 = vmax.f32 %v10749_v61, %v16916_v28  ;;  %16846 = vmatmul.mubr.msk.bf16.gmra.mrb[84].mxu0 %vm6363_vm2, %v17396_v33  ;;  %17022 = vmatmul.mubr.msk.bf16.gmra.mrb[84].mxu1 %vm6363_vm2, %v17397_v25  ;;  %v21470_v28 = vld [vmem:[#allocation94_spill] sm:$0xff]  ;;  %v21471_v29 = vld [vmem:[#allocation95_spill] sm:$0xff] }
 0x37d   : > { %15911 = vst [vmem:[%s19818_s14 + $0xe0] sm:$0xff] %v15597_v23   ;;  %v12679_v62 = vadd.f32 %v20173_v7, %v12500_v58  ;;  %v12501_v63 = vmax.f32 %v10747_v6, %v11996_v55  ;;  %v21472_v59 = vmax.f32 %v21470_v28, %v21471_v29  ;;  %v21473_v55 = vld [vmem:[#allocation96_spill] sm:$0xff]  ;;  %v21474_v23 = vld [vmem:[#allocation97_spill] sm:$0xff] }
 0x37e   : > { %v12682_v18 = vadd.f32 %v20173_v7, %v12503_v50  ;;  %v12853_v37 = vmax.f32 %v12681_v12, 0.0  ;;  %v21475_v58 = vmax.f32 %v21473_v55, %v21474_v23  ;;  %v21476_v50 = vld [vmem:[#allocation98_spill] sm:$0xff]  ;;  %v21492_v28 = vld [vmem:[#allocation109_spill] sm:$0xff] }
 0x37f   : > { %v12680_v26 = vadd.f32 %v20173_v7, %v12501_v63  ;;  %v16743_v27 = vpop.f32.mrb[236].mxu0  ;;  %v16919_v54 = vpop.f32.mrb[236].mxu1  ;;  %v12851_v4 = vmax.f32 %v12679_v62, 0.0  ;;  %v21477_v62 = vld [vmem:[#allocation99_spill] sm:$0xff] }
 0x380   : > { %v12854_v30 = vmax.f32 %v12682_v18, 0.0  ;;  %v10752_v10 = vmax.f32 %v21460_v31, %v16743_v27  ;;  %v10255_v11 = vpop.f32.mrb[237].mxu0  ;;  %v12009_v3 = vpop.f32.mrb[237].mxu1  ;;  %v21478_v63 = vmax.f32 %v21476_v50, %v21477_v62 }
 0x381   : > { %v12852_v8 = vmax.f32 %v12680_v26, 0.0  ;;  %v10750_v46 = vmax.f32 %v21463_v15, %v10255_v11  ;;  %v16744_v47 = vpop.f32.mrb[238].mxu0  ;;  %v16920_v5 = vpop.f32.mrb[238].mxu1 }
 0x382   : > { %v15612_v53 = vpack.c.bf16 %v12854_v30, %v12853_v37  ;;  %v12506_v13 = vmax.f32 %v10752_v10, %v16919_v54  ;;  %v10753_v19 = vmax.f32 %v21466_v17, %v16744_v47  ;;  %v10258_v48 = vpop.f32.mrb[239].mxu0  ;;  %v12012_v49 = vpop.f32.mrb[239].mxu1  ;;  %v21479_v30 = vld [vmem:[#allocation100_spill] sm:$0xff] }
 0x383   : > { %v15607_v20 = vpack.c.bf16 %v12852_v8, %v12851_v4  ;;  %v12504_v51 = vmax.f32 %v10750_v46, %v12009_v3  ;;  %v10751_v24 = vmax.f32 %v21469_v57, %v10258_v48  ;;  %v21481_v1 = vmax.f32 %v21479_v30, %v21480_v0 }
 0x384   : > { %15914 = vst [vmem:[%s19818_s14 + $0xf8] sm:$0xff] %v15612_v53   ;;  %v12685_v32 = vadd.f32 %v20173_v7, %v12506_v13  ;;  %v12507_v33 = vmax.f32 %v10753_v19, %v16920_v5  ;;  %v21482_v5 = vld [vmem:[#allocation102_spill] sm:$0xff]  ;;  %v21483_v53 = vld [vmem:[#allocation103_spill] sm:$0xff] }
 0x385   : > { %15913 = vst [vmem:[%s19818_s14 + $0xf0] sm:$0xff] %v15607_v20   ;;  %v12683_v25 = vadd.f32 %v20173_v7, %v12504_v51  ;;  %v12505_v21 = vmax.f32 %v10751_v24, %v12012_v49  ;;  %v21484_v13 = vmax.f32 %v21482_v5, %v21483_v53  ;;  %v21485_v49 = vld [vmem:[#allocation104_spill] sm:$0xff]  ;;  %v21486_v20 = vld [vmem:[#allocation105_spill] sm:$0xff] }
 0x386   : > { %v12686_v22 = vadd.f32 %v20173_v7, %v12507_v33  ;;  %v12857_v41 = vmax.f32 %v12685_v32, 0.0  ;;  %v21487_v51 = vmax.f32 %v21485_v49, %v21486_v20  ;;  %v21488_v33 = vld [vmem:[#allocation106_spill] sm:$0xff]  ;;  %v21504_v5 = vld [vmem:[#allocation117_spill] sm:$0xff] }
 0x387   : > { %v12684_v35 = vadd.f32 %v20173_v7, %v12505_v21  ;;  %v16747_v36 = vpop.f32.mrb[240].mxu0  ;;  %v16923_v40 = vpop.f32.mrb[240].mxu1  ;;  %v12855_v61 = vmax.f32 %v12683_v25, 0.0  ;;  %v21489_v25 = vld [vmem:[#allocation107_spill] sm:$0xff] }
 0x388   : > { %v12858_v43 = vmax.f32 %v12686_v22, 0.0  ;;  %v10756_v38 = vmax.f32 %v21472_v59, %v16747_v36  ;;  %v10271_v44 = vpop.f32.mrb[241].mxu0  ;;  %v12025_v60 = vpop.f32.mrb[241].mxu1  ;;  %v21490_v21 = vmax.f32 %v21488_v33, %v21489_v25 }
 0x389   : > { %v12856_v2 = vmax.f32 %v12684_v35, 0.0  ;;  %v10754_v45 = vmax.f32 %v21475_v58, %v10271_v44  ;;  %v16748_v42 = vpop.f32.mrb[242].mxu0  ;;  %v16924_v39 = vpop.f32.mrb[242].mxu1 }
 0x38a   : > { %v15622_v6 = vpack.c.bf16 %v12858_v43, %v12857_v41  ;;  %v12510_v12 = vmax.f32 %v10756_v38, %v16923_v40  ;;  %v10757_v18 = vmax.f32 %v21478_v63, %v16748_v42  ;;  %v10274_v26 = vpop.f32.mrb[243].mxu0  ;;  %v12028_v27 = vpop.f32.mrb[243].mxu1  ;;  %v21491_v43 = vld [vmem:[#allocation108_spill] sm:$0xff] }
 0x38b   : > { %v15617_v54 = vpack.c.bf16 %v12856_v2, %v12855_v61  ;;  %v12508_v37 = vmax.f32 %v10754_v45, %v12025_v60  ;;  %v10755_v31 = vmax.f32 %v21481_v1, %v10274_v26  ;;  %v21493_v29 = vmax.f32 %v21491_v43, %v21492_v28 }
 0x38c   : > { %15916 = vst [vmem:[%s19818_s14 + $0x108] sm:$0xff] %v15622_v6   ;;  %v12689_v10 = vadd.f32 %v20173_v7, %v12510_v12  ;;  %v12511_v11 = vmax.f32 %v10757_v18, %v16924_v39  ;;  %v21494_v39 = vld [vmem:[#allocation110_spill] sm:$0xff]  ;;  %v21495_v6 = vld [vmem:[#allocation111_spill] sm:$0xff] }
 0x38d   : > { %15915 = vst [vmem:[%s19818_s14 + $0x100] sm:$0xff] %v15617_v54   ;;  %v12687_v3 = vadd.f32 %v20173_v7, %v12508_v37  ;;  %v12509_v4 = vmax.f32 %v10755_v31, %v12028_v27  ;;  %v21496_v12 = vmax.f32 %v21494_v39, %v21495_v6  ;;  %v21497_v27 = vld [vmem:[#allocation112_spill] sm:$0xff]  ;;  %v21498_v54 = vld [vmem:[#allocation113_spill] sm:$0xff] }
 0x38e   : > { %v12690_v8 = vadd.f32 %v20173_v7, %v12511_v11  ;;  %v12861_v46 = vmax.f32 %v12689_v10, 0.0  ;;  %v21499_v37 = vmax.f32 %v21497_v27, %v21498_v54  ;;  %v21500_v11 = vld [vmem:[#allocation114_spill] sm:$0xff]  ;;  %v21516_v39 = vld [vmem:[#allocation125_spill] sm:$0xff] }
 0x38f   : > { %v12688_v9 = vadd.f32 %v20173_v7, %v12509_v4  ;;  %v16751_v14 = vpop.f32.mrb[244].mxu0  ;;  %v16927_v15 = vpop.f32.mrb[244].mxu1  ;;  %v12859_v19 = vmax.f32 %v12687_v3, 0.0  ;;  %v21501_v3 = vld [vmem:[#allocation115_spill] sm:$0xff] }
 0x390   : > { %v12862_v47 = vmax.f32 %v12690_v8, 0.0  ;;  %v10760_v34 = vmax.f32 %v21484_v13, %v16751_v14  ;;  %v10287_v16 = vpop.f32.mrb[245].mxu0  ;;  %v12041_v17 = vpop.f32.mrb[245].mxu1  ;;  %v21502_v4 = vmax.f32 %v21500_v11, %v21501_v3 }
 0x391   : > { %v12860_v48 = vmax.f32 %v12688_v9, 0.0  ;;  %v10758_v52 = vmax.f32 %v21487_v51, %v10287_v16  ;;  %v16752_v56 = vpop.f32.mrb[246].mxu0  ;;  %v16928_v57 = vpop.f32.mrb[246].mxu1 }
 0x392   : > { %v15632_v24 = vpack.c.bf16 %v12862_v47, %v12861_v46  ;;  %v12514_v32 = vmax.f32 %v10760_v34, %v16927_v15  ;;  %v10761_v22 = vmax.f32 %v21490_v21, %v16752_v56  ;;  %v10290_v35 = vpop.f32.mrb[247].mxu0  ;;  %v12044_v36 = vpop.f32.mrb[247].mxu1  ;;  %v21503_v47 = vld [vmem:[#allocation116_spill] sm:$0xff] }
 0x393   : > { %v15627_v40 = vpack.c.bf16 %v12860_v48, %v12859_v19  ;;  %v12512_v41 = vmax.f32 %v10758_v52, %v12041_v17  ;;  %v10759_v59 = vmax.f32 %v21493_v29, %v10290_v35  ;;  %v21505_v53 = vmax.f32 %v21503_v47, %v21504_v5 }
 0x394   : > { %15918 = vst [vmem:[%s19818_s14 + $0x118] sm:$0xff] %v15632_v24   ;;  %v12693_v38 = vadd.f32 %v20173_v7, %v12514_v32  ;;  %v12515_v44 = vmax.f32 %v10761_v22, %v16928_v57  ;;  %v21506_v57 = vld [vmem:[#allocation118_spill] sm:$0xff]  ;;  %v21507_v24 = vld [vmem:[#allocation119_spill] sm:$0xff] }
 0x395   : > { %15917 = vst [vmem:[%s19818_s14 + $0x110] sm:$0xff] %v15627_v40   ;;  %v12691_v60 = vadd.f32 %v20173_v7, %v12512_v41  ;;  %v12513_v61 = vmax.f32 %v10759_v59, %v12044_v36  ;;  %v21508_v32 = vmax.f32 %v21506_v57, %v21507_v24  ;;  %v21509_v36 = vld [vmem:[#allocation120_spill] sm:$0xff]  ;;  %v21510_v40 = vld [vmem:[#allocation121_spill] sm:$0xff] }
 0x396   : > { %v12694_v2 = vadd.f32 %v20173_v7, %v12515_v44  ;;  %v12865_v45 = vmax.f32 %v12693_v38, 0.0  ;;  %v21511_v41 = vmax.f32 %v21509_v36, %v21510_v40  ;;  %v21512_v44 = vld [vmem:[#allocation122_spill] sm:$0xff]  ;;  %v21528_v57 = vld [vmem:[#allocation133_spill] sm:$0xff] }
 0x397   : > { %v12692_v55 = vadd.f32 %v20173_v7, %v12513_v61  ;;  %v16755_v23 = vpop.f32.mrb[248].mxu0  ;;  %v16931_v58 = vpop.f32.mrb[248].mxu1  ;;  %v12863_v18 = vmax.f32 %v12691_v60, 0.0  ;;  %v21513_v60 = vld [vmem:[#allocation123_spill] sm:$0xff] }
 0x398   : > { %v12866_v42 = vmax.f32 %v12694_v2, 0.0  ;;  %v10764_v50 = vmax.f32 %v21496_v12, %v16755_v23  ;;  %v10303_v62 = vpop.f32.mrb[249].mxu0  ;;  %v12057_v63 = vpop.f32.mrb[249].mxu1  ;;  %v21514_v61 = vmax.f32 %v21512_v44, %v21513_v60 }
 0x399   : > { %v12864_v26 = vmax.f32 %v12692_v55, 0.0  ;;  %v10762_v30 = vmax.f32 %v21499_v37, %v10303_v62  ;;  %v16756_v0 = vpop.f32.mrb[250].mxu0  ;;  %v16932_v1 = vpop.f32.mrb[250].mxu1 }
 0x39a   : > { %v15642_v31 = vpack.c.bf16 %v12866_v42, %v12865_v45  ;;  %v12518_v10 = vmax.f32 %v10764_v50, %v16931_v58  ;;  %v10765_v8 = vmax.f32 %v21502_v4, %v16756_v0  ;;  %v10306_v9 = vpop.f32.mrb[251].mxu0  ;;  %v12060_v14 = vpop.f32.mrb[251].mxu1  ;;  %v21515_v42 = vld [vmem:[#allocation124_spill] sm:$0xff] }
 0x39b   : > { %v15637_v15 = vpack.c.bf16 %v12864_v26, %v12863_v18  ;;  %v12516_v46 = vmax.f32 %v10762_v30, %v12057_v63  ;;  %v10763_v13 = vmax.f32 %v21505_v53, %v10306_v9  ;;  %v21517_v6 = vmax.f32 %v21515_v42, %v21516_v39 }
 0x39c   : > { %15920 = vst [vmem:[%s19818_s14 + $0x128] sm:$0xff] %v15642_v31   ;;  %v12697_v34 = vadd.f32 %v20173_v7, %v12518_v10  ;;  %v12519_v16 = vmax.f32 %v10765_v8, %v16932_v1  ;;  %v21518_v1 = vld [vmem:[#allocation126_spill] sm:$0xff]  ;;  %v21519_v31 = vld [vmem:[#allocation127_spill] sm:$0xff] }
 0x39d   : > { %15919 = vst [vmem:[%s19818_s14 + $0x120] sm:$0xff] %v15637_v15   ;;  %v12695_v17 = vadd.f32 %v20173_v7, %v12516_v46  ;;  %v12517_v19 = vmax.f32 %v10763_v13, %v12060_v14  ;;  %v21520_v10 = vmax.f32 %v21518_v1, %v21519_v31  ;;  %v21521_v14 = vld [vmem:[#allocation128_spill] sm:$0xff]  ;;  %v21522_v15 = vld [vmem:[#allocation129_spill] sm:$0xff] }
 0x39e   : > { %v12698_v48 = vadd.f32 %v20173_v7, %v12519_v16  ;;  %v12869_v52 = vmax.f32 %v12697_v34, 0.0  ;;  %v21523_v46 = vmax.f32 %v21521_v14, %v21522_v15  ;;  %v21524_v16 = vld [vmem:[#allocation130_spill] sm:$0xff]  ;;  %v21540_v1 = vld [vmem:[#allocation141_spill] sm:$0xff] }
 0x39f   : > { %v12696_v49 = vadd.f32 %v20173_v7, %v12517_v19  ;;  %v16759_v20 = vpop.f32.mrb[252].mxu0  ;;  %v16935_v51 = vpop.f32.mrb[252].mxu1  ;;  %v12867_v22 = vmax.f32 %v12695_v17, 0.0  ;;  %v21525_v17 = vld [vmem:[#allocation131_spill] sm:$0xff] }
 0x3a0   : > { %v12870_v56 = vmax.f32 %v12698_v48, 0.0  ;;  %v10768_v33 = vmax.f32 %v21508_v32, %v16759_v20  ;;  %v10319_v25 = vpop.f32.mrb[253].mxu0  ;;  %v12073_v21 = vpop.f32.mrb[253].mxu1  ;;  %v21526_v19 = vmax.f32 %v21524_v16, %v21525_v17 }
 0x3a1   : > { %v12868_v35 = vmax.f32 %v12696_v49, 0.0  ;;  %v10766_v43 = vmax.f32 %v21511_v41, %v10319_v25  ;;  %v16760_v28 = vpop.f32.mrb[254].mxu0  ;;  %v16936_v29 = vpop.f32.mrb[254].mxu1 }
 0x3a2   : > { %v15652_v59 = vpack.c.bf16 %v12870_v56, %v12869_v52  ;;  %v12522_v38 = vmax.f32 %v10768_v33, %v16935_v51  ;;  %v10769_v2 = vmax.f32 %v21514_v61, %v16760_v28  ;;  %v10322_v55 = vpop.f32.mrb[255].mxu0  ;;  %v12076_v23 = vpop.f32.mrb[255].mxu1  ;;  %v21527_v56 = vld [vmem:[#allocation132_spill] sm:$0xff] }
 0x3a3   : > { %v15647_v58 = vpack.c.bf16 %v12868_v35, %v12867_v22  ;;  %v12520_v45 = vmax.f32 %v10766_v43, %v12073_v21  ;;  %v10767_v12 = vmax.f32 %v21517_v6, %v10322_v55  ;;  %v21529_v24 = vmax.f32 %v21527_v56, %v21528_v57 }
 0x3a4   : > { %15922 = vst [vmem:[%s19818_s14 + $0x138] sm:$0xff] %v15652_v59   ;;  %v12701_v50 = vadd.f32 %v20173_v7, %v12522_v38  ;;  %v12523_v62 = vmax.f32 %v10769_v2, %v16936_v29  ;;  %v21530_v29 = vld [vmem:[#allocation134_spill] sm:$0xff]  ;;  %v21531_v59 = vld [vmem:[#allocation135_spill] sm:$0xff] }
 0x3a5   : > { %15921 = vst [vmem:[%s19818_s14 + $0x130] sm:$0xff] %v15647_v58   ;;  %v12699_v63 = vadd.f32 %v20173_v7, %v12520_v45  ;;  %v12521_v18 = vmax.f32 %v10767_v12, %v12076_v23  ;;  %v21532_v38 = vmax.f32 %v21530_v29, %v21531_v59  ;;  %v21533_v23 = vld [vmem:[#allocation136_spill] sm:$0xff]  ;;  %v21534_v58 = vld [vmem:[#allocation137_spill] sm:$0xff] }
 0x3a6   : > { %v12702_v26 = vadd.f32 %v20173_v7, %v12523_v62  ;;  %v12873_v30 = vmax.f32 %v12701_v50, 0.0  ;;  %v21535_v45 = vmax.f32 %v21533_v23, %v21534_v58  ;;  %v21536_v62 = vld [vmem:[#allocation138_spill] sm:$0xff]  ;;  %v21552_v29 = vld [vmem:[#allocation149_spill] sm:$0xff] }
 0x3a7   : > { %v12700_v27 = vadd.f32 %v20173_v7, %v12521_v18  ;;  %v16763_v54 = vpop.f32.mrb[0].mxu0  ;;  %v16939_v37 = vpop.f32.mrb[0].mxu1  ;;  %v12871_v8 = vmax.f32 %v12699_v63, 0.0  ;;  %v21537_v63 = vld [vmem:[#allocation139_spill] sm:$0xff] }
 0x3a8   : > { %v12874_v0 = vmax.f32 %v12702_v26, 0.0  ;;  %v10772_v11 = vmax.f32 %v21520_v10, %v16763_v54  ;;  %v10335_v3 = vpop.f32.mrb[1].mxu0  ;;  %v12089_v4 = vpop.f32.mrb[1].mxu1  ;;  %v21538_v18 = vmax.f32 %v21536_v62, %v21537_v63 }
 0x3a9   : > { %v12872_v9 = vmax.f32 %v12700_v27, 0.0  ;;  %v10770_v47 = vmax.f32 %v21523_v46, %v10335_v3  ;;  %v16764_v5 = vpop.f32.mrb[2].mxu0  ;;  %v16940_v53 = vpop.f32.mrb[2].mxu1 }
 0x3aa   : > { %v15662_v13 = vpack.c.bf16 %v12874_v0, %v12873_v30  ;;  %v12526_v34 = vmax.f32 %v10772_v11, %v16939_v37  ;;  %v10773_v48 = vmax.f32 %v21526_v19, %v16764_v5  ;;  %v10338_v49 = vpop.f32.mrb[3].mxu0  ;;  %v12092_v20 = vpop.f32.mrb[3].mxu1  ;;  %v21539_v0 = vld [vmem:[#allocation140_spill] sm:$0xff] }
 0x3ab   : > { %v15657_v51 = vpack.c.bf16 %v12872_v9, %v12871_v8  ;;  %v12524_v52 = vmax.f32 %v10770_v47, %v12089_v4  ;;  %v10771_v32 = vmax.f32 %v21529_v24, %v10338_v49  ;;  %v21541_v31 = vmax.f32 %v21539_v0, %v21540_v1 }
 0x3ac   : > { %15924 = vst [vmem:[%s19818_s14 + $0x148] sm:$0xff] %v15662_v13   ;;  %v12705_v33 = vadd.f32 %v20173_v7, %v12526_v34  ;;  %v12527_v25 = vmax.f32 %v10773_v48, %v16940_v53  ;;  %v21542_v53 = vld [vmem:[#allocation142_spill] sm:$0xff]  ;;  %v21543_v13 = vld [vmem:[#allocation143_spill] sm:$0xff] }
 0x3ad   : > { %15923 = vst [vmem:[%s19818_s14 + $0x140] sm:$0xff] %v15657_v51   ;;  %v12703_v21 = vadd.f32 %v20173_v7, %v12524_v52  ;;  %v12525_v22 = vmax.f32 %v10771_v32, %v12092_v20  ;;  %v21544_v34 = vmax.f32 %v21542_v53, %v21543_v13  ;;  %v21545_v20 = vld [vmem:[#allocation144_spill] sm:$0xff]  ;;  %v21546_v51 = vld [vmem:[#allocation145_spill] sm:$0xff] }
 0x3ae   : > { %v12706_v35 = vadd.f32 %v20173_v7, %v12527_v25  ;;  %v12877_v43 = vmax.f32 %v12705_v33, 0.0  ;;  %v21547_v52 = vmax.f32 %v21545_v20, %v21546_v51  ;;  %v21548_v25 = vld [vmem:[#allocation146_spill] sm:$0xff]  ;;  %v21564_v53 = vld [vmem:[#allocation157_spill] sm:$0xff] }
 0x3af   : > { %v12704_v36 = vadd.f32 %v20173_v7, %v12525_v22  ;;  %v16767_v40 = vpop.f32.mrb[4].mxu0  ;;  %v16943_v41 = vpop.f32.mrb[4].mxu1  ;;  %v12875_v2 = vmax.f32 %v12703_v21, 0.0  ;;  %v21549_v21 = vld [vmem:[#allocation147_spill] sm:$0xff] }
 0x3b0   : > { %v12878_v28 = vmax.f32 %v12706_v35, 0.0  ;;  %v10776_v44 = vmax.f32 %v21532_v38, %v16767_v40  ;;  %v10351_v60 = vpop.f32.mrb[5].mxu0  ;;  %v12105_v61 = vpop.f32.mrb[5].mxu1  ;;  %v21550_v22 = vmax.f32 %v21548_v25, %v21549_v21 }
 0x3b1   : > { %v12876_v55 = vmax.f32 %v12704_v36, 0.0  ;;  %v10774_v42 = vmax.f32 %v21535_v45, %v10351_v60  ;;  %v16768_v39 = vpop.f32.mrb[6].mxu0  ;;  %v16944_v6 = vpop.f32.mrb[6].mxu1 }
 0x3b2   : > { %v15672_v12 = vpack.c.bf16 %v12878_v28, %v12877_v43  ;;  %v12530_v50 = vmax.f32 %v10776_v44, %v16943_v41  ;;  %v10777_v26 = vmax.f32 %v21538_v18, %v16768_v39  ;;  %v10354_v27 = vpop.f32.mrb[7].mxu0  ;;  %v12108_v54 = vpop.f32.mrb[7].mxu1  ;;  %v21551_v28 = vld [vmem:[#allocation148_spill] sm:$0xff] }
 0x3b3   : > { %v15667_v37 = vpack.c.bf16 %v12876_v55, %v12875_v2  ;;  %v12528_v30 = vmax.f32 %v10774_v42, %v12105_v61  ;;  %v10775_v10 = vmax.f32 %v21541_v31, %v10354_v27  ;;  %v21553_v59 = vmax.f32 %v21551_v28, %v21552_v29 }
 0x3b4   : > { %15926 = vst [vmem:[%s19818_s14 + $0x158] sm:$0xff] %v15672_v12   ;;  %v12709_v11 = vadd.f32 %v20173_v7, %v12530_v50  ;;  %v12531_v3 = vmax.f32 %v10777_v26, %v16944_v6  ;;  %v21554_v6 = vld [vmem:[#allocation150_spill] sm:$0xff]  ;;  %v21555_v12 = vld [vmem:[#allocation151_spill] sm:$0xff] }
 0x3b5   : > { %15925 = vst [vmem:[%s19818_s14 + $0x150] sm:$0xff] %v15667_v37   ;;  %v12707_v4 = vadd.f32 %v20173_v7, %v12528_v30  ;;  %v12529_v8 = vmax.f32 %v10775_v10, %v12108_v54  ;;  %v21556_v50 = vmax.f32 %v21554_v6, %v21555_v12  ;;  %v21557_v54 = vld [vmem:[#allocation152_spill] sm:$0xff]  ;;  %v21558_v37 = vld [vmem:[#allocation153_spill] sm:$0xff] }
 0x3b6   : > { %v12710_v9 = vadd.f32 %v20173_v7, %v12531_v3  ;;  %v12881_v47 = vmax.f32 %v12709_v11, 0.0  ;;  %v21559_v30 = vmax.f32 %v21557_v54, %v21558_v37  ;;  %v21560_v3 = vld [vmem:[#allocation154_spill] sm:$0xff]  ;;  %v21576_v6 = vld [vmem:[#allocation165_spill] sm:$0xff] }
 0x3b7   : > { %v12708_v14 = vadd.f32 %v20173_v7, %v12529_v8  ;;  %v16771_v15 = vpop.f32.mrb[8].mxu0  ;;  %v16947_v46 = vpop.f32.mrb[8].mxu1  ;;  %v12879_v48 = vmax.f32 %v12707_v4, 0.0  ;;  %v21561_v4 = vld [vmem:[#allocation155_spill] sm:$0xff] }
 0x3b8   : > { %v12882_v5 = vmax.f32 %v12710_v9, 0.0  ;;  %v10780_v16 = vmax.f32 %v21544_v34, %v16771_v15  ;;  %v10367_v17 = vpop.f32.mrb[9].mxu0  ;;  %v12121_v19 = vpop.f32.mrb[9].mxu1  ;;  %v21562_v8 = vmax.f32 %v21560_v3, %v21561_v4 }
 0x3b9   : > { %v12880_v49 = vmax.f32 %v12708_v14, 0.0  ;;  %v10778_v56 = vmax.f32 %v21547_v52, %v10367_v17  ;;  %v16772_v57 = vpop.f32.mrb[10].mxu0  ;;  %v16948_v24 = vpop.f32.mrb[10].mxu1 }
 0x3ba   : > { %v15682_v32 = vpack.c.bf16 %v12882_v5, %v12881_v47  ;;  %v12534_v33 = vmax.f32 %v10780_v16, %v16947_v46  ;;  %v10781_v35 = vmax.f32 %v21550_v22, %v16772_v57  ;;  %v10370_v36 = vpop.f32.mrb[11].mxu0  ;;  %v12124_v40 = vpop.f32.mrb[11].mxu1  ;;  %v21563_v5 = vld [vmem:[#allocation156_spill] sm:$0xff] }
 0x3bb   : > { %v15677_v41 = vpack.c.bf16 %v12880_v49, %v12879_v48  ;;  %v12532_v43 = vmax.f32 %v10778_v56, %v12121_v19  ;;  %v10779_v38 = vmax.f32 %v21553_v59, %v10370_v36  ;;  %v21565_v13 = vmax.f32 %v21563_v5, %v21564_v53 }
 0x3bc   : > { %15928 = vst [vmem:[%s19818_s14 + $0x168] sm:$0xff] %v15682_v32   ;;  %v12713_v44 = vadd.f32 %v20173_v7, %v12534_v33  ;;  %v12535_v60 = vmax.f32 %v10781_v35, %v16948_v24  ;;  %v21566_v24 = vld [vmem:[#allocation158_spill] sm:$0xff]  ;;  %v21567_v32 = vld [vmem:[#allocation159_spill] sm:$0xff] }
 0x3bd   : > { %15927 = vst [vmem:[%s19818_s14 + $0x160] sm:$0xff] %v15677_v41   ;;  %v12711_v61 = vadd.f32 %v20173_v7, %v12532_v43  ;;  %v12533_v2 = vmax.f32 %v10779_v38, %v12124_v40  ;;  %v21568_v33 = vmax.f32 %v21566_v24, %v21567_v32  ;;  %v21569_v40 = vld [vmem:[#allocation160_spill] sm:$0xff]  ;;  %v21570_v41 = vld [vmem:[#allocation161_spill] sm:$0xff] }
 0x3be   : > { %v12714_v55 = vadd.f32 %v20173_v7, %v12535_v60  ;;  %v12885_v42 = vmax.f32 %v12713_v44, 0.0  ;;  %v21571_v43 = vmax.f32 %v21569_v40, %v21570_v41  ;;  %v21572_v60 = vld [vmem:[#allocation162_spill] sm:$0xff]  ;;  %v21588_v24 = vld [vmem:[#allocation173_spill] sm:$0xff] }
 0x3bf   : > { %v12712_v23 = vadd.f32 %v20173_v7, %v12533_v2  ;;  %v16775_v58 = vpop.f32.mrb[12].mxu0  ;;  %v16951_v45 = vpop.f32.mrb[12].mxu1  ;;  %v12883_v26 = vmax.f32 %v12711_v61, 0.0  ;;  %v21573_v61 = vld [vmem:[#allocation163_spill] sm:$0xff] }
 0x3c0   : > { %v12886_v39 = vmax.f32 %v12714_v55, 0.0  ;;  %v10784_v62 = vmax.f32 %v21556_v50, %v16775_v58  ;;  %v10383_v63 = vpop.f32.mrb[13].mxu0  ;;  %v12137_v18 = vpop.f32.mrb[13].mxu1  ;;  %v21574_v2 = vmax.f32 %v21572_v60, %v21573_v61 }
 0x3c1   : > { %v12884_v27 = vmax.f32 %v12712_v23, 0.0  ;;  %v10782_v0 = vmax.f32 %v21559_v30, %v10383_v63  ;;  %v16776_v1 = vpop.f32.mrb[14].mxu0  ;;  %v16952_v31 = vpop.f32.mrb[14].mxu1 }
 0x3c2   : > { %v15692_v10 = vpack.c.bf16 %v12886_v39, %v12885_v42  ;;  %v12538_v11 = vmax.f32 %v10784_v62, %v16951_v45  ;;  %v10785_v9 = vmax.f32 %v21562_v8, %v16776_v1  ;;  %v10386_v14 = vpop.f32.mrb[15].mxu0  ;;  %v12140_v15 = vpop.f32.mrb[15].mxu1  ;;  %v21575_v39 = vld [vmem:[#allocation164_spill] sm:$0xff] }
 0x3c3   : > { %v15687_v46 = vpack.c.bf16 %v12884_v27, %v12883_v26  ;;  %v12536_v47 = vmax.f32 %v10782_v0, %v12137_v18  ;;  %v10783_v34 = vmax.f32 %v21565_v13, %v10386_v14  ;;  %v21577_v12 = vmax.f32 %v21575_v39, %v21576_v6 }
 0x3c4   : > { %15930 = vst [vmem:[%s19818_s14 + $0x178] sm:$0xff] %v15692_v10   ;;  %v12717_v16 = vadd.f32 %v20173_v7, %v12538_v11  ;;  %v12539_v17 = vmax.f32 %v10785_v9, %v16952_v31  ;;  %v21578_v31 = vld [vmem:[#allocation166_spill] sm:$0xff]  ;;  %v21579_v10 = vld [vmem:[#allocation167_spill] sm:$0xff] }
 0x3c5   : > { %15929 = vst [vmem:[%s19818_s14 + $0x170] sm:$0xff] %v15687_v46   ;;  %v12715_v19 = vadd.f32 %v20173_v7, %v12536_v47  ;;  %v12537_v48 = vmax.f32 %v10783_v34, %v12140_v15  ;;  %v21580_v11 = vmax.f32 %v21578_v31, %v21579_v10  ;;  %v21581_v15 = vld [vmem:[#allocation168_spill] sm:$0xff]  ;;  %v21582_v46 = vld [vmem:[#allocation169_spill] sm:$0xff] }
 0x3c6   : > { %v12718_v49 = vadd.f32 %v20173_v7, %v12539_v17  ;;  %v12889_v56 = vmax.f32 %v12717_v16, 0.0  ;;  %v21583_v47 = vmax.f32 %v21581_v15, %v21582_v46  ;;  %v21584_v17 = vld [vmem:[#allocation170_spill] sm:$0xff]  ;;  %v21600_v31 = vld [vmem:[#allocation181_spill] sm:$0xff] }
 0x3c7   : > { %v12716_v20 = vadd.f32 %v20173_v7, %v12537_v48  ;;  %v16779_v51 = vpop.f32.mrb[16].mxu0  ;;  %v16955_v52 = vpop.f32.mrb[16].mxu1  ;;  %v12887_v35 = vmax.f32 %v12715_v19, 0.0  ;;  %v21585_v19 = vld [vmem:[#allocation171_spill] sm:$0xff] }
 0x3c8   : > { %v12890_v57 = vmax.f32 %v12718_v49, 0.0  ;;  %v10788_v25 = vmax.f32 %v21568_v33, %v16779_v51  ;;  %v10399_v21 = vpop.f32.mrb[17].mxu0  ;;  %v12153_v22 = vpop.f32.mrb[17].mxu1  ;;  %v21586_v48 = vmax.f32 %v21584_v17, %v21585_v19 }
 0x3c9   : > { %v12888_v36 = vmax.f32 %v12716_v20, 0.0  ;;  %v10786_v28 = vmax.f32 %v21571_v43, %v10399_v21  ;;  %v16780_v29 = vpop.f32.mrb[18].mxu0  ;;  %v16956_v59 = vpop.f32.mrb[18].mxu1 }
 0x3ca   : > { %v15702_v38 = vpack.c.bf16 %v12890_v57, %v12889_v56  ;;  %v12542_v44 = vmax.f32 %v10788_v25, %v16955_v52  ;;  %v10789_v55 = vmax.f32 %v21574_v2, %v16780_v29  ;;  %v10402_v23 = vpop.f32.mrb[19].mxu0  ;;  %v12156_v58 = vpop.f32.mrb[19].mxu1  ;;  %v21587_v57 = vld [vmem:[#allocation172_spill] sm:$0xff] }
 0x3cb   : > { %v15697_v45 = vpack.c.bf16 %v12888_v36, %v12887_v35  ;;  %v12540_v42 = vmax.f32 %v10786_v28, %v12153_v22  ;;  %v10787_v50 = vmax.f32 %v21577_v12, %v10402_v23  ;;  %v21589_v32 = vmax.f32 %v21587_v57, %v21588_v24 }
 0x3cc   : > { %15932 = vst [vmem:[%s19818_s14 + $0x188] sm:$0xff] %v15702_v38   ;;  %v12721_v62 = vadd.f32 %v20173_v7, %v12542_v44  ;;  %v12543_v63 = vmax.f32 %v10789_v55, %v16956_v59  ;;  %v21590_v59 = vld [vmem:[#allocation174_spill] sm:$0xff]  ;;  %v21591_v38 = vld [vmem:[#allocation175_spill] sm:$0xff] }
 0x3cd   : > { %15931 = vst [vmem:[%s19818_s14 + $0x180] sm:$0xff] %v15697_v45   ;;  %v12719_v18 = vadd.f32 %v20173_v7, %v12540_v42  ;;  %v12541_v26 = vmax.f32 %v10787_v50, %v12156_v58  ;;  %v21592_v44 = vmax.f32 %v21590_v59, %v21591_v38  ;;  %v21593_v58 = vld [vmem:[#allocation176_spill] sm:$0xff]  ;;  %v21594_v45 = vld [vmem:[#allocation177_spill] sm:$0xff] }
 0x3ce   : > { %v12722_v27 = vadd.f32 %v20173_v7, %v12543_v63  ;;  %v12893_v0 = vmax.f32 %v12721_v62, 0.0  ;;  %v21595_v42 = vmax.f32 %v21593_v58, %v21594_v45  ;;  %v21596_v63 = vld [vmem:[#allocation178_spill] sm:$0xff]  ;;  %v21612_v59 = vld [vmem:[#allocation189_spill] sm:$0xff] }
 0x3cf   : > { %v12720_v54 = vadd.f32 %v20173_v7, %v12541_v26  ;;  %v16783_v37 = vpop.f32.mrb[20].mxu0  ;;  %v16959_v30 = vpop.f32.mrb[20].mxu1  ;;  %v12891_v9 = vmax.f32 %v12719_v18, 0.0  ;;  %v21597_v18 = vld [vmem:[#allocation179_spill] sm:$0xff] }
 0x3d0   : > { %v12894_v1 = vmax.f32 %v12722_v27, 0.0  ;;  %v10792_v3 = vmax.f32 %v21580_v11, %v16783_v37  ;;  %v10415_v4 = vpop.f32.mrb[21].mxu0  ;;  %v12169_v8 = vpop.f32.mrb[21].mxu1  ;;  %v21598_v26 = vmax.f32 %v21596_v63, %v21597_v18 }
 0x3d1   : > { %v12892_v14 = vmax.f32 %v12720_v54, 0.0  ;;  %v10790_v5 = vmax.f32 %v21583_v47, %v10415_v4  ;;  %v16784_v53 = vpop.f32.mrb[22].mxu0  ;;  %v16960_v13 = vpop.f32.mrb[22].mxu1 }
 0x3d2   : > { %v15712_v34 = vpack.c.bf16 %v12894_v1, %v12893_v0  ;;  %v12546_v16 = vmax.f32 %v10792_v3, %v16959_v30  ;;  %v10793_v49 = vmax.f32 %v21586_v48, %v16784_v53  ;;  %v10418_v20 = vpop.f32.mrb[23].mxu0  ;;  %v12172_v51 = vpop.f32.mrb[23].mxu1  ;;  %v21599_v1 = vld [vmem:[#allocation180_spill] sm:$0xff] }
 0x3d3   : > { %v15707_v52 = vpack.c.bf16 %v12892_v14, %v12891_v9  ;;  %v12544_v56 = vmax.f32 %v10790_v5, %v12169_v8  ;;  %v10791_v33 = vmax.f32 %v21589_v32, %v10418_v20  ;;  %v21601_v10 = vmax.f32 %v21599_v1, %v21600_v31 }
 0x3d4   : > { %15934 = vst [vmem:[%s19818_s14 + $0x198] sm:$0xff] %v15712_v34   ;;  %v12725_v25 = vadd.f32 %v20173_v7, %v12546_v16  ;;  %v12547_v21 = vmax.f32 %v10793_v49, %v16960_v13  ;;  %v21602_v13 = vld [vmem:[#allocation182_spill] sm:$0xff]  ;;  %v21603_v34 = vld [vmem:[#allocation183_spill] sm:$0xff] }
 0x3d5   : > { %15933 = vst [vmem:[%s19818_s14 + $0x190] sm:$0xff] %v15707_v52   ;;  %v12723_v22 = vadd.f32 %v20173_v7, %v12544_v56  ;;  %v12545_v35 = vmax.f32 %v10791_v33, %v12172_v51  ;;  %v21604_v16 = vmax.f32 %v21602_v13, %v21603_v34  ;;  %v21605_v51 = vld [vmem:[#allocation184_spill] sm:$0xff]  ;;  %v21606_v52 = vld [vmem:[#allocation185_spill] sm:$0xff] }
 0x3d6   : > { %v12726_v36 = vadd.f32 %v20173_v7, %v12547_v21  ;;  %v12897_v28 = vmax.f32 %v12725_v25, 0.0  ;;  %v21607_v56 = vmax.f32 %v21605_v51, %v21606_v52  ;;  %v21608_v21 = vld [vmem:[#allocation186_spill] sm:$0xff]  ;;  %v21624_v13 = vld [vmem:[#allocation197_spill] sm:$0xff] }
 0x3d7   : > { %v12724_v40 = vadd.f32 %v20173_v7, %v12545_v35  ;;  %v16787_v41 = vpop.f32.mrb[24].mxu0  ;;  %v16963_v43 = vpop.f32.mrb[24].mxu1  ;;  %v12895_v55 = vmax.f32 %v12723_v22, 0.0  ;;  %v21609_v22 = vld [vmem:[#allocation187_spill] sm:$0xff] }
 0x3d8   : > { %v12898_v29 = vmax.f32 %v12726_v36, 0.0  ;;  %v10796_v60 = vmax.f32 %v21592_v44, %v16787_v41  ;;  %v10431_v61 = vpop.f32.mrb[25].mxu0  ;;  %v12185_v2 = vpop.f32.mrb[25].mxu1  ;;  %v21610_v35 = vmax.f32 %v21608_v21, %v21609_v22 }
 0x3d9   : > { %v12896_v23 = vmax.f32 %v12724_v40, 0.0  ;;  %v10794_v39 = vmax.f32 %v21595_v42, %v10431_v61  ;;  %v16788_v6 = vpop.f32.mrb[26].mxu0  ;;  %v16964_v12 = vpop.f32.mrb[26].mxu1 }
 0x3da   : > { %v15722_v50 = vpack.c.bf16 %v12898_v29, %v12897_v28  ;;  %v12550_v62 = vmax.f32 %v10796_v60, %v16963_v43  ;;  %v10797_v27 = vmax.f32 %v21598_v26, %v16788_v6  ;;  %v10434_v54 = vpop.f32.mrb[27].mxu0  ;;  %v12188_v37 = vpop.f32.mrb[27].mxu1  ;;  %v21611_v29 = vld [vmem:[#allocation188_spill] sm:$0xff] }
 0x3db   : > { %v15717_v30 = vpack.c.bf16 %v12896_v23, %v12895_v55  ;;  %v12548_v0 = vmax.f32 %v10794_v39, %v12185_v2  ;;  %v10795_v11 = vmax.f32 %v21601_v10, %v10434_v54  ;;  %v21613_v38 = vmax.f32 %v21611_v29, %v21612_v59 }
 0x3dc   : > { %15936 = vst [vmem:[%s19818_s14 + $0x1a8] sm:$0xff] %v15722_v50   ;;  %v12729_v3 = vadd.f32 %v20173_v7, %v12550_v62  ;;  %v12551_v4 = vmax.f32 %v10797_v27, %v16964_v12  ;;  %v21614_v12 = vld [vmem:[#allocation190_spill] sm:$0xff]  ;;  %v21615_v50 = vld [vmem:[#allocation191_spill] sm:$0xff] }
 0x3dd   : > { %15935 = vst [vmem:[%s19818_s14 + $0x1a0] sm:$0xff] %v15717_v30   ;;  %v12727_v8 = vadd.f32 %v20173_v7, %v12548_v0  ;;  %v12549_v9 = vmax.f32 %v10795_v11, %v12188_v37  ;;  %v21616_v62 = vmax.f32 %v21614_v12, %v21615_v50  ;;  %v21617_v37 = vld [vmem:[#allocation192_spill] sm:$0xff]  ;;  %v21618_v30 = vld [vmem:[#allocation193_spill] sm:$0xff] }
 0x3de   : > { %v12730_v14 = vadd.f32 %v20173_v7, %v12551_v4  ;;  %v12901_v5 = vmax.f32 %v12729_v3, 0.0  ;;  %v21619_v0 = vmax.f32 %v21617_v37, %v21618_v30  ;;  %v21620_v4 = vld [vmem:[#allocation194_spill] sm:$0xff]  ;;  %v21636_v12 = vld [vmem:[#allocation205_spill] sm:$0xff] }
 0x3df   : > { %v12728_v15 = vadd.f32 %v20173_v7, %v12549_v9  ;;  %v16791_v46 = vpop.f32.mrb[28].mxu0  ;;  %v16967_v47 = vpop.f32.mrb[28].mxu1  ;;  %v12899_v49 = vmax.f32 %v12727_v8, 0.0  ;;  %v21621_v8 = vld [vmem:[#allocation195_spill] sm:$0xff] }
 0x3e0   : > { %v12902_v53 = vmax.f32 %v12730_v14, 0.0  ;;  %v10800_v17 = vmax.f32 %v21604_v16, %v16791_v46  ;;  %v10447_v19 = vpop.f32.mrb[29].mxu0  ;;  %v12201_v48 = vpop.f32.mrb[29].mxu1  ;;  %v21622_v9 = vmax.f32 %v21620_v4, %v21621_v8 }
 0x3e1   : > { %v12900_v20 = vmax.f32 %v12728_v15, 0.0  ;;  %v10798_v57 = vmax.f32 %v21607_v56, %v10447_v19  ;;  %v16792_v24 = vpop.f32.mrb[30].mxu0  ;;  %v16968_v32 = vpop.f32.mrb[30].mxu1 }
 0x3e2   : > { %v15732_v33 = vpack.c.bf16 %v12902_v53, %v12901_v5  ;;  %v12554_v25 = vmax.f32 %v10800_v17, %v16967_v47  ;;  %v10801_v36 = vmax.f32 %v21610_v35, %v16792_v24  ;;  %v10450_v40 = vpop.f32.mrb[31].mxu0  ;;  %v12204_v41 = vpop.f32.mrb[31].mxu1  ;;  %v21623_v53 = vld [vmem:[#allocation196_spill] sm:$0xff] }
 0x3e3   : > { %v15727_v43 = vpack.c.bf16 %v12900_v20, %v12899_v49  ;;  %v12552_v28 = vmax.f32 %v10798_v57, %v12201_v48  ;;  %v10799_v44 = vmax.f32 %v21613_v38, %v10450_v40  ;;  %v21625_v34 = vmax.f32 %v21623_v53, %v21624_v13 }
 0x3e4   : > { %15938 = vst [vmem:[%s19818_s14 + $0x1b8] sm:$0xff] %v15732_v33   ;;  %v12733_v60 = vadd.f32 %v20173_v7, %v12554_v25  ;;  %v12555_v61 = vmax.f32 %v10801_v36, %v16968_v32  ;;  %v21626_v32 = vld [vmem:[#allocation198_spill] sm:$0xff]  ;;  %v21627_v33 = vld [vmem:[#allocation199_spill] sm:$0xff] }
 0x3e5   : > { %15937 = vst [vmem:[%s19818_s14 + $0x1b0] sm:$0xff] %v15727_v43   ;;  %v12731_v2 = vadd.f32 %v20173_v7, %v12552_v28  ;;  %v12553_v55 = vmax.f32 %v10799_v44, %v12204_v41  ;;  %v21628_v25 = vmax.f32 %v21626_v32, %v21627_v33  ;;  %v21629_v41 = vld [vmem:[#allocation200_spill] sm:$0xff]  ;;  %v21630_v43 = vld [vmem:[#allocation201_spill] sm:$0xff] }
 0x3e6   : > { %v12734_v23 = vadd.f32 %v20173_v7, %v12555_v61  ;;  %v12905_v39 = vmax.f32 %v12733_v60, 0.0  ;;  %v21631_v28 = vmax.f32 %v21629_v41, %v21630_v43  ;;  %v21632_v61 = vld [vmem:[#allocation202_spill] sm:$0xff]  ;;  %v21648_v32 = vld [vmem:[#allocation213_spill] sm:$0xff] }
 0x3e7   : > { %v12732_v58 = vadd.f32 %v20173_v7, %v12553_v55  ;;  %v16795_v45 = vpop.f32.mrb[32].mxu0  ;;  %v16971_v42 = vpop.f32.mrb[32].mxu1  ;;  %v12903_v27 = vmax.f32 %v12731_v2, 0.0  ;;  %v21633_v2 = vld [vmem:[#allocation203_spill] sm:$0xff] }
 0x3e8   : > { %v12906_v6 = vmax.f32 %v12734_v23, 0.0  ;;  %v10804_v63 = vmax.f32 %v21616_v62, %v16795_v45  ;;  %v10463_v18 = vpop.f32.mrb[33].mxu0  ;;  %v12217_v26 = vpop.f32.mrb[33].mxu1  ;;  %v21634_v55 = vmax.f32 %v21632_v61, %v21633_v2 }
 0x3e9   : > { %v12904_v54 = vmax.f32 %v12732_v58, 0.0  ;;  %v10802_v1 = vmax.f32 %v21619_v0, %v10463_v18  ;;  %v16796_v31 = vpop.f32.mrb[34].mxu0  ;;  %v16972_v10 = vpop.f32.mrb[34].mxu1 }
 0x3ea   : > { %v15742_v11 = vpack.c.bf16 %v12906_v6, %v12905_v39  ;;  %v12558_v3 = vmax.f32 %v10804_v63, %v16971_v42  ;;  %v10805_v14 = vmax.f32 %v21622_v9, %v16796_v31  ;;  %v10466_v15 = vpop.f32.mrb[35].mxu0  ;;  %v12220_v46 = vpop.f32.mrb[35].mxu1  ;;  %v21635_v6 = vld [vmem:[#allocation204_spill] sm:$0xff] }
 0x3eb   : > { %v15737_v47 = vpack.c.bf16 %v12904_v54, %v12903_v27  ;;  %v12556_v5 = vmax.f32 %v10802_v1, %v12217_v26  ;;  %v10803_v16 = vmax.f32 %v21625_v34, %v10466_v15  ;;  %v21637_v50 = vmax.f32 %v21635_v6, %v21636_v12 }
 0x3ec   : > { %15940 = vst [vmem:[%s19818_s14 + $0x1c8] sm:$0xff] %v15742_v11   ;;  %v12737_v17 = vadd.f32 %v20173_v7, %v12558_v3  ;;  %v12559_v19 = vmax.f32 %v10805_v14, %v16972_v10  ;;  %v21638_v10 = vld [vmem:[#allocation206_spill] sm:$0xff]  ;;  %v21639_v11 = vld [vmem:[#allocation207_spill] sm:$0xff] }
 0x3ed   : > { %15939 = vst [vmem:[%s19818_s14 + $0x1c0] sm:$0xff] %v15737_v47   ;;  %v12735_v48 = vadd.f32 %v20173_v7, %v12556_v5  ;;  %v12557_v49 = vmax.f32 %v10803_v16, %v12220_v46  ;;  %v21640_v3 = vmax.f32 %v21638_v10, %v21639_v11  ;;  %v21641_v46 = vld [vmem:[#allocation208_spill] sm:$0xff]  ;;  %v21642_v47 = vld [vmem:[#allocation209_spill] sm:$0xff] }
 0x3ee   : > { %v12738_v20 = vadd.f32 %v20173_v7, %v12559_v19  ;;  %v12909_v57 = vmax.f32 %v12737_v17, 0.0  ;;  %v21643_v5 = vmax.f32 %v21641_v46, %v21642_v47  ;;  %v21644_v19 = vld [vmem:[#allocation210_spill] sm:$0xff] }
 0x3ef   : > { %v12736_v51 = vadd.f32 %v20173_v7, %v12557_v49  ;;  %v16799_v52 = vpop.f32.mrb[36].mxu0  ;;  %v16975_v56 = vpop.f32.mrb[36].mxu1  ;;  %v12907_v36 = vmax.f32 %v12735_v48, 0.0  ;;  %v21645_v48 = vld [vmem:[#allocation211_spill] sm:$0xff] }
 0x3f0   : > { %v12910_v24 = vmax.f32 %v12738_v20, 0.0  ;;  %v10808_v21 = vmax.f32 %v21628_v25, %v16799_v52  ;;  %v10479_v22 = vpop.f32.mrb[37].mxu0  ;;  %v12233_v35 = vpop.f32.mrb[37].mxu1  ;;  %v21646_v49 = vmax.f32 %v21644_v19, %v21645_v48 }
 0x3f1   : > { %v12908_v40 = vmax.f32 %v12736_v51, 0.0  ;;  %v10806_v29 = vmax.f32 %v21631_v28, %v10479_v22  ;;  %v16800_v59 = vpop.f32.mrb[38].mxu0  ;;  %v16976_v38 = vpop.f32.mrb[38].mxu1 }
 0x3f2   : > { %v15752_v44 = vpack.c.bf16 %v12910_v24, %v12909_v57  ;;  %v12562_v60 = vmax.f32 %v10808_v21, %v16975_v56  ;;  %v10809_v23 = vmax.f32 %v21634_v55, %v16800_v59  ;;  %v10482_v58 = vpop.f32.mrb[39].mxu0  ;;  %v12236_v45 = vpop.f32.mrb[39].mxu1  ;;  %v21647_v24 = vld [vmem:[#allocation212_spill] sm:$0xff] }
 0x3f3   : > { %v15747_v42 = vpack.c.bf16 %v12908_v40, %v12907_v36  ;;  %v12560_v39 = vmax.f32 %v10806_v29, %v12233_v35  ;;  %v10807_v62 = vmax.f32 %v21637_v50, %v10482_v58  ;;  %v21649_v33 = vmax.f32 %v21647_v24, %v21648_v32 }
 0x3f4   : > { %15942 = vst [vmem:[%s19818_s14 + $0x1d8] sm:$0xff] %v15752_v44   ;;  %v12741_v63 = vadd.f32 %v20173_v7, %v12562_v60  ;;  %v12563_v18 = vmax.f32 %v10809_v23, %v16976_v38  ;;  %v21650_v38 = vld [vmem:[#allocation214_spill] sm:$0xff]  ;;  %v21651_v44 = vld [vmem:[#allocation215_spill] sm:$0xff] }
 0x3f5   : > { %15941 = vst [vmem:[%s19818_s14 + $0x1d0] sm:$0xff] %v15747_v42   ;;  %v12739_v26 = vadd.f32 %v20173_v7, %v12560_v39  ;;  %v12561_v27 = vmax.f32 %v10807_v62, %v12236_v45  ;;  %v21652_v60 = vmax.f32 %v21650_v38, %v21651_v44  ;;  %v21653_v45 = vld [vmem:[#allocation216_spill] sm:$0xff]  ;;  %v21654_v42 = vld [vmem:[#allocation217_spill] sm:$0xff] }
 0x3f6   : > { %v12742_v54 = vadd.f32 %v20173_v7, %v12563_v18  ;;  %v12913_v1 = vmax.f32 %v12741_v63, 0.0  ;;  %v21655_v39 = vmax.f32 %v21653_v45, %v21654_v42  ;;  %v21656_v63 = vld [vmem:[#allocation218_spill] sm:$0xff]  ;;  %v21657_v18 = vld [vmem:[#allocation219_spill] sm:$0xff]  ;;  %v21672_v38 = vld [vmem:[#allocation229_spill] sm:$0xff] }
 0x3f7   : > { %v12740_v37 = vadd.f32 %v20173_v7, %v12561_v27  ;;  %v16803_v30 = vpop.f32.mrb[40].mxu0  ;;  %v16979_v0 = vpop.f32.mrb[40].mxu1  ;;  %v12911_v14 = vmax.f32 %v12739_v26, 0.0  ;;  %v21658_v26 = vmax.f32 %v21656_v63, %v21657_v18 }
 0x3f8   : > { %v12914_v31 = vmax.f32 %v12742_v54, 0.0  ;;  %v10812_v4 = vmax.f32 %v21640_v3, %v16803_v30  ;;  %v10495_v8 = vpop.f32.mrb[41].mxu0  ;;  %v12249_v9 = vpop.f32.mrb[41].mxu1  ;;  %v20510_v3 = vld [vmem:[%s20711_s2] ss:$0 sm:$0xff] }
 0x3f9   : > { %v12912_v15 = vmax.f32 %v12740_v37, 0.0  ;;  %v10810_v53 = vmax.f32 %v21643_v5, %v10495_v8  ;;  %v16804_v13 = vpop.f32.mrb[42].mxu0  ;;  %v16980_v34 = vpop.f32.mrb[42].mxu1 }
 0x3fa   : > { %v15762_v16 = vpack.c.bf16 %v12914_v31, %v12913_v1  ;;  %v12566_v17 = vmax.f32 %v10812_v4, %v16979_v0  ;;  %v10813_v20 = vmax.f32 %v21646_v49, %v16804_v13  ;;  %v10498_v51 = vpop.f32.mrb[43].mxu0  ;;  %v12252_v52 = vpop.f32.mrb[43].mxu1  ;;  %v21659_v1 = vld [vmem:[#allocation220_spill] sm:$0xff]  ;;  %v21660_v31 = vld [vmem:[#allocation221_spill] sm:$0xff] }
 0x3fb   : > { %v15757_v56 = vpack.c.bf16 %v12912_v15, %v12911_v14  ;;  %v12564_v57 = vmax.f32 %v10810_v53, %v12249_v9  ;;  %v10811_v25 = vmax.f32 %v21649_v33, %v10498_v51  ;;  %v21661_v10 = vmax.f32 %v21659_v1, %v21660_v31 }
 0x3fc   : > { %15944 = vst [vmem:[%s19818_s14 + $0x1e8] sm:$0xff] %v15762_v16   ;;  %v12745_v21 = vadd.f32 %v20173_v7, %v12566_v17  ;;  %v12567_v22 = vmax.f32 %v10813_v20, %v16980_v34  ;;  %v21662_v34 = vld [vmem:[#allocation222_spill] sm:$0xff]  ;;  %v21663_v16 = vld [vmem:[#allocation223_spill] sm:$0xff] }
 0x3fd   : > { %15943 = vst [vmem:[%s19818_s14 + $0x1e0] sm:$0xff] %v15757_v56   ;;  %v12743_v35 = vadd.f32 %v20173_v7, %v12564_v57  ;;  %v12565_v36 = vmax.f32 %v10811_v25, %v12252_v52  ;;  %v21664_v17 = vmax.f32 %v21662_v34, %v21663_v16  ;;  %v21665_v52 = vld [vmem:[#allocation224_spill] sm:$0xff]  ;;  %v21666_v56 = vld [vmem:[#allocation225_spill] sm:$0xff] }
 0x3fe   : > { %v12746_v40 = vadd.f32 %v20173_v7, %v12567_v22  ;;  %v12917_v29 = vmax.f32 %v12745_v21, 0.0  ;;  %v21667_v57 = vmax.f32 %v21665_v52, %v21666_v56  ;;  %v21668_v22 = vld [vmem:[#allocation226_spill] sm:$0xff]  ;;  %v21684_v34 = vld [vmem:[#allocation237_spill] sm:$0xff] }
 0x3ff   : > { %v12744_v41 = vadd.f32 %v20173_v7, %v12565_v36  ;;  %v16807_v43 = vpop.f32.mrb[44].mxu0  ;;  %v16983_v28 = vpop.f32.mrb[44].mxu1  ;;  %v12915_v23 = vmax.f32 %v12743_v35, 0.0  ;;  %v21669_v35 = vld [vmem:[#allocation227_spill] sm:$0xff] }
 0x400   : > { %v12918_v59 = vmax.f32 %v12746_v40, 0.0  ;;  %v10816_v61 = vmax.f32 %v21652_v60, %v16807_v43  ;;  %v10511_v2 = vpop.f32.mrb[45].mxu0  ;;  %v12265_v55 = vpop.f32.mrb[45].mxu1  ;;  %v21670_v36 = vmax.f32 %v21668_v22, %v21669_v35 }
 0x401   : > { %v12916_v58 = vmax.f32 %v12744_v41, 0.0  ;;  %v10814_v6 = vmax.f32 %v21655_v39, %v10511_v2  ;;  %v16808_v12 = vpop.f32.mrb[46].mxu0  ;;  %v16984_v7 = vpop.f32.mrb[46].mxu1 }
 0x402   : > { %v15772_v50 = vpack.c.bf16 %v12918_v59, %v12917_v29  ;;  %v12570_v62 = vmax.f32 %v10816_v61, %v16983_v28  ;;  %v10817_v27 = vmax.f32 %v21658_v26, %v16808_v12  ;;  %v10514_v54 = vpop.f32.mrb[47].mxu0  ;;  %v12268_v37 = vpop.f32.mrb[47].mxu1  ;;  %v21671_v59 = vld [vmem:[#allocation228_spill] sm:$0xff] }
 0x403   : > { %v15767_v30 = vpack.c.bf16 %v12916_v58, %v12915_v23  ;;  %v12568_v0 = vmax.f32 %v10814_v6, %v12265_v55  ;;  %v10815_v11 = vmax.f32 %v21661_v10, %v10514_v54  ;;  %v21673_v44 = vmax.f32 %v21671_v59, %v21672_v38 }
 0x404   : > { %15946 = vst [vmem:[%s19818_s14 + $0x1f8] sm:$0xff] %v15772_v50   ;;  %v12749_v4 = vadd.f32 %v20510_v3, %v12570_v62  ;;  %v12571_v8 = vmax.f32 %v10817_v27, %v16984_v7  ;;  %v21674_v7 = vld [vmem:[#allocation230_spill] sm:$0xff]  ;;  %v21675_v50 = vld [vmem:[#allocation231_spill] sm:$0xff] }
 0x405   : > { %15945 = vst [vmem:[%s19818_s14 + $0x1f0] sm:$0xff] %v15767_v30   ;;  %v12747_v9 = vadd.f32 %v20510_v3, %v12568_v0  ;;  %v12569_v14 = vmax.f32 %v10815_v11, %v12268_v37  ;;  %v21676_v62 = vmax.f32 %v21674_v7, %v21675_v50  ;;  %v21677_v37 = vld [vmem:[#allocation232_spill] sm:$0xff]  ;;  %v21678_v30 = vld [vmem:[#allocation233_spill] sm:$0xff] }
 0x406   : > { %v12750_v15 = vadd.f32 %v20510_v3, %v12571_v8  ;;  %v12921_v53 = vmax.f32 %v12749_v4, 0.0  ;;  %v21679_v0 = vmax.f32 %v21677_v37, %v21678_v30  ;;  %v21680_v8 = vld [vmem:[#allocation234_spill] sm:$0xff]  ;;  %v21696_v7 = vld [vmem:[#allocation245_spill] sm:$0xff] }
 0x407   : > { %v12748_v46 = vadd.f32 %v20510_v3, %v12569_v14  ;;  %v16811_v47 = vpop.f32.mrb[48].mxu0  ;;  %v16987_v5 = vpop.f32.mrb[48].mxu1  ;;  %v12919_v20 = vmax.f32 %v12747_v9, 0.0  ;;  %v21681_v9 = vld [vmem:[#allocation235_spill] sm:$0xff] }
 0x408   : > { %v12922_v13 = vmax.f32 %v12750_v15, 0.0  ;;  %v10820_v19 = vmax.f32 %v21664_v17, %v16811_v47  ;;  %v10527_v48 = vpop.f32.mrb[49].mxu0  ;;  %v12281_v49 = vpop.f32.mrb[49].mxu1  ;;  %v21682_v14 = vmax.f32 %v21680_v8, %v21681_v9 }
 0x409   : > { %v12920_v51 = vmax.f32 %v12748_v46, 0.0  ;;  %v10818_v24 = vmax.f32 %v21667_v57, %v10527_v48  ;;  %v16812_v32 = vpop.f32.mrb[50].mxu0  ;;  %v16988_v33 = vpop.f32.mrb[50].mxu1 }
 0x40a   : > { %v15782_v25 = vpack.c.bf16 %v12922_v13, %v12921_v53  ;;  %v12574_v21 = vmax.f32 %v10820_v19, %v16987_v5  ;;  %v10821_v40 = vmax.f32 %v21670_v36, %v16812_v32  ;;  %v10530_v41 = vpop.f32.mrb[51].mxu0  ;;  %v12284_v43 = vpop.f32.mrb[51].mxu1  ;;  %v21683_v13 = vld [vmem:[#allocation236_spill] sm:$0xff] }
 0x40b   : > { %v15777_v28 = vpack.c.bf16 %v12920_v51, %v12919_v20  ;;  %v12572_v29 = vmax.f32 %v10818_v24, %v12281_v49  ;;  %v10819_v60 = vmax.f32 %v21673_v44, %v10530_v41  ;;  %v21685_v16 = vmax.f32 %v21683_v13, %v21684_v34 }
 0x40c   : > { %15948 = vst [vmem:[%s19818_s14 + $0x208] sm:$0xff] %v15782_v25   ;;  %v12753_v61 = vadd.f32 %v20510_v3, %v12574_v21  ;;  %v12575_v2 = vmax.f32 %v10821_v40, %v16988_v33  ;;  %v21686_v33 = vld [vmem:[#allocation238_spill] sm:$0xff]  ;;  %v21687_v25 = vld [vmem:[#allocation239_spill] sm:$0xff] }
 0x40d   : > { %15947 = vst [vmem:[%s19818_s14 + $0x200] sm:$0xff] %v15777_v28   ;;  %v12751_v55 = vadd.f32 %v20510_v3, %v12572_v29  ;;  %v12573_v23 = vmax.f32 %v10819_v60, %v12284_v43  ;;  %v21688_v21 = vmax.f32 %v21686_v33, %v21687_v25  ;;  %v21689_v43 = vld [vmem:[#allocation240_spill] sm:$0xff]  ;;  %v21690_v28 = vld [vmem:[#allocation241_spill] sm:$0xff] }
 0x40e   : > { %v12754_v58 = vadd.f32 %v20510_v3, %v12575_v2  ;;  %v12925_v6 = vmax.f32 %v12753_v61, 0.0  ;;  %v21691_v29 = vmax.f32 %v21689_v43, %v21690_v28  ;;  %v21692_v2 = vld [vmem:[#allocation242_spill] sm:$0xff]  ;;  %v21708_v33 = vld [vmem:[#allocation253_spill] sm:$0xff] }
 0x40f   : > { %v12752_v45 = vadd.f32 %v20510_v3, %v12573_v23  ;;  %v16815_v42 = vpop.f32.mrb[52].mxu0  ;;  %v16991_v39 = vpop.f32.mrb[52].mxu1  ;;  %v12923_v27 = vmax.f32 %v12751_v55, 0.0  ;;  %v21693_v55 = vld [vmem:[#allocation243_spill] sm:$0xff] }
 0x410   : > { %v12926_v12 = vmax.f32 %v12754_v58, 0.0  ;;  %v10824_v63 = vmax.f32 %v21676_v62, %v16815_v42  ;;  %v10543_v18 = vpop.f32.mrb[53].mxu0  ;;  %v12297_v26 = vpop.f32.mrb[53].mxu1  ;;  %v21694_v23 = vmax.f32 %v21692_v2, %v21693_v55 }
 0x411   : > { %v12924_v54 = vmax.f32 %v12752_v45, 0.0  ;;  %v10822_v1 = vmax.f32 %v21679_v0, %v10543_v18  ;;  %v16816_v31 = vpop.f32.mrb[54].mxu0  ;;  %v16992_v10 = vpop.f32.mrb[54].mxu1 }
 0x412   : > { %v15792_v11 = vpack.c.bf16 %v12926_v12, %v12925_v6  ;;  %v12578_v4 = vmax.f32 %v10824_v63, %v16991_v39  ;;  %v10825_v15 = vmax.f32 %v21682_v14, %v16816_v31  ;;  %v10546_v46 = vpop.f32.mrb[55].mxu0  ;;  %v12300_v47 = vpop.f32.mrb[55].mxu1  ;;  %v21695_v12 = vld [vmem:[#allocation244_spill] sm:$0xff] }
 0x413   : > { %v15787_v5 = vpack.c.bf16 %v12924_v54, %v12923_v27  ;;  %v12576_v53 = vmax.f32 %v10822_v1, %v12297_v26  ;;  %v10823_v17 = vmax.f32 %v21685_v16, %v10546_v46  ;;  %v21697_v50 = vmax.f32 %v21695_v12, %v21696_v7 }
 0x414   : > { %15950 = vst [vmem:[%s19818_s14 + $0x218] sm:$0xff] %v15792_v11   ;;  %v12757_v19 = vadd.f32 %v20510_v3, %v12578_v4  ;;  %v12579_v48 = vmax.f32 %v10825_v15, %v16992_v10  ;;  %v21698_v10 = vld [vmem:[#allocation246_spill] sm:$0xff]  ;;  %v21699_v11 = vld [vmem:[#allocation247_spill] sm:$0xff] }
 0x415   : > { %15949 = vst [vmem:[%s19818_s14 + $0x210] sm:$0xff] %v15787_v5   ;;  %v12755_v49 = vadd.f32 %v20510_v3, %v12576_v53  ;;  %v12577_v20 = vmax.f32 %v10823_v17, %v12300_v47  ;;  %v21700_v4 = vmax.f32 %v21698_v10, %v21699_v11  ;;  %v21701_v47 = vld [vmem:[#allocation248_spill] sm:$0xff]  ;;  %v21702_v5 = vld [vmem:[#allocation249_spill] sm:$0xff] }
 0x416   : > { %v12758_v51 = vadd.f32 %v20510_v3, %v12579_v48  ;;  %v12929_v24 = vmax.f32 %v12757_v19, 0.0  ;;  %v21703_v53 = vmax.f32 %v21701_v47, %v21702_v5  ;;  %v21704_v48 = vld [vmem:[#allocation250_spill] sm:$0xff]  ;;  %v21720_v10 = vld [vmem:[#allocation261_spill] sm:$0xff] }
 0x417   : > { %v12756_v52 = vadd.f32 %v20510_v3, %v12577_v20  ;;  %v16819_v56 = vpop.f32.mrb[56].mxu0  ;;  %v16995_v57 = vpop.f32.mrb[56].mxu1  ;;  %v12927_v40 = vmax.f32 %v12755_v49, 0.0  ;;  %v21705_v49 = vld [vmem:[#allocation251_spill] sm:$0xff] }
 0x418   : > { %v12930_v32 = vmax.f32 %v12758_v51, 0.0  ;;  %v10828_v22 = vmax.f32 %v21688_v21, %v16819_v56  ;;  %v10559_v35 = vpop.f32.mrb[57].mxu0  ;;  %v12313_v36 = vpop.f32.mrb[57].mxu1  ;;  %v21706_v20 = vmax.f32 %v21704_v48, %v21705_v49 }
 0x419   : > { %v12928_v41 = vmax.f32 %v12756_v52, 0.0  ;;  %v10826_v59 = vmax.f32 %v21691_v29, %v10559_v35  ;;  %v16820_v38 = vpop.f32.mrb[58].mxu0  ;;  %v16996_v44 = vpop.f32.mrb[58].mxu1 }
 0x41a   : > { %v15802_v60 = vpack.c.bf16 %v12930_v32, %v12929_v24  ;;  %v12582_v61 = vmax.f32 %v10828_v22, %v16995_v57  ;;  %v10829_v58 = vmax.f32 %v21694_v23, %v16820_v38  ;;  %v10562_v45 = vpop.f32.mrb[59].mxu0  ;;  %v12316_v42 = vpop.f32.mrb[59].mxu1  ;;  %v21707_v32 = vld [vmem:[#allocation252_spill] sm:$0xff] }
 0x41b   : > { %v15797_v39 = vpack.c.bf16 %v12928_v41, %v12927_v40  ;;  %v12580_v6 = vmax.f32 %v10826_v59, %v12313_v36  ;;  %v10827_v62 = vmax.f32 %v21697_v50, %v10562_v45  ;;  %v21709_v25 = vmax.f32 %v21707_v32, %v21708_v33 }
 0x41c   : > { %15952 = vst [vmem:[%s19818_s14 + $0x228] sm:$0xff] %v15802_v60   ;;  %v12761_v63 = vadd.f32 %v20510_v3, %v12582_v61  ;;  %v12583_v18 = vmax.f32 %v10829_v58, %v16996_v44  ;;  %v21710_v44 = vld [vmem:[#allocation254_spill] sm:$0xff]  ;;  %v21711_v60 = vld [vmem:[#allocation255_spill] sm:$0xff] }
 0x41d   : > { %15951 = vst [vmem:[%s19818_s14 + $0x220] sm:$0xff] %v15797_v39   ;;  %v12759_v26 = vadd.f32 %v20510_v3, %v12580_v6  ;;  %v12581_v27 = vmax.f32 %v10827_v62, %v12316_v42  ;;  %v21712_v61 = vmax.f32 %v21710_v44, %v21711_v60  ;;  %v21713_v42 = vld [vmem:[#allocation256_spill] sm:$0xff]  ;;  %v21714_v39 = vld [vmem:[#allocation257_spill] sm:$0xff] }
 0x41e   : > { %v12762_v54 = vadd.f32 %v20510_v3, %v12583_v18  ;;  %v12933_v1 = vmax.f32 %v12761_v63, 0.0  ;;  %v21715_v6 = vmax.f32 %v21713_v42, %v21714_v39  ;;  %v21716_v18 = vld [vmem:[#allocation258_spill] sm:$0xff]  ;;  %v21732_v44 = vld [vmem:[#allocation269_spill] sm:$0xff] }
 0x41f   : > { %v12760_v37 = vadd.f32 %v20510_v3, %v12581_v27  ;;  %v16823_v30 = vpop.f32.mrb[60].mxu0  ;;  %v16999_v0 = vpop.f32.mrb[60].mxu1  ;;  %v12931_v15 = vmax.f32 %v12759_v26, 0.0  ;;  %v21717_v26 = vld [vmem:[#allocation259_spill] sm:$0xff] }
 0x420   : > { %v12934_v31 = vmax.f32 %v12762_v54, 0.0  ;;  %v10832_v8 = vmax.f32 %v21700_v4, %v16823_v30  ;;  %v10575_v9 = vpop.f32.mrb[61].mxu0  ;;  %v12329_v14 = vpop.f32.mrb[61].mxu1  ;;  %v21718_v27 = vmax.f32 %v21716_v18, %v21717_v26 }
 0x421   : > { %v12932_v46 = vmax.f32 %v12760_v37, 0.0  ;;  %v10830_v13 = vmax.f32 %v21703_v53, %v10575_v9  ;;  %v16824_v34 = vpop.f32.mrb[62].mxu0  ;;  %v17000_v16 = vpop.f32.mrb[62].mxu1 }
 0x422   : > { %v15812_v17 = vpack.c.bf16 %v12934_v31, %v12933_v1  ;;  %v12586_v19 = vmax.f32 %v10832_v8, %v16999_v0  ;;  %v10833_v51 = vmax.f32 %v21706_v20, %v16824_v34  ;;  %v10578_v52 = vpop.f32.mrb[63].mxu0  ;;  %v12332_v56 = vpop.f32.mrb[63].mxu1  ;;  %v21719_v31 = vld [vmem:[#allocation260_spill] sm:$0xff] }
 0x423   : > { %v15807_v57 = vpack.c.bf16 %v12932_v46, %v12931_v15  ;;  %v12584_v24 = vmax.f32 %v10830_v13, %v12329_v14  ;;  %v10831_v21 = vmax.f32 %v21709_v25, %v10578_v52  ;;  %v21721_v11 = vmax.f32 %v21719_v31, %v21720_v10 }
 0x424   : > { %15954 = vst [vmem:[%s19818_s14 + $0x238] sm:$0xff] %v15812_v17   ;;  %v12765_v22 = vadd.f32 %v20510_v3, %v12586_v19  ;;  %v12587_v35 = vmax.f32 %v10833_v51, %v17000_v16  ;;  %v21722_v16 = vld [vmem:[#allocation262_spill] sm:$0xff]  ;;  %v21723_v17 = vld [vmem:[#allocation263_spill] sm:$0xff] }
 0x425   : > { %15953 = vst [vmem:[%s19818_s14 + $0x230] sm:$0xff] %v15807_v57   ;;  %v12763_v36 = vadd.f32 %v20510_v3, %v12584_v24  ;;  %v12585_v40 = vmax.f32 %v10831_v21, %v12332_v56  ;;  %v21724_v19 = vmax.f32 %v21722_v16, %v21723_v17  ;;  %v21725_v56 = vld [vmem:[#allocation264_spill] sm:$0xff]  ;;  %v21726_v57 = vld [vmem:[#allocation265_spill] sm:$0xff] }
 0x426   : > { %v12766_v41 = vadd.f32 %v20510_v3, %v12587_v35  ;;  %v12937_v59 = vmax.f32 %v12765_v22, 0.0  ;;  %v21727_v24 = vmax.f32 %v21725_v56, %v21726_v57  ;;  %v21728_v35 = vld [vmem:[#allocation266_spill] sm:$0xff]  ;;  %v21744_v16 = vld [vmem:[#allocation277_spill] sm:$0xff] }
 0x427   : > { %v12764_v43 = vadd.f32 %v20510_v3, %v12585_v40  ;;  %v16827_v28 = vpop.f32.mrb[64].mxu0  ;;  %v17003_v29 = vpop.f32.mrb[64].mxu1  ;;  %v12935_v58 = vmax.f32 %v12763_v36, 0.0  ;;  %v21729_v36 = vld [vmem:[#allocation267_spill] sm:$0xff] }
 0x428   : > { %v12938_v38 = vmax.f32 %v12766_v41, 0.0  ;;  %v10836_v2 = vmax.f32 %v21712_v61, %v16827_v28  ;;  %v10591_v55 = vpop.f32.mrb[65].mxu0  ;;  %v12345_v23 = vpop.f32.mrb[65].mxu1  ;;  %v21730_v40 = vmax.f32 %v21728_v35, %v21729_v36 }
 0x429   : > { %v12936_v45 = vmax.f32 %v12764_v43, 0.0  ;;  %v10834_v12 = vmax.f32 %v21715_v6, %v10591_v55  ;;  %v16828_v7 = vpop.f32.mrb[66].mxu0  ;;  %v17004_v50 = vpop.f32.mrb[66].mxu1 }
 0x42a   : > { %v15822_v62 = vpack.c.bf16 %v12938_v38, %v12937_v59  ;;  %v12590_v63 = vmax.f32 %v10836_v2, %v17003_v29  ;;  %v10837_v54 = vmax.f32 %v21718_v27, %v16828_v7  ;;  %v10594_v37 = vpop.f32.mrb[67].mxu0  ;;  %v12348_v30 = vpop.f32.mrb[67].mxu1  ;;  %v21731_v38 = vld [vmem:[#allocation268_spill] sm:$0xff] }
 0x42b   : > { %v15817_v0 = vpack.c.bf16 %v12936_v45, %v12935_v58  ;;  %v12588_v1 = vmax.f32 %v10834_v12, %v12345_v23  ;;  %v10835_v4 = vmax.f32 %v21721_v11, %v10594_v37  ;;  %v21733_v60 = vmax.f32 %v21731_v38, %v21732_v44 }
 0x42c   : > { %15956 = vst [vmem:[%s19818_s14 + $0x248] sm:$0xff] %v15822_v62   ;;  %v12769_v8 = vadd.f32 %v20510_v3, %v12590_v63  ;;  %v12591_v9 = vmax.f32 %v10837_v54, %v17004_v50  ;;  %v21734_v50 = vld [vmem:[#allocation270_spill] sm:$0xff]  ;;  %v21735_v62 = vld [vmem:[#allocation271_spill] sm:$0xff] }
 0x42d   : > { %15955 = vst [vmem:[%s19818_s14 + $0x240] sm:$0xff] %v15817_v0   ;;  %v12767_v14 = vadd.f32 %v20510_v3, %v12588_v1  ;;  %v12589_v15 = vmax.f32 %v10835_v4, %v12348_v30  ;;  %v21736_v63 = vmax.f32 %v21734_v50, %v21735_v62  ;;  %v21737_v30 = vld [vmem:[#allocation272_spill] sm:$0xff]  ;;  %v21738_v0 = vld [vmem:[#allocation273_spill] sm:$0xff] }
 0x42e   : > { %v12770_v46 = vadd.f32 %v20510_v3, %v12591_v9  ;;  %v12941_v13 = vmax.f32 %v12769_v8, 0.0  ;;  %v21739_v1 = vmax.f32 %v21737_v30, %v21738_v0  ;;  %v21740_v9 = vld [vmem:[#allocation274_spill] sm:$0xff]  ;;  %v21756_v50 = vld [vmem:[#allocation285_spill] sm:$0xff] }
 0x42f   : > { %v12768_v47 = vadd.f32 %v20510_v3, %v12589_v15  ;;  %v16831_v5 = vpop.f32.mrb[68].mxu0  ;;  %v17007_v53 = vpop.f32.mrb[68].mxu1  ;;  %v12939_v51 = vmax.f32 %v12767_v14, 0.0  ;;  %v21741_v14 = vld [vmem:[#allocation275_spill] sm:$0xff] }
 0x430   : > { %v12942_v34 = vmax.f32 %v12770_v46, 0.0  ;;  %v10840_v48 = vmax.f32 %v21724_v19, %v16831_v5  ;;  %v10607_v49 = vpop.f32.mrb[69].mxu0  ;;  %v12361_v20 = vpop.f32.mrb[69].mxu1  ;;  %v21742_v15 = vmax.f32 %v21740_v9, %v21741_v14 }
 0x431   : > { %v12940_v52 = vmax.f32 %v12768_v47, 0.0  ;;  %v10838_v32 = vmax.f32 %v21727_v24, %v10607_v49  ;;  %v16832_v33 = vpop.f32.mrb[70].mxu0  ;;  %v17008_v25 = vpop.f32.mrb[70].mxu1 }
 0x432   : > { %v15832_v21 = vpack.c.bf16 %v12942_v34, %v12941_v13  ;;  %v12594_v22 = vmax.f32 %v10840_v48, %v17007_v53  ;;  %v10841_v41 = vmax.f32 %v21730_v40, %v16832_v33  ;;  %v10610_v43 = vpop.f32.mrb[71].mxu0  ;;  %v12364_v28 = vpop.f32.mrb[71].mxu1  ;;  %v21743_v34 = vld [vmem:[#allocation276_spill] sm:$0xff] }
 0x433   : > { %v15827_v29 = vpack.c.bf16 %v12940_v52, %v12939_v51  ;;  %v12592_v59 = vmax.f32 %v10838_v32, %v12361_v20  ;;  %v10839_v61 = vmax.f32 %v21733_v60, %v10610_v43  ;;  %v21745_v17 = vmax.f32 %v21743_v34, %v21744_v16 }
 0x434   : > { %15958 = vst [vmem:[%s19818_s14 + $0x258] sm:$0xff] %v15832_v21   ;;  %v12773_v2 = vadd.f32 %v20510_v3, %v12594_v22  ;;  %v12595_v55 = vmax.f32 %v10841_v41, %v17008_v25  ;;  %v21746_v25 = vld [vmem:[#allocation278_spill] sm:$0xff]  ;;  %v21747_v21 = vld [vmem:[#allocation279_spill] sm:$0xff] }
 0x435   : > { %15957 = vst [vmem:[%s19818_s14 + $0x250] sm:$0xff] %v15827_v29   ;;  %v12771_v23 = vadd.f32 %v20510_v3, %v12592_v59  ;;  %v12593_v58 = vmax.f32 %v10839_v61, %v12364_v28  ;;  %v21748_v22 = vmax.f32 %v21746_v25, %v21747_v21  ;;  %v21749_v28 = vld [vmem:[#allocation280_spill] sm:$0xff]  ;;  %v21750_v29 = vld [vmem:[#allocation281_spill] sm:$0xff] }
 0x436   : > { %v12774_v45 = vadd.f32 %v20510_v3, %v12595_v55  ;;  %v12945_v12 = vmax.f32 %v12773_v2, 0.0  ;;  %v21751_v59 = vmax.f32 %v21749_v28, %v21750_v29  ;;  %v21752_v55 = vld [vmem:[#allocation282_spill] sm:$0xff]  ;;  %v21768_v25 = vld [vmem:[#allocation293_spill] sm:$0xff] }
 0x437   : > { %v12772_v42 = vadd.f32 %v20510_v3, %v12593_v58  ;;  %v16835_v39 = vpop.f32.mrb[72].mxu0  ;;  %v17011_v6 = vpop.f32.mrb[72].mxu1  ;;  %v12943_v54 = vmax.f32 %v12771_v23, 0.0  ;;  %v21753_v23 = vld [vmem:[#allocation283_spill] sm:$0xff] }
 0x438   : > { %v12946_v7 = vmax.f32 %v12774_v45, 0.0  ;;  %v10844_v18 = vmax.f32 %v21736_v63, %v16835_v39  ;;  %v10623_v26 = vpop.f32.mrb[73].mxu0  ;;  %v12377_v27 = vpop.f32.mrb[73].mxu1  ;;  %v21754_v58 = vmax.f32 %v21752_v55, %v21753_v23 }
 0x439   : > { %v12944_v37 = vmax.f32 %v12772_v42, 0.0  ;;  %v10842_v31 = vmax.f32 %v21739_v1, %v10623_v26  ;;  %v16836_v10 = vpop.f32.mrb[74].mxu0  ;;  %v17012_v11 = vpop.f32.mrb[74].mxu1 }
 0x43a   : > { %v15842_v4 = vpack.c.bf16 %v12946_v7, %v12945_v12  ;;  %v12598_v8 = vmax.f32 %v10844_v18, %v17011_v6  ;;  %v10845_v46 = vmax.f32 %v21742_v15, %v16836_v10  ;;  %v10626_v47 = vpop.f32.mrb[75].mxu0  ;;  %v12380_v5 = vpop.f32.mrb[75].mxu1  ;;  %v21755_v7 = vld [vmem:[#allocation284_spill] sm:$0xff] }
 0x43b   : > { %v15837_v53 = vpack.c.bf16 %v12944_v37, %v12943_v54  ;;  %v12596_v13 = vmax.f32 %v10842_v31, %v12377_v27  ;;  %v10843_v19 = vmax.f32 %v21745_v17, %v10626_v47  ;;  %v21757_v62 = vmax.f32 %v21755_v7, %v21756_v50 }
 0x43c   : > { %15960 = vst [vmem:[%s19818_s14 + $0x268] sm:$0xff] %v15842_v4   ;;  %v12777_v48 = vadd.f32 %v20510_v3, %v12598_v8  ;;  %v12599_v49 = vmax.f32 %v10845_v46, %v17012_v11  ;;  %v21758_v11 = vld [vmem:[#allocation286_spill] sm:$0xff]  ;;  %v21759_v4 = vld [vmem:[#allocation287_spill] sm:$0xff] }
 0x43d   : > { %15959 = vst [vmem:[%s19818_s14 + $0x260] sm:$0xff] %v15837_v53   ;;  %v12775_v20 = vadd.f32 %v20510_v3, %v12596_v13  ;;  %v12597_v51 = vmax.f32 %v10843_v19, %v12380_v5  ;;  %v21760_v8 = vmax.f32 %v21758_v11, %v21759_v4  ;;  %v21761_v5 = vld [vmem:[#allocation288_spill] sm:$0xff]  ;;  %v21762_v53 = vld [vmem:[#allocation289_spill] sm:$0xff] }
 0x43e   : > { %v12778_v52 = vadd.f32 %v20510_v3, %v12599_v49  ;;  %v12949_v32 = vmax.f32 %v12777_v48, 0.0  ;;  %v21763_v13 = vmax.f32 %v21761_v5, %v21762_v53  ;;  %v21764_v49 = vld [vmem:[#allocation290_spill] sm:$0xff]  ;;  %v21780_v11 = vld [vmem:[#allocation301_spill] sm:$0xff] }
 0x43f   : > { %v12776_v56 = vadd.f32 %v20510_v3, %v12597_v51  ;;  %v16839_v57 = vpop.f32.mrb[76].mxu0  ;;  %v17015_v24 = vpop.f32.mrb[76].mxu1  ;;  %v12947_v41 = vmax.f32 %v12775_v20, 0.0  ;;  %v21765_v20 = vld [vmem:[#allocation291_spill] sm:$0xff] }
 0x440   : > { %v12950_v33 = vmax.f32 %v12778_v52, 0.0  ;;  %v10848_v35 = vmax.f32 %v21748_v22, %v16839_v57  ;;  %v10639_v36 = vpop.f32.mrb[77].mxu0  ;;  %v12393_v40 = vpop.f32.mrb[77].mxu1  ;;  %v21766_v51 = vmax.f32 %v21764_v49, %v21765_v20 }
 0x441   : > { %v12948_v43 = vmax.f32 %v12776_v56, 0.0  ;;  %v10846_v38 = vmax.f32 %v21751_v59, %v10639_v36  ;;  %v16840_v44 = vpop.f32.mrb[78].mxu0  ;;  %v17016_v60 = vpop.f32.mrb[78].mxu1 }
 0x442   : > { %v15852_v61 = vpack.c.bf16 %v12950_v33, %v12949_v32  ;;  %v12602_v2 = vmax.f32 %v10848_v35, %v17015_v24  ;;  %v10849_v45 = vmax.f32 %v21754_v58, %v16840_v44  ;;  %v10642_v42 = vpop.f32.mrb[79].mxu0  ;;  %v12396_v39 = vpop.f32.mrb[79].mxu1  ;;  %v21767_v33 = vld [vmem:[#allocation292_spill] sm:$0xff] }
 0x443   : > { %v15847_v6 = vpack.c.bf16 %v12948_v43, %v12947_v41  ;;  %v12600_v12 = vmax.f32 %v10846_v38, %v12393_v40  ;;  %v10847_v63 = vmax.f32 %v21757_v62, %v10642_v42  ;;  %v21769_v21 = vmax.f32 %v21767_v33, %v21768_v25 }
 0x444   : > { %15962 = vst [vmem:[%s19818_s14 + $0x278] sm:$0xff] %v15852_v61   ;;  %v12781_v18 = vadd.f32 %v20510_v3, %v12602_v2  ;;  %v12603_v26 = vmax.f32 %v10849_v45, %v17016_v60  ;;  %v21770_v60 = vld [vmem:[#allocation294_spill] sm:$0xff]  ;;  %v21771_v61 = vld [vmem:[#allocation295_spill] sm:$0xff] }
 0x445   : > { %15961 = vst [vmem:[%s19818_s14 + $0x270] sm:$0xff] %v15847_v6   ;;  %v12779_v27 = vadd.f32 %v20510_v3, %v12600_v12  ;;  %v12601_v54 = vmax.f32 %v10847_v63, %v12396_v39  ;;  %v21772_v2 = vmax.f32 %v21770_v60, %v21771_v61  ;;  %v21773_v39 = vld [vmem:[#allocation296_spill] sm:$0xff]  ;;  %v21774_v6 = vld [vmem:[#allocation297_spill] sm:$0xff] }
 0x446   : > { %v12782_v37 = vadd.f32 %v20510_v3, %v12603_v26  ;;  %v12953_v31 = vmax.f32 %v12781_v18, 0.0  ;;  %v21775_v12 = vmax.f32 %v21773_v39, %v21774_v6  ;;  %v21776_v26 = vld [vmem:[#allocation298_spill] sm:$0xff] }
 0x447   : > { %v12780_v30 = vadd.f32 %v20510_v3, %v12601_v54  ;;  %v16843_v0 = vpop.f32.mrb[80].mxu0  ;;  %v17019_v1 = vpop.f32.mrb[80].mxu1  ;;  %v12951_v46 = vmax.f32 %v12779_v27, 0.0  ;;  %v21777_v27 = vld [vmem:[#allocation299_spill] sm:$0xff] }
 0x448   : > { %v12954_v10 = vmax.f32 %v12782_v37, 0.0  ;;  %v10852_v9 = vmax.f32 %v21760_v8, %v16843_v0  ;;  %v10655_v14 = vpop.f32.mrb[81].mxu0  ;;  %v12409_v15 = vpop.f32.mrb[81].mxu1  ;;  %v21778_v54 = vmax.f32 %v21776_v26, %v21777_v27 }
 0x449   : > { %v12952_v47 = vmax.f32 %v12780_v30, 0.0  ;;  %v10850_v34 = vmax.f32 %v21763_v13, %v10655_v14  ;;  %v16844_v16 = vpop.f32.mrb[82].mxu0  ;;  %v17020_v17 = vpop.f32.mrb[82].mxu1 }
 0x44a   : > { %v15862_v19 = vpack.c.bf16 %v12954_v10, %v12953_v31  ;;  %v12606_v48 = vmax.f32 %v10852_v9, %v17019_v1  ;;  %v10853_v52 = vmax.f32 %v21766_v51, %v16844_v16  ;;  %v10658_v56 = vpop.f32.mrb[83].mxu0  ;;  %v12412_v57 = vpop.f32.mrb[83].mxu1  ;;  %v21779_v10 = vld [vmem:[#allocation300_spill] sm:$0xff] }
 0x44b   : > { %v15857_v24 = vpack.c.bf16 %v12952_v47, %v12951_v46  ;;  %v12604_v32 = vmax.f32 %v10850_v34, %v12409_v15  ;;  %v10851_v22 = vmax.f32 %v21769_v21, %v10658_v56  ;;  %v21781_v4 = vmax.f32 %v21779_v10, %v21780_v11 }
 0x44c   : > { %15964 = vst [vmem:[%s19818_s14 + $0x288] sm:$0xff] %v15862_v19   ;;  %v12785_v35 = vadd.f32 %v20510_v3, %v12606_v48  ;;  %v12607_v36 = vmax.f32 %v10853_v52, %v17020_v17 }
 0x44d   : > { %15963 = vst [vmem:[%s19818_s14 + $0x280] sm:$0xff] %v15857_v24   ;;  %v12783_v40 = vadd.f32 %v20510_v3, %v12604_v32  ;;  %v12605_v41 = vmax.f32 %v10851_v22, %v12412_v57 }
 0x44e   : > { %v12786_v43 = vadd.f32 %v20510_v3, %v12607_v36  ;;  %v12957_v38 = vmax.f32 %v12785_v35, 0.0 }
 0x44f   : > { %v12784_v28 = vadd.f32 %v20510_v3, %v12605_v41  ;;  %v16847_v29 = vpop.f32.mrb[84].mxu0  ;;  %v17023_v59 = vpop.f32.mrb[84].mxu1  ;;  %v12955_v45 = vmax.f32 %v12783_v40, 0.0 }
 0x450   : > { %v12958_v44 = vmax.f32 %v12786_v43, 0.0  ;;  %v10856_v55 = vmax.f32 %v21772_v2, %v16847_v29  ;;  %v10671_v23 = vpop.f32.mrb[85].mxu0  ;;  %v12425_v58 = vpop.f32.mrb[85].mxu1 }
 0x451   : > { %v12956_v42 = vmax.f32 %v12784_v28, 0.0  ;;  %v10854_v7 = vmax.f32 %v21775_v12, %v10671_v23  ;;  %v16848_v50 = vpop.f32.mrb[86].mxu0  ;;  %v17024_v62 = vpop.f32.mrb[86].mxu1 }
 0x452   : > { %v15872_v63 = vpack.c.bf16 %v12958_v44, %v12957_v38  ;;  %v12610_v18 = vmax.f32 %v10856_v55, %v17023_v59  ;;  %v10857_v37 = vmax.f32 %v21778_v54, %v16848_v50  ;;  %v10674_v30 = vpop.f32.mrb[87].mxu0  ;;  %v12428_v0 = vpop.f32.mrb[87].mxu1 }
 0x453   : > { %v15867_v1 = vpack.c.bf16 %v12956_v42, %v12955_v45  ;;  %v12608_v31 = vmax.f32 %v10854_v7, %v12425_v58  ;;  %v10855_v8 = vmax.f32 %v21781_v4, %v10674_v30 }
 0x454   : > { %15966 = vst [vmem:[%s19818_s14 + $0x298] sm:$0xff] %v15872_v63   ;;  %v12789_v9 = vadd.f32 %v20510_v3, %v12610_v18  ;;  %v12611_v14 = vmax.f32 %v10857_v37, %v17024_v62 }
 0x455   : > { %15965 = vst [vmem:[%s19818_s14 + $0x290] sm:$0xff] %v15867_v1   ;;  %v12787_v15 = vadd.f32 %v20510_v3, %v12608_v31  ;;  %v12609_v46 = vmax.f32 %v10855_v8, %v12428_v0 }
 0x456   : > { %v12790_v47 = vadd.f32 %v20510_v3, %v12611_v14  ;;  %v12961_v53 = vmax.f32 %v12789_v9, 0.0 }
 0x457   : > { %v12788_v5 = vadd.f32 %v20510_v3, %v12609_v46  ;;  %v12959_v34 = vmax.f32 %v12787_v15, 0.0 }
 0x458   : > { %v12962_v13 = vmax.f32 %v12790_v47, 0.0 }
 0x459   : > { %v12960_v16 = vmax.f32 %v12788_v5, 0.0 }
 0x45a   : > { %v15882_v17 = vpack.c.bf16 %v12962_v13, %v12961_v53 }
 0x45b   : > { %v15877_v19 = vpack.c.bf16 %v12960_v16, %v12959_v34 }
 0x45c   : > { %15968 = vst [vmem:[%s19818_s14 + $0x2a8] sm:$0xff] %v15882_v17  }
 0x45d   : > { %15967 = vst [vmem:[%s19818_s14 + $0x2a0] sm:$0xff] %v15877_v19  }
 0x45e PF: > { %p10_p9 = scmp.ge.s32.totalorder %s17462_s16, 4   ;;  %s21782_s12 = smov %s17418_s13 }
 0x45f   : > { %s21783_s13 = smov %s17471_s19  ;;  %s21784_s14 = smov %s17462_s16 }
 0x460   :  { %12 = sbr.rel (!%p10_p9) target bundleno = 2 (0x2), region = 126 }

// kernel: cnn_forward.4
= control target key start
LH: loop header
LB: loop body
LE: loop exit
PB: predicated region body
PF: predicated region fallthrough
CT: control target
= control target key end

     0   :  { %v3540_v0 = vmov 0.0   ;;  %vm3541_vm0 = vmmov 0   ;;  %vm368_vm1 = vcmask 261120   ;;  %s4646_s1 = inlined_call_operand.vmem [shape: bf16[288,128], index: 1, kind: input, shape index: {}]   ;;  %s4647_s0 = inlined_call_operand.vmem [shape: bf16[4,176,288], index: 0, kind: input, shape index: {}]   ;;  %s4648_s2 = inlined_call_operand.vmem [shape: f32[1,128], index: 2, kind: input, shape index: {}]   ;;  %s4649_s3 = inlined_call_operand.vmem [shape: bf16[176,128], index: 3, kind: output, shape index: {}]  }
   0x1   :  { %3146 = vmatprep.subr.bf16.mxu1 %v3540_v0  ;;  %v3566_v1 = vld [vmem:[%s4646_s1 + $0x40] sm:$0xff]   ;;  %3150 = vmatprep.mubr.msk.bf16.mxu1 %vm3541_vm0, %v3540_v0  ;;  %v3585_v4 = vld [vmem:[%s4646_s1 + $0x48] sm:$0xff]   ;;  %v3607_v8 = vld [vmem:[%s4646_s1 + $0x50] sm:$0xff]  }
   0x2   :  { %v3573_v2 = vld [vmem:[%s4646_s1 + $0x80] sm:$0xff]   ;;  %2766 = vmatprep.subr.bf16.mxu0 %v3566_v1  ;;  %v3592_v5 = vld [vmem:[%s4646_s1 + $0x88] sm:$0xff]   ;;  %v3613_v9 = vld [vmem:[%s4646_s1 + $0x10] sm:$0xff]  }
   0x3   :  { %v3579_v3 = vld [vmem:[%s4646_s1] sm:$0xff]   ;;  %3147 = vmatpush3.bf16.msra.mxu1 %v3573_v2  ;;  %v3598_v6 = vld [vmem:[%s4646_s1 + $0x8] sm:$0xff]   ;;  %v3620_v10 = vld [vmem:[%s4646_s1 + $0x58] sm:$0xff]  }
   0x4   :  { %2767 = vmatpush3.bf16.msra.mxu0 %v3579_v3  ;;  %3148 = vmatprep.subr.bf16.mxu1 %v3540_v0  ;;  %v3350_v7 = vld [vmem:[%s4647_s0 + $0x8] ss:$12 sps:$4 sm:$0xff]   ;;  %v3630_v11 = vld [vmem:[%s4646_s1 + $0x18] sm:$0xff]   ;;  %v3637_v12 = vld [vmem:[%s4646_s1 + $0x60] sm:$0xff]  }
   0x5   :  { %2768 = vmatprep.subr.bf16.mxu0 %v3585_v4  ;;  %v3355_v13 = vld [vmem:[%s4647_s0 + $0x20] ss:$12 sps:$4 sm:$0xff]   ;;  %v3360_v17 = vld [vmem:[%s4647_s0 + $0x38] ss:$12 sps:$4 sm:$0xff]   ;;  %v3674_v18 = vld [vmem:[%s4646_s1 + $0x70] sm:$0xff]  }
   0x6   :  { %v3647_v14 = vld [vmem:[%s4646_s1 + $0x20] sm:$0xff]   ;;  %v3654_v15 = vld [vmem:[%s4646_s1 + $0x68] sm:$0xff]   ;;  %v3684_v20 = vld [vmem:[%s4646_s1 + $0x30] sm:$0xff]  }
   0x7   :  { %3149 = vmatpush3.bf16.msra.mxu1 %v3592_v5  ;;  %v3660_v16 = vld [vmem:[%s4646_s1 + $0x28] sm:$0xff]   ;;  %v3367_v19 = vld [vmem:[%s4647_s0 + $0x4] ss:$12 sps:$4 sm:$0xff]   ;;  %v3690_v21 = vld [vmem:[%s4646_s1 + $0x78] sm:$0xff]  }
   0x8   :  { %2769 = vmatpush3.bf16.msra.mxu0 %v3598_v6  ;;  %2861 = vmatprep.subr.bf16.mxu1 %v3566_v1  ;;  %v3701_v22 = vld [vmem:[%s4646_s1 + $0x38] sm:$0xff]   ;;  %v3365_v24 = vld [vmem:[%s4647_s0] ss:$12 sps:$4 sm:$0xff]   ;;  %v3371_v26 = vld [vmem:[%s4647_s0 + $0x68] ss:$12 sps:$4 sm:$0xff]  }
   0x9   :  { %2770 = vmatprep.subr.bf16.mxu0 %v3607_v8  ;;  %434 = vmatprep.mubr.bf16.mxu0 %v3367_v19  ;;  %v3368_v23 = vld [vmem:[%s4647_s0 + $0x50] ss:$12 sps:$4 sm:$0xff]   ;;  %v3372_v27 = vld [vmem:[%s4647_s0 + $0x18] ss:$12 sps:$4 sm:$0xff]   ;;  %v3373_v28 = vld [vmem:[%s4647_s0 + $0x34] ss:$12 sps:$4 sm:$0xff]  }
   0xa   :  { %3151 = vmatmul.mubr.msk.bf16.vlgmr.msra.gmra.mrb[0].mxu1 %vm368_vm1, %v3350_v7  ;;  %v3369_v25 = vld [vmem:[%s4647_s0 + $0x1c] ss:$12 sps:$4 sm:$0xff]   ;;  %v3375_v29 = vld [vmem:[%s4647_s0 + $0x80] ss:$12 sps:$4 sm:$0xff]   ;;  %v3379_v32 = vld [vmem:[%s4647_s0 + $0x98] ss:$12 sps:$4 sm:$0xff]  }
   0xb   :  { %3154 = vmatprep.mubr.msk.bf16.mxu1 %vm3541_vm0, %v3540_v0  ;;  %2862 = vmatpush3.bf16.msra.mxu1 %v3579_v3  ;;  %v3376_v30 = vld [vmem:[%s4647_s0 + $0x30] ss:$12 sps:$4 sm:$0xff]   ;;  %v3377_v31 = vld [vmem:[%s4647_s0 + $0x4c] ss:$12 sps:$4 sm:$0xff]   ;;  %v3380_v33 = vld [vmem:[%s4647_s0 + $0x48] ss:$12 sps:$4 sm:$0xff]  }
   0xc   :  { %2771 = vmatpush3.bf16.msra.mxu0 %v3613_v9  ;;  %2863 = vmatprep.subr.bf16.mxu1 %v3585_v4  ;;  %v3381_v34 = vld [vmem:[%s4647_s0 + $0x64] ss:$12 sps:$4 sm:$0xff]   ;;  %v3384_v36 = vld [vmem:[%s4647_s0 + $0x60] ss:$12 sps:$4 sm:$0xff]   ;;  %v3385_v37 = vld [vmem:[%s4647_s0 + $0x7c] ss:$12 sps:$4 sm:$0xff]  }
   0xd   :  { %2772 = vmatprep.subr.bf16.mxu0 %v3620_v10  ;;  %v3383_v35 = vld [vmem:[%s4647_s0 + $0xb0] ss:$12 sps:$4 sm:$0xff]   ;;  %v3387_v38 = vld [vmem:[%s4647_s0 + $0xc8] ss:$12 sps:$4 sm:$0xff]   ;;  %v3388_v39 = vld [vmem:[%s4647_s0 + $0x78] ss:$12 sps:$4 sm:$0xff]  }
   0xe   :  { %v3389_v40 = vld [vmem:[%s4647_s0 + $0x94] ss:$12 sps:$4 sm:$0xff]   ;;  %v3392_v42 = vld [vmem:[%s4647_s0 + $0x90] ss:$12 sps:$4 sm:$0xff]   ;;  %v3393_v43 = vld [vmem:[%s4647_s0 + $0xac] ss:$12 sps:$4 sm:$0xff]  }
   0xf   :  { %2864 = vmatpush3.bf16.msra.mxu1 %v3598_v6  ;;  %v3391_v41 = vld [vmem:[%s4647_s0 + $0xe0] ss:$12 sps:$4 sm:$0xff]   ;;  %v3395_v44 = vld [vmem:[%s4647_s0 + $0xf8] ss:$12 sps:$4 sm:$0xff]   ;;  %v3396_v45 = vld [vmem:[%s4647_s0 + $0xa8] ss:$12 sps:$4 sm:$0xff]  }
  0x10   :  { %2773 = vmatpush3.bf16.msra.mxu0 %v3630_v11  ;;  %2865 = vmatprep.subr.bf16.mxu1 %v3607_v8  ;;  %v3399_v46 = vld [vmem:[%s4647_s0 + $0x10c] ss:$12 sps:$4 sm:$0xff]   ;;  %v3400_v47 = vld [vmem:[%s4647_s0 + $0xc4] ss:$12 sps:$4 sm:$0xff]   ;;  %v3397_v48 = vld [vmem:[%s4647_s0 + $0x108] ss:$12 sps:$4 sm:$0xff]  }
  0x11   :  { %2774 = vmatprep.subr.bf16.mxu0 %v3637_v12  ;;  %v3402_v49 = vld [vmem:[%s4647_s0 + $0xc0] ss:$12 sps:$4 sm:$0xff]   ;;  %v3403_v50 = vld [vmem:[%s4647_s0 + $0x124] ss:$12 sps:$4 sm:$0xff]   ;;  %v3405_v51 = vld [vmem:[%s4647_s0 + $0xdc] ss:$12 sps:$4 sm:$0xff]  }
  0x12   :  { %3155 = vmatmul.mubr.msk.bf16.gmra.mrb[4].mxu1 %vm368_vm1, %v3355_v13  ;;  %v3407_v52 = vld [vmem:[%s4647_s0 + $0x120] ss:$12 sps:$4 sm:$0xff]   ;;  %v3408_v53 = vld [vmem:[%s4647_s0 + $0xd8] ss:$12 sps:$4 sm:$0xff]   ;;  %v3409_v54 = vld [vmem:[%s4647_s0 + $0x13c] ss:$12 sps:$4 sm:$0xff]  }
  0x13   :  { %3158 = vmatprep.mubr.msk.bf16.mxu1 %vm3541_vm0, %v3540_v0  ;;  %2866 = vmatpush3.bf16.msra.mxu1 %v3613_v9  ;;  %v3411_v55 = vld [vmem:[%s4647_s0 + $0xf4] ss:$12 sps:$4 sm:$0xff]   ;;  %v3413_v56 = vld [vmem:[%s4647_s0 + $0x138] ss:$12 sps:$4 sm:$0xff]   ;;  %v3414_v57 = vld [vmem:[%s4647_s0 + $0xf0] ss:$12 sps:$4 sm:$0xff]  }
  0x14   :  { %2775 = vmatpush3.bf16.msra.mxu0 %v3647_v14  ;;  %2867 = vmatprep.subr.bf16.mxu1 %v3620_v10  ;;  %v3415_v58 = vld [vmem:[%s4647_s0 + $0x154] ss:$12 sps:$4 sm:$0xff]   ;;  %v3417_v59 = vld [vmem:[%s4647_s0 + $0x150] ss:$12 sps:$4 sm:$0xff]   ;;  %v3419_v61 = vld [vmem:[%s4647_s0 + $0x16c] ss:$12 sps:$4 sm:$0xff]  }
  0x15   :  { %2776 = vmatprep.subr.bf16.mxu0 %v3654_v15  ;;  %v3418_v60 = vld [vmem:[%s4647_s0 + $0x110] ss:$12 sps:$4 sm:$0xff]   ;;  %v3421_v62 = vld [vmem:[%s4647_s0 + $0x168] ss:$12 sps:$4 sm:$0xff]   ;;  %v3425_v13 = vld [vmem:[%s4647_s0 + $0x180] ss:$12 sps:$4 sm:$0xff]  }
  0x16   :  { %v3422_v63 = vld [vmem:[%s4647_s0 + $0x128] ss:$12 sps:$4 sm:$0xff]   ;;  %v3423_v7 = vld [vmem:[%s4647_s0 + $0x184] ss:$12 sps:$4 sm:$0xff]  }
  0x17   :  { %2868 = vmatpush3.bf16.msra.mxu1 %v3630_v11  ;;  %v3427_v19 = vld [vmem:[%s4647_s0 + $0x19c] ss:$12 sps:$4 sm:$0xff]  }
  0x18   :  { %2777 = vmatpush3.bf16.msra.mxu0 %v3660_v16  ;;  %2869 = vmatprep.subr.bf16.mxu1 %v3637_v12 }
  0x19   :  { %2778 = vmatprep.subr.bf16.mxu0 %v3674_v18 }
  0x1a   :  { %3159 = vmatmul.mubr.msk.bf16.gmra.mrb[8].mxu1 %vm368_vm1, %v3360_v17  ;;  %v3426_v17 = vld [vmem:[%s4647_s0 + $0x140] ss:$12 sps:$4 sm:$0xff]  }
  0x1b   :  { %3162 = vmatprep.mubr.msk.bf16.mxu1 %vm3541_vm0, %v3540_v0  ;;  %2870 = vmatpush3.bf16.msra.mxu1 %v3647_v14 }
  0x1c   :  { %2779 = vmatpush3.bf16.msra.mxu0 %v3684_v20  ;;  %2871 = vmatprep.subr.bf16.mxu1 %v3654_v15 }
  0x1d   :  { %2780 = vmatprep.subr.bf16.mxu0 %v3690_v21 }
  0x1f   :  { %2872 = vmatpush3.bf16.msra.mxu1 %v3660_v16 }
  0x20   :  { %2781 = vmatpush3.bf16.msra.mxu0 %v3701_v22  ;;  %2873 = vmatprep.subr.bf16.mxu1 %v3674_v18 }
  0x21   :  { %3194 = vmatprep.subr.bf16.mxu0 %v3540_v0 }
  0x22   :  { %3163 = vmatmul.mubr.msk.bf16.gmra.mrb[12].mxu1 %vm368_vm1, %v3368_v23  ;;  %v3430_v23 = vld [vmem:[%s4647_s0 + $0x158] ss:$12 sps:$4 sm:$0xff]  }
  0x23   :  { %435 = vmatmul.mubr.bf16.vlgmr.msra.gmra.mrb[0].mxu0 %v3365_v24  ;;  %3166 = vmatprep.mubr.msk.bf16.mxu1 %vm3541_vm0, %v3540_v0  ;;  %v3431_v24 = vld [vmem:[%s4647_s0 + $0x1b4] ss:$12 sps:$4 sm:$0xff]  }
  0x24   :  { %3195 = vmatpush3.bf16.msra.mxu0 %v3573_v2  ;;  %442 = vmatprep.mubr.bf16.mxu0 %v3369_v25  ;;  %v3433_v25 = vld [vmem:[%s4647_s0 + $0x1b0] ss:$12 sps:$4 sm:$0xff]  }
  0x25   :  { %3196 = vmatprep.subr.bf16.mxu0 %v3540_v0  ;;  %2874 = vmatpush3.bf16.msra.mxu1 %v3684_v20 }
  0x26   :  { %2875 = vmatprep.subr.bf16.mxu1 %v3690_v21 }
  0x28   :  { %3197 = vmatpush3.bf16.msra.mxu0 %v3592_v5 }
  0x29   :  { %2876 = vmatpush3.bf16.msra.mxu1 %v3701_v22  ;;  %3242 = vmatprep.subr.bf16.mxu0 %v3540_v0 }
  0x2a   :  { %3167 = vmatmul.mubr.msk.bf16.gmra.mrb[16].mxu1 %vm368_vm1, %v3371_v26  ;;  %2956 = vmatprep.subr.bf16.mxu1 %v3566_v1  ;;  %v3434_v26 = vld [vmem:[%s4647_s0 + $0x170] ss:$12 sps:$4 sm:$0xff]  }
  0x2b   :  { %443 = vmatmul.mubr.bf16.gmra.mrb[4].mxu0 %v3372_v27  ;;  %3170 = vmatprep.mubr.msk.bf16.mxu1 %vm3541_vm0, %v3540_v0  ;;  %v3435_v27 = vld [vmem:[%s4647_s0 + $0x1cc] ss:$12 sps:$4 sm:$0xff]  }
  0x2c   :  { %450 = vmatprep.mubr.bf16.mxu0 %v3373_v28  ;;  %v3437_v28 = vld [vmem:[%s4647_s0 + $0x1c8] ss:$12 sps:$4 sm:$0xff]  }
  0x32   :  { %3171 = vmatmul.mubr.msk.bf16.gmra.mrb[20].mxu1 %vm368_vm1, %v3375_v29  ;;  %v3438_v29 = vld [vmem:[%s4647_s0 + $0x188] ss:$12 sps:$4 sm:$0xff]  }
  0x33   :  { %451 = vmatmul.mubr.bf16.gmra.mrb[8].mxu0 %v3376_v30  ;;  %3174 = vmatprep.mubr.msk.bf16.mxu1 %vm3541_vm0, %v3540_v0  ;;  %v3439_v30 = vld [vmem:[%s4647_s0 + $0x1e4] ss:$12 sps:$4 sm:$0xff]  }
  0x34   :  { %458 = vmatprep.mubr.bf16.mxu0 %v3377_v31  ;;  %v3441_v31 = vld [vmem:[%s4647_s0 + $0x1e0] ss:$12 sps:$4 sm:$0xff]  }
  0x3a   :  { %3175 = vmatmul.mubr.msk.bf16.gmra.mrb[24].mxu1 %vm368_vm1, %v3379_v32  ;;  %v3442_v32 = vld [vmem:[%s4647_s0 + $0x1a0] ss:$12 sps:$4 sm:$0xff]  }
  0x3b   :  { %459 = vmatmul.mubr.bf16.gmra.mrb[12].mxu0 %v3380_v33  ;;  %3178 = vmatprep.mubr.msk.bf16.mxu1 %vm3541_vm0, %v3540_v0  ;;  %v3443_v33 = vld [vmem:[%s4647_s0 + $0x1fc] ss:$12 sps:$4 sm:$0xff]  }
  0x3c   :  { %466 = vmatprep.mubr.bf16.mxu0 %v3381_v34  ;;  %v3445_v34 = vld [vmem:[%s4647_s0 + $0x1f8] ss:$12 sps:$4 sm:$0xff]  }
  0x42   :  { %3179 = vmatmul.mubr.msk.bf16.gmra.mrb[28].mxu1 %vm368_vm1, %v3383_v35  ;;  %v3446_v35 = vld [vmem:[%s4647_s0 + $0x1b8] ss:$12 sps:$4 sm:$0xff]  }
  0x43   :  { %467 = vmatmul.mubr.bf16.gmra.mrb[16].mxu0 %v3384_v36  ;;  %3182 = vmatprep.mubr.msk.bf16.mxu1 %vm3541_vm0, %v3540_v0  ;;  %v3449_v36 = vld [vmem:[%s4647_s0 + $0x214] ss:$12 sps:$4 sm:$0xff]  }
  0x44   :  { %474 = vmatprep.mubr.bf16.mxu0 %v3385_v37  ;;  %v3447_v37 = vld [vmem:[%s4647_s0 + $0x210] ss:$12 sps:$4 sm:$0xff]  }
  0x4a   :  { %3183 = vmatmul.mubr.msk.bf16.gmra.mrb[32].mxu1 %vm368_vm1, %v3387_v38  ;;  %v3450_v38 = vld [vmem:[%s4647_s0 + $0x1d0] ss:$12 sps:$4 sm:$0xff]  }
  0x4b   :  { %475 = vmatmul.mubr.bf16.gmra.mrb[20].mxu0 %v3388_v39  ;;  %3186 = vmatprep.mubr.msk.bf16.mxu1 %vm3541_vm0, %v3540_v0  ;;  %v3451_v39 = vld [vmem:[%s4647_s0 + $0x22c] ss:$12 sps:$4 sm:$0xff]  }
  0x4c   :  { %482 = vmatprep.mubr.bf16.mxu0 %v3389_v40  ;;  %v3453_v40 = vld [vmem:[%s4647_s0 + $0x228] ss:$12 sps:$4 sm:$0xff]  }
  0x52   :  { %3187 = vmatmul.mubr.msk.bf16.gmra.mrb[36].mxu1 %vm368_vm1, %v3391_v41  ;;  %v3454_v41 = vld [vmem:[%s4647_s0 + $0x1e8] ss:$12 sps:$4 sm:$0xff]  }
  0x53   :  { %483 = vmatmul.mubr.bf16.gmra.mrb[24].mxu0 %v3392_v42  ;;  %3190 = vmatprep.mubr.msk.bf16.mxu1 %vm3541_vm0, %v3540_v0  ;;  %v3455_v42 = vld [vmem:[%s4647_s0 + $0x244] ss:$12 sps:$4 sm:$0xff]  }
  0x54   :  { %490 = vmatprep.mubr.bf16.mxu0 %v3393_v43  ;;  %v3473_v43 = vld [vmem:[%s4647_s0 + $0x2a0] ss:$12 sps:$4 sm:$0xff]  }
  0x5a   :  { %3191 = vmatmul.mubr.msk.bf16.gmra.mrb[40].mxu1 %vm368_vm1, %v3395_v44 }
  0x5b   :  { %491 = vmatmul.mubr.bf16.gmra.mrb[28].mxu0 %v3396_v45  ;;  %919 = vmatprep.mubr.bf16.mxu1 %v3399_v46  ;;  %v3474_v45 = vld [vmem:[%s4647_s0 + $0x260] ss:$12 sps:$4 sm:$0xff]  }
  0x5c   :  { %498 = vmatprep.mubr.bf16.mxu0 %v3400_v47  ;;  %v3475_v47 = vld [vmem:[%s4647_s0 + $0x2bc] ss:$12 sps:$4 sm:$0xff]  }
  0x62   :  { %920 = vmatmul.mubr.bf16.vlgmr.msra.gmra.mrb[44].mxu1 %v3397_v48 }
  0x63   :  { %499 = vmatmul.mubr.bf16.gmra.mrb[32].mxu0 %v3402_v49  ;;  %927 = vmatprep.mubr.bf16.mxu1 %v3403_v50  ;;  %v3477_v50 = vld [vmem:[%s4647_s0 + $0x2b8] ss:$12 sps:$4 sm:$0xff]  }
  0x64   :  { %506 = vmatprep.mubr.bf16.mxu0 %v3405_v51  ;;  %2957 = vmatpush3.bf16.msra.mxu1 %v3579_v3 }
  0x65   :  { %2958 = vmatprep.subr.bf16.mxu1 %v3585_v4 }
  0x68   :  { %2959 = vmatpush3.bf16.msra.mxu1 %v3598_v6 }
  0x69   :  { %2960 = vmatprep.subr.bf16.mxu1 %v3607_v8 }
  0x6a   :  { %928 = vmatmul.mubr.bf16.gmra.mrb[48].mxu1 %v3407_v52  ;;  %v3478_v52 = vld [vmem:[%s4647_s0 + $0x278] ss:$12 sps:$4 sm:$0xff]  }
  0x6b   :  { %507 = vmatmul.mubr.bf16.gmra.mrb[36].mxu0 %v3408_v53  ;;  %935 = vmatprep.mubr.bf16.mxu1 %v3409_v54  ;;  %v3479_v54 = vld [vmem:[%s4647_s0 + $0x2d4] ss:$12 sps:$4 sm:$0xff]  }
  0x6c   :  { %514 = vmatprep.mubr.bf16.mxu0 %v3411_v55  ;;  %2961 = vmatpush3.bf16.msra.mxu1 %v3613_v9 }
  0x6d   :  { %2962 = vmatprep.subr.bf16.mxu1 %v3620_v10 }
  0x70   :  { %2963 = vmatpush3.bf16.msra.mxu1 %v3630_v11 }
  0x71   :  { %2964 = vmatprep.subr.bf16.mxu1 %v3637_v12 }
  0x72   :  { %936 = vmatmul.mubr.bf16.gmra.mrb[52].mxu1 %v3413_v56 }
  0x73   :  { %515 = vmatmul.mubr.bf16.gmra.mrb[40].mxu0 %v3414_v57  ;;  %943 = vmatprep.mubr.bf16.mxu1 %v3415_v58  ;;  %v3481_v58 = vld [vmem:[%s4647_s0 + $0x2d0] ss:$12 sps:$4 sm:$0xff]  }
  0x74   :  { %3198 = vmatprep.mubr.msk.bf16.mxu0 %vm3541_vm0, %v3540_v0  ;;  %2965 = vmatpush3.bf16.msra.mxu1 %v3647_v14 }
  0x75   :  { %2966 = vmatprep.subr.bf16.mxu1 %v3654_v15 }
  0x78   :  { %2967 = vmatpush3.bf16.msra.mxu1 %v3660_v16 }
  0x79   :  { %2968 = vmatprep.subr.bf16.mxu1 %v3674_v18 }
  0x7a   :  { %944 = vmatmul.mubr.bf16.gmra.mrb[56].mxu1 %v3417_v59 }
  0x7b   :  { %3199 = vmatmul.mubr.msk.bf16.vlgmr.msra.gmra.mrb[44].mxu0 %vm368_vm1, %v3418_v60  ;;  %951 = vmatprep.mubr.bf16.mxu1 %v3419_v61  ;;  %v3482_v61 = vld [vmem:[%s4647_s0 + $0x290] ss:$12 sps:$4 sm:$0xff]  }
  0x7c   :  { %3243 = vmatpush3.bf16.msra.mxu0 %v3573_v2  ;;  %3202 = vmatprep.mubr.msk.bf16.mxu0 %vm3541_vm0, %v3540_v0 }
  0x7d   :  { %3244 = vmatprep.subr.bf16.mxu0 %v3540_v0  ;;  %2969 = vmatpush3.bf16.msra.mxu1 %v3684_v20 }
  0x7e   :  { %2970 = vmatprep.subr.bf16.mxu1 %v3690_v21 }
  0x80   :  { %3245 = vmatpush3.bf16.msra.mxu0 %v3592_v5 }
  0x81   :  { %2971 = vmatpush3.bf16.msra.mxu1 %v3701_v22  ;;  %3290 = vmatprep.subr.bf16.mxu0 %v3540_v0 }
  0x82   :  { %952 = vmatmul.mubr.bf16.gmra.mrb[60].mxu1 %v3421_v62  ;;  %3051 = vmatprep.subr.bf16.mxu1 %v3566_v1  ;;  %v3429_v1 = vld [vmem:[%s4647_s0 + $0x198] ss:$12 sps:$4 sm:$0xff]  }
  0x83   :  { %3203 = vmatmul.mubr.msk.bf16.gmra.mrb[48].mxu0 %vm368_vm1, %v3422_v63  ;;  %959 = vmatprep.mubr.bf16.mxu1 %v3423_v7  ;;  %v3483_v63 = vld [vmem:[%s4647_s0 + $0x2ec] ss:$12 sps:$4 sm:$0xff]  }
  0x84   :  { %3206 = vmatprep.mubr.msk.bf16.mxu0 %vm3541_vm0, %v3540_v0 }
  0x8a   :  { %960 = vmatmul.mubr.bf16.gmra.mrb[64].mxu1 %v3425_v13 }
  0x8b   :  { %3207 = vmatmul.mubr.msk.bf16.gmra.mrb[52].mxu0 %vm368_vm1, %v3426_v17  ;;  %967 = vmatprep.mubr.bf16.mxu1 %v3427_v19 }
  0x8c   :  { %3210 = vmatprep.mubr.msk.bf16.mxu0 %vm3541_vm0, %v3540_v0 }
  0x92   :  { %968 = vmatmul.mubr.bf16.gmra.mrb[68].mxu1 %v3429_v1 }
  0x93   :  { %3211 = vmatmul.mubr.msk.bf16.gmra.mrb[56].mxu0 %vm368_vm1, %v3430_v23  ;;  %975 = vmatprep.mubr.bf16.mxu1 %v3431_v24 }
  0x94   :  { %3214 = vmatprep.mubr.msk.bf16.mxu0 %vm3541_vm0, %v3540_v0 }
  0x9a   :  { %976 = vmatmul.mubr.bf16.gmra.mrb[72].mxu1 %v3433_v25 }
  0x9b   :  { %3215 = vmatmul.mubr.msk.bf16.gmra.mrb[60].mxu0 %vm368_vm1, %v3434_v26  ;;  %983 = vmatprep.mubr.bf16.mxu1 %v3435_v27  ;;  %v3485_v27 = vld [vmem:[%s4647_s0 + $0x2e8] ss:$12 sps:$4 sm:$0xff]  }
  0x9c   :  { %3218 = vmatprep.mubr.msk.bf16.mxu0 %vm3541_vm0, %v3540_v0 }
  0xa2   :  { %984 = vmatmul.mubr.bf16.gmra.mrb[76].mxu1 %v3437_v28 }
  0xa3   :  { %3219 = vmatmul.mubr.msk.bf16.gmra.mrb[64].mxu0 %vm368_vm1, %v3438_v29  ;;  %991 = vmatprep.mubr.bf16.mxu1 %v3439_v30  ;;  %v3486_v30 = vld [vmem:[%s4647_s0 + $0x2a8] ss:$12 sps:$4 sm:$0xff]  }
  0xa4   :  { %3222 = vmatprep.mubr.msk.bf16.mxu0 %vm3541_vm0, %v3540_v0 }
  0xaa   :  { %992 = vmatmul.mubr.bf16.gmra.mrb[80].mxu1 %v3441_v31 }
  0xab   :  { %3223 = vmatmul.mubr.msk.bf16.gmra.mrb[68].mxu0 %vm368_vm1, %v3442_v32  ;;  %999 = vmatprep.mubr.bf16.mxu1 %v3443_v33  ;;  %v3487_v32 = vld [vmem:[%s4647_s0 + $0x304] ss:$12 sps:$4 sm:$0xff]  }
  0xac   :  { %3226 = vmatprep.mubr.msk.bf16.mxu0 %vm3541_vm0, %v3540_v0 }
  0xb2   :  { %1000 = vmatmul.mubr.bf16.gmra.mrb[84].mxu1 %v3445_v34 }
  0xb3   :  { %3227 = vmatmul.mubr.msk.bf16.gmra.mrb[72].mxu0 %vm368_vm1, %v3446_v35  ;;  %1426 = vmatprep.mubr.bf16.mxu1 %v3449_v36 }
  0xb4   :  { %3230 = vmatprep.mubr.msk.bf16.mxu0 %vm3541_vm0, %v3540_v0 }
  0xba   :  { %1427 = vmatmul.mubr.bf16.vlgmr.msra.gmra.mrb[88].mxu1 %v3447_v37 }
  0xbb   :  { %3231 = vmatmul.mubr.msk.bf16.gmra.mrb[76].mxu0 %vm368_vm1, %v3450_v38  ;;  %1434 = vmatprep.mubr.bf16.mxu1 %v3451_v39 }
  0xbc   :  { %3234 = vmatprep.mubr.msk.bf16.mxu0 %vm3541_vm0, %v3540_v0  ;;  %3052 = vmatpush3.bf16.msra.mxu1 %v3579_v3  ;;  %v3457_v3 = vld [vmem:[%s4647_s0 + $0x240] ss:$12 sps:$4 sm:$0xff]  }
  0xbd   :  { %3053 = vmatprep.subr.bf16.mxu1 %v3585_v4  ;;  %v3458_v4 = vld [vmem:[%s4647_s0 + $0x200] ss:$12 sps:$4 sm:$0xff]  }
  0xc0   :  { %3054 = vmatpush3.bf16.msra.mxu1 %v3598_v6  ;;  %v3459_v6 = vld [vmem:[%s4647_s0 + $0x25c] ss:$12 sps:$4 sm:$0xff]  }
  0xc1   :  { %3055 = vmatprep.subr.bf16.mxu1 %v3607_v8  ;;  %v3461_v8 = vld [vmem:[%s4647_s0 + $0x258] ss:$12 sps:$4 sm:$0xff]  }
  0xc2   :  { %1435 = vmatmul.mubr.bf16.gmra.mrb[92].mxu1 %v3453_v40 }
  0xc3   :  { %3235 = vmatmul.mubr.msk.bf16.gmra.mrb[80].mxu0 %vm368_vm1, %v3454_v41  ;;  %1442 = vmatprep.mubr.bf16.mxu1 %v3455_v42  ;;  %v3489_v42 = vld [vmem:[%s4647_s0 + $0x300] ss:$12 sps:$4 sm:$0xff]  }
  0xc4   :  { %3238 = vmatprep.mubr.msk.bf16.mxu0 %vm3541_vm0, %v3540_v0  ;;  %3056 = vmatpush3.bf16.msra.mxu1 %v3613_v9  ;;  %v3462_v9 = vld [vmem:[%s4647_s0 + $0x218] ss:$12 sps:$4 sm:$0xff]  }
  0xc5   :  { %3057 = vmatprep.subr.bf16.mxu1 %v3620_v10  ;;  %v3463_v10 = vld [vmem:[%s4647_s0 + $0x274] ss:$12 sps:$4 sm:$0xff]  }
  0xc8   :  { %3058 = vmatpush3.bf16.msra.mxu1 %v3630_v11  ;;  %v3465_v11 = vld [vmem:[%s4647_s0 + $0x270] ss:$12 sps:$4 sm:$0xff]  }
  0xc9   :  { %3059 = vmatprep.subr.bf16.mxu1 %v3637_v12  ;;  %v3466_v12 = vld [vmem:[%s4647_s0 + $0x230] ss:$12 sps:$4 sm:$0xff]  }
  0xca   :  { %1443 = vmatmul.mubr.bf16.gmra.mrb[96].mxu1 %v3457_v3 }
  0xcb   :  { %3239 = vmatmul.mubr.msk.bf16.gmra.mrb[84].mxu0 %vm368_vm1, %v3458_v4  ;;  %1450 = vmatprep.mubr.bf16.mxu1 %v3459_v6  ;;  %v3490_v6 = vld [vmem:[%s4647_s0 + $0x2c0] ss:$12 sps:$4 sm:$0xff]  }
  0xcc   :  { %3246 = vmatprep.mubr.msk.bf16.mxu0 %vm3541_vm0, %v3540_v0  ;;  %3060 = vmatpush3.bf16.msra.mxu1 %v3647_v14 }
  0xcd   :  { %3061 = vmatprep.subr.bf16.mxu1 %v3654_v15  ;;  %v3469_v15 = vld [vmem:[%s4647_s0 + $0x288] ss:$12 sps:$4 sm:$0xff]  }
  0xd0   :  { %3062 = vmatpush3.bf16.msra.mxu1 %v3660_v16 }
  0xd1   :  { %3063 = vmatprep.subr.bf16.mxu1 %v3674_v18 }
  0xd2   :  { %1451 = vmatmul.mubr.bf16.gmra.mrb[100].mxu1 %v3461_v8 }
  0xd3   :  { %3247 = vmatmul.mubr.msk.bf16.vlgmr.msra.gmra.mrb[88].mxu0 %vm368_vm1, %v3462_v9  ;;  %1458 = vmatprep.mubr.bf16.mxu1 %v3463_v10  ;;  %v3493_v9 = vld [vmem:[%s4647_s0 + $0x31c] ss:$12 sps:$4 sm:$0xff]  }
  0xd4   :  { %3291 = vmatpush3.bf16.msra.mxu0 %v3573_v2  ;;  %3250 = vmatprep.mubr.msk.bf16.mxu0 %vm3541_vm0, %v3540_v0  ;;  %v3467_v2 = vld [vmem:[%s4647_s0 + $0x28c] ss:$12 sps:$4 sm:$0xff]  }
  0xd5   :  { %3292 = vmatprep.subr.bf16.mxu0 %v3540_v0  ;;  %3064 = vmatpush3.bf16.msra.mxu1 %v3684_v20  ;;  %v3471_v20 = vld [vmem:[%s4647_s0 + $0x2a4] ss:$12 sps:$4 sm:$0xff]  }
  0xd6   :  { %3065 = vmatprep.subr.bf16.mxu1 %v3690_v21 }
  0xd8   :  { %3293 = vmatpush3.bf16.msra.mxu0 %v3592_v5  ;;  %v3470_v5 = vld [vmem:[%s4647_s0 + $0x248] ss:$12 sps:$4 sm:$0xff]  }
  0xd9   :  { %3066 = vmatpush3.bf16.msra.mxu1 %v3701_v22 }
  0xda   :  { %1459 = vmatmul.mubr.bf16.gmra.mrb[104].mxu1 %v3465_v11  ;;  %3338 = vmatprep.subr.bf16.mxu1 %v3540_v0 }
  0xdb   :  { %3251 = vmatmul.mubr.msk.bf16.gmra.mrb[92].mxu0 %vm368_vm1, %v3466_v12  ;;  %1466 = vmatprep.mubr.bf16.mxu1 %v3467_v2 }
  0xdc   :  { %3254 = vmatprep.mubr.msk.bf16.mxu0 %vm3541_vm0, %v3540_v0 }
  0xdd   :  { %v557_v14 = vpop.f32.mrb[0].mxu1 }
  0xde   :  { %v3152_v16 = vpop.f32.mrb[1].mxu1 }
  0xdf   :  { %v560_v18 = vpop.f32.mrb[2].mxu1 }
  0xe0   :  { %v3153_v21 = vpop.f32.mrb[3].mxu1 }
  0xe2   :  { %1467 = vmatmul.mubr.bf16.gmra.mrb[108].mxu1 %v3469_v15 }
  0xe3   :  { %3255 = vmatmul.mubr.msk.bf16.gmra.mrb[96].mxu0 %vm368_vm1, %v3470_v5  ;;  %1474 = vmatprep.mubr.bf16.mxu1 %v3471_v20  ;;  %v3491_v20 = vld [vmem:[%s4647_s0 + $0x318] ss:$12 sps:$4 sm:$0xff]  }
  0xe4   :  { %3258 = vmatprep.mubr.msk.bf16.mxu0 %vm3541_vm0, %v3540_v0 }
  0xe5   :  { %v565_v22 = vpop.f32.mrb[4].mxu1 }
  0xe6   :  { %v3156_v44 = vpop.f32.mrb[5].mxu1 }
  0xe7   :  { %v568_v46 = vpop.f32.mrb[6].mxu1 }
  0xe8   :  { %v3157_v48 = vpop.f32.mrb[7].mxu1 }
  0xea   :  { %1475 = vmatmul.mubr.bf16.gmra.mrb[112].mxu1 %v3473_v43  ;;  %v3494_v43 = vld [vmem:[%s4647_s0 + $0x2d8] ss:$12 sps:$4 sm:$0xff]  }
  0xeb   :  { %3259 = vmatmul.mubr.msk.bf16.gmra.mrb[100].mxu0 %vm368_vm1, %v3474_v45  ;;  %1482 = vmatprep.mubr.bf16.mxu1 %v3475_v47  ;;  %v3495_v45 = vld [vmem:[%s4647_s0 + $0x334] ss:$12 sps:$4 sm:$0xff]  }
  0xec   :  { %3262 = vmatprep.mubr.msk.bf16.mxu0 %vm3541_vm0, %v3540_v0 }
  0xed   :  { %v573_v49 = vpop.f32.mrb[8].mxu1 }
  0xee   :  { %v3160_v51 = vpop.f32.mrb[9].mxu1 }
  0xef   :  { %v576_v53 = vpop.f32.mrb[10].mxu1 }
  0xf0   :  { %v3161_v55 = vpop.f32.mrb[11].mxu1 }
  0xf2   :  { %1483 = vmatmul.mubr.bf16.gmra.mrb[116].mxu1 %v3477_v50 }
  0xf3   :  { %3263 = vmatmul.mubr.msk.bf16.gmra.mrb[104].mxu0 %vm368_vm1, %v3478_v52  ;;  %1490 = vmatprep.mubr.bf16.mxu1 %v3479_v54 }
  0xf4   :  { %3266 = vmatprep.mubr.msk.bf16.mxu0 %vm3541_vm0, %v3540_v0 }
  0xf5   :  { %v4080_v56 = vpop.f32.mrb[12].mxu1 }
  0xf6   :  { %v2782_v57 = vpop.f32.mrb[0].mxu0  ;;  %v3164_v59 = vpop.f32.mrb[13].mxu1 }
  0xf7   :  { %v2783_v60 = vpop.f32.mrb[1].mxu0  ;;  %v4088_v62 = vpop.f32.mrb[14].mxu1  ;;  %v3498_v59 = vld [vmem:[%s4647_s0 + $0x2f0] ss:$12 sps:$4 sm:$0xff]  }
  0xf8   :  { %v2784_v7 = vadd.f32 %v2783_v60, %v2782_v57  ;;  %v2785_v13 = vpop.f32.mrb[2].mxu0  ;;  %v3165_v17 = vpop.f32.mrb[15].mxu1 }
  0xf9   :  { %v2786_v19 = vpop.f32.mrb[3].mxu0 }
  0xfa   :  { %v4093_v1 = vadd.f32 %v2784_v7, %v557_v14  ;;  %v2787_v23 = vadd.f32 %v2786_v19, %v2785_v13  ;;  %1491 = vmatmul.mubr.bf16.gmra.mrb[120].mxu1 %v3481_v58  ;;  %v3539_v13 = vld [vmem:[%s4646_s1 + $0x88] sm:$0xff]  }
  0xfb   :  { %3267 = vmatmul.mubr.msk.bf16.gmra.mrb[108].mxu0 %vm368_vm1, %v3482_v61  ;;  %1498 = vmatprep.mubr.bf16.mxu1 %v3483_v63  ;;  %v3499_v61 = vld [vmem:[%s4647_s0 + $0x34c] ss:$12 sps:$4 sm:$0xff]  }
  0xfc   :  { %v4096_v24 = vadd.f32 %v2787_v23, %v560_v18  ;;  %3270 = vmatprep.mubr.msk.bf16.mxu0 %vm3541_vm0, %v3540_v0 }
  0xfd   :  { %v4100_v25 = vpop.f32.mrb[16].mxu1 }
  0xfe   :  { %v2788_v26 = vpop.f32.mrb[4].mxu0  ;;  %v3168_v28 = vpop.f32.mrb[17].mxu1 }
  0xff   :  { %v2789_v29 = vpop.f32.mrb[5].mxu0  ;;  %v4108_v31 = vpop.f32.mrb[18].mxu1 }
 0x100   :  { %v2790_v33 = vadd.f32 %v2789_v29, %v2788_v26  ;;  %v2791_v34 = vpop.f32.mrb[6].mxu0  ;;  %v3169_v35 = vpop.f32.mrb[19].mxu1  ;;  %v3501_v29 = vld [vmem:[%s4647_s0 + $0x348] ss:$12 sps:$4 sm:$0xff]  }
 0x101   :  { %v2792_v36 = vpop.f32.mrb[7].mxu0 }
 0x102   :  { %v4113_v37 = vadd.f32 %v2790_v33, %v565_v22  ;;  %v2793_v38 = vadd.f32 %v2792_v36, %v2791_v34  ;;  %1499 = vmatmul.mubr.bf16.gmra.mrb[124].mxu1 %v3485_v27 }
 0x103   :  { %3271 = vmatmul.mubr.msk.bf16.gmra.mrb[112].mxu0 %vm368_vm1, %v3486_v30  ;;  %1506 = vmatprep.mubr.bf16.mxu1 %v3487_v32  ;;  %v3502_v32 = vld [vmem:[%s4647_s0 + $0x308] ss:$12 sps:$4 sm:$0xff]  }
 0x104   :  { %v4116_v39 = vadd.f32 %v2793_v38, %v568_v46  ;;  %3274 = vmatprep.mubr.msk.bf16.mxu0 %vm3541_vm0, %v3540_v0 }
 0x105   :  { %v4120_v40 = vpop.f32.mrb[20].mxu1 }
 0x106   :  { %v2794_v41 = vpop.f32.mrb[8].mxu0  ;;  %v3172_v3 = vpop.f32.mrb[21].mxu1 }
 0x107   :  { %v2795_v4 = vpop.f32.mrb[9].mxu0  ;;  %v4128_v8 = vpop.f32.mrb[22].mxu1 }
 0x108   :  { %v2796_v10 = vadd.f32 %v2795_v4, %v2794_v41  ;;  %v2797_v11 = vpop.f32.mrb[10].mxu0  ;;  %v3173_v12 = vpop.f32.mrb[23].mxu1 }
 0x109   :  { %v2798_v2 = vpop.f32.mrb[11].mxu0 }
 0x10a   :  { %v4133_v14 = vadd.f32 %v2796_v10, %v573_v49  ;;  %v2799_v15 = vadd.f32 %v2798_v2, %v2797_v11  ;;  %1507 = vmatmul.mubr.bf16.gmra.mrb[128].mxu1 %v3489_v42  ;;  %v3506_v11 = vld [vmem:[%s4647_s0 + $0x320] ss:$12 sps:$4 sm:$0xff]  }
 0x10b   :  { %3275 = vmatmul.mubr.msk.bf16.gmra.mrb[116].mxu0 %vm368_vm1, %v3490_v6  ;;  %1933 = vmatprep.mubr.bf16.mxu1 %v3493_v9  ;;  %v3505_v9 = vld [vmem:[%s4647_s0 + $0x360] ss:$12 sps:$4 sm:$0xff]  }
 0x10c   :  { %v4136_v16 = vadd.f32 %v2799_v15, %v576_v53  ;;  %3278 = vmatprep.mubr.msk.bf16.mxu0 %vm3541_vm0, %v3540_v0  ;;  %v3538_v53 = vld [vmem:[%s4646_s1 + $0x80] sm:$0xff]  }
 0x10d   :  { %v4140_v5 = vpop.f32.mrb[24].mxu1 }
 0x10e   :  { %v2800_v18 = vpop.f32.mrb[12].mxu0  ;;  %v3176_v21 = vpop.f32.mrb[25].mxu1 }
 0x10f   :  { %v2801_v22 = vpop.f32.mrb[13].mxu0  ;;  %v4148_v44 = vpop.f32.mrb[26].mxu1 }
 0x110   :  { %v2802_v46 = vadd.f32 %v2801_v22, %v2800_v18  ;;  %v2803_v47 = vpop.f32.mrb[14].mxu0  ;;  %v3177_v48 = vpop.f32.mrb[27].mxu1 }
 0x111   :  { %v2804_v49 = vpop.f32.mrb[15].mxu0 }
 0x112   :  { %v4154_v50 = vadd.f32 %v2802_v46, %v4080_v56  ;;  %v2805_v51 = vadd.f32 %v2804_v49, %v2803_v47  ;;  %1934 = vmatmul.mubr.bf16.vlgmr.msra.gmra.mrb[132].mxu1 %v3491_v20  ;;  %v3497_v56 = vld [vmem:[%s4647_s0 + $0x330] ss:$12 sps:$4 sm:$0xff]   ;;  %v3509_v47 = vld [vmem:[%s4647_s0 + $0x378] ss:$12 sps:$4 sm:$0xff]  }
 0x113   :  { %3279 = vmatmul.mubr.msk.bf16.gmra.mrb[120].mxu0 %vm368_vm1, %v3494_v43  ;;  %1941 = vmatprep.mubr.bf16.mxu1 %v3495_v45  ;;  %v3510_v49 = vld [vmem:[%s4647_s0 + $0x338] ss:$12 sps:$4 sm:$0xff]  }
 0x114   :  { %v4158_v52 = vadd.f32 %v2805_v51, %v4088_v62  ;;  %3282 = vmatprep.mubr.msk.bf16.mxu0 %vm3541_vm0, %v3540_v0  ;;  %3340 = vmatpush3.bf16.msra.mxu1 %v3538_v53 }
 0x115   :  { %v4165_v54 = vpop.f32.mrb[28].mxu1  ;;  %3339 = vmatprep.subr.bf16.mxu1 %v3540_v0 }
 0x116   :  { %v2806_v55 = vpop.f32.mrb[16].mxu0  ;;  %v3180_v57 = vpop.f32.mrb[29].mxu1 }
 0x117   :  { %v2807_v58 = vpop.f32.mrb[17].mxu0  ;;  %v4174_v60 = vpop.f32.mrb[30].mxu1 }
 0x118   :  { %v2808_v62 = vadd.f32 %v2807_v58, %v2806_v55  ;;  %v2809_v63 = vpop.f32.mrb[18].mxu0  ;;  %v3181_v7 = vpop.f32.mrb[31].mxu1  ;;  %3341 = vmatpush3.bf16.msra.mxu1 %v3539_v13 }
 0x119   :  { %v2810_v17 = vpop.f32.mrb[19].mxu0  ;;  %v3513_v7 = vld [vmem:[%s4647_s0 + $0x390] ss:$12 sps:$4 sm:$0xff]  }
 0x11a   :  { %v4183_v19 = vadd.f32 %v2808_v62, %v4100_v25  ;;  %v2811_v23 = vadd.f32 %v2810_v17, %v2809_v63  ;;  %1942 = vmatmul.mubr.bf16.gmra.mrb[136].mxu1 %v3497_v56  ;;  %v3514_v17 = vld [vmem:[%s4647_s0 + $0x350] ss:$12 sps:$4 sm:$0xff]  }
 0x11b   :  { %3283 = vmatmul.mubr.msk.bf16.gmra.mrb[124].mxu0 %vm368_vm1, %v3498_v59  ;;  %1949 = vmatprep.mubr.bf16.mxu1 %v3499_v61 }
 0x11c   :  { %v4187_v26 = vadd.f32 %v2811_v23, %v4108_v31  ;;  %3286 = vmatprep.mubr.msk.bf16.mxu0 %vm3541_vm0, %v3540_v0  ;;  %v3503_v31 = vld [vmem:[%s4647_s0 + $0x364] ss:$12 sps:$4 sm:$0xff]  }
 0x11d   :  { %v4191_v27 = vpop.f32.mrb[32].mxu1 }
 0x11e   :  { %v2812_v28 = vpop.f32.mrb[20].mxu0  ;;  %v3184_v25 = vpop.f32.mrb[33].mxu1 }
 0x11f   :  { %v2813_v30 = vpop.f32.mrb[21].mxu0  ;;  %v4199_v33 = vpop.f32.mrb[34].mxu1 }
 0x120   :  { %v2814_v34 = vadd.f32 %v2813_v30, %v2812_v28  ;;  %v2815_v35 = vpop.f32.mrb[22].mxu0  ;;  %v3185_v36 = vpop.f32.mrb[35].mxu1 }
 0x121   :  { %v2816_v38 = vpop.f32.mrb[23].mxu0 }
 0x122   :  { %v4205_v41 = vadd.f32 %v2814_v34, %v4120_v40  ;;  %v2817_v42 = vadd.f32 %v2816_v38, %v2815_v35  ;;  %1950 = vmatmul.mubr.bf16.gmra.mrb[140].mxu1 %v3501_v29 }
 0x123   :  { %3287 = vmatmul.mubr.msk.bf16.gmra.mrb[128].mxu0 %vm368_vm1, %v3502_v32  ;;  %1957 = vmatprep.mubr.bf16.mxu1 %v3503_v31 }
 0x124   :  { %v4209_v3 = vadd.f32 %v2817_v42, %v4128_v8  ;;  %3294 = vmatprep.mubr.msk.bf16.mxu0 %vm3541_vm0, %v3540_v0  ;;  %v3507_v8 = vld [vmem:[%s4647_s0 + $0x37c] ss:$12 sps:$4 sm:$0xff]  }
 0x125   :  { %v4213_v4 = vpop.f32.mrb[36].mxu1 }
 0x126   :  { %v2818_v6 = vpop.f32.mrb[24].mxu0  ;;  %v3188_v40 = vpop.f32.mrb[37].mxu1 }
 0x127   :  { %v2819_v10 = vpop.f32.mrb[25].mxu0  ;;  %v4221_v12 = vpop.f32.mrb[38].mxu1  ;;  %v3518_v40 = vld [vmem:[%s4647_s0 + $0x368] ss:$12 sps:$4 sm:$0xff]  }
 0x128   :  { %v2820_v2 = vadd.f32 %v2819_v10, %v2818_v6  ;;  %v2821_v15 = vpop.f32.mrb[26].mxu0  ;;  %v3189_v18 = vpop.f32.mrb[39].mxu1  ;;  %v3517_v6 = vld [vmem:[%s4647_s0 + $0x3a8] ss:$12 sps:$4 sm:$0xff]  }
 0x129   :  { %v2822_v20 = vpop.f32.mrb[27].mxu0 }
 0x12a   :  { %v4227_v21 = vadd.f32 %v2820_v2, %v4140_v5  ;;  %v2823_v22 = vadd.f32 %v2822_v20, %v2821_v15  ;;  %1958 = vmatmul.mubr.bf16.gmra.mrb[144].mxu1 %v3505_v9 }
 0x12b   :  { %3295 = vmatmul.mubr.msk.bf16.vlgmr.msra.gmra.mrb[132].mxu0 %vm368_vm1, %v3506_v11  ;;  %1965 = vmatprep.mubr.bf16.mxu1 %v3507_v8 }
 0x12c   :  { %v4231_v43 = vadd.f32 %v2823_v22, %v4148_v44  ;;  %3298 = vmatprep.mubr.msk.bf16.mxu0 %vm3541_vm0, %v3540_v0  ;;  %v3511_v44 = vld [vmem:[%s4647_s0 + $0x394] ss:$12 sps:$4 sm:$0xff]  }
 0x12d   :  { %v4235_v45 = vpop.f32.mrb[40].mxu1 }
 0x12e   :  { %v2824_v46 = vpop.f32.mrb[28].mxu0  ;;  %v3192_v5 = vpop.f32.mrb[41].mxu1 }
 0x12f   :  { %v2825_v48 = vpop.f32.mrb[29].mxu0  ;;  %v4243_v51 = vpop.f32.mrb[42].mxu1 }
 0x130   :  { %v2826_v53 = vadd.f32 %v2825_v48, %v2824_v46  ;;  %v2827_v55 = vpop.f32.mrb[30].mxu0  ;;  %v3193_v56 = vpop.f32.mrb[43].mxu1 }
 0x131   :  { %v2828_v57 = vpop.f32.mrb[31].mxu0 }
 0x132   :  { %v4249_v58 = vadd.f32 %v2826_v53, %v4165_v54  ;;  %v2829_v59 = vadd.f32 %v2828_v57, %v2827_v55  ;;  %1966 = vmatmul.mubr.bf16.gmra.mrb[148].mxu1 %v3509_v47  ;;  %v3522_v53 = vld [vmem:[%s4647_s0 + $0x380] ss:$12 sps:$4 sm:$0xff]  }
 0x133   :  { %3299 = vmatmul.mubr.msk.bf16.gmra.mrb[136].mxu0 %vm368_vm1, %v3510_v49  ;;  %1973 = vmatprep.mubr.bf16.mxu1 %v3511_v44  ;;  %v3521_v49 = vld [vmem:[%s4647_s0 + $0x3c0] ss:$12 sps:$4 sm:$0xff]  }
 0x134   :  { %v4253_v61 = vadd.f32 %v2829_v59, %v4174_v60  ;;  %3302 = vmatprep.mubr.msk.bf16.mxu0 %vm3541_vm0, %v3540_v0  ;;  %v3515_v60 = vld [vmem:[%s4647_s0 + $0x3ac] ss:$12 sps:$4 sm:$0xff]  }
 0x135   :  { %v2877_v62 = vpop.f32.mrb[44].mxu1 }
 0x136   :  { %v2830_v63 = vpop.f32.mrb[32].mxu0  ;;  %v2878_v13 = vpop.f32.mrb[45].mxu1 }
 0x137   :  { %v2831_v54 = vpop.f32.mrb[33].mxu0  ;;  %v2879_v23 = vadd.f32 %v2878_v13, %v2877_v62  ;;  %v2880_v28 = vpop.f32.mrb[46].mxu1 }
 0x138   :  { %v2832_v29 = vadd.f32 %v2831_v54, %v2830_v63  ;;  %v2833_v25 = vpop.f32.mrb[34].mxu0  ;;  %v2881_v30 = vpop.f32.mrb[47].mxu1 }
 0x139   :  { %v2834_v32 = vpop.f32.mrb[35].mxu0  ;;  %v4266_v31 = vadd.f32 %v2881_v30, %v2880_v28 }
 0x13a   :  { %v4269_v34 = vadd.f32 %v2832_v29, %v4191_v27  ;;  %v2835_v35 = vadd.f32 %v2834_v32, %v2833_v25  ;;  %1974 = vmatmul.mubr.bf16.gmra.mrb[152].mxu1 %v3513_v7  ;;  %v3525_v29 = vld [vmem:[%s4647_s0 + $0x3d8] ss:$12 sps:$4 sm:$0xff]  }
 0x13b   :  { %3303 = vmatmul.mubr.msk.bf16.gmra.mrb[140].mxu0 %vm368_vm1, %v3514_v17  ;;  %1981 = vmatprep.mubr.bf16.mxu1 %v3515_v60  ;;  %v3526_v32 = vld [vmem:[%s4647_s0 + $0x398] ss:$12 sps:$4 sm:$0xff]  }
 0x13c   :  { %v4273_v36 = vadd.f32 %v2835_v35, %v4199_v33  ;;  %3306 = vmatprep.mubr.msk.bf16.mxu0 %vm3541_vm0, %v3540_v0  ;;  %v3519_v33 = vld [vmem:[%s4647_s0 + $0x3c4] ss:$12 sps:$4 sm:$0xff]  }
 0x13d   :  { %v2883_v38 = vpop.f32.mrb[48].mxu1 }
 0x13e   :  { %v2836_v42 = vpop.f32.mrb[36].mxu0  ;;  %v2884_v9 = vpop.f32.mrb[49].mxu1 }
 0x13f   :  { %v2837_v27 = vpop.f32.mrb[37].mxu0  ;;  %v2885_v10 = vadd.f32 %v2884_v9, %v2883_v38  ;;  %v2886_v11 = vpop.f32.mrb[50].mxu1  ;;  %v3527_v38 = vld [vmem:[%s4647_s0 + $0x3f4] ss:$12 sps:$4 sm:$0xff]  }
 0x140   :  { %v2838_v8 = vadd.f32 %v2837_v27, %v2836_v42  ;;  %v2839_v2 = vpop.f32.mrb[38].mxu0  ;;  %v2887_v15 = vpop.f32.mrb[51].mxu1 }
 0x141   :  { %v2840_v18 = vpop.f32.mrb[39].mxu0  ;;  %v4286_v20 = vadd.f32 %v2887_v15, %v2886_v11 }
 0x142   :  { %v4289_v22 = vadd.f32 %v2838_v8, %v4213_v4  ;;  %v2841_v46 = vadd.f32 %v2840_v18, %v2839_v2  ;;  %1982 = vmatmul.mubr.bf16.gmra.mrb[156].mxu1 %v3517_v6  ;;  %v3529_v2 = vld [vmem:[%s4647_s0 + $0x3f0] ss:$12 sps:$4 sm:$0xff]  }
 0x143   :  { %3307 = vmatmul.mubr.msk.bf16.gmra.mrb[144].mxu0 %vm368_vm1, %v3518_v40  ;;  %1989 = vmatprep.mubr.bf16.mxu1 %v3519_v33 }
 0x144   :  { %v4293_v47 = vadd.f32 %v2841_v46, %v4221_v12  ;;  %3310 = vmatprep.mubr.msk.bf16.mxu0 %vm3541_vm0, %v3540_v0  ;;  %v3523_v12 = vld [vmem:[%s4647_s0 + $0x3dc] ss:$12 sps:$4 sm:$0xff]  }
 0x145   :  { %v2889_v5 = vpop.f32.mrb[52].mxu1  ;;  %v3530_v46 = vld [vmem:[%s4647_s0 + $0x3b0] ss:$12 sps:$4 sm:$0xff]  }
 0x146   :  { %4656 = vst [vmem:[#allocation2_spill] sm:$0xff] %v4293_v47  ;;  %v2842_v48 = vpop.f32.mrb[40].mxu0  ;;  %v2890_v44 = vpop.f32.mrb[53].mxu1 }
 0x147   :  { %v2843_v4 = vpop.f32.mrb[41].mxu0  ;;  %v2891_v55 = vadd.f32 %v2890_v44, %v2889_v5  ;;  %v2892_v56 = vpop.f32.mrb[54].mxu1 }
 0x148   :  { %v2844_v57 = vadd.f32 %v2843_v4, %v2842_v48  ;;  %v2845_v59 = vpop.f32.mrb[42].mxu0  ;;  %v2893_v62 = vpop.f32.mrb[55].mxu1 }
 0x149   :  { %v2846_v63 = vpop.f32.mrb[43].mxu0  ;;  %v2894_v7 = vadd.f32 %v2893_v62, %v2892_v56 }
 0x14a   :  { %v4307_v13 = vadd.f32 %v2844_v57, %v4235_v45  ;;  %v2847_v54 = vadd.f32 %v2846_v63, %v2845_v59  ;;  %1990 = vmatmul.mubr.bf16.gmra.mrb[160].mxu1 %v3521_v49  ;;  %v3531_v49 = vld [vmem:[%s4647_s0 + $0x40c] ss:$12 sps:$4 sm:$0xff]   ;;  %v3533_v63 = vld [vmem:[%s4647_s0 + $0x408] ss:$12 sps:$4 sm:$0xff]  }
 0x14b   :  { %3311 = vmatmul.mubr.msk.bf16.gmra.mrb[148].mxu0 %vm368_vm1, %v3522_v53  ;;  %1997 = vmatprep.mubr.bf16.mxu1 %v3523_v12 }
 0x14c   :  { %v4311_v17 = vadd.f32 %v2847_v54, %v4243_v51  ;;  %3314 = vmatprep.mubr.msk.bf16.mxu0 %vm3541_vm0, %v3540_v0 }
 0x14d   :  { %v2895_v28 = vpop.f32.mrb[56].mxu1 }
 0x14e   :  { %4657 = vst [vmem:[#allocation3_spill] sm:$0xff] %v4311_v17  ;;  %v1042_v60 = vpop.f32.mrb[44].mxu0  ;;  %v2896_v25 = vpop.f32.mrb[57].mxu1 }
 0x14f   :  { %v4318_v45 = vadd.f32 %v2879_v23, %v1042_v60  ;;  %v3200_v30 = vpop.f32.mrb[45].mxu0  ;;  %v2897_v35 = vadd.f32 %v2896_v25, %v2895_v28  ;;  %v2898_v51 = vpop.f32.mrb[58].mxu1  ;;  %v3534_v60 = vld [vmem:[%s4647_s0 + $0x3c8] ss:$12 sps:$4 sm:$0xff]  }
 0x150   :  { %v1045_v42 = vpop.f32.mrb[46].mxu0  ;;  %v2899_v6 = vpop.f32.mrb[59].mxu1 }
 0x151   :  { %v4329_v27 = vadd.f32 %v4266_v31, %v1045_v42  ;;  %v3201_v23 = vpop.f32.mrb[47].mxu0  ;;  %v2900_v40 = vadd.f32 %v2899_v6, %v2898_v51 }
 0x152   :  { %1998 = vmatmul.mubr.bf16.gmra.mrb[164].mxu1 %v3525_v29 }
 0x153   :  { %3315 = vmatmul.mubr.msk.bf16.gmra.mrb[152].mxu0 %vm368_vm1, %v3526_v32  ;;  %2005 = vmatprep.mubr.bf16.mxu1 %v3527_v38 }
 0x154   :  { %3318 = vmatprep.mubr.msk.bf16.mxu0 %vm3541_vm0, %v3540_v0 }
 0x155   :  { %v2901_v33 = vpop.f32.mrb[60].mxu1 }
 0x156   :  { %v1050_v8 = vpop.f32.mrb[48].mxu0  ;;  %v2902_v31 = vpop.f32.mrb[61].mxu1 }
 0x157   :  { %v4339_v15 = vadd.f32 %v2885_v10, %v1050_v8  ;;  %v3204_v18 = vpop.f32.mrb[49].mxu0  ;;  %v2903_v5 = vadd.f32 %v2902_v31, %v2901_v33  ;;  %v2904_v48 = vpop.f32.mrb[62].mxu1 }
 0x158   :  { %v1053_v44 = vpop.f32.mrb[50].mxu0  ;;  %v2905_v4 = vpop.f32.mrb[63].mxu1  ;;  %v3536_v18 = vld [vmem:[%s4647_s0 + $0x3e0] ss:$12 sps:$4 sm:$0xff]  }
 0x159   :  { %v4350_v56 = vadd.f32 %v4286_v20, %v1053_v44  ;;  %v3205_v10 = vpop.f32.mrb[51].mxu0  ;;  %v2906_v12 = vadd.f32 %v2905_v4, %v2904_v48 }
 0x15a   :  { %2006 = vmatmul.mubr.bf16.gmra.mrb[168].mxu1 %v3529_v2 }
 0x15b   :  { %3319 = vmatmul.mubr.msk.bf16.gmra.mrb[156].mxu0 %vm368_vm1, %v3530_v46  ;;  %2013 = vmatprep.mubr.bf16.mxu1 %v3531_v49 }
 0x15c   :  { %3322 = vmatprep.mubr.msk.bf16.mxu0 %vm3541_vm0, %v3540_v0 }
 0x15d   :  { %v2907_v59 = vpop.f32.mrb[64].mxu1 }
 0x15e   :  { %v1058_v62 = vpop.f32.mrb[52].mxu0  ;;  %v2908_v20 = vpop.f32.mrb[65].mxu1 }
 0x15f   :  { %v4360_v54 = vadd.f32 %v2891_v55, %v1058_v62  ;;  %v3208_v28 = vpop.f32.mrb[53].mxu0  ;;  %v2909_v29 = vadd.f32 %v2908_v20, %v2907_v59  ;;  %v2910_v25 = vpop.f32.mrb[66].mxu1 }
 0x160   :  { %v1061_v30 = vpop.f32.mrb[54].mxu0  ;;  %v2911_v32 = vpop.f32.mrb[67].mxu1 }
 0x161   :  { %v4367_v38 = vadd.f32 %v2894_v7, %v1061_v30  ;;  %v3209_v42 = vpop.f32.mrb[55].mxu0  ;;  %v2912_v6 = vadd.f32 %v2911_v32, %v2910_v25  ;;  %v3535_v7 = vld [vmem:[%s4647_s0 + $0x410] ss:$12 sps:$4 sm:$0xff]  }
 0x162   :  { %2014 = vmatmul.mubr.bf16.gmra.mrb[172].mxu1 %v3533_v63 }
 0x163   :  { %3323 = vmatmul.mubr.msk.bf16.gmra.mrb[160].mxu0 %vm368_vm1, %v3534_v60  ;;  %3334 = vmatprep.mubr.msk.bf16.mxu1 %vm3541_vm0, %v3540_v0 }
 0x164   :  { %3326 = vmatprep.mubr.msk.bf16.mxu0 %vm3541_vm0, %v3540_v0 }
 0x165   :  { %v2913_v23 = vpop.f32.mrb[68].mxu1 }
 0x166   :  { %v1066_v33 = vpop.f32.mrb[56].mxu0  ;;  %v2914_v8 = vpop.f32.mrb[69].mxu1 }
 0x167   :  { %v4379_v2 = vadd.f32 %v2897_v35, %v1066_v33  ;;  %v3212_v31 = vpop.f32.mrb[57].mxu0  ;;  %v2915_v46 = vadd.f32 %v2914_v8, %v2913_v23  ;;  %v2916_v48 = vpop.f32.mrb[70].mxu1 }
 0x168   :  { %v1069_v49 = vpop.f32.mrb[58].mxu0  ;;  %v2917_v44 = vpop.f32.mrb[71].mxu1 }
 0x169   :  { %v4386_v10 = vadd.f32 %v2900_v40, %v1069_v49  ;;  %v3213_v59 = vpop.f32.mrb[59].mxu0  ;;  %v2918_v62 = vadd.f32 %v2917_v44, %v2916_v48  ;;  %v3537_v40 = vld [vmem:[%s4647_s0 + $0x3f8] ss:$12 sps:$4 sm:$0xff]  }
 0x16a   :  { %3335 = vmatmul.mubr.msk.bf16.vlgmr.msra.gmra.mrb[176].mxu1 %vm368_vm1, %v3535_v7 }
 0x16b   :  { %3327 = vmatmul.mubr.msk.bf16.gmra.mrb[164].mxu0 %vm368_vm1, %v3536_v18 }
 0x16c   :  { %3330 = vmatprep.mubr.msk.bf16.mxu0 %vm3541_vm0, %v3540_v0 }
 0x16d   :  { %v2919_v63 = vpop.f32.mrb[72].mxu1 }
 0x16e   :  { %v1074_v20 = vpop.f32.mrb[60].mxu0  ;;  %v2920_v28 = vpop.f32.mrb[73].mxu1 }
 0x16f   :  { %v4394_v60 = vadd.f32 %v2903_v5, %v1074_v20  ;;  %v3216_v25 = vpop.f32.mrb[61].mxu0  ;;  %v2921_v30 = vadd.f32 %v2920_v28, %v2919_v63  ;;  %v2922_v32 = vpop.f32.mrb[74].mxu1 }
 0x170   :  { %v1077_v42 = vpop.f32.mrb[62].mxu0  ;;  %v2923_v23 = vpop.f32.mrb[75].mxu1 }
 0x171   :  { %v4401_v7 = vadd.f32 %v2906_v12, %v1077_v42  ;;  %v3217_v0 = vpop.f32.mrb[63].mxu0  ;;  %v2924_v8 = vadd.f32 %v2923_v23, %v2922_v32 }
 0x173   :  { %3331 = vmatmul.mubr.msk.bf16.gmra.mrb[168].mxu0 %vm368_vm1, %v3537_v40 }
 0x175   :  { %v2925_v31 = vpop.f32.mrb[76].mxu1 }
 0x176   :  { %v1082_v18 = vpop.f32.mrb[64].mxu0  ;;  %v2926_v48 = vpop.f32.mrb[77].mxu1 }
 0x177   :  { %v4406_v49 = vadd.f32 %v2909_v29, %v1082_v18  ;;  %v3220_v44 = vpop.f32.mrb[65].mxu0  ;;  %v2927_v59 = vadd.f32 %v2926_v48, %v2925_v31  ;;  %v2928_v63 = vpop.f32.mrb[78].mxu1 }
 0x178   :  { %v1085_v20 = vpop.f32.mrb[66].mxu0  ;;  %v2929_v28 = vpop.f32.mrb[79].mxu1 }
 0x179   :  { %v4410_v25 = vadd.f32 %v2912_v6, %v1085_v20  ;;  %v3221_v32 = vpop.f32.mrb[67].mxu0  ;;  %v2930_v42 = vadd.f32 %v2929_v28, %v2928_v63 }
 0x17d   :  { %v2931_v23 = vpop.f32.mrb[80].mxu1 }
 0x17e   :  { %v1090_v0 = vpop.f32.mrb[68].mxu0  ;;  %v2932_v5 = vpop.f32.mrb[81].mxu1 }
 0x17f   :  { %v4414_v29 = vadd.f32 %v2915_v46, %v1090_v0  ;;  %v3224_v18 = vpop.f32.mrb[69].mxu0  ;;  %v2933_v31 = vadd.f32 %v2932_v5, %v2931_v23  ;;  %v2934_v48 = vpop.f32.mrb[82].mxu1 }
 0x180   :  { %v1093_v44 = vpop.f32.mrb[70].mxu0  ;;  %v2935_v33 = vpop.f32.mrb[83].mxu1 }
 0x181   :  { %v4418_v6 = vadd.f32 %v2918_v62, %v1093_v44  ;;  %v3225_v20 = vpop.f32.mrb[71].mxu0  ;;  %v2936_v63 = vadd.f32 %v2935_v33, %v2934_v48 }
 0x185   :  { %v2937_v32 = vpop.f32.mrb[84].mxu1 }
 0x186   :  { %v1098_v40 = vpop.f32.mrb[72].mxu0  ;;  %v2938_v35 = vpop.f32.mrb[85].mxu1 }
 0x187   :  { %v4422_v46 = vadd.f32 %v2921_v30, %v1098_v40  ;;  %v3228_v0 = vpop.f32.mrb[73].mxu0  ;;  %v2939_v5 = vadd.f32 %v2938_v35, %v2937_v32  ;;  %v2940_v23 = vpop.f32.mrb[86].mxu1 }
 0x188   :  { %v1101_v18 = vpop.f32.mrb[74].mxu0  ;;  %v2941_v4 = vpop.f32.mrb[87].mxu1 }
 0x189   :  { %v4426_v62 = vadd.f32 %v2924_v8, %v1101_v18  ;;  %v3229_v44 = vpop.f32.mrb[75].mxu0  ;;  %v2942_v33 = vadd.f32 %v2941_v4, %v2940_v23 }
 0x18d   :  { %v2972_v20 = vpop.f32.mrb[88].mxu1 }
 0x18e   :  { %v1106_v28 = vpop.f32.mrb[76].mxu0  ;;  %v2973_v55 = vpop.f32.mrb[89].mxu1 }
 0x18f   :  { %v4430_v30 = vadd.f32 %v2927_v59, %v1106_v28  ;;  %v3232_v40 = vpop.f32.mrb[77].mxu0  ;;  %v2974_v35 = vadd.f32 %v2973_v55, %v2972_v20  ;;  %v2975_v32 = vpop.f32.mrb[90].mxu1 }
 0x190   :  { %v1109_v0 = vpop.f32.mrb[78].mxu0  ;;  %v2976_v51 = vpop.f32.mrb[91].mxu1 }
 0x191   :  { %v4434_v8 = vadd.f32 %v2930_v42, %v1109_v0  ;;  %v3233_v18 = vpop.f32.mrb[79].mxu0  ;;  %v2977_v4 = vadd.f32 %v2976_v51, %v2975_v32 }
 0x195   :  { %v2978_v44 = vpop.f32.mrb[92].mxu1 }
 0x196   :  { %v1114_v48 = vpop.f32.mrb[80].mxu0  ;;  %v2979_v57 = vpop.f32.mrb[93].mxu1 }
 0x197   :  { %v4438_v59 = vadd.f32 %v2933_v31, %v1114_v48  ;;  %v3236_v28 = vpop.f32.mrb[81].mxu0  ;;  %v2980_v55 = vadd.f32 %v2979_v57, %v2978_v44  ;;  %v2981_v20 = vpop.f32.mrb[94].mxu1 }
 0x198   :  { %v1117_v40 = vpop.f32.mrb[82].mxu0  ;;  %v2982_v53 = vpop.f32.mrb[95].mxu1 }
 0x199   :  { %4658 = vst [vmem:[#allocation4_spill] sm:$0xff] %v4438_v59  ;;  %v4442_v42 = vadd.f32 %v2936_v63, %v1117_v40  ;;  %v3237_v0 = vpop.f32.mrb[83].mxu0  ;;  %v2983_v51 = vadd.f32 %v2982_v53, %v2981_v20  ;;  %v4662_v59 = vmax.f32 %v4093_v1, %v4318_v45  ;;  %v4664_v1 = vmax.f32 %v4113_v37, %v4339_v15 }
 0x19a   :  { %v4666_v37 = vmax.f32 %v4133_v14, %v4360_v54  ;;  %v4668_v14 = vmax.f32 %v4154_v50, %v4379_v2  ;;  %v4670_v50 = vmax.f32 %v4183_v19, %v4394_v60  ;;  %v4672_v19 = vmax.f32 %v4205_v41, %v4406_v49 }
 0x19b   :  { %4659 = vst [vmem:[#allocation5_spill] sm:$0xff] %v4442_v42  ;;  %v4674_v41 = vmax.f32 %v4227_v21, %v4414_v29  ;;  %v4676_v21 = vmax.f32 %v4249_v58, %v4422_v46  ;;  %v4678_v58 = vmax.f32 %v4269_v34, %v4430_v30 }
 0x19d   :  { %v2984_v18 = vpop.f32.mrb[96].mxu1 }
 0x19e   :  { %v1122_v23 = vpop.f32.mrb[84].mxu0  ;;  %v2985_v11 = vpop.f32.mrb[97].mxu1 }
 0x19f   :  { %v4446_v31 = vadd.f32 %v2939_v5, %v1122_v23  ;;  %v3240_v48 = vpop.f32.mrb[85].mxu0  ;;  %v2986_v57 = vadd.f32 %v2985_v11, %v2984_v18  ;;  %v2987_v44 = vpop.f32.mrb[98].mxu1 }
 0x1a0   :  { %v1125_v28 = vpop.f32.mrb[86].mxu0  ;;  %v2988_v9 = vpop.f32.mrb[99].mxu1  ;;  %v4680_v34 = vld [vmem:[#allocation4_spill] sm:$0xff] }
 0x1a1   :  { %4660 = vst [vmem:[#allocation6_spill] sm:$0xff] %v4446_v31  ;;  %v4450_v63 = vadd.f32 %v2942_v33, %v1125_v28  ;;  %v3241_v40 = vpop.f32.mrb[87].mxu0  ;;  %v2989_v53 = vadd.f32 %v2988_v9, %v2987_v44  ;;  %v4663_v44 = vmax.f32 %v4096_v24, %v4329_v27  ;;  %v4665_v24 = vmax.f32 %v4116_v39, %v4350_v56 }
 0x1a2   :  { %v4667_v39 = vmax.f32 %v4136_v16, %v4367_v38  ;;  %v4669_v16 = vmax.f32 %v4158_v52, %v4386_v10  ;;  %v4671_v52 = vmax.f32 %v4187_v26, %v4401_v7  ;;  %v4673_v26 = vmax.f32 %v4209_v3, %v4410_v25 }
 0x1a3   :  { %4661 = vst [vmem:[#allocation7_spill] sm:$0xff] %v4450_v63  ;;  %v4675_v3 = vmax.f32 %v4231_v43, %v4418_v6  ;;  %v4677_v43 = vmax.f32 %v4253_v61, %v4426_v62  ;;  %v4679_v61 = vmax.f32 %v4273_v36, %v4434_v8  ;;  %v4681_v30 = vmax.f32 %v4289_v22, %v4680_v34  ;;  %v4682_v36 = vld [vmem:[#allocation2_spill] sm:$0xff]  ;;  %v4683_v8 = vld [vmem:[#allocation5_spill] sm:$0xff] }
 0x1a5   :  { %v2990_v0 = vpop.f32.mrb[100].mxu1 }
 0x1a6   :  { %v1549_v32 = vpop.f32.mrb[88].mxu0  ;;  %v2991_v42 = vpop.f32.mrb[101].mxu1 }
 0x1a7   :  { %v1550_v5 = vadd.f32 %v2974_v35, %v1549_v32  ;;  %v3248_v23 = vpop.f32.mrb[89].mxu0  ;;  %v2992_v48 = vadd.f32 %v2991_v42, %v2990_v0  ;;  %v2993_v11 = vpop.f32.mrb[102].mxu1 }
 0x1a8   :  { %v1552_v18 = vpop.f32.mrb[90].mxu0  ;;  %v2994_v47 = vpop.f32.mrb[103].mxu1  ;;  %v4685_v22 = vld [vmem:[#allocation6_spill] sm:$0xff] }
 0x1a9   :  { %v4457_v12 = vmax.f32 %v4662_v59, %v1550_v5  ;;  %v1553_v33 = vadd.f32 %v2977_v4, %v1552_v18  ;;  %v3249_v28 = vpop.f32.mrb[91].mxu0  ;;  %v2995_v9 = vadd.f32 %v2994_v47, %v2993_v11 }
 0x1ab   :  { %v4462_v40 = vmax.f32 %v4663_v44, %v1553_v33 }
 0x1ad   :  { %v2996_v20 = vpop.f32.mrb[104].mxu1 }
 0x1ae   :  { %v1557_v35 = vpop.f32.mrb[92].mxu0  ;;  %v2997_v32 = vpop.f32.mrb[105].mxu1 }
 0x1af   :  { %v1558_v42 = vadd.f32 %v2980_v55, %v1557_v35  ;;  %v3252_v0 = vpop.f32.mrb[93].mxu0  ;;  %v2998_v23 = vadd.f32 %v2997_v32, %v2996_v20  ;;  %v2999_v63 = vpop.f32.mrb[106].mxu1 }
 0x1b0   :  { %v1560_v17 = vpop.f32.mrb[94].mxu0  ;;  %v3000_v31 = vpop.f32.mrb[107].mxu1 }
 0x1b1   :  { %v4467_v45 = vmax.f32 %v4664_v1, %v1558_v42  ;;  %v1561_v47 = vadd.f32 %v2983_v51, %v1560_v17  ;;  %v3253_v4 = vpop.f32.mrb[95].mxu0  ;;  %v3001_v59 = vadd.f32 %v3000_v31, %v2999_v63 }
 0x1b3   :  { %v4472_v27 = vmax.f32 %v4665_v24, %v1561_v47 }
 0x1b5   :  { %v3002_v5 = vpop.f32.mrb[108].mxu1 }
 0x1b6   :  { %v1565_v55 = vpop.f32.mrb[96].mxu0  ;;  %v3003_v11 = vpop.f32.mrb[109].mxu1 }
 0x1b7   :  { %v1566_v20 = vadd.f32 %v2986_v57, %v1565_v55  ;;  %v3256_v18 = vpop.f32.mrb[97].mxu0  ;;  %v3004_v33 = vadd.f32 %v3003_v11, %v3002_v5  ;;  %v3005_v28 = vpop.f32.mrb[110].mxu1 }
 0x1b8   :  { %v1568_v44 = vpop.f32.mrb[98].mxu0  ;;  %v3006_v35 = vpop.f32.mrb[111].mxu1 }
 0x1b9   :  { %v4477_v17 = vmax.f32 %v4666_v37, %v1566_v20  ;;  %v1569_v15 = vadd.f32 %v2989_v53, %v1568_v44  ;;  %v3257_v51 = vpop.f32.mrb[99].mxu0  ;;  %v3007_v31 = vadd.f32 %v3006_v35, %v3005_v28 }
 0x1bb   :  { %v4482_v56 = vmax.f32 %v4667_v39, %v1569_v15 }
 0x1bd   :  { %v3008_v63 = vpop.f32.mrb[112].mxu1 }
 0x1be   :  { %v1573_v57 = vpop.f32.mrb[100].mxu0  ;;  %v3009_v32 = vpop.f32.mrb[113].mxu1 }
 0x1bf   :  { %v1574_v42 = vadd.f32 %v2992_v48, %v1573_v57  ;;  %v3260_v0 = vpop.f32.mrb[101].mxu0  ;;  %v3010_v1 = vadd.f32 %v3009_v32, %v3008_v63  ;;  %v3011_v47 = vpop.f32.mrb[114].mxu1 }
 0x1c0   :  { %v1576_v4 = vpop.f32.mrb[102].mxu0  ;;  %v3012_v24 = vpop.f32.mrb[115].mxu1 }
 0x1c1   :  { %v4487_v54 = vmax.f32 %v4668_v14, %v1574_v42  ;;  %v1577_v53 = vadd.f32 %v2995_v9, %v1576_v4  ;;  %v3261_v5 = vpop.f32.mrb[103].mxu0  ;;  %v3013_v55 = vadd.f32 %v3012_v24, %v3011_v47 }
 0x1c3   :  { %v4492_v38 = vmax.f32 %v4669_v16, %v1577_v53 }
 0x1c5   :  { %v3014_v11 = vpop.f32.mrb[116].mxu1 }
 0x1c6   :  { %v1581_v48 = vpop.f32.mrb[104].mxu0  ;;  %v3015_v20 = vpop.f32.mrb[117].mxu1 }
 0x1c7   :  { %v1582_v18 = vadd.f32 %v2998_v23, %v1581_v48  ;;  %v3264_v28 = vpop.f32.mrb[105].mxu0  ;;  %v3016_v44 = vadd.f32 %v3015_v20, %v3014_v11  ;;  %v3017_v35 = vpop.f32.mrb[118].mxu1 }
 0x1c8   :  { %v1584_v37 = vpop.f32.mrb[106].mxu0  ;;  %v3018_v15 = vpop.f32.mrb[119].mxu1 }
 0x1c9   :  { %v4497_v2 = vmax.f32 %v4670_v50, %v1582_v18  ;;  %v1585_v9 = vadd.f32 %v3001_v59, %v1584_v37  ;;  %v3265_v51 = vpop.f32.mrb[107].mxu0  ;;  %v3019_v39 = vadd.f32 %v3018_v15, %v3017_v35 }
 0x1cb   :  { %v4502_v10 = vmax.f32 %v4671_v52, %v1585_v9 }
 0x1cd   :  { %v3020_v63 = vpop.f32.mrb[120].mxu1 }
 0x1ce   :  { %v1589_v23 = vpop.f32.mrb[108].mxu0  ;;  %v3021_v57 = vpop.f32.mrb[121].mxu1 }
 0x1cf   :  { %v1590_v32 = vadd.f32 %v3004_v33, %v1589_v23  ;;  %v3268_v42 = vpop.f32.mrb[109].mxu0  ;;  %v3022_v0 = vadd.f32 %v3021_v57, %v3020_v63  ;;  %v3023_v47 = vpop.f32.mrb[122].mxu1 }
 0x1d0   :  { %v1592_v4 = vpop.f32.mrb[110].mxu0  ;;  %v3024_v24 = vpop.f32.mrb[123].mxu1 }
 0x1d1   :  { %v4507_v60 = vmax.f32 %v4672_v19, %v1590_v32  ;;  %v1593_v59 = vadd.f32 %v3007_v31, %v1592_v4  ;;  %v3269_v14 = vpop.f32.mrb[111].mxu0  ;;  %v3025_v53 = vadd.f32 %v3024_v24, %v3023_v47 }
 0x1d3   :  { %v4512_v7 = vmax.f32 %v4673_v26, %v1593_v59 }
 0x1d5   :  { %v3026_v5 = vpop.f32.mrb[124].mxu1 }
 0x1d6   :  { %v1597_v33 = vpop.f32.mrb[112].mxu0  ;;  %v3027_v16 = vpop.f32.mrb[125].mxu1 }
 0x1d7   :  { %v1598_v11 = vadd.f32 %v3010_v1, %v1597_v33  ;;  %v3272_v48 = vpop.f32.mrb[113].mxu0  ;;  %v3028_v20 = vadd.f32 %v3027_v16, %v3026_v5  ;;  %v3029_v18 = vpop.f32.mrb[126].mxu1 }
 0x1d8   :  { %v1600_v28 = vpop.f32.mrb[114].mxu0  ;;  %v3030_v35 = vpop.f32.mrb[127].mxu1 }
 0x1d9   :  { %v4517_v49 = vmax.f32 %v4674_v41, %v1598_v11  ;;  %v1601_v31 = vadd.f32 %v3013_v55, %v1600_v28  ;;  %v3273_v37 = vpop.f32.mrb[115].mxu0  ;;  %v3031_v15 = vadd.f32 %v3030_v35, %v3029_v18 }
 0x1db   :  { %v4522_v25 = vmax.f32 %v4675_v3, %v1601_v31 }
 0x1dd   :  { %v3032_v50 = vpop.f32.mrb[128].mxu1 }
 0x1de   :  { %v1605_v1 = vpop.f32.mrb[116].mxu0  ;;  %v3033_v9 = vpop.f32.mrb[129].mxu1 }
 0x1df   :  { %v1606_v51 = vadd.f32 %v3016_v44, %v1605_v1  ;;  %v3276_v52 = vpop.f32.mrb[117].mxu0  ;;  %v3034_v63 = vadd.f32 %v3033_v9, %v3032_v50  ;;  %v3035_v23 = vpop.f32.mrb[130].mxu1 }
 0x1e0   :  { %v1608_v57 = vpop.f32.mrb[118].mxu0  ;;  %v3036_v32 = vpop.f32.mrb[131].mxu1 }
 0x1e1   :  { %v4527_v29 = vmax.f32 %v4676_v21, %v1606_v51  ;;  %v1609_v55 = vadd.f32 %v3019_v39, %v1608_v57  ;;  %v3277_v42 = vpop.f32.mrb[119].mxu0  ;;  %v3037_v47 = vadd.f32 %v3036_v32, %v3035_v23  ;;  %v4684_v51 = vmax.f32 %v4682_v36, %v4683_v8 }
 0x1e3   :  { %v4532_v6 = vmax.f32 %v4677_v43, %v1609_v55 }
 0x1e5   :  { %v3067_v4 = vpop.f32.mrb[132].mxu1 }
 0x1e6   :  { %v1613_v44 = vpop.f32.mrb[120].mxu0  ;;  %v3068_v24 = vpop.f32.mrb[133].mxu1 }
 0x1e7   :  { %v1614_v19 = vadd.f32 %v3022_v0, %v1613_v44  ;;  %v3280_v59 = vpop.f32.mrb[121].mxu0  ;;  %v3069_v14 = vadd.f32 %v3068_v24, %v3067_v4  ;;  %v3070_v26 = vpop.f32.mrb[134].mxu1  ;;  %v4686_v44 = vmax.f32 %v4307_v13, %v4685_v22  ;;  %v4567_v13 = vld [vmem:[%s4648_s2] ss:$0 sm:$0xff] }
 0x1e8   :  { %v1616_v5 = vpop.f32.mrb[122].mxu0  ;;  %v3071_v33 = vpop.f32.mrb[135].mxu1 }
 0x1e9   :  { %v4537_v46 = vmax.f32 %v4678_v58, %v1614_v19  ;;  %v1617_v39 = vadd.f32 %v3025_v53, %v1616_v5  ;;  %v3281_v16 = vpop.f32.mrb[123].mxu0  ;;  %v3072_v11 = vadd.f32 %v3071_v33, %v3070_v26  ;;  %v4687_v26 = vld [vmem:[#allocation3_spill] sm:$0xff] }
 0x1ea   :  { %v4688_v5 = vld [vmem:[#allocation7_spill] sm:$0xff] }
 0x1eb   :  { %v4542_v62 = vmax.f32 %v4679_v61, %v1617_v39  ;;  %v4689_v33 = vmax.f32 %v4687_v26, %v4688_v5 }
 0x1ed   :  { %v3073_v48 = vpop.f32.mrb[136].mxu1 }
 0x1ee   :  { %v1621_v0 = vpop.f32.mrb[124].mxu0  ;;  %v3074_v18 = vpop.f32.mrb[137].mxu1 }
 0x1ef   :  { %v1622_v28 = vadd.f32 %v3028_v20, %v1621_v0  ;;  %v3284_v35 = vpop.f32.mrb[125].mxu0  ;;  %v3075_v41 = vadd.f32 %v3074_v18, %v3073_v48  ;;  %v3076_v31 = vpop.f32.mrb[138].mxu1 }
 0x1f0   :  { %v1624_v37 = vpop.f32.mrb[126].mxu0  ;;  %v3077_v3 = vpop.f32.mrb[139].mxu1 }
 0x1f1   :  { %v4547_v53 = vmax.f32 %v4681_v30, %v1622_v28  ;;  %v1625_v50 = vadd.f32 %v3031_v15, %v1624_v37  ;;  %v3285_v1 = vpop.f32.mrb[127].mxu0  ;;  %v3078_v9 = vadd.f32 %v3077_v3, %v3076_v31 }
 0x1f3   :  { %v4552_v52 = vmax.f32 %v4684_v51, %v1625_v50 }
 0x1f5   :  { %v3079_v23 = vpop.f32.mrb[140].mxu1 }
 0x1f6   :  { %v1629_v20 = vpop.f32.mrb[128].mxu0  ;;  %v3080_v57 = vpop.f32.mrb[141].mxu1 }
 0x1f7   :  { %v1630_v32 = vadd.f32 %v3034_v63, %v1629_v20  ;;  %v3288_v21 = vpop.f32.mrb[129].mxu0  ;;  %v3081_v55 = vadd.f32 %v3080_v57, %v3079_v23  ;;  %v3082_v42 = vpop.f32.mrb[142].mxu1 }
 0x1f8   :  { %v1632_v43 = vpop.f32.mrb[130].mxu0  ;;  %v3083_v4 = vpop.f32.mrb[143].mxu1 }
 0x1f9   :  { %v4557_v15 = vmax.f32 %v4686_v44, %v1630_v32  ;;  %v1633_v24 = vadd.f32 %v3037_v47, %v1632_v43  ;;  %v3289_v19 = vpop.f32.mrb[131].mxu0  ;;  %v3084_v59 = vadd.f32 %v3083_v4, %v3082_v42 }
 0x1fb   :  { %v4562_v58 = vmax.f32 %v4689_v33, %v1633_v24 }
 0x1fd   :  { %v3085_v39 = vpop.f32.mrb[144].mxu1 }
 0x1fe   :  { %v2056_v63 = vpop.f32.mrb[132].mxu0  ;;  %v3086_v16 = vpop.f32.mrb[145].mxu1 }
 0x1ff   :  { %v2057_v61 = vadd.f32 %v3069_v14, %v2056_v63  ;;  %v3296_v48 = vpop.f32.mrb[133].mxu0  ;;  %v3087_v0 = vadd.f32 %v3086_v16, %v3085_v39  ;;  %v3088_v18 = vpop.f32.mrb[146].mxu1 }
 0x200   :  { %v2059_v47 = vpop.f32.mrb[134].mxu0  ;;  %v3089_v28 = vpop.f32.mrb[147].mxu1 }
 0x201   :  { %v2143_v35 = vmax.f32 %v4457_v12, %v2057_v61  ;;  %v2060_v31 = vadd.f32 %v3072_v11, %v2059_v47  ;;  %v3297_v37 = vpop.f32.mrb[135].mxu0  ;;  %v3090_v3 = vadd.f32 %v3089_v28, %v3088_v18 }
 0x203   :  { %v2172_v34 = vadd.f32 %v4567_v13, %v2143_v35  ;;  %v2144_v30 = vmax.f32 %v4462_v40, %v2060_v31 }
 0x205   :  { %v2173_v14 = vadd.f32 %v4567_v13, %v2144_v30  ;;  %v3091_v50 = vpop.f32.mrb[148].mxu1  ;;  %v2194_v8 = vmax.f32 %v2172_v34, 0.0 }
 0x206   :  { %v2064_v1 = vpop.f32.mrb[136].mxu0  ;;  %v3092_v36 = vpop.f32.mrb[149].mxu1 }
 0x207   :  { %v2195_v51 = vmax.f32 %v2173_v14, 0.0  ;;  %v2065_v23 = vadd.f32 %v3075_v41, %v2064_v1  ;;  %v3300_v20 = vpop.f32.mrb[137].mxu0  ;;  %v3093_v57 = vadd.f32 %v3092_v36, %v3091_v50  ;;  %v3094_v32 = vpop.f32.mrb[150].mxu1 }
 0x208   :  { %v2067_v21 = vpop.f32.mrb[138].mxu0  ;;  %v3095_v12 = vpop.f32.mrb[151].mxu1 }
 0x209   :  { %v2704_v11 = vpack.c.bf16 %v2195_v51, %v2194_v8  ;;  %v2145_v42 = vmax.f32 %v4467_v45, %v2065_v23  ;;  %v2068_v43 = vadd.f32 %v3078_v9, %v2067_v21  ;;  %v3301_v4 = vpop.f32.mrb[139].mxu0  ;;  %v3096_v22 = vadd.f32 %v3095_v12, %v3094_v32 }
 0x20b   :  { %2705 = vst [vmem:[%s4649_s3] sm:$0xff] %v2704_v11   ;;  %v2174_v40 = vadd.f32 %v4567_v13, %v2145_v42  ;;  %v2146_v44 = vmax.f32 %v4472_v27, %v2068_v43 }
 0x20d   :  { %v2175_v41 = vadd.f32 %v4567_v13, %v2146_v44  ;;  %v3097_v24 = vpop.f32.mrb[152].mxu1  ;;  %v2196_v5 = vmax.f32 %v2174_v40, 0.0 }
 0x20e   :  { %v2072_v19 = vpop.f32.mrb[140].mxu0  ;;  %v3098_v26 = vpop.f32.mrb[153].mxu1 }
 0x20f   :  { %v2197_v33 = vmax.f32 %v2175_v41, 0.0  ;;  %v2073_v39 = vadd.f32 %v3081_v55, %v2072_v19  ;;  %v3304_v45 = vpop.f32.mrb[141].mxu0  ;;  %v3099_v9 = vadd.f32 %v3098_v26, %v3097_v24  ;;  %v3100_v63 = vpop.f32.mrb[154].mxu1 }
 0x210   :  { %v2075_v16 = vpop.f32.mrb[142].mxu0  ;;  %v3101_v61 = vpop.f32.mrb[155].mxu1 }
 0x211   :  { %v2709_v48 = vpack.c.bf16 %v2197_v33, %v2196_v5  ;;  %v2147_v18 = vmax.f32 %v4477_v17, %v2073_v39  ;;  %v2076_v47 = vadd.f32 %v3084_v59, %v2075_v16  ;;  %v3305_v28 = vpop.f32.mrb[143].mxu0  ;;  %v3102_v35 = vadd.f32 %v3101_v61, %v3100_v63 }
 0x213   :  { %2756 = vst [vmem:[%s4649_s3 + $0x8] sm:$0xff] %v2709_v48   ;;  %v2176_v27 = vadd.f32 %v4567_v13, %v2147_v18  ;;  %v2148_v31 = vmax.f32 %v4482_v56, %v2076_v47 }
 0x215   :  { %v2177_v55 = vadd.f32 %v4567_v13, %v2148_v31  ;;  %v3103_v37 = vpop.f32.mrb[156].mxu1  ;;  %v2198_v14 = vmax.f32 %v2176_v27, 0.0 }
 0x216   :  { %v2080_v34 = vpop.f32.mrb[144].mxu0  ;;  %v3104_v30 = vpop.f32.mrb[157].mxu1 }
 0x217   :  { %v2199_v50 = vmax.f32 %v2177_v55, 0.0  ;;  %v2081_v1 = vadd.f32 %v3087_v0, %v2080_v34  ;;  %v3308_v17 = vpop.f32.mrb[145].mxu0  ;;  %v3105_v59 = vadd.f32 %v3104_v30, %v3103_v37  ;;  %v3106_v36 = vpop.f32.mrb[158].mxu1 }
 0x218   :  { %v2083_v8 = vpop.f32.mrb[146].mxu0  ;;  %v3107_v51 = vpop.f32.mrb[159].mxu1 }
 0x219   :  { %v2714_v23 = vpack.c.bf16 %v2199_v50, %v2198_v14  ;;  %v2149_v20 = vmax.f32 %v4487_v54, %v2081_v1  ;;  %v2084_v32 = vadd.f32 %v3090_v3, %v2083_v8  ;;  %v3309_v21 = vpop.f32.mrb[147].mxu0  ;;  %v3108_v12 = vadd.f32 %v3107_v51, %v3106_v36 }
 0x21b   :  { %2757 = vst [vmem:[%s4649_s3 + $0x10] sm:$0xff] %v2714_v23   ;;  %v2178_v56 = vadd.f32 %v4567_v13, %v2149_v20  ;;  %v2150_v11 = vmax.f32 %v4492_v38, %v2084_v32 }
 0x21d   :  { %v2179_v0 = vadd.f32 %v4567_v13, %v2150_v11  ;;  %v3109_v42 = vpop.f32.mrb[160].mxu1  ;;  %v2200_v40 = vmax.f32 %v2178_v56, 0.0 }
 0x21e   :  { %v2088_v43 = vpop.f32.mrb[148].mxu0  ;;  %v3110_v4 = vpop.f32.mrb[161].mxu1 }
 0x21f   :  { %v2201_v44 = vmax.f32 %v2179_v0, 0.0  ;;  %v2089_v41 = vadd.f32 %v3093_v57, %v2088_v43  ;;  %v3312_v54 = vpop.f32.mrb[149].mxu0  ;;  %v3111_v3 = vadd.f32 %v3110_v4, %v3109_v42  ;;  %v3112_v24 = vpop.f32.mrb[162].mxu1 }
 0x220   :  { %v2091_v19 = vpop.f32.mrb[150].mxu0  ;;  %v3113_v26 = vpop.f32.mrb[163].mxu1 }
 0x221   :  { %v2719_v5 = vpack.c.bf16 %v2201_v44, %v2200_v40  ;;  %v2151_v33 = vmax.f32 %v4497_v2, %v2089_v41  ;;  %v2092_v39 = vadd.f32 %v3096_v22, %v2091_v19  ;;  %v3313_v45 = vpop.f32.mrb[151].mxu0  ;;  %v3114_v63 = vadd.f32 %v3113_v26, %v3112_v24 }
 0x223   :  { %2758 = vst [vmem:[%s4649_s3 + $0x18] sm:$0xff] %v2719_v5   ;;  %v2180_v38 = vadd.f32 %v4567_v13, %v2151_v33  ;;  %v2152_v16 = vmax.f32 %v4502_v10, %v2092_v39 }
 0x225   :  { %v2181_v57 = vadd.f32 %v4567_v13, %v2152_v16  ;;  %v3115_v61 = vpop.f32.mrb[164].mxu1  ;;  %v2202_v47 = vmax.f32 %v2180_v38, 0.0 }
 0x226   :  { %v2096_v48 = vpop.f32.mrb[152].mxu0  ;;  %v3116_v18 = vpop.f32.mrb[165].mxu1 }
 0x227   :  { %v2203_v28 = vmax.f32 %v2181_v57, 0.0  ;;  %v2097_v27 = vadd.f32 %v3099_v9, %v2096_v48  ;;  %v3316_v2 = vpop.f32.mrb[153].mxu0  ;;  %v3117_v22 = vadd.f32 %v3116_v18, %v3115_v61  ;;  %v3118_v31 = vpop.f32.mrb[166].mxu1 }
 0x228   :  { %v2099_v55 = vpop.f32.mrb[154].mxu0  ;;  %v3119_v37 = vpop.f32.mrb[167].mxu1 }
 0x229   :  { %v2724_v34 = vpack.c.bf16 %v2203_v28, %v2202_v47  ;;  %v2153_v30 = vmax.f32 %v4507_v60, %v2097_v27  ;;  %v2100_v14 = vadd.f32 %v3102_v35, %v2099_v55  ;;  %v3317_v50 = vpop.f32.mrb[155].mxu0  ;;  %v3120_v1 = vadd.f32 %v3119_v37, %v3118_v31 }
 0x22b   :  { %2759 = vst [vmem:[%s4649_s3 + $0x20] sm:$0xff] %v2724_v34   ;;  %v2182_v10 = vadd.f32 %v4567_v13, %v2153_v30  ;;  %v2154_v17 = vmax.f32 %v4512_v7, %v2100_v14 }
 0x22d   :  { %v2183_v9 = vadd.f32 %v4567_v13, %v2154_v17  ;;  %v3121_v36 = vpop.f32.mrb[168].mxu1  ;;  %v2204_v23 = vmax.f32 %v2182_v10, 0.0 }
 0x22e   :  { %v2104_v8 = vpop.f32.mrb[156].mxu0  ;;  %v3122_v51 = vpop.f32.mrb[169].mxu1 }
 0x22f   :  { %v2205_v20 = vmax.f32 %v2183_v9, 0.0  ;;  %v2105_v32 = vadd.f32 %v3105_v59, %v2104_v8  ;;  %v3320_v60 = vpop.f32.mrb[157].mxu0  ;;  %v3123_v35 = vadd.f32 %v3122_v51, %v3121_v36  ;;  %v3124_v21 = vpop.f32.mrb[170].mxu1 }
 0x230   :  { %v2107_v56 = vpop.f32.mrb[158].mxu0  ;;  %v3125_v11 = vpop.f32.mrb[171].mxu1 }
 0x231   :  { %v2729_v0 = vpack.c.bf16 %v2205_v20, %v2204_v23  ;;  %v2155_v42 = vmax.f32 %v4517_v49, %v2105_v32  ;;  %v2108_v43 = vadd.f32 %v3108_v12, %v2107_v56  ;;  %v3321_v4 = vpop.f32.mrb[159].mxu0  ;;  %v3126_v40 = vadd.f32 %v3125_v11, %v3124_v21 }
 0x233   :  { %2760 = vst [vmem:[%s4649_s3 + $0x28] sm:$0xff] %v2729_v0   ;;  %v2184_v7 = vadd.f32 %v4567_v13, %v2155_v42  ;;  %v2156_v44 = vmax.f32 %v4522_v25, %v2108_v43 }
 0x235   :  { %v2185_v59 = vadd.f32 %v4567_v13, %v2156_v44  ;;  %v3127_v41 = vpop.f32.mrb[172].mxu1  ;;  %v2206_v19 = vmax.f32 %v2184_v7, 0.0 }
 0x236   :  { %v2112_v54 = vpop.f32.mrb[160].mxu0  ;;  %v3128_v24 = vpop.f32.mrb[173].mxu1 }
 0x237   :  { %v2207_v26 = vmax.f32 %v2185_v59, 0.0  ;;  %v2113_v5 = vadd.f32 %v3111_v3, %v2112_v54  ;;  %v3324_v49 = vpop.f32.mrb[161].mxu0  ;;  %v3129_v12 = vadd.f32 %v3128_v24, %v3127_v41  ;;  %v3130_v33 = vpop.f32.mrb[174].mxu1 }
 0x238   :  { %v2115_v39 = vpop.f32.mrb[162].mxu0  ;;  %v3131_v45 = vpop.f32.mrb[175].mxu1 }
 0x239   :  { %v2734_v38 = vpack.c.bf16 %v2207_v26, %v2206_v19  ;;  %v2157_v16 = vmax.f32 %v4527_v29, %v2113_v5  ;;  %v2116_v57 = vadd.f32 %v3114_v63, %v2115_v39  ;;  %v3325_v61 = vpop.f32.mrb[163].mxu0  ;;  %v3132_v48 = vadd.f32 %v3131_v45, %v3130_v33 }
 0x23b   :  { %2761 = vst [vmem:[%s4649_s3 + $0x30] sm:$0xff] %v2734_v38   ;;  %v2186_v25 = vadd.f32 %v4567_v13, %v2157_v16  ;;  %v2158_v18 = vmax.f32 %v4532_v6, %v2116_v57 }
 0x23d   :  { %v2187_v3 = vadd.f32 %v4567_v13, %v2158_v18  ;;  %v2136_v47 = vpop.f32.mrb[176].mxu1  ;;  %v2208_v31 = vmax.f32 %v2186_v25, 0.0 }
 0x23e   :  { %v2137_v28 = vadd.f32 %v3129_v12, %v2136_v47  ;;  %v2120_v27 = vpop.f32.mrb[164].mxu0  ;;  %v3336_v2 = vpop.f32.mrb[177].mxu1 }
 0x23f   :  { %v2209_v55 = vmax.f32 %v2187_v3, 0.0  ;;  %v2121_v29 = vadd.f32 %v3117_v22, %v2120_v27  ;;  %v3328_v63 = vpop.f32.mrb[165].mxu0  ;;  %v2139_v37 = vpop.f32.mrb[178].mxu1 }
 0x240   :  { %v2163_v34 = vmax.f32 %v4557_v15, %v2137_v28  ;;  %v2140_v30 = vadd.f32 %v3132_v48, %v2139_v37  ;;  %v2123_v14 = vpop.f32.mrb[166].mxu0  ;;  %v3337_v50 = vpop.f32.mrb[179].mxu1 }
 0x241   :  { %v2739_v10 = vpack.c.bf16 %v2209_v55, %v2208_v31  ;;  %v2159_v17 = vmax.f32 %v4537_v46, %v2121_v29  ;;  %v2124_v6 = vadd.f32 %v3120_v1, %v2123_v14  ;;  %v3329_v9 = vpop.f32.mrb[167].mxu0 }
 0x242   :  { %v2192_v36 = vadd.f32 %v4567_v13, %v2163_v34  ;;  %v2164_v8 = vmax.f32 %v4562_v58, %v2140_v30 }
 0x243   :  { %2762 = vst [vmem:[%s4649_s3 + $0x38] sm:$0xff] %v2739_v10   ;;  %v2188_v22 = vadd.f32 %v4567_v13, %v2159_v17  ;;  %v2160_v15 = vmax.f32 %v4542_v62, %v2124_v6 }
 0x244   :  { %v2193_v51 = vadd.f32 %v4567_v13, %v2164_v8  ;;  %v2214_v20 = vmax.f32 %v2192_v36, 0.0 }
 0x245   :  { %v2189_v23 = vadd.f32 %v4567_v13, %v2160_v15  ;;  %v2210_v32 = vmax.f32 %v2188_v22, 0.0 }
 0x246   :  { %v2215_v46 = vmax.f32 %v2193_v51, 0.0  ;;  %v2128_v1 = vpop.f32.mrb[168].mxu0 }
 0x247   :  { %v2211_v60 = vmax.f32 %v2189_v23, 0.0  ;;  %v2129_v21 = vadd.f32 %v3123_v35, %v2128_v1  ;;  %v3332_v56 = vpop.f32.mrb[169].mxu0 }
 0x248   :  { %v2754_v58 = vpack.c.bf16 %v2215_v46, %v2214_v20  ;;  %v2131_v11 = vpop.f32.mrb[170].mxu0 }
 0x249   :  { %v2744_v0 = vpack.c.bf16 %v2211_v60, %v2210_v32  ;;  %v2161_v42 = vmax.f32 %v4547_v53, %v2129_v21  ;;  %v2132_v43 = vadd.f32 %v3126_v40, %v2131_v11  ;;  %v3333_v4 = vpop.f32.mrb[171].mxu0 }
 0x24a   :  { %2765 = vst [vmem:[%s4649_s3 + $0x50] sm:$0xff] %v2754_v58  }
 0x24b   :  { %2763 = vst [vmem:[%s4649_s3 + $0x40] sm:$0xff] %v2744_v0   ;;  %v2190_v62 = vadd.f32 %v4567_v13, %v2161_v42  ;;  %v2162_v35 = vmax.f32 %v4552_v52, %v2132_v43 }
 0x24d   :  { %v2191_v7 = vadd.f32 %v4567_v13, %v2162_v35  ;;  %v2212_v44 = vmax.f32 %v2190_v62, 0.0 }
 0x24f   :  { %v2213_v59 = vmax.f32 %v2191_v7, 0.0 }
 0x251   :  { %v2749_v41 = vpack.c.bf16 %v2213_v59, %v2212_v44 }
 0x253   :  { %2764 = vst [vmem:[%s4649_s3 + $0x48] sm:$0xff] %v2749_v41  }

// kernel: cnn_forward.5
= control target key start
LH: loop header
LB: loop body
LE: loop exit
PB: predicated region body
PF: predicated region fallthrough
CT: control target
= control target key end

     0   :  { %s4517_s0 = inlined_call_operand.vmem [shape: bf16[8,2304], index: 0, kind: input, shape index: {}]   ;;  %s4518_s1 = inlined_call_operand.vmem [shape: bf16[2304,256], index: 1, kind: input, shape index: {}]   ;;  %s4519_s2 = inlined_call_operand.vmem [shape: f32[1,256], index: 2, kind: input, shape index: {}]   ;;  %s4520_s3 = inlined_call_operand.vmem [shape: bf16[256,128], index: 3, kind: input, shape index: {}]   ;;  %s4521_s4 = inlined_call_operand.vmem [shape: f32[1,128], index: 4, kind: input, shape index: {}]   ;;  %s4522_s5 = inlined_call_operand.vmem [shape: bf16[128,128], index: 5, kind: input, shape index: {}]   ;;  %s4523_s6 = inlined_call_operand.vmem [shape: f32[1,128], index: 6, kind: input, shape index: {}]   ;;  %s4524_s7 = inlined_call_operand.hbm [shape: f32[2,128], index: 7, kind: output, shape index: {}]  }
   0x1   :  { %v2950_v0 = vld [vmem:[%s4518_s1 + $0x4] ss:$8 sps:$4 sm:$0xff]   ;;  %v2954_v2 = vld [vmem:[%s4518_s1] ss:$8 sps:$4 sm:$0xff]   ;;  %v2956_v4 = vld [vmem:[%s4518_s1 + $0x14] ss:$8 sps:$4 sm:$0xff]  }
   0x2   :  { %v2952_v1 = vld [vmem:[%s4518_s1 + $0x404] ss:$8 sps:$4 sm:$0xff]   ;;  %1828 = vmatprep.subr.bf16.mxu1 %v2950_v0  ;;  %v2955_v3 = vld [vmem:[%s4518_s1 + $0x400] ss:$8 sps:$4 sm:$0xff]   ;;  %v2958_v5 = vld [vmem:[%s4518_s1 + $0x414] ss:$8 sps:$4 sm:$0xff]  }
   0x3   :  { %1992 = vmatprep.subr.bf16.mxu0 %v2952_v1  ;;  %1829 = vmatpush1.bf16.msra.mxu1 %v2954_v2  ;;  %v2960_v6 = vld [vmem:[%s4518_s1 + $0x10] ss:$8 sps:$4 sm:$0xff]   ;;  %v2962_v8 = vld [vmem:[%s4518_s1 + $0x24] ss:$8 sps:$4 sm:$0xff]   ;;  %v2966_v10 = vld [vmem:[%s4518_s1 + $0x20] ss:$8 sps:$4 sm:$0xff]  }
   0x4   :  { %1993 = vmatpush1.bf16.msra.mxu0 %v2955_v3  ;;  %1830 = vmatprep.subr.bf16.mxu1 %v2956_v4  ;;  %v2961_v7 = vld [vmem:[%s4518_s1 + $0x410] ss:$8 sps:$4 sm:$0xff]   ;;  %v2964_v9 = vld [vmem:[%s4518_s1 + $0x424] ss:$8 sps:$4 sm:$0xff]   ;;  %v2967_v11 = vld [vmem:[%s4518_s1 + $0x420] ss:$8 sps:$4 sm:$0xff]  }
   0x5   :  { %1994 = vmatprep.subr.bf16.mxu0 %v2958_v5  ;;  %v2968_v12 = vld [vmem:[%s4518_s1 + $0x34] ss:$8 sps:$4 sm:$0xff]   ;;  %v2972_v14 = vld [vmem:[%s4518_s1 + $0x30] ss:$8 sps:$4 sm:$0xff]   ;;  %v2974_v16 = vld [vmem:[%s4518_s1 + $0x44] ss:$8 sps:$4 sm:$0xff]  }
   0x6   :  { %v2970_v13 = vld [vmem:[%s4518_s1 + $0x434] ss:$8 sps:$4 sm:$0xff]   ;;  %v2973_v15 = vld [vmem:[%s4518_s1 + $0x430] ss:$8 sps:$4 sm:$0xff]   ;;  %v2976_v17 = vld [vmem:[%s4518_s1 + $0x444] ss:$8 sps:$4 sm:$0xff]  }
   0x7   :  { %1831 = vmatpush1.bf16.msra.mxu1 %v2960_v6  ;;  %v2978_v18 = vld [vmem:[%s4518_s1 + $0x40] ss:$8 sps:$4 sm:$0xff]   ;;  %v2980_v20 = vld [vmem:[%s4518_s1 + $0x54] ss:$8 sps:$4 sm:$0xff]   ;;  %v2984_v22 = vld [vmem:[%s4518_s1 + $0x50] ss:$8 sps:$4 sm:$0xff]  }
   0x8   :  { %1995 = vmatpush1.bf16.msra.mxu0 %v2961_v7  ;;  %1832 = vmatprep.subr.bf16.mxu1 %v2962_v8  ;;  %v2979_v19 = vld [vmem:[%s4518_s1 + $0x440] ss:$8 sps:$4 sm:$0xff]   ;;  %v2982_v21 = vld [vmem:[%s4518_s1 + $0x454] ss:$8 sps:$4 sm:$0xff]   ;;  %v2985_v23 = vld [vmem:[%s4518_s1 + $0x450] ss:$8 sps:$4 sm:$0xff]  }
   0x9   :  { %1996 = vmatprep.subr.bf16.mxu0 %v2964_v9  ;;  %v2986_v24 = vld [vmem:[%s4518_s1 + $0x64] ss:$8 sps:$4 sm:$0xff]   ;;  %v2990_v26 = vld [vmem:[%s4518_s1 + $0x60] ss:$8 sps:$4 sm:$0xff]   ;;  %v2992_v28 = vld [vmem:[%s4518_s1 + $0x74] ss:$8 sps:$4 sm:$0xff]  }
   0xa   :  { %v2988_v25 = vld [vmem:[%s4518_s1 + $0x464] ss:$8 sps:$4 sm:$0xff]   ;;  %v2991_v27 = vld [vmem:[%s4518_s1 + $0x460] ss:$8 sps:$4 sm:$0xff]   ;;  %v2994_v29 = vld [vmem:[%s4518_s1 + $0x474] ss:$8 sps:$4 sm:$0xff]  }
   0xb   :  { %1833 = vmatpush1.bf16.msra.mxu1 %v2966_v10  ;;  %v2996_v30 = vld [vmem:[%s4518_s1 + $0x70] ss:$8 sps:$4 sm:$0xff]   ;;  %v2998_v32 = vld [vmem:[%s4518_s1 + $0x84] ss:$8 sps:$4 sm:$0xff]   ;;  %v3002_v34 = vld [vmem:[%s4518_s1 + $0x80] ss:$8 sps:$4 sm:$0xff]  }
   0xc   :  { %1997 = vmatpush1.bf16.msra.mxu0 %v2967_v11  ;;  %1834 = vmatprep.subr.bf16.mxu1 %v2968_v12  ;;  %v2997_v31 = vld [vmem:[%s4518_s1 + $0x470] ss:$8 sps:$4 sm:$0xff]   ;;  %v3000_v33 = vld [vmem:[%s4518_s1 + $0x484] ss:$8 sps:$4 sm:$0xff]   ;;  %v3003_v35 = vld [vmem:[%s4518_s1 + $0x480] ss:$8 sps:$4 sm:$0xff]  }
   0xd   :  { %1998 = vmatprep.subr.bf16.mxu0 %v2970_v13  ;;  %v3004_v36 = vld [vmem:[%s4518_s1 + $0x94] ss:$8 sps:$4 sm:$0xff]   ;;  %v3008_v38 = vld [vmem:[%s4518_s1 + $0x90] ss:$8 sps:$4 sm:$0xff]   ;;  %v3010_v40 = vld [vmem:[%s4518_s1 + $0xa4] ss:$8 sps:$4 sm:$0xff]  }
   0xe   :  { %v3006_v37 = vld [vmem:[%s4518_s1 + $0x494] ss:$8 sps:$4 sm:$0xff]   ;;  %v3009_v39 = vld [vmem:[%s4518_s1 + $0x490] ss:$8 sps:$4 sm:$0xff]   ;;  %v3012_v41 = vld [vmem:[%s4518_s1 + $0x4a4] ss:$8 sps:$4 sm:$0xff]  }
   0xf   :  { %1835 = vmatpush1.bf16.msra.mxu1 %v2972_v14  ;;  %v3014_v42 = vld [vmem:[%s4518_s1 + $0xa0] ss:$8 sps:$4 sm:$0xff]   ;;  %v3016_v44 = vld [vmem:[%s4518_s1 + $0xb4] ss:$8 sps:$4 sm:$0xff]   ;;  %v3020_v47 = vld [vmem:[%s4518_s1 + $0xb0] ss:$8 sps:$4 sm:$0xff]  }
  0x10   :  { %1999 = vmatpush1.bf16.msra.mxu0 %v2973_v15  ;;  %1836 = vmatprep.subr.bf16.mxu1 %v2974_v16  ;;  %v3015_v43 = vld [vmem:[%s4518_s1 + $0x4a0] ss:$8 sps:$4 sm:$0xff]   ;;  %v3018_v45 = vld [vmem:[%s4518_s1 + $0x4b4] ss:$8 sps:$4 sm:$0xff]   ;;  %v3021_v49 = vld [vmem:[%s4518_s1 + $0x4b0] ss:$8 sps:$4 sm:$0xff]  }
  0x11   :  { %2000 = vmatprep.subr.bf16.mxu0 %v2976_v17  ;;  %v28_v46 = vld [vmem:[%s4517_s0] sm:$0xff]  ;;  %v3028_v56 = vld [vmem:[%s4518_s1 + $0xd4] ss:$8 sps:$4 sm:$0xff]   ;;  %v3032_v58 = vld [vmem:[%s4518_s1 + $0xd0] ss:$8 sps:$4 sm:$0xff]  }
  0x12   :  { %v2535_v48 = vcombine.high %v28_v46, %v28_v46  ;;  %v32_v50 = vld [vmem:[%s4517_s0 + $0x20] sm:$0xff]  ;;  %v3030_v57 = vld [vmem:[%s4518_s1 + $0x4d4] ss:$8 sps:$4 sm:$0xff]   ;;  %v3033_v59 = vld [vmem:[%s4518_s1 + $0x4d0] ss:$8 sps:$4 sm:$0xff]   ;;  %v2534_v6 = vcombine.low %v28_v46, %v28_v46 }
  0x13   :  { %1837 = vmatpush1.bf16.msra.mxu1 %v2978_v18  ;;  %v3022_v51 = vld [vmem:[%s4518_s1 + $0xc4] ss:$8 sps:$4 sm:$0xff]   ;;  %v2543_v53 = vcombine.high %v32_v50, %v32_v50  ;;  %v3026_v54 = vld [vmem:[%s4518_s1 + $0xc0] ss:$8 sps:$4 sm:$0xff]   ;;  %v3040_v0 = vld [vmem:[%s4518_s1 + $0xf4] ss:$8 sps:$4 sm:$0xff]   ;;  %v2542_v7 = vcombine.low %v32_v50, %v32_v50 }
  0x14   :  { %2001 = vmatpush1.bf16.msra.mxu0 %v2979_v19  ;;  %1838 = vmatprep.subr.bf16.mxu1 %v2980_v20  ;;  %v3024_v52 = vld [vmem:[%s4518_s1 + $0x4c4] ss:$8 sps:$4 sm:$0xff]   ;;  %v3027_v55 = vld [vmem:[%s4518_s1 + $0x4c0] ss:$8 sps:$4 sm:$0xff]   ;;  %v3042_v1 = vld [vmem:[%s4518_s1 + $0x4f4] ss:$8 sps:$4 sm:$0xff]  }
  0x15   :  { %2002 = vmatprep.subr.bf16.mxu0 %v2982_v21  ;;  %1860 = vmatprep.mubr.bf16.mxu1 %v2535_v48  ;;  %v3034_v60 = vld [vmem:[%s4518_s1 + $0xe4] ss:$8 sps:$4 sm:$0xff]   ;;  %v3038_v62 = vld [vmem:[%s4518_s1 + $0xe0] ss:$8 sps:$4 sm:$0xff]   ;;  %v3044_v2 = vld [vmem:[%s4518_s1 + $0xf0] ss:$8 sps:$4 sm:$0xff]  }
  0x16   :  { %2024 = vmatprep.mubr.bf16.mxu0 %v2543_v53  ;;  %v3036_v61 = vld [vmem:[%s4518_s1 + $0x4e4] ss:$8 sps:$4 sm:$0xff]   ;;  %v3039_v63 = vld [vmem:[%s4518_s1 + $0x4e0] ss:$8 sps:$4 sm:$0xff]   ;;  %v3045_v3 = vld [vmem:[%s4518_s1 + $0x4f0] ss:$8 sps:$4 sm:$0xff]  }
  0x17   :  { %1839 = vmatpush1.bf16.msra.mxu1 %v2984_v22  ;;  %v3050_v4 = vld [vmem:[%s4518_s1 + $0x104] ss:$8 sps:$4 sm:$0xff]   ;;  %v3048_v8 = vld [vmem:[%s4518_s1 + $0x100] ss:$8 sps:$4 sm:$0xff]   ;;  %v3058_v10 = vld [vmem:[%s4518_s1 + $0x114] ss:$8 sps:$4 sm:$0xff]  }
  0x18   :  { %2003 = vmatpush1.bf16.msra.mxu0 %v2985_v23  ;;  %1840 = vmatprep.subr.bf16.mxu1 %v2986_v24  ;;  %v3055_v5 = vld [vmem:[%s4518_s1 + $0x504] ss:$8 sps:$4 sm:$0xff]   ;;  %v3053_v9 = vld [vmem:[%s4518_s1 + $0x500] ss:$8 sps:$4 sm:$0xff]   ;;  %v3061_v11 = vld [vmem:[%s4518_s1 + $0x514] ss:$8 sps:$4 sm:$0xff]  }
  0x19   :  { %2004 = vmatprep.subr.bf16.mxu0 %v2988_v25  ;;  %v3056_v12 = vld [vmem:[%s4518_s1 + $0x110] ss:$8 sps:$4 sm:$0xff]   ;;  %v3064_v14 = vld [vmem:[%s4518_s1 + $0x124] ss:$8 sps:$4 sm:$0xff]   ;;  %v3062_v16 = vld [vmem:[%s4518_s1 + $0x120] ss:$8 sps:$4 sm:$0xff]  }
  0x1a   :  { %v3059_v13 = vld [vmem:[%s4518_s1 + $0x510] ss:$8 sps:$4 sm:$0xff]   ;;  %v3067_v15 = vld [vmem:[%s4518_s1 + $0x524] ss:$8 sps:$4 sm:$0xff]   ;;  %v3065_v17 = vld [vmem:[%s4518_s1 + $0x520] ss:$8 sps:$4 sm:$0xff]  }
  0x1b   :  { %1841 = vmatpush1.bf16.msra.mxu1 %v2990_v26  ;;  %v3070_v18 = vld [vmem:[%s4518_s1 + $0x134] ss:$8 sps:$4 sm:$0xff]   ;;  %v3068_v20 = vld [vmem:[%s4518_s1 + $0x130] ss:$8 sps:$4 sm:$0xff]   ;;  %v3076_v22 = vld [vmem:[%s4518_s1 + $0x144] ss:$8 sps:$4 sm:$0xff]  }
  0x1c   :  { %2005 = vmatpush1.bf16.msra.mxu0 %v2991_v27  ;;  %1842 = vmatprep.subr.bf16.mxu1 %v2992_v28  ;;  %v3073_v19 = vld [vmem:[%s4518_s1 + $0x534] ss:$8 sps:$4 sm:$0xff]   ;;  %v3071_v21 = vld [vmem:[%s4518_s1 + $0x530] ss:$8 sps:$4 sm:$0xff]   ;;  %v3079_v23 = vld [vmem:[%s4518_s1 + $0x544] ss:$8 sps:$4 sm:$0xff]  }
  0x1d   :  { %2006 = vmatprep.subr.bf16.mxu0 %v2994_v29  ;;  %v3074_v24 = vld [vmem:[%s4518_s1 + $0x140] ss:$8 sps:$4 sm:$0xff]   ;;  %v3082_v26 = vld [vmem:[%s4518_s1 + $0x154] ss:$8 sps:$4 sm:$0xff]   ;;  %v3080_v28 = vld [vmem:[%s4518_s1 + $0x150] ss:$8 sps:$4 sm:$0xff]  }
  0x1e   :  { %v3077_v25 = vld [vmem:[%s4518_s1 + $0x540] ss:$8 sps:$4 sm:$0xff]   ;;  %v3085_v27 = vld [vmem:[%s4518_s1 + $0x554] ss:$8 sps:$4 sm:$0xff]   ;;  %v3083_v29 = vld [vmem:[%s4518_s1 + $0x550] ss:$8 sps:$4 sm:$0xff]  }
  0x1f   :  { %1843 = vmatpush1.bf16.msra.mxu1 %v2996_v30  ;;  %v3088_v30 = vld [vmem:[%s4518_s1 + $0x164] ss:$8 sps:$4 sm:$0xff]   ;;  %v3106_v46 = vld [vmem:[%s4518_s1 + $0x194] ss:$8 sps:$4 sm:$0xff]   ;;  %v3104_v48 = vld [vmem:[%s4518_s1 + $0x190] ss:$8 sps:$4 sm:$0xff]  }
  0x20   :  { %2007 = vmatpush1.bf16.msra.mxu0 %v2997_v31  ;;  %1844 = vmatprep.subr.bf16.mxu1 %v2998_v32  ;;  %v3091_v31 = vld [vmem:[%s4518_s1 + $0x564] ss:$8 sps:$4 sm:$0xff]   ;;  %v3113_v53 = vld [vmem:[%s4518_s1 + $0x5a0] ss:$8 sps:$4 sm:$0xff]  }
  0x21   :  { %2008 = vmatprep.subr.bf16.mxu0 %v3000_v33  ;;  %v3770_v32 = vld [vmem:[%s4517_s0 + $0x8] sm:$0xff] }
  0x22   :  { %v3086_v33 = vld [vmem:[%s4518_s1 + $0x160] ss:$8 sps:$4 sm:$0xff]   ;;  %v3112_v50 = vld [vmem:[%s4518_s1 + $0x1a4] ss:$8 sps:$4 sm:$0xff]  }
  0x23   :  { %1845 = vmatpush1.bf16.msra.mxu1 %v3002_v34  ;;  %v3089_v34 = vld [vmem:[%s4518_s1 + $0x560] ss:$8 sps:$4 sm:$0xff]  }
  0x24   :  { %2009 = vmatpush1.bf16.msra.mxu0 %v3003_v35  ;;  %1846 = vmatprep.subr.bf16.mxu1 %v3004_v36  ;;  %v2537_v35 = vcombine.high %v3770_v32, %v3770_v32  ;;  %v3783_v36 = vld [vmem:[%s4517_s0 + $0x28] sm:$0xff] }
  0x25   :  { %2010 = vmatprep.subr.bf16.mxu0 %v3006_v37  ;;  %v3094_v37 = vld [vmem:[%s4518_s1 + $0x174] ss:$8 sps:$4 sm:$0xff]  }
  0x27   :  { %1847 = vmatpush1.bf16.msra.mxu1 %v3008_v38  ;;  %v2545_v38 = vcombine.high %v3783_v36, %v3783_v36 }
  0x28   :  { %2011 = vmatpush1.bf16.msra.mxu0 %v3009_v39  ;;  %1848 = vmatprep.subr.bf16.mxu1 %v3010_v40  ;;  %v3097_v39 = vld [vmem:[%s4518_s1 + $0x574] ss:$8 sps:$4 sm:$0xff]   ;;  %v3092_v40 = vld [vmem:[%s4518_s1 + $0x170] ss:$8 sps:$4 sm:$0xff]  }
  0x29   :  { %2012 = vmatprep.subr.bf16.mxu0 %v3012_v41  ;;  %v3095_v41 = vld [vmem:[%s4518_s1 + $0x570] ss:$8 sps:$4 sm:$0xff]  }
  0x2b   :  { %1849 = vmatpush1.bf16.msra.mxu1 %v3014_v42  ;;  %v3100_v42 = vld [vmem:[%s4518_s1 + $0x184] ss:$8 sps:$4 sm:$0xff]  }
  0x2c   :  { %2013 = vmatpush1.bf16.msra.mxu0 %v3015_v43  ;;  %1850 = vmatprep.subr.bf16.mxu1 %v3016_v44  ;;  %v3103_v43 = vld [vmem:[%s4518_s1 + $0x584] ss:$8 sps:$4 sm:$0xff]   ;;  %v3098_v44 = vld [vmem:[%s4518_s1 + $0x180] ss:$8 sps:$4 sm:$0xff]  }
  0x2d   :  { %2014 = vmatprep.subr.bf16.mxu0 %v3018_v45  ;;  %v3101_v45 = vld [vmem:[%s4518_s1 + $0x580] ss:$8 sps:$4 sm:$0xff]  }
  0x2f   :  { %1851 = vmatpush1.bf16.msra.mxu1 %v3020_v47  ;;  %v3109_v47 = vld [vmem:[%s4518_s1 + $0x594] ss:$8 sps:$4 sm:$0xff]  }
  0x30   :  { %2015 = vmatpush1.bf16.msra.mxu0 %v3021_v49  ;;  %1852 = vmatprep.subr.bf16.mxu1 %v3022_v51  ;;  %v3107_v49 = vld [vmem:[%s4518_s1 + $0x590] ss:$8 sps:$4 sm:$0xff]   ;;  %v3115_v51 = vld [vmem:[%s4518_s1 + $0x5a4] ss:$8 sps:$4 sm:$0xff]  }
  0x31   :  { %2016 = vmatprep.subr.bf16.mxu0 %v3024_v52  ;;  %v3110_v52 = vld [vmem:[%s4518_s1 + $0x1a0] ss:$8 sps:$4 sm:$0xff]  }
  0x33   :  { %1853 = vmatpush1.bf16.msra.mxu1 %v3026_v54  ;;  %v3118_v54 = vld [vmem:[%s4518_s1 + $0x1b4] ss:$8 sps:$4 sm:$0xff]  }
  0x34   :  { %2017 = vmatpush1.bf16.msra.mxu0 %v3027_v55  ;;  %1854 = vmatprep.subr.bf16.mxu1 %v3028_v56  ;;  %v3121_v55 = vld [vmem:[%s4518_s1 + $0x5b4] ss:$8 sps:$4 sm:$0xff]   ;;  %v3116_v56 = vld [vmem:[%s4518_s1 + $0x1b0] ss:$8 sps:$4 sm:$0xff]  }
  0x35   :  { %2018 = vmatprep.subr.bf16.mxu0 %v3030_v57  ;;  %v3119_v57 = vld [vmem:[%s4518_s1 + $0x5b0] ss:$8 sps:$4 sm:$0xff]  }
  0x37   :  { %1855 = vmatpush1.bf16.msra.mxu1 %v3032_v58  ;;  %v3124_v58 = vld [vmem:[%s4518_s1 + $0x1c4] ss:$8 sps:$4 sm:$0xff]  }
  0x38   :  { %2019 = vmatpush1.bf16.msra.mxu0 %v3033_v59  ;;  %1856 = vmatprep.subr.bf16.mxu1 %v3034_v60  ;;  %v3127_v59 = vld [vmem:[%s4518_s1 + $0x5c4] ss:$8 sps:$4 sm:$0xff]   ;;  %v3122_v60 = vld [vmem:[%s4518_s1 + $0x1c0] ss:$8 sps:$4 sm:$0xff]  }
  0x39   :  { %2020 = vmatprep.subr.bf16.mxu0 %v3036_v61  ;;  %v3125_v61 = vld [vmem:[%s4518_s1 + $0x5c0] ss:$8 sps:$4 sm:$0xff]  }
  0x3b   :  { %1857 = vmatpush1.bf16.msra.mxu1 %v3038_v62  ;;  %v3130_v62 = vld [vmem:[%s4518_s1 + $0x1d4] ss:$8 sps:$4 sm:$0xff]  }
  0x3c   :  { %2021 = vmatpush1.bf16.msra.mxu0 %v3039_v63  ;;  %1858 = vmatprep.subr.bf16.mxu1 %v3040_v0  ;;  %v3133_v63 = vld [vmem:[%s4518_s1 + $0x5d4] ss:$8 sps:$4 sm:$0xff]   ;;  %v3128_v0 = vld [vmem:[%s4518_s1 + $0x1d0] ss:$8 sps:$4 sm:$0xff]  }
  0x3d   :  { %2022 = vmatprep.subr.bf16.mxu0 %v3042_v1  ;;  %v3131_v1 = vld [vmem:[%s4518_s1 + $0x5d0] ss:$8 sps:$4 sm:$0xff]  }
  0x3f   :  { %1859 = vmatpush1.bf16.msra.mxu1 %v3044_v2  ;;  %v3136_v2 = vld [vmem:[%s4518_s1 + $0x1e4] ss:$8 sps:$4 sm:$0xff]  }
  0x40   :  { %2023 = vmatpush1.bf16.msra.mxu0 %v3045_v3  ;;  %1869 = vmatprep.subr.bf16.mxu1 %v3050_v4  ;;  %v3139_v3 = vld [vmem:[%s4518_s1 + $0x5e4] ss:$8 sps:$4 sm:$0xff]   ;;  %v3134_v4 = vld [vmem:[%s4518_s1 + $0x1e0] ss:$8 sps:$4 sm:$0xff]  }
  0x41   :  { %2033 = vmatprep.subr.bf16.mxu0 %v3055_v5  ;;  %v3137_v5 = vld [vmem:[%s4518_s1 + $0x5e0] ss:$8 sps:$4 sm:$0xff]  }
  0x42   :  { %1861 = vmatmul.mubr.bf16.vlgmr.msra.gmra.mrb[0].mxu1 %v2534_v6  ;;  %v3142_v6 = vld [vmem:[%s4518_s1 + $0x1f4] ss:$8 sps:$4 sm:$0xff]  }
  0x43   :  { %2025 = vmatmul.mubr.bf16.vlgmr.msra.gmra.mrb[0].mxu0 %v2542_v7  ;;  %1870 = vmatpush1.bf16.msra.mxu1 %v3048_v8  ;;  %v3145_v7 = vld [vmem:[%s4518_s1 + $0x5f4] ss:$8 sps:$4 sm:$0xff]   ;;  %v3140_v8 = vld [vmem:[%s4518_s1 + $0x1f0] ss:$8 sps:$4 sm:$0xff]  }
  0x44   :  { %2034 = vmatpush1.bf16.msra.mxu0 %v3053_v9  ;;  %1871 = vmatprep.subr.bf16.mxu1 %v3058_v10  ;;  %v3143_v9 = vld [vmem:[%s4518_s1 + $0x5f0] ss:$8 sps:$4 sm:$0xff]   ;;  %v3150_v10 = vld [vmem:[%s4518_s1 + $0x204] ss:$8 sps:$4 sm:$0xff]  }
  0x45   :  { %2035 = vmatprep.subr.bf16.mxu0 %v3061_v11  ;;  %1901 = vmatprep.mubr.bf16.mxu1 %v2537_v35  ;;  %v3155_v11 = vld [vmem:[%s4518_s1 + $0x604] ss:$8 sps:$4 sm:$0xff]   ;;  %v3177_v35 = vld [vmem:[%s4518_s1 + $0x640] ss:$8 sps:$4 sm:$0xff]  }
  0x46   :  { %2065 = vmatprep.mubr.bf16.mxu0 %v2545_v38  ;;  %v3180_v38 = vld [vmem:[%s4518_s1 + $0x250] ss:$8 sps:$4 sm:$0xff]  }
  0x47   :  { %1872 = vmatpush1.bf16.msra.mxu1 %v3056_v12  ;;  %v2536_v12 = vcombine.low %v3770_v32, %v3770_v32  ;;  %v3176_v32 = vld [vmem:[%s4518_s1 + $0x244] ss:$8 sps:$4 sm:$0xff]  }
  0x48   :  { %2036 = vmatpush1.bf16.msra.mxu0 %v3059_v13  ;;  %1873 = vmatprep.subr.bf16.mxu1 %v3064_v14  ;;  %v3148_v13 = vld [vmem:[%s4518_s1 + $0x200] ss:$8 sps:$4 sm:$0xff]   ;;  %v2544_v14 = vcombine.low %v3783_v36, %v3783_v36  ;;  %v3182_v36 = vld [vmem:[%s4518_s1 + $0x254] ss:$8 sps:$4 sm:$0xff]  }
  0x49   :  { %2037 = vmatprep.subr.bf16.mxu0 %v3067_v15  ;;  %v3153_v15 = vld [vmem:[%s4518_s1 + $0x600] ss:$8 sps:$4 sm:$0xff]  }
  0x4b   :  { %1874 = vmatpush1.bf16.msra.mxu1 %v3062_v16  ;;  %v3158_v16 = vld [vmem:[%s4518_s1 + $0x214] ss:$8 sps:$4 sm:$0xff]  }
  0x4c   :  { %2038 = vmatpush1.bf16.msra.mxu0 %v3065_v17  ;;  %1875 = vmatprep.subr.bf16.mxu1 %v3070_v18  ;;  %v3161_v17 = vld [vmem:[%s4518_s1 + $0x614] ss:$8 sps:$4 sm:$0xff]  }
  0x4d   :  { %2039 = vmatprep.subr.bf16.mxu0 %v3073_v19  ;;  %v3920_v18 = vld [vmem:[%s4517_s0 + $0x10] sm:$0xff] }
  0x4e   :  { %v2539_v19 = vcombine.high %v3920_v18, %v3920_v18 }
  0x4f   :  { %1876 = vmatpush1.bf16.msra.mxu1 %v3068_v20  ;;  %v3927_v20 = vld [vmem:[%s4517_s0 + $0x30] sm:$0xff] }
  0x50   :  { %2040 = vmatpush1.bf16.msra.mxu0 %v3071_v21  ;;  %1877 = vmatprep.subr.bf16.mxu1 %v3076_v22  ;;  %v3156_v21 = vld [vmem:[%s4518_s1 + $0x210] ss:$8 sps:$4 sm:$0xff]  }
  0x51   :  { %2041 = vmatprep.subr.bf16.mxu0 %v3079_v23  ;;  %v3159_v22 = vld [vmem:[%s4518_s1 + $0x610] ss:$8 sps:$4 sm:$0xff]   ;;  %v2547_v23 = vcombine.high %v3927_v20, %v3927_v20 }
  0x53   :  { %1878 = vmatpush1.bf16.msra.mxu1 %v3074_v24  ;;  %v3164_v24 = vld [vmem:[%s4518_s1 + $0x224] ss:$8 sps:$4 sm:$0xff]  }
  0x54   :  { %2042 = vmatpush1.bf16.msra.mxu0 %v3077_v25  ;;  %1879 = vmatprep.subr.bf16.mxu1 %v3082_v26  ;;  %v3167_v25 = vld [vmem:[%s4518_s1 + $0x624] ss:$8 sps:$4 sm:$0xff]   ;;  %v3162_v26 = vld [vmem:[%s4518_s1 + $0x220] ss:$8 sps:$4 sm:$0xff]  }
  0x55   :  { %2043 = vmatprep.subr.bf16.mxu0 %v3085_v27  ;;  %v3165_v27 = vld [vmem:[%s4518_s1 + $0x620] ss:$8 sps:$4 sm:$0xff]  }
  0x57   :  { %1880 = vmatpush1.bf16.msra.mxu1 %v3080_v28  ;;  %v3170_v28 = vld [vmem:[%s4518_s1 + $0x234] ss:$8 sps:$4 sm:$0xff]  }
  0x58   :  { %2044 = vmatpush1.bf16.msra.mxu0 %v3083_v29  ;;  %1881 = vmatprep.subr.bf16.mxu1 %v3088_v30  ;;  %v3173_v29 = vld [vmem:[%s4518_s1 + $0x634] ss:$8 sps:$4 sm:$0xff]   ;;  %v3168_v30 = vld [vmem:[%s4518_s1 + $0x230] ss:$8 sps:$4 sm:$0xff]  }
  0x59   :  { %2045 = vmatprep.subr.bf16.mxu0 %v3091_v31  ;;  %v3171_v31 = vld [vmem:[%s4518_s1 + $0x630] ss:$8 sps:$4 sm:$0xff]  }
  0x5b   :  { %1882 = vmatpush1.bf16.msra.mxu1 %v3086_v33  ;;  %v3179_v33 = vld [vmem:[%s4518_s1 + $0x644] ss:$8 sps:$4 sm:$0xff]  }
  0x5c   :  { %2046 = vmatpush1.bf16.msra.mxu0 %v3089_v34  ;;  %1883 = vmatprep.subr.bf16.mxu1 %v3094_v37  ;;  %v3174_v34 = vld [vmem:[%s4518_s1 + $0x240] ss:$8 sps:$4 sm:$0xff]   ;;  %v3185_v37 = vld [vmem:[%s4518_s1 + $0x654] ss:$8 sps:$4 sm:$0xff]  }
  0x5d   :  { %2047 = vmatprep.subr.bf16.mxu0 %v3097_v39  ;;  %v3183_v39 = vld [vmem:[%s4518_s1 + $0x650] ss:$8 sps:$4 sm:$0xff]  }
  0x5f   :  { %1884 = vmatpush1.bf16.msra.mxu1 %v3092_v40  ;;  %v3188_v40 = vld [vmem:[%s4518_s1 + $0x264] ss:$8 sps:$4 sm:$0xff]  }
  0x60   :  { %2048 = vmatpush1.bf16.msra.mxu0 %v3095_v41  ;;  %1885 = vmatprep.subr.bf16.mxu1 %v3100_v42  ;;  %v3191_v41 = vld [vmem:[%s4518_s1 + $0x664] ss:$8 sps:$4 sm:$0xff]   ;;  %v3186_v42 = vld [vmem:[%s4518_s1 + $0x260] ss:$8 sps:$4 sm:$0xff]  }
  0x61   :  { %2049 = vmatprep.subr.bf16.mxu0 %v3103_v43  ;;  %v3189_v43 = vld [vmem:[%s4518_s1 + $0x660] ss:$8 sps:$4 sm:$0xff]  }
  0x63   :  { %1886 = vmatpush1.bf16.msra.mxu1 %v3098_v44  ;;  %v3194_v44 = vld [vmem:[%s4518_s1 + $0x274] ss:$8 sps:$4 sm:$0xff]  }
  0x64   :  { %2050 = vmatpush1.bf16.msra.mxu0 %v3101_v45  ;;  %1887 = vmatprep.subr.bf16.mxu1 %v3106_v46  ;;  %v3197_v45 = vld [vmem:[%s4518_s1 + $0x674] ss:$8 sps:$4 sm:$0xff]   ;;  %v3192_v46 = vld [vmem:[%s4518_s1 + $0x270] ss:$8 sps:$4 sm:$0xff]  }
  0x65   :  { %2051 = vmatprep.subr.bf16.mxu0 %v3109_v47  ;;  %v3195_v47 = vld [vmem:[%s4518_s1 + $0x670] ss:$8 sps:$4 sm:$0xff]  }
  0x67   :  { %1888 = vmatpush1.bf16.msra.mxu1 %v3104_v48  ;;  %v3200_v48 = vld [vmem:[%s4518_s1 + $0x284] ss:$8 sps:$4 sm:$0xff]  }
  0x68   :  { %2052 = vmatpush1.bf16.msra.mxu0 %v3107_v49  ;;  %1889 = vmatprep.subr.bf16.mxu1 %v3112_v50  ;;  %v3203_v49 = vld [vmem:[%s4518_s1 + $0x684] ss:$8 sps:$4 sm:$0xff]   ;;  %v3198_v50 = vld [vmem:[%s4518_s1 + $0x280] ss:$8 sps:$4 sm:$0xff]  }
  0x69   :  { %2053 = vmatprep.subr.bf16.mxu0 %v3115_v51  ;;  %v3201_v51 = vld [vmem:[%s4518_s1 + $0x680] ss:$8 sps:$4 sm:$0xff]  }
  0x6b   :  { %1890 = vmatpush1.bf16.msra.mxu1 %v3110_v52  ;;  %v3206_v52 = vld [vmem:[%s4518_s1 + $0x294] ss:$8 sps:$4 sm:$0xff]  }
  0x6c   :  { %2054 = vmatpush1.bf16.msra.mxu0 %v3113_v53  ;;  %1891 = vmatprep.subr.bf16.mxu1 %v3118_v54  ;;  %v3209_v53 = vld [vmem:[%s4518_s1 + $0x694] ss:$8 sps:$4 sm:$0xff]   ;;  %v3204_v54 = vld [vmem:[%s4518_s1 + $0x290] ss:$8 sps:$4 sm:$0xff]  }
  0x6d   :  { %2055 = vmatprep.subr.bf16.mxu0 %v3121_v55  ;;  %v3207_v55 = vld [vmem:[%s4518_s1 + $0x690] ss:$8 sps:$4 sm:$0xff]  }
  0x6f   :  { %1892 = vmatpush1.bf16.msra.mxu1 %v3116_v56  ;;  %v3212_v56 = vld [vmem:[%s4518_s1 + $0x2a4] ss:$8 sps:$4 sm:$0xff]  }
  0x70   :  { %2056 = vmatpush1.bf16.msra.mxu0 %v3119_v57  ;;  %1893 = vmatprep.subr.bf16.mxu1 %v3124_v58  ;;  %v3215_v57 = vld [vmem:[%s4518_s1 + $0x6a4] ss:$8 sps:$4 sm:$0xff]   ;;  %v3210_v58 = vld [vmem:[%s4518_s1 + $0x2a0] ss:$8 sps:$4 sm:$0xff]  }
  0x71   :  { %2057 = vmatprep.subr.bf16.mxu0 %v3127_v59  ;;  %v3213_v59 = vld [vmem:[%s4518_s1 + $0x6a0] ss:$8 sps:$4 sm:$0xff]  }
  0x73   :  { %1894 = vmatpush1.bf16.msra.mxu1 %v3122_v60  ;;  %v3218_v60 = vld [vmem:[%s4518_s1 + $0x2b4] ss:$8 sps:$4 sm:$0xff]  }
  0x74   :  { %2058 = vmatpush1.bf16.msra.mxu0 %v3125_v61  ;;  %1895 = vmatprep.subr.bf16.mxu1 %v3130_v62  ;;  %v3221_v61 = vld [vmem:[%s4518_s1 + $0x6b4] ss:$8 sps:$4 sm:$0xff]   ;;  %v3216_v62 = vld [vmem:[%s4518_s1 + $0x2b0] ss:$8 sps:$4 sm:$0xff]  }
  0x75   :  { %2059 = vmatprep.subr.bf16.mxu0 %v3133_v63  ;;  %v3219_v63 = vld [vmem:[%s4518_s1 + $0x6b0] ss:$8 sps:$4 sm:$0xff]  }
  0x77   :  { %1896 = vmatpush1.bf16.msra.mxu1 %v3128_v0  ;;  %v3224_v0 = vld [vmem:[%s4518_s1 + $0x2c4] ss:$8 sps:$4 sm:$0xff]  }
  0x78   :  { %2060 = vmatpush1.bf16.msra.mxu0 %v3131_v1  ;;  %1897 = vmatprep.subr.bf16.mxu1 %v3136_v2  ;;  %v3227_v1 = vld [vmem:[%s4518_s1 + $0x6c4] ss:$8 sps:$4 sm:$0xff]   ;;  %v3222_v2 = vld [vmem:[%s4518_s1 + $0x2c0] ss:$8 sps:$4 sm:$0xff]  }
  0x79   :  { %2061 = vmatprep.subr.bf16.mxu0 %v3139_v3  ;;  %v3225_v3 = vld [vmem:[%s4518_s1 + $0x6c0] ss:$8 sps:$4 sm:$0xff]  }
  0x7b   :  { %1898 = vmatpush1.bf16.msra.mxu1 %v3134_v4  ;;  %v3230_v4 = vld [vmem:[%s4518_s1 + $0x2d4] ss:$8 sps:$4 sm:$0xff]  }
  0x7c   :  { %2062 = vmatpush1.bf16.msra.mxu0 %v3137_v5  ;;  %1899 = vmatprep.subr.bf16.mxu1 %v3142_v6  ;;  %v3233_v5 = vld [vmem:[%s4518_s1 + $0x6d4] ss:$8 sps:$4 sm:$0xff]   ;;  %v3228_v6 = vld [vmem:[%s4518_s1 + $0x2d0] ss:$8 sps:$4 sm:$0xff]  }
  0x7d   :  { %2063 = vmatprep.subr.bf16.mxu0 %v3145_v7  ;;  %v3231_v7 = vld [vmem:[%s4518_s1 + $0x6d0] ss:$8 sps:$4 sm:$0xff]  }
  0x7f   :  { %1900 = vmatpush1.bf16.msra.mxu1 %v3140_v8  ;;  %v3236_v8 = vld [vmem:[%s4518_s1 + $0x2e4] ss:$8 sps:$4 sm:$0xff]  }
  0x80   :  { %2064 = vmatpush1.bf16.msra.mxu0 %v3143_v9  ;;  %1910 = vmatprep.subr.bf16.mxu1 %v3150_v10  ;;  %v3239_v9 = vld [vmem:[%s4518_s1 + $0x6e4] ss:$8 sps:$4 sm:$0xff]   ;;  %v3234_v10 = vld [vmem:[%s4518_s1 + $0x2e0] ss:$8 sps:$4 sm:$0xff]  }
  0x81   :  { %2074 = vmatprep.subr.bf16.mxu0 %v3155_v11  ;;  %v3237_v11 = vld [vmem:[%s4518_s1 + $0x6e0] ss:$8 sps:$4 sm:$0xff]  }
  0x82   :  { %1902 = vmatmul.mubr.bf16.vlgmr.msra.gmra.mrb[0].mxu1 %v2536_v12  ;;  %v3242_v12 = vld [vmem:[%s4518_s1 + $0x2f4] ss:$8 sps:$4 sm:$0xff]  }
  0x83   :  { %2066 = vmatmul.mubr.bf16.vlgmr.msra.gmra.mrb[0].mxu0 %v2544_v14  ;;  %1911 = vmatpush1.bf16.msra.mxu1 %v3148_v13  ;;  %v3245_v13 = vld [vmem:[%s4518_s1 + $0x6f4] ss:$8 sps:$4 sm:$0xff]   ;;  %v3240_v14 = vld [vmem:[%s4518_s1 + $0x2f0] ss:$8 sps:$4 sm:$0xff]  }
  0x84   :  { %2075 = vmatpush1.bf16.msra.mxu0 %v3153_v15  ;;  %1912 = vmatprep.subr.bf16.mxu1 %v3158_v16  ;;  %v3243_v15 = vld [vmem:[%s4518_s1 + $0x6f0] ss:$8 sps:$4 sm:$0xff]   ;;  %v3250_v16 = vld [vmem:[%s4518_s1 + $0x304] ss:$8 sps:$4 sm:$0xff]  }
  0x85   :  { %2076 = vmatprep.subr.bf16.mxu0 %v3161_v17  ;;  %1942 = vmatprep.mubr.bf16.mxu1 %v2539_v19  ;;  %v3255_v17 = vld [vmem:[%s4518_s1 + $0x704] ss:$8 sps:$4 sm:$0xff]   ;;  %v3248_v19 = vld [vmem:[%s4518_s1 + $0x300] ss:$8 sps:$4 sm:$0xff]  }
  0x86   :  { %2106 = vmatprep.mubr.bf16.mxu0 %v2547_v23  ;;  %v2546_v23 = vcombine.low %v3927_v20, %v3927_v20  ;;  %v3256_v20 = vld [vmem:[%s4518_s1 + $0x310] ss:$8 sps:$4 sm:$0xff]  }
  0x87   :  { %1913 = vmatpush1.bf16.msra.mxu1 %v3156_v21  ;;  %v3253_v21 = vld [vmem:[%s4518_s1 + $0x700] ss:$8 sps:$4 sm:$0xff]  }
  0x88   :  { %2077 = vmatpush1.bf16.msra.mxu0 %v3159_v22  ;;  %1914 = vmatprep.subr.bf16.mxu1 %v3164_v24  ;;  %v2538_v22 = vcombine.low %v3920_v18, %v3920_v18  ;;  %v4124_v24 = vld [vmem:[%s4517_s0 + $0x18] sm:$0xff] }
  0x89   :  { %2078 = vmatprep.subr.bf16.mxu0 %v3167_v25  ;;  %v4129_v25 = vld [vmem:[%s4517_s0 + $0x38] sm:$0xff] }
  0x8a   :  { %v3261_v18 = vld [vmem:[%s4518_s1 + $0x714] ss:$8 sps:$4 sm:$0xff]  }
  0x8b   :  { %1915 = vmatpush1.bf16.msra.mxu1 %v3162_v26  ;;  %v3258_v26 = vld [vmem:[%s4518_s1 + $0x314] ss:$8 sps:$4 sm:$0xff]  }
  0x8c   :  { %2079 = vmatpush1.bf16.msra.mxu0 %v3165_v27  ;;  %1916 = vmatprep.subr.bf16.mxu1 %v3170_v28  ;;  %v3259_v27 = vld [vmem:[%s4518_s1 + $0x710] ss:$8 sps:$4 sm:$0xff]   ;;  %v2541_v28 = vcombine.high %v4124_v24, %v4124_v24 }
  0x8d   :  { %2080 = vmatprep.subr.bf16.mxu0 %v3173_v29  ;;  %v2549_v29 = vcombine.high %v4129_v25, %v4129_v25 }
  0x8f   :  { %1917 = vmatpush1.bf16.msra.mxu1 %v3168_v30  ;;  %v3264_v30 = vld [vmem:[%s4518_s1 + $0x324] ss:$8 sps:$4 sm:$0xff]  }
  0x90   :  { %2081 = vmatpush1.bf16.msra.mxu0 %v3171_v31  ;;  %1918 = vmatprep.subr.bf16.mxu1 %v3176_v32  ;;  %v3267_v31 = vld [vmem:[%s4518_s1 + $0x724] ss:$8 sps:$4 sm:$0xff]   ;;  %v3262_v32 = vld [vmem:[%s4518_s1 + $0x320] ss:$8 sps:$4 sm:$0xff]  }
  0x91   :  { %2082 = vmatprep.subr.bf16.mxu0 %v3179_v33  ;;  %v3265_v33 = vld [vmem:[%s4518_s1 + $0x720] ss:$8 sps:$4 sm:$0xff]  }
  0x93   :  { %1919 = vmatpush1.bf16.msra.mxu1 %v3174_v34  ;;  %v3270_v34 = vld [vmem:[%s4518_s1 + $0x334] ss:$8 sps:$4 sm:$0xff]  }
  0x94   :  { %2083 = vmatpush1.bf16.msra.mxu0 %v3177_v35  ;;  %1920 = vmatprep.subr.bf16.mxu1 %v3182_v36  ;;  %v3273_v35 = vld [vmem:[%s4518_s1 + $0x734] ss:$8 sps:$4 sm:$0xff]   ;;  %v3268_v36 = vld [vmem:[%s4518_s1 + $0x330] ss:$8 sps:$4 sm:$0xff]  }
  0x95   :  { %2084 = vmatprep.subr.bf16.mxu0 %v3185_v37  ;;  %v3271_v37 = vld [vmem:[%s4518_s1 + $0x730] ss:$8 sps:$4 sm:$0xff]  }
  0x97   :  { %1921 = vmatpush1.bf16.msra.mxu1 %v3180_v38  ;;  %v3276_v38 = vld [vmem:[%s4518_s1 + $0x344] ss:$8 sps:$4 sm:$0xff]  }
  0x98   :  { %2085 = vmatpush1.bf16.msra.mxu0 %v3183_v39  ;;  %1922 = vmatprep.subr.bf16.mxu1 %v3188_v40  ;;  %v3279_v39 = vld [vmem:[%s4518_s1 + $0x744] ss:$8 sps:$4 sm:$0xff]   ;;  %v3274_v40 = vld [vmem:[%s4518_s1 + $0x340] ss:$8 sps:$4 sm:$0xff]  }
  0x99   :  { %2086 = vmatprep.subr.bf16.mxu0 %v3191_v41  ;;  %v3277_v41 = vld [vmem:[%s4518_s1 + $0x740] ss:$8 sps:$4 sm:$0xff]  }
  0x9b   :  { %1923 = vmatpush1.bf16.msra.mxu1 %v3186_v42  ;;  %v3282_v42 = vld [vmem:[%s4518_s1 + $0x354] ss:$8 sps:$4 sm:$0xff]  }
  0x9c   :  { %2087 = vmatpush1.bf16.msra.mxu0 %v3189_v43  ;;  %1924 = vmatprep.subr.bf16.mxu1 %v3194_v44  ;;  %v3285_v43 = vld [vmem:[%s4518_s1 + $0x754] ss:$8 sps:$4 sm:$0xff]  }
  0x9d   :  { %2088 = vmatprep.subr.bf16.mxu0 %v3197_v45 }
  0x9f   :  { %1925 = vmatpush1.bf16.msra.mxu1 %v3192_v46 }
  0xa0   :  { %2089 = vmatpush1.bf16.msra.mxu0 %v3195_v47  ;;  %1926 = vmatprep.subr.bf16.mxu1 %v3200_v48 }
  0xa1   :  { %2090 = vmatprep.subr.bf16.mxu0 %v3203_v49 }
  0xa3   :  { %1927 = vmatpush1.bf16.msra.mxu1 %v3198_v50 }
  0xa4   :  { %2091 = vmatpush1.bf16.msra.mxu0 %v3201_v51  ;;  %1928 = vmatprep.subr.bf16.mxu1 %v3206_v52 }
  0xa5   :  { %2092 = vmatprep.subr.bf16.mxu0 %v3209_v53 }
  0xa7   :  { %1929 = vmatpush1.bf16.msra.mxu1 %v3204_v54 }
  0xa8   :  { %2093 = vmatpush1.bf16.msra.mxu0 %v3207_v55  ;;  %1930 = vmatprep.subr.bf16.mxu1 %v3212_v56 }
  0xa9   :  { %2094 = vmatprep.subr.bf16.mxu0 %v3215_v57 }
  0xab   :  { %1931 = vmatpush1.bf16.msra.mxu1 %v3210_v58 }
  0xac   :  { %2095 = vmatpush1.bf16.msra.mxu0 %v3213_v59  ;;  %1932 = vmatprep.subr.bf16.mxu1 %v3218_v60 }
  0xad   :  { %2096 = vmatprep.subr.bf16.mxu0 %v3221_v61 }
  0xaf   :  { %1933 = vmatpush1.bf16.msra.mxu1 %v3216_v62 }
  0xb0   :  { %2097 = vmatpush1.bf16.msra.mxu0 %v3219_v63  ;;  %1934 = vmatprep.subr.bf16.mxu1 %v3224_v0 }
  0xb1   :  { %2098 = vmatprep.subr.bf16.mxu0 %v3227_v1 }
  0xb3   :  { %1935 = vmatpush1.bf16.msra.mxu1 %v3222_v2 }
  0xb4   :  { %2099 = vmatpush1.bf16.msra.mxu0 %v3225_v3  ;;  %1936 = vmatprep.subr.bf16.mxu1 %v3230_v4 }
  0xb5   :  { %2100 = vmatprep.subr.bf16.mxu0 %v3233_v5 }
  0xb7   :  { %1937 = vmatpush1.bf16.msra.mxu1 %v3228_v6 }
  0xb8   :  { %2101 = vmatpush1.bf16.msra.mxu0 %v3231_v7  ;;  %1938 = vmatprep.subr.bf16.mxu1 %v3236_v8 }
  0xb9   :  { %2102 = vmatprep.subr.bf16.mxu0 %v3239_v9 }
  0xbb   :  { %1939 = vmatpush1.bf16.msra.mxu1 %v3234_v10 }
  0xbc   :  { %2103 = vmatpush1.bf16.msra.mxu0 %v3237_v11  ;;  %1940 = vmatprep.subr.bf16.mxu1 %v3242_v12 }
  0xbd   :  { %2104 = vmatprep.subr.bf16.mxu0 %v3245_v13 }
  0xbf   :  { %1941 = vmatpush1.bf16.msra.mxu1 %v3240_v14 }
  0xc0   :  { %2105 = vmatpush1.bf16.msra.mxu0 %v3243_v15  ;;  %1951 = vmatprep.subr.bf16.mxu1 %v3250_v16 }
  0xc1   :  { %2115 = vmatprep.subr.bf16.mxu0 %v3255_v17 }
  0xc2   :  { %1943 = vmatmul.mubr.bf16.vlgmr.msra.gmra.mrb[0].mxu1 %v2538_v22 }
  0xc3   :  { %2107 = vmatmul.mubr.bf16.vlgmr.msra.gmra.mrb[0].mxu0 %v2546_v23  ;;  %1952 = vmatpush1.bf16.msra.mxu1 %v3248_v19 }
  0xc4   :  { %2116 = vmatpush1.bf16.msra.mxu0 %v3253_v21  ;;  %1953 = vmatprep.subr.bf16.mxu1 %v3258_v26 }
  0xc5   :  { %2117 = vmatprep.subr.bf16.mxu0 %v3261_v18  ;;  %1983 = vmatprep.mubr.bf16.mxu1 %v2541_v28 }
  0xc6   :  { %2147 = vmatprep.mubr.bf16.mxu0 %v2549_v29 }
  0xc7   :  { %1954 = vmatpush1.bf16.msra.mxu1 %v3256_v20 }
  0xc8   :  { %2118 = vmatpush1.bf16.msra.mxu0 %v3259_v27  ;;  %1955 = vmatprep.subr.bf16.mxu1 %v3264_v30 }
  0xc9   :  { %2119 = vmatprep.subr.bf16.mxu0 %v3267_v31 }
  0xcb   :  { %1956 = vmatpush1.bf16.msra.mxu1 %v3262_v32 }
  0xcc   :  { %2120 = vmatpush1.bf16.msra.mxu0 %v3265_v33  ;;  %1957 = vmatprep.subr.bf16.mxu1 %v3270_v34 }
  0xcd   :  { %2121 = vmatprep.subr.bf16.mxu0 %v3273_v35 }
  0xcf   :  { %1958 = vmatpush1.bf16.msra.mxu1 %v3268_v36 }
  0xd0   :  { %2122 = vmatpush1.bf16.msra.mxu0 %v3271_v37  ;;  %1959 = vmatprep.subr.bf16.mxu1 %v3276_v38 }
  0xd1   :  { %2123 = vmatprep.subr.bf16.mxu0 %v3279_v39 }
  0xd2   :  { %12 = vsyncpa [#allocation3], 0  ;;  %v3280_v44 = vld [vmem:[%s4518_s1 + $0x350] ss:$8 sps:$4 sm:$0xff]   ;;  %v3288_v46 = vld [vmem:[%s4518_s1 + $0x364] ss:$8 sps:$4 sm:$0xff]   ;;  %v2540_v20 = vcombine.low %v4124_v24, %v4124_v24  ;;  %v2548_v27 = vcombine.low %v4129_v25, %v4129_v25 }
  0xd3   :  { %1960 = vmatpush1.bf16.msra.mxu1 %v3274_v40  ;;  %v3283_v45 = vld [vmem:[%s4518_s1 + $0x750] ss:$8 sps:$4 sm:$0xff]   ;;  %v3291_v47 = vld [vmem:[%s4518_s1 + $0x764] ss:$8 sps:$4 sm:$0xff]   ;;  %v3286_v48 = vld [vmem:[%s4518_s1 + $0x360] ss:$8 sps:$4 sm:$0xff]  }
  0xd4   :  { %2124 = vmatpush1.bf16.msra.mxu0 %v3277_v41  ;;  %1961 = vmatprep.subr.bf16.mxu1 %v3282_v42  ;;  %v3289_v49 = vld [vmem:[%s4518_s1 + $0x760] ss:$8 sps:$4 sm:$0xff]   ;;  %v3294_v50 = vld [vmem:[%s4518_s1 + $0x374] ss:$8 sps:$4 sm:$0xff]   ;;  %v3292_v52 = vld [vmem:[%s4518_s1 + $0x370] ss:$8 sps:$4 sm:$0xff]  }
  0xd5   :  { %2125 = vmatprep.subr.bf16.mxu0 %v3285_v43  ;;  %v3297_v51 = vld [vmem:[%s4518_s1 + $0x774] ss:$8 sps:$4 sm:$0xff]   ;;  %v3295_v53 = vld [vmem:[%s4518_s1 + $0x770] ss:$8 sps:$4 sm:$0xff]   ;;  %v3300_v54 = vld [vmem:[%s4518_s1 + $0x384] ss:$8 sps:$4 sm:$0xff]  }
  0xd6   :  { %v3303_v55 = vld [vmem:[%s4518_s1 + $0x784] ss:$8 sps:$4 sm:$0xff]   ;;  %v3298_v56 = vld [vmem:[%s4518_s1 + $0x380] ss:$8 sps:$4 sm:$0xff]   ;;  %v3306_v58 = vld [vmem:[%s4518_s1 + $0x394] ss:$8 sps:$4 sm:$0xff]  }
  0xd7   :  { %1962 = vmatpush1.bf16.msra.mxu1 %v3280_v44  ;;  %v3301_v57 = vld [vmem:[%s4518_s1 + $0x780] ss:$8 sps:$4 sm:$0xff]   ;;  %v3309_v59 = vld [vmem:[%s4518_s1 + $0x794] ss:$8 sps:$4 sm:$0xff]   ;;  %v3304_v60 = vld [vmem:[%s4518_s1 + $0x390] ss:$8 sps:$4 sm:$0xff]  }
  0xd8   :  { %2126 = vmatpush1.bf16.msra.mxu0 %v3283_v45  ;;  %1963 = vmatprep.subr.bf16.mxu1 %v3288_v46  ;;  %v3307_v61 = vld [vmem:[%s4518_s1 + $0x790] ss:$8 sps:$4 sm:$0xff]   ;;  %v3312_v62 = vld [vmem:[%s4518_s1 + $0x3a4] ss:$8 sps:$4 sm:$0xff]   ;;  %v3310_v0 = vld [vmem:[%s4518_s1 + $0x3a0] ss:$8 sps:$4 sm:$0xff]  }
  0xd9   :  { %2127 = vmatprep.subr.bf16.mxu0 %v3291_v47  ;;  %v3315_v63 = vld [vmem:[%s4518_s1 + $0x7a4] ss:$8 sps:$4 sm:$0xff]   ;;  %v3313_v1 = vld [vmem:[%s4518_s1 + $0x7a0] ss:$8 sps:$4 sm:$0xff]   ;;  %v3318_v2 = vld [vmem:[%s4518_s1 + $0x3b4] ss:$8 sps:$4 sm:$0xff]  }
  0xda   :  { %v3321_v3 = vld [vmem:[%s4518_s1 + $0x7b4] ss:$8 sps:$4 sm:$0xff]   ;;  %v3316_v4 = vld [vmem:[%s4518_s1 + $0x3b0] ss:$8 sps:$4 sm:$0xff]   ;;  %v3324_v6 = vld [vmem:[%s4518_s1 + $0x3c4] ss:$8 sps:$4 sm:$0xff]  }
  0xdb   :  { %1964 = vmatpush1.bf16.msra.mxu1 %v3286_v48  ;;  %v3319_v5 = vld [vmem:[%s4518_s1 + $0x7b0] ss:$8 sps:$4 sm:$0xff]   ;;  %v3327_v7 = vld [vmem:[%s4518_s1 + $0x7c4] ss:$8 sps:$4 sm:$0xff]   ;;  %v3322_v8 = vld [vmem:[%s4518_s1 + $0x3c0] ss:$8 sps:$4 sm:$0xff]  }
  0xdc   :  { %2128 = vmatpush1.bf16.msra.mxu0 %v3289_v49  ;;  %1965 = vmatprep.subr.bf16.mxu1 %v3294_v50  ;;  %v3325_v9 = vld [vmem:[%s4518_s1 + $0x7c0] ss:$8 sps:$4 sm:$0xff]   ;;  %v3330_v10 = vld [vmem:[%s4518_s1 + $0x3d4] ss:$8 sps:$4 sm:$0xff]   ;;  %v3328_v12 = vld [vmem:[%s4518_s1 + $0x3d0] ss:$8 sps:$4 sm:$0xff]  }
  0xdd   :  { %2129 = vmatprep.subr.bf16.mxu0 %v3297_v51  ;;  %v3333_v11 = vld [vmem:[%s4518_s1 + $0x7d4] ss:$8 sps:$4 sm:$0xff]   ;;  %v3331_v13 = vld [vmem:[%s4518_s1 + $0x7d0] ss:$8 sps:$4 sm:$0xff]   ;;  %v3336_v14 = vld [vmem:[%s4518_s1 + $0x3e4] ss:$8 sps:$4 sm:$0xff]  }
  0xde   :  { %v3339_v15 = vld [vmem:[%s4518_s1 + $0x7e4] ss:$8 sps:$4 sm:$0xff]   ;;  %v3334_v16 = vld [vmem:[%s4518_s1 + $0x3e0] ss:$8 sps:$4 sm:$0xff]   ;;  %v3342_v19 = vld [vmem:[%s4518_s1 + $0x3f4] ss:$8 sps:$4 sm:$0xff]  }
  0xdf   :  { %1966 = vmatpush1.bf16.msra.mxu1 %v3292_v52  ;;  %v3337_v17 = vld [vmem:[%s4518_s1 + $0x7e0] ss:$8 sps:$4 sm:$0xff]   ;;  %v3345_v21 = vld [vmem:[%s4518_s1 + $0x7f4] ss:$8 sps:$4 sm:$0xff]   ;;  %v3340_v22 = vld [vmem:[%s4518_s1 + $0x3f0] ss:$8 sps:$4 sm:$0xff]  }
  0xe0   :  { %2130 = vmatpush1.bf16.msra.mxu0 %v3295_v53  ;;  %1967 = vmatprep.subr.bf16.mxu1 %v3300_v54  ;;  %v3343_v23 = vld [vmem:[%s4518_s1 + $0x7f0] ss:$8 sps:$4 sm:$0xff]   ;;  %v3352_v26 = vld [vmem:[%s4518_s1 + $0x804] ss:$8 sps:$4 sm:$0xff]   ;;  %v3350_v28 = vld [vmem:[%s4518_s1 + $0x800] ss:$8 sps:$4 sm:$0xff]  }
  0xe1   :  { %2131 = vmatprep.subr.bf16.mxu0 %v3303_v55  ;;  %v4321_v18 = vld [vmem:[%s4517_s0 + $0x40] sm:$0xff]  ;;  %v3355_v30 = vld [vmem:[%s4518_s1 + $0x814] ss:$8 sps:$4 sm:$0xff]   ;;  %v3353_v24 = vld [vmem:[%s4518_s1 + $0x810] ss:$8 sps:$4 sm:$0xff]   ;;  %vm3449_vm0 = vmmov 0  }
  0xe2   :  { %v2551_v29 = vcombine.high %v4321_v18, %v4321_v18  ;;  %v3358_v25 = vld [vmem:[%s4518_s1 + $0x824] ss:$8 sps:$4 sm:$0xff]   ;;  %v3356_v31 = vld [vmem:[%s4518_s1 + $0x820] ss:$8 sps:$4 sm:$0xff]   ;;  %v3361_v32 = vld [vmem:[%s4518_s1 + $0x834] ss:$8 sps:$4 sm:$0xff]  }
  0xe3   :  { %1968 = vmatpush1.bf16.msra.mxu1 %v3298_v56  ;;  %v3359_v33 = vld [vmem:[%s4518_s1 + $0x830] ss:$8 sps:$4 sm:$0xff]   ;;  %v3364_v34 = vld [vmem:[%s4518_s1 + $0x844] ss:$8 sps:$4 sm:$0xff]   ;;  %v3362_v35 = vld [vmem:[%s4518_s1 + $0x840] ss:$8 sps:$4 sm:$0xff]  }
  0xe4   :  { %2132 = vmatpush1.bf16.msra.mxu0 %v3301_v57  ;;  %1969 = vmatprep.subr.bf16.mxu1 %v3306_v58  ;;  %v3367_v36 = vld [vmem:[%s4518_s1 + $0x854] ss:$8 sps:$4 sm:$0xff]   ;;  %v3365_v37 = vld [vmem:[%s4518_s1 + $0x850] ss:$8 sps:$4 sm:$0xff]   ;;  %v3370_v38 = vld [vmem:[%s4518_s1 + $0x864] ss:$8 sps:$4 sm:$0xff]   ;;  %v2550_v58 = vcombine.low %v4321_v18, %v4321_v18 }
  0xe5   :  { %2133 = vmatprep.subr.bf16.mxu0 %v3309_v59  ;;  %v3368_v39 = vld [vmem:[%s4518_s1 + $0x860] ss:$8 sps:$4 sm:$0xff]   ;;  %v3373_v40 = vld [vmem:[%s4518_s1 + $0x874] ss:$8 sps:$4 sm:$0xff]   ;;  %v3371_v41 = vld [vmem:[%s4518_s1 + $0x870] ss:$8 sps:$4 sm:$0xff]  }
  0xe6   :  { %v3376_v42 = vld [vmem:[%s4518_s1 + $0x884] ss:$8 sps:$4 sm:$0xff]   ;;  %v3374_v43 = vld [vmem:[%s4518_s1 + $0x880] ss:$8 sps:$4 sm:$0xff]   ;;  %v3379_v44 = vld [vmem:[%s4518_s1 + $0x894] ss:$8 sps:$4 sm:$0xff]  }
  0xe7   :  { %1970 = vmatpush1.bf16.msra.mxu1 %v3304_v60  ;;  %v3377_v45 = vld [vmem:[%s4518_s1 + $0x890] ss:$8 sps:$4 sm:$0xff]   ;;  %v3382_v46 = vld [vmem:[%s4518_s1 + $0x8a4] ss:$8 sps:$4 sm:$0xff]   ;;  %v3380_v47 = vld [vmem:[%s4518_s1 + $0x8a0] ss:$8 sps:$4 sm:$0xff]  }
  0xe8   :  { %2134 = vmatpush1.bf16.msra.mxu0 %v3307_v61  ;;  %1971 = vmatprep.subr.bf16.mxu1 %v3312_v62  ;;  %v3385_v48 = vld [vmem:[%s4518_s1 + $0x8b4] ss:$8 sps:$4 sm:$0xff]   ;;  %v3383_v49 = vld [vmem:[%s4518_s1 + $0x8b0] ss:$8 sps:$4 sm:$0xff]   ;;  %v3388_v50 = vld [vmem:[%s4518_s1 + $0x8c4] ss:$8 sps:$4 sm:$0xff]  }
  0xe9   :  { %2135 = vmatprep.subr.bf16.mxu0 %v3315_v63  ;;  %v3386_v51 = vld [vmem:[%s4518_s1 + $0x8c0] ss:$8 sps:$4 sm:$0xff]   ;;  %v3391_v52 = vld [vmem:[%s4518_s1 + $0x8d4] ss:$8 sps:$4 sm:$0xff]   ;;  %v3389_v53 = vld [vmem:[%s4518_s1 + $0x8d0] ss:$8 sps:$4 sm:$0xff]  }
  0xea   :  { %v3394_v54 = vld [vmem:[%s4518_s1 + $0x8e4] ss:$8 sps:$4 sm:$0xff]   ;;  %v3392_v55 = vld [vmem:[%s4518_s1 + $0x8e0] ss:$8 sps:$4 sm:$0xff]   ;;  %v3397_v56 = vld [vmem:[%s4518_s1 + $0x8f4] ss:$8 sps:$4 sm:$0xff]  }
  0xeb   :  { %1972 = vmatpush1.bf16.msra.mxu1 %v3310_v0  ;;  %v3395_v57 = vld [vmem:[%s4518_s1 + $0x8f0] ss:$8 sps:$4 sm:$0xff]   ;;  %v3400_v59 = vld [vmem:[%s4520_s3 + $0x40] sm:$0xff]   ;;  %v3402_v61 = vld [vmem:[%s4520_s3 + $0x48] sm:$0xff]  }
  0xec   :  { %2136 = vmatpush1.bf16.msra.mxu0 %v3313_v1  ;;  %1973 = vmatprep.subr.bf16.mxu1 %v3318_v2  ;;  %v3401_v60 = vld [vmem:[%s4520_s3] sm:$0xff]   ;;  %v3403_v62 = vld [vmem:[%s4520_s3 + $0x8] sm:$0xff]   ;;  %v3404_v63 = vld [vmem:[%s4520_s3 + $0x50] sm:$0xff]  }
  0xed   :  { %2137 = vmatprep.subr.bf16.mxu0 %v3321_v3  ;;  %v3405_v0 = vld [vmem:[%s4520_s3 + $0x10] sm:$0xff]   ;;  %v3406_v1 = vld [vmem:[%s4520_s3 + $0x58] sm:$0xff]   ;;  %v3408_v3 = vld [vmem:[%s4520_s3 + $0x60] sm:$0xff]  }
  0xee   :  { %v3407_v2 = vld [vmem:[%s4520_s3 + $0x18] sm:$0xff]  }
  0xef   :  { %1974 = vmatpush1.bf16.msra.mxu1 %v3316_v4  ;;  %v3409_v4 = vld [vmem:[%s4520_s3 + $0x20] sm:$0xff]  }
  0xf0   :  { %2138 = vmatpush1.bf16.msra.mxu0 %v3319_v5  ;;  %1975 = vmatprep.subr.bf16.mxu1 %v3324_v6  ;;  %v3410_v5 = vld [vmem:[%s4520_s3 + $0x68] sm:$0xff]  }
  0xf1   :  { %2139 = vmatprep.subr.bf16.mxu0 %v3327_v7  ;;  %v3411_v6 = vld [vmem:[%s4520_s3 + $0x28] sm:$0xff]   ;;  %v3412_v7 = vld [vmem:[%s4520_s3 + $0x70] sm:$0xff]  }
  0xf3   :  { %1976 = vmatpush1.bf16.msra.mxu1 %v3322_v8  ;;  %v3413_v8 = vld [vmem:[%s4520_s3 + $0x30] sm:$0xff]  }
  0xf4   :  { %2140 = vmatpush1.bf16.msra.mxu0 %v3325_v9  ;;  %1977 = vmatprep.subr.bf16.mxu1 %v3330_v10  ;;  %v3414_v9 = vld [vmem:[%s4520_s3 + $0x78] sm:$0xff]  }
  0xf5   :  { %2141 = vmatprep.subr.bf16.mxu0 %v3333_v11  ;;  %v3415_v10 = vld [vmem:[%s4520_s3 + $0x38] sm:$0xff]   ;;  %v3448_v11 = vmov 0.0  }
  0xf7   :  { %1978 = vmatpush1.bf16.msra.mxu1 %v3328_v12 }
  0xf8   :  { %2142 = vmatpush1.bf16.msra.mxu0 %v3331_v13  ;;  %1979 = vmatprep.subr.bf16.mxu1 %v3336_v14 }
  0xf9   :  { %2143 = vmatprep.subr.bf16.mxu0 %v3339_v15 }
  0xfb   :  { %1980 = vmatpush1.bf16.msra.mxu1 %v3334_v16  ;;  %v2215_v16 = vlaneseq }
  0xfc   :  { %2144 = vmatpush1.bf16.msra.mxu0 %v3337_v17  ;;  %1981 = vmatprep.subr.bf16.mxu1 %v3342_v19 }
  0xfd   :  { %2145 = vmatprep.subr.bf16.mxu0 %v3345_v21  ;;  %v2216_v17 = vshrl.u32 %v2215_v16, 7 }
  0xff   :  { %1982 = vmatpush1.bf16.msra.mxu1 %v3340_v22 }
 0x100   :  { %2146 = vmatpush1.bf16.msra.mxu0 %v3343_v23  ;;  %2866 = vmatprep.subr.bf16.mxu1 %v3400_v59 }
 0x101   :  { %2156 = vmatprep.subr.bf16.mxu0 %v3352_v26 }
 0x102   :  { %1984 = vmatmul.mubr.bf16.vlgmr.msra.gmra.mrb[0].mxu1 %v2540_v20  ;;  %v2217_v20 = vsub.s32 0, %v2216_v17 }
 0x103   :  { %2148 = vmatmul.mubr.bf16.vlgmr.msra.gmra.mrb[0].mxu0 %v2548_v27  ;;  %2867 = vmatpush3.bf16.msra.mxu1 %v3401_v60  ;;  %v2857_v60 = vld [vmem:[%s4523_s6] ss:$0 sm:$0xff] }
 0x104   :  { %2157 = vmatpush1.bf16.msra.mxu0 %v3350_v28  ;;  %2188 = vmatprep.mubr.bf16.mxu0 %v2551_v29  ;;  %v2213_v28 = vld [vmem:[%s4519_s2] sm:$0x3] }
 0x105   :  { %2158 = vmatprep.subr.bf16.mxu0 %v3355_v30  ;;  %2868 = vmatprep.subr.bf16.mxu1 %v3402_v61  ;;  %v2221_v30 = vsub.s32 1, %v2216_v17 }
 0x107   :  { %2869 = vmatpush3.bf16.msra.mxu1 %v3403_v62 }
 0x108   :  { %2159 = vmatpush1.bf16.msra.mxu0 %v3353_v24  ;;  %2870 = vmatprep.subr.bf16.mxu1 %v3404_v63 }
 0x109   :  { %2160 = vmatprep.subr.bf16.mxu0 %v3358_v25 }
 0x10b   :  { %2871 = vmatpush3.bf16.msra.mxu1 %v3405_v0 }
 0x10c   :  { %2161 = vmatpush1.bf16.msra.mxu0 %v3356_v31  ;;  %2872 = vmatprep.subr.bf16.mxu1 %v3406_v1 }
 0x10d   :  { %2162 = vmatprep.subr.bf16.mxu0 %v3361_v32  ;;  %v2218_v32 = vrot.slane %v2213_v28, %v2217_v20 }
 0x10f   :  { %2873 = vmatpush3.bf16.msra.mxu1 %v3407_v2 }
 0x110   :  { %2163 = vmatpush1.bf16.msra.mxu0 %v3359_v33  ;;  %2874 = vmatprep.subr.bf16.mxu1 %v3408_v3 }
 0x111   :  { %2164 = vmatprep.subr.bf16.mxu0 %v3364_v34  ;;  %v2222_v34 = vrot.slane %v2213_v28, %v2221_v30 }
 0x113   :  { %2875 = vmatpush3.bf16.msra.mxu1 %v3409_v4 }
 0x114   :  { %2165 = vmatpush1.bf16.msra.mxu0 %v3362_v35  ;;  %2876 = vmatprep.subr.bf16.mxu1 %v3410_v5 }
 0x115   :  { %2166 = vmatprep.subr.bf16.mxu0 %v3367_v36 }
 0x117   :  { %2877 = vmatpush3.bf16.msra.mxu1 %v3411_v6 }
 0x118   :  { %2167 = vmatpush1.bf16.msra.mxu0 %v3365_v37  ;;  %2878 = vmatprep.subr.bf16.mxu1 %v3412_v7 }
 0x119   :  { %2168 = vmatprep.subr.bf16.mxu0 %v3370_v38 }
 0x11b   :  { %2879 = vmatpush3.bf16.msra.mxu1 %v3413_v8 }
 0x11c   :  { %2169 = vmatpush1.bf16.msra.mxu0 %v3368_v39  ;;  %2880 = vmatprep.subr.bf16.mxu1 %v3414_v9 }
 0x11d   :  { %2170 = vmatprep.subr.bf16.mxu0 %v3373_v40 }
 0x11f   :  { %2881 = vmatpush3.bf16.msra.mxu1 %v3415_v10 }
 0x120   :  { %2171 = vmatpush1.bf16.msra.mxu0 %v3371_v41  ;;  %2897 = vmatprep.subr.bf16.mxu1 %v3448_v11 }
 0x121   :  { %2172 = vmatprep.subr.bf16.mxu0 %v3376_v42  ;;  %v3416_v42 = vld [vmem:[%s4522_s5] sm:$0xff]  }
 0x124   :  { %2173 = vmatpush1.bf16.msra.mxu0 %v3374_v43 }
 0x125   :  { %2174 = vmatprep.subr.bf16.mxu0 %v3379_v44  ;;  %v3417_v44 = vld [vmem:[%s4522_s5 + $0x8] sm:$0xff]  }
 0x128   :  { %2175 = vmatpush1.bf16.msra.mxu0 %v3377_v45  ;;  %v3418_v45 = vld [vmem:[%s4522_s5 + $0x10] sm:$0xff]  }
 0x129   :  { %2176 = vmatprep.subr.bf16.mxu0 %v3382_v46  ;;  %v3419_v46 = vld [vmem:[%s4522_s5 + $0x18] sm:$0xff]  }
 0x12c   :  { %2177 = vmatpush1.bf16.msra.mxu0 %v3380_v47  ;;  %v3420_v47 = vld [vmem:[%s4522_s5 + $0x20] sm:$0xff]  }
 0x12d   :  { %2178 = vmatprep.subr.bf16.mxu0 %v3385_v48  ;;  %v3421_v48 = vld [vmem:[%s4522_s5 + $0x28] sm:$0xff]  }
 0x130   :  { %2179 = vmatpush1.bf16.msra.mxu0 %v3383_v49  ;;  %v3422_v49 = vld [vmem:[%s4522_s5 + $0x30] sm:$0xff]  }
 0x131   :  { %2180 = vmatprep.subr.bf16.mxu0 %v3388_v50  ;;  %v3423_v50 = vld [vmem:[%s4522_s5 + $0x38] sm:$0xff]   ;;  %s3450_s5 = smov [#allocation2]  }
 0x132   :  { %s2526_s19 = sshll.u32 %s3450_s5, 4  ;;  %s2527_s19 = int_to_ptr.vmem [resolvable:$true] %s2526_s19 }
 0x133   :  { %p3429_p1 = scmp.lt.s32.totalorder %s2527_s19, %s2527_s19 }
 0x134   :  { %2181 = vmatpush1.bf16.msra.mxu0 %v3386_v51 }
 0x135   :  { %2182 = vmatprep.subr.bf16.mxu0 %v3391_v52  ;;  %v2840_v52 = vld [vmem:[%s4521_s4] ss:$0 sm:$0xff]  ;;  %s3424_s4 = scalar_lea.vmem %s2527_s19, 32 }
 0x136   :  { %p3425_p0 = scmp.ne.s32.totalorder %s2527_s19, %s3424_s4  ;;  %p3430_p2 = scmp.lt.s32.totalorder %s3424_s4, %s3424_s4 }
 0x138   :  { %2183 = vmatpush1.bf16.msra.mxu0 %v3389_v53  ;;  %p3431_p3 = por %p3430_p2, %p3429_p1 }
 0x139   :  { %2184 = vmatprep.subr.bf16.mxu0 %v3394_v54 }
 0x13a   :  { %p3432_p4 = pnand %p3431_p3, %p3425_p0 }
 0x13c   :  { %2185 = vmatpush1.bf16.msra.mxu0 %v3392_v55 }
 0x13d   :  { %2186 = vmatprep.subr.bf16.mxu0 %v3397_v56 }
 0x140   :  { %2187 = vmatpush1.bf16.msra.mxu0 %v3395_v57 }
 0x143   :  { %2189 = vmatmul.mubr.bf16.vlgmr.msra.gmra.mrb[0].mxu0 %v2550_v58 }
 0x1d5   :  { %v1985_v12 = vpop.f32.mrb[0].mxu1 }
 0x1d6   :  { %v1987_v13 = vpop.f32.mrb[1].mxu1 }
 0x1d7   :  { %v1989_v14 = vpop.f32.mrb[2].mxu1 }
 0x1d8   :  { %v1990_v15 = vpop.f32.mrb[3].mxu1 }
 0x216   :  { %v2190_v19 = vpop.f32.mrb[0].mxu0 }
 0x217   :  { %v2917_v21 = vadd.f32 %v2190_v19, %v1985_v12  ;;  %v2192_v22 = vpop.f32.mrb[1].mxu0 }
 0x218   :  { %v2918_v23 = vadd.f32 %v2192_v22, %v1987_v13  ;;  %v2194_v26 = vpop.f32.mrb[2].mxu0 }
 0x219   :  { %v2199_v18 = vrot.slane %v2917_v21, 2  ;;  %v2195_v27 = vpop.f32.mrb[3].mxu0 }
 0x21a   :  { %v2200_v29 = vrot.slane %v2918_v23, 2 }
 0x21b   :  { %v2203_v24 = vmax.f32 %v2917_v21, %v2199_v18 }
 0x21c   :  { %v2204_v25 = vmax.f32 %v2918_v23, %v2200_v29 }
 0x21d   :  { %v2207_v31 = vrot.slane %v2203_v24, 4 }
 0x21e   :  { %v2208_v33 = vrot.slane %v2204_v25, 4 }
 0x21f   :  { %v2211_v35 = vmax.f32 %v2203_v24, %v2207_v31 }
 0x220   :  { %v2212_v36 = vmax.f32 %v2204_v25, %v2208_v33 }
 0x221   :  { %v2225_v37 = vadd.f32 %v2218_v32, %v2211_v35 }
 0x222   :  { %v2226_v38 = vadd.f32 %v2222_v34, %v2212_v36 }
 0x223   :  { %v2227_v39 = vmax.f32 %v2225_v37, 0.0 }
 0x224   :  { %v2228_v40 = vmax.f32 %v2226_v38, 0.0 }
 0x225   :  { %v2229_v43 = vpack.c.bf16 %v2227_v39, %v2227_v39 }
 0x226   :  { %v2230_v41 = vpack.c.bf16 %v2228_v40, %v2228_v40 }
 0x228   :  { %2398 = vmatprep.mubr.bf16.mxu1 %v2230_v41 }
 0x229   :  { %2399 = vmatmul.mubr.bf16.vlgmr.msra.gmra.mrb[4].mxu1 %v2229_v43 }
 0x22a   :  { %2898 = vmatpush3.bf16.msra.mxu1 %v3416_v42  ;;  %2913 = vmatprep.mubr.msk.bf16.mxu1 %vm3449_vm0, %v3448_v11 }
 0x22b   :  { %2899 = vmatprep.subr.bf16.mxu1 %v3448_v11 }
 0x22e   :  { %2900 = vmatpush3.bf16.msra.mxu1 %v3417_v44 }
 0x22f   :  { %2901 = vmatprep.subr.bf16.mxu1 %v3448_v11 }
 0x232   :  { %2902 = vmatpush3.bf16.msra.mxu1 %v3418_v45 }
 0x233   :  { %2903 = vmatprep.subr.bf16.mxu1 %v3448_v11 }
 0x236   :  { %2904 = vmatpush3.bf16.msra.mxu1 %v3419_v46 }
 0x237   :  { %2905 = vmatprep.subr.bf16.mxu1 %v3448_v11 }
 0x23a   :  { %2906 = vmatpush3.bf16.msra.mxu1 %v3420_v47 }
 0x23b   :  { %2907 = vmatprep.subr.bf16.mxu1 %v3448_v11 }
 0x23e   :  { %2908 = vmatpush3.bf16.msra.mxu1 %v3421_v48 }
 0x23f   :  { %2909 = vmatprep.subr.bf16.mxu1 %v3448_v11 }
 0x242   :  { %2910 = vmatpush3.bf16.msra.mxu1 %v3422_v49 }
 0x243   :  { %2911 = vmatprep.subr.bf16.mxu1 %v3448_v11 }
 0x246   :  { %2912 = vmatpush3.bf16.msra.mxu1 %v3423_v50 }
 0x2fc   :  { %v2882_v51 = vpop.f32.mrb[4].mxu1 }
 0x2fd   :  { %v2883_v53 = vpop.f32.mrb[5].mxu1 }
 0x2fe   :  { %v2884_v54 = vadd.f32 %v2883_v53, %v2882_v51  ;;  %v2885_v55 = vpop.f32.mrb[6].mxu1 }
 0x2ff   :  { %v2886_v56 = vpop.f32.mrb[7].mxu1 }
 0x300   :  { %v2401_v57 = vadd.f32 %v2884_v54, %v2840_v52 }
 0x302   :  { %v2406_v58 = vmax.f32 %v2401_v57, 0.0 }
 0x304   :  { %v2407_v59 = vpack.c.bf16 %v2406_v58, %v2406_v58 }
 0x306   :  { %2914 = vmatmul.mubr.bf16.vlgmr.msra.gmra.mrb[8].mxu1 %v2407_v59 }
 0x3d9   :  { %v2513_v61 = vpop.f32.mrb[8].mxu1 }
 0x3da   :  { %v2514_v62 = vadd.f32 %v2857_v60, %v2513_v61  ;;  %v2915_v63 = vpop.f32.mrb[9].mxu1 }
 0x3db   :  { %v2516_v0 = vpop.f32.mrb[10].mxu1 }
 0x3dc   :  { %2519 = vst [vmem:[#allocation2] sm:$0x3] %v2514_v62  ;;  %v2916_v1 = vpop.f32.mrb[11].mxu1 }
 0x3dd   :  { %3435 = shalt.err (!%p3432_p4)
}
 0x3de   :  { %s3436_s6 = scalar_lea.hbm %s4524_s7, 32 }
 0x3df   :  { %p3437_p5 = scmp.ne.s32.totalorder %s4524_s7, %s3436_s6  ;;  %p3440_p6 = scmp.lt.u32.totalorder %s3436_s6, %s4524_s7 }
 0x3e1   :  { %p3442_p7 = pnand %p3440_p6, %p3437_p5 }
 0x3e3   :  { %3445 = shalt.err (!%p3442_p7)
}
 0x3e4   :  { %2529 = dma.vmem_to_hbm [thread:$0]  %s2527_s19, 32, %s4524_s7, [#allocation3]  }
 0x3e5   :  { %3446 = dma.done.wait [#allocation3], 32  }
 0x3e6   :  { %3447 = vsyncadd [#allocation3], 4294967264 }
 0x3e7   :  { %2533 = vsyncpa [#allocation3], 1 }

</bundles_post_ra>
